<compile_context>
chip_gen: v7x
topology: tpu7x:2x2x1
jax: 0.10.0
libtpu: 0.0.40
codegen_flags: <defaults>
</compile_context>

<pallas_src>
import functools
import numpy as np

import jax
import jax.numpy as jnp
from jax.experimental import pallas as pl
from jax.experimental.pallas import tpu as pltpu


# ----------------------------- static model config -----------------------------

IMG = 32
CHANNELS = 3

TEACHER_PATCH = 8
TEACHER_D = 64
TEACHER_HEADS = 4
TEACHER_MLP = 128
TEACHER_LAYERS = 2
TEACHER_NP = (IMG // TEACHER_PATCH) ** 2          # 16 patches
TEACHER_N = TEACHER_NP + 1                        # 17 tokens (CLS + patches)

STUDENT_PATCH = 16
STUDENT_D = 128
NUM_CLASSES = 10


# ----------------------------- composed bilinear resize -----------------------------

def _bilinear_matrix_np(in_size, out_size):
    # torchvision bilinear, align_corners=False.  antialias=True only changes weights
    # when DOWNscaling; both resizes here are upscales -> identical weights.
    scale = in_size / out_size
    dst = np.arange(out_size, dtype=np.float64)
    src = np.clip((dst + 0.5) * scale - 0.5, 0.0, in_size - 1)
    lo = np.floor(src).astype(np.int64)
    hi = np.minimum(lo + 1, in_size - 1)
    w_hi = src - lo
    w_lo = 1.0 - w_hi
    R = np.zeros((out_size, in_size), dtype=np.float64)
    R[np.arange(out_size), lo] += w_lo
    R[np.arange(out_size), hi] += w_hi
    return R


# compose 32->70 followed by 70->224 into one exact 32->224 matrix (per axis)
_R_TOTAL = (_bilinear_matrix_np(70, 224) @ _bilinear_matrix_np(32, 70)).astype(np.float32)
_R_TOTAL_T = np.ascontiguousarray(_R_TOTAL.T)      # [32, 224]


def _resize_kernel(x_ref, rwT_ref, rh_ref, o_ref):
    # Width pass first (lane-dense): T = X_flat @ Rw^T  with X_flat = [C*H, W].
    # Then per-channel height pass: img_c = Rh @ T_c.  Output stored in bf16.
    C, H, W = x_ref.shape
    t = jnp.dot(x_ref[...].reshape(C * H, W), rwT_ref[...],
                preferred_element_type=jnp.float32)                  # [C*H, 224]
    rh = rh_ref[...]                                                 # [224, H]
    for c in range(C):
        img = jnp.dot(rh, t[c * H:(c + 1) * H, :],
                      preferred_element_type=jnp.float32)            # [224, 224]
        o_ref[c] = img.astype(o_ref.dtype)


def resize_to_student(x):
    """x: [B,C,32,32] f32 -> [B,C,224,224] bf16, single Pallas call, grid over batch."""
    B, C, H, W = x.shape
    rwT = jnp.asarray(_R_TOTAL_T)      # [32, 224]
    rh = jnp.asarray(_R_TOTAL)         # [224, 32]
    OH, OW = rh.shape[0], rwT.shape[1]
    return pl.pallas_call(
        _resize_kernel,
        out_shape=jax.ShapeDtypeStruct((B, C, OH, OW), jnp.bfloat16),
        grid=(B,),
        in_specs=[pl.BlockSpec((None, C, H, W), lambda b: (b, 0, 0, 0)),
                  pl.BlockSpec((W, OW), lambda b: (0, 0)),
                  pl.BlockSpec((OH, H), lambda b: (0, 0))],
        out_specs=pl.BlockSpec((None, C, OH, OW), lambda b: (b, 0, 0, 0)),
        compiler_params=pltpu.CompilerParams(dimension_semantics=("parallel",)),
    )(x, rwT, rh)


# ----------------------------- patch extraction (XLA reshape/transpose) -----------------------------
# TODO(synk): extracting patches directly inside the resize kernel would need a 4-D
# in-kernel transpose ((pi,r,pj,s)->(pi,pj,r,s)); kept in XLA for robust lowering.

def patchify(x, P):
    B, C, H, W = x.shape
    Hp, Wp = H // P, W // P
    p = x.reshape(B, C, Hp, P, Wp, P).transpose(0, 2, 4, 1, 3, 5)
    return p.reshape(B, Hp * Wp, C * P * P)


# ----------------------------- fused teacher (embed + both layers + attn maps) -----------------------------

def _teacher_kernel(patches_ref, pw_ref, pb_ref, cls_ref, pos_ref,
                    ln1g_ref, ln1b_ref, wqkv_ref, bqkv_ref, wo_ref, bo_ref,
                    ln2g_ref, ln2b_ref, w1_ref, b1_ref, w2_ref, b2_ref,
                    fused_ref, tok_scr, attn_scr, *, N, D, H, Dh, L):
    f32, bf16 = jnp.float32, jnp.bfloat16

    def ln(v, g, b):
        mu = jnp.mean(v, axis=-1, keepdims=True)
        var = jnp.mean((v - mu) ** 2, axis=-1, keepdims=True)
        return (v - mu) * jax.lax.rsqrt(var + 1e-5) * g + b          # eps = torch default

    # --- patch embed + cls + positional embedding (tokens built via ref-slice stores) ---
    emb = jnp.dot(patches_ref[...], pw_ref[...],
                  preferred_element_type=f32) + pb_ref[...]          # [N-1, D]
    pos = pos_ref[...]                                               # [N, D]
    tok_scr[0:1, :] = cls_ref[...] + pos[0:1, :]
    tok_scr[1:N, :] = emb + pos[1:N, :]
    tok = tok_scr[...]                                               # [N, D]

    scale = 1.0 / (Dh ** 0.5)
    for l in range(L):                                               # static unroll, L = 2
        # --- attention block ---
        h1 = ln(tok, ln1g_ref[l], ln1b_ref[l])
        qkv = jnp.dot(h1.astype(bf16), wqkv_ref[l],
                      preferred_element_type=f32) + bqkv_ref[l]      # [N, 3D]
        fused_acc = jnp.zeros((N, N), f32)
        for hh in range(H):
            q = qkv[:, hh * Dh:(hh + 1) * Dh]
            k = qkv[:, D + hh * Dh:D + (hh + 1) * Dh]
            v = qkv[:, 2 * D + hh * Dh:2 * D + (hh + 1) * Dh]
            s = jax.lax.dot_general(q, k, (((1,), (1,)), ((), ())),
                                    preferred_element_type=f32) * scale
            s = s - jnp.max(s, axis=-1, keepdims=True)
            e = jnp.exp(s)
            p = e / jnp.sum(e, axis=-1, keepdims=True)               # attn probs [N, N]
            fused_acc = fused_acc + p
            # head output written through a static lane slice (no concatenate)
            attn_scr[:, hh * Dh:(hh + 1) * Dh] = jnp.dot(p, v, preferred_element_type=f32)
        fused_ref[l] = fused_acc * (1.0 / H)                         # head_fusion = 'mean'
        o = jnp.dot(attn_scr[...].astype(bf16), wo_ref[l],
                    preferred_element_type=f32) + bo_ref[l]
        tok = tok + o

        # --- MLP block ---
        h2 = ln(tok, ln2g_ref[l], ln2b_ref[l])
        m1 = jnp.dot(h2.astype(bf16), w1_ref[l],
                     preferred_element_type=f32) + b1_ref[l]
        m1 = jax.nn.gelu(m1)   # TODO(synk): torch nn.GELU default is exact erf; tanh approx used here
        m2 = jnp.dot(m1.astype(bf16), w2_ref[l],
                     preferred_element_type=f32) + b2_ref[l]
        tok = tok + m2


def teacher_fused_attentions(x, tp):
    """Returns per-layer head-fused attention maps [B, L, N, N], one fused pallas_call."""
    B = x.shape[0]
    N, D, H, L = TEACHER_N, TEACHER_D, TEACHER_HEADS, TEACHER_LAYERS
    Dh = D // H
    patches = patchify(x, TEACHER_PATCH).astype(jnp.bfloat16)        # [B, 16, 192]
    NP, PF = patches.shape[1], patches.shape[2]

    def full(shape):
        nd = len(shape)
        return pl.BlockSpec(tuple(shape), lambda b, _n=nd: (0,) * _n)

    kernel = functools.partial(_teacher_kernel, N=N, D=D, H=H, Dh=Dh, L=L)
    fused = pl.pallas_call(
        kernel,
        out_shape=jax.ShapeDtypeStruct((B, L, N, N), jnp.float32),
        grid=(B,),
        in_specs=[
            pl.BlockSpec((None, NP, PF), lambda b: (b, 0, 0)),
            full(tp['patch_w'].shape), full(tp['patch_b'].shape),
            full(tp['cls'].shape), full(tp['pos'].shape),
            full(tp['ln1_g'].shape), full(tp['ln1_b'].shape),
            full(tp['wqkv'].shape), full(tp['bqkv'].shape),
            full(tp['wo'].shape), full(tp['bo'].shape),
            full(tp['ln2_g'].shape), full(tp['ln2_b'].shape),
            full(tp['w1'].shape), full(tp['b1'].shape),
            full(tp['w2'].shape), full(tp['b2'].shape),
        ],
        out_specs=pl.BlockSpec((None, L, N, N), lambda b: (b, 0, 0, 0)),
        scratch_shapes=[pltpu.VMEM((N, D), jnp.float32),   # token build buffer
                        pltpu.VMEM((N, D), jnp.float32)],  # concatenated head outputs
        compiler_params=pltpu.CompilerParams(dimension_semantics=("parallel",)),
    )(patches, tp['patch_w'], tp['patch_b'], tp['cls'], tp['pos'],
      tp['ln1_g'], tp['ln1_b'], tp['wqkv'], tp['bqkv'], tp['wo'], tp['bo'],
      tp['ln2_g'], tp['ln2_b'], tp['w1'], tp['b1'], tp['w2'], tp['b2'])
    return fused


# ----------------------------- attention rollout (XLA wrapper, tiny) -----------------------------

def attention_rollout(fused_all, discard_ratio=0.95):
    """VITAttentionRollout (head_fusion='mean').  fused_all: [B, L, N, N].
    Follows the reference: per-batch topk(largest=False) indices are unioned and zeroed
    in batch 0's map (never the flattened index 0), chain is built for batch 0."""
    B, L, N, _ = fused_all.shape
    eye = jnp.eye(N, dtype=jnp.float32)
    k = int(N * N * discard_ratio)
    result = eye
    for l in range(L):
        layer = fused_all[:, l]                                      # [B, N, N]
        flat = layer.reshape(B, N * N)
        idx = jnp.argsort(flat, axis=-1)[:, :k].reshape(-1)          # k smallest per batch
        keep = jnp.ones((N * N,), jnp.bool_).at[idx].set(False)
        keep = keep.at[0].set(True)                                  # never drop CLS->CLS
        f0 = jnp.where(keep.reshape(N, N), layer[0], 0.0)
        a = (f0 + eye) * 0.5
        # TODO(synk): reference uses a.sum(dim=-1) WITHOUT keepdim (broadcast quirk for B=1);
        # row-normalization (the intended semantics) is used here.
        a = a / jnp.sum(a, axis=-1, keepdims=True)
        result = a @ result                                          # single 17x17 matmul per layer
    mask = result[0, 1:]
    width = int((N - 1) ** 0.5)
    mask = mask.reshape(width, width)
    return mask / jnp.maximum(jnp.max(mask), 1e-12)


# ----------------------------- fused student forward -----------------------------

def _student_kernel(p_ref, we_ref, be_ref, wh_ref, bh_ref, o_ref):
    h = jnp.dot(p_ref[...], we_ref[...],
                preferred_element_type=jnp.float32) + be_ref[...]    # [196, D]
    h = jax.nn.gelu(h)
    pooled = jnp.mean(h, axis=0, keepdims=True)                      # mean pool [1, D]
    o_ref[...] = jnp.dot(pooled, wh_ref[...],
                         preferred_element_type=jnp.float32) + bh_ref[...]


def student_forward(patches, sp):
    """patches: [B,196,768] bf16 -> logits [B,num_classes]; one pallas_call, grid over B."""
    B, NP, PF = patches.shape
    out = pl.pallas_call(
        _student_kernel,
        out_shape=jax.ShapeDtypeStruct((B, 1, NUM_CLASSES), jnp.float32),
        grid=(B,),
        in_specs=[pl.BlockSpec((None, NP, PF), lambda b: (b, 0, 0)),
                  pl.BlockSpec(sp['w_embed'].shape, lambda b: (0, 0)),
                  pl.BlockSpec(sp['b_embed'].shape, lambda b: (0, 0)),
                  pl.BlockSpec(sp['w_head'].shape, lambda b: (0, 0)),
                  pl.BlockSpec(sp['b_head'].shape, lambda b: (0, 0))],
        out_specs=pl.BlockSpec((None, 1, NUM_CLASSES), lambda b: (b, 0, 0)),
        compiler_params=pltpu.CompilerParams(dimension_semantics=("parallel",)),
    )(patches, sp['w_embed'], sp['b_embed'], sp['w_head'], sp['b_head'])
    return out.reshape(B, NUM_CLASSES)


# ----------------------------- parameter init (bf16 weight copies made ONCE here) -----------------------------

def init_teacher_params(key):
    D, L, mlp = TEACHER_D, TEACHER_LAYERS, TEACHER_MLP
    C, P, N = CHANNELS, TEACHER_PATCH, TEACHER_N
    ks = jax.random.split(key, 7)
    bf16 = jnp.bfloat16

    def nrm(k, shape, s=0.02):
        return jax.random.normal(k, shape, jnp.float32) * s

    return {
        'patch_w': nrm(ks[0], (C * P * P, D)).astype(bf16),
        'patch_b': jnp.zeros((1, D), jnp.float32),
        'cls': nrm(ks[1], (1, D)),
        'pos': nrm(ks[2], (N, D)),
        'ln1_g': jnp.ones((L, 1, D), jnp.float32),
        'ln1_b': jnp.zeros((L, 1, D), jnp.float32),
        'wqkv': nrm(ks[3], (L, D, 3 * D)).astype(bf16),
        'bqkv': jnp.zeros((L, 1, 3 * D), jnp.float32),
        'wo': nrm(ks[4], (L, D, D)).astype(bf16),
        'bo': jnp.zeros((L, 1, D), jnp.float32),
        'ln2_g': jnp.ones((L, 1, D), jnp.float32),
        'ln2_b': jnp.zeros((L, 1, D), jnp.float32),
        'w1': nrm(ks[5], (L, D, mlp)).astype(bf16),
        'b1': jnp.zeros((L, 1, mlp), jnp.float32),
        'w2': nrm(ks[6], (L, mlp, D)).astype(bf16),
        'b2': jnp.zeros((L, 1, D), jnp.float32),
    }


def init_student_params(key):
    C, P, D = CHANNELS, STUDENT_PATCH, STUDENT_D
    k1, k2 = jax.random.split(key)
    return {
        'w_embed': (jax.random.normal(k1, (C * P * P, D), jnp.float32) * 0.02).astype(jnp.bfloat16),
        'b_embed': jnp.zeros((1, D), jnp.float32),
        'w_head': jax.random.normal(k2, (D, NUM_CLASSES), jnp.float32) * 0.02,
        'b_head': jnp.zeros((1, NUM_CLASSES), jnp.float32),
    }


# ----------------------------- NewModel.forward -----------------------------

def new_model_forward(x, teacher_params, student_params):
    # resize x -> 70x70 -> 224x224, composed into one exact 32->224 separable resize (bf16 out)
    input_student = resize_to_student(x)                             # [B,3,224,224] bf16
    # target = attention rollout of the teacher on the ORIGINAL x
    fused_attns = teacher_fused_attentions(x, teacher_params)        # [B, L, N, N]
    target = attention_rollout(fused_attns, discard_ratio=0.95)
    # output = student(resized input)
    patches_s = patchify(input_student, STUDENT_PATCH)               # [B,196,768] bf16
    output = student_forward(patches_s, student_params)
    return output, target


if __name__ == "__main__":
    key = jax.random.PRNGKey(0)
    kx, kt, ks = jax.random.split(key, 3)

    x = jax.random.normal(kx, (2, CHANNELS, IMG, IMG), jnp.float32)   # NCHW, like PyTorch
    teacher_params = init_teacher_params(kt)
    student_params = init_student_params(ks)

    fwd = jax.jit(new_model_forward)
    output, target = fwd(x, teacher_params, student_params)
    jax.block_until_ready(output)
    jax.block_until_ready(target)

    assert output.shape == (2, NUM_CLASSES)
    assert target.shape == (4, 4)             # sqrt(n_patches) x sqrt(n_patches) rollout mask
    assert bool(jnp.all(jnp.isfinite(output))) and bool(jnp.all(jnp.isfinite(target)))
    print("KERNEL_OK")
</pallas_src>

<mosaic_0001>
module attributes {stable_mosaic.version = 11 : i64} {
  func.func @_resize_kernel(%arg0: i32, %arg1: memref<1x3x32x32xf32, #tpu.memory_space<vmem>>, %arg2: memref<32x224xf32, #tpu.memory_space<vmem>>, %arg3: memref<224x32xf32, #tpu.memory_space<vmem>>, %arg4: memref<1x3x224x224xbf16, #tpu.memory_space<vmem>>) attributes {dimension_semantics = [#tpu.dimension_semantics<parallel>], iteration_bounds = array<i64: 2>, scalar_prefetch = 0 : i64, scratch_operands = 0 : i64, tpu.core_type = #tpu.core_type<tc>, window_params = [{transform_indices = @transform_0, window_bounds = array<i64: 1, 3, 32, 32>}, {pipeline_mode = #tpu.pipeline_mode<synchronous>, transform_indices = @transform_1, window_bounds = array<i64: 32, 224>}, {pipeline_mode = #tpu.pipeline_mode<synchronous>, transform_indices = @transform_2, window_bounds = array<i64: 224, 32>}, {transform_indices = @transform_3, window_bounds = array<i64: 1, 3, 224, 224>}]} {
    %c0 = arith.constant 0 : index
    %c0_0 = arith.constant 0 : index
    %c0_1 = arith.constant 0 : index
    %c0_2 = arith.constant 0 : index
    %0 = vector.load %arg1[%c0, %c0_0, %c0_1, %c0_2] : memref<1x3x32x32xf32, #tpu.memory_space<vmem>>, vector<1x3x32x32xf32>
    %1 = vector.shape_cast %0 : vector<1x3x32x32xf32> to vector<3x32x32xf32>
    %2 = vector.shape_cast %1 : vector<3x32x32xf32> to vector<96x32xf32>
    %c0_3 = arith.constant 0 : index
    %c0_4 = arith.constant 0 : index
    %3 = vector.load %arg2[%c0_3, %c0_4] : memref<32x224xf32, #tpu.memory_space<vmem>>, vector<32x224xf32>
    %cst = arith.constant dense<0.000000e+00> : vector<96x224xf32>
    %4 = tpu.matmul %2, %3, %cst {dimension_numbers = #tpu.dot_dimension_numbers<[1], [0], [0], [1], [0, 0, 1, 1], [], []>} : vector<96x32xf32>, vector<32x224xf32>, vector<96x224xf32> -> vector<96x224xf32>
    %c0_5 = arith.constant 0 : index
    %c0_6 = arith.constant 0 : index
    %5 = vector.load %arg3[%c0_5, %c0_6] : memref<224x32xf32, #tpu.memory_space<vmem>>, vector<224x32xf32>
    %6 = vector.extract_strided_slice %4 {offsets = [0, 0], sizes = [32, 224], strides = [1, 1]} : vector<96x224xf32> to vector<32x224xf32>
    %cst_7 = arith.constant dense<0.000000e+00> : vector<224x224xf32>
    %7 = tpu.matmul %5, %6, %cst_7 {dimension_numbers = #tpu.dot_dimension_numbers<[1], [0], [0], [1], [0, 0, 1, 1], [], []>} : vector<224x32xf32>, vector<32x224xf32>, vector<224x224xf32> -> vector<224x224xf32>
    %8 = arith.truncf %7 : vector<224x224xf32> to vector<224x224xbf16>
    %c0_8 = arith.constant 0 : index
    %c0_9 = arith.constant 0 : index
    %c0_10 = arith.constant 0 : index
    %c0_11 = arith.constant 0 : index
    %9 = vector.load %arg4[%c0_8, %c0_9, %c0_10, %c0_11] : memref<1x3x224x224xbf16, #tpu.memory_space<vmem>>, vector<1x1x224x224xbf16>
    %10 = vector.shape_cast %9 : vector<1x1x224x224xbf16> to vector<224x224xbf16>
    %11 = vector.shape_cast %8 : vector<224x224xbf16> to vector<1x1x224x224xbf16>
    tpu.vector_store %arg4[%c0_8, %c0_9, %c0_10, %c0_11], %11 {strides = array<i32>} : memref<1x3x224x224xbf16, #tpu.memory_space<vmem>>, vector<1x1x224x224xbf16>,
    %12 = vector.extract_strided_slice %4 {offsets = [32, 0], sizes = [32, 224], strides = [1, 1]} : vector<96x224xf32> to vector<32x224xf32>
    %cst_12 = arith.constant dense<0.000000e+00> : vector<224x224xf32>
    %13 = tpu.matmul %5, %12, %cst_12 {dimension_numbers = #tpu.dot_dimension_numbers<[1], [0], [0], [1], [0, 0, 1, 1], [], []>} : vector<224x32xf32>, vector<32x224xf32>, vector<224x224xf32> -> vector<224x224xf32>
    %14 = arith.truncf %13 : vector<224x224xf32> to vector<224x224xbf16>
    %c0_13 = arith.constant 0 : index
    %c1 = arith.constant 1 : index
    %c0_14 = arith.constant 0 : index
    %c0_15 = arith.constant 0 : index
    %15 = vector.load %arg4[%c0_13, %c1, %c0_14, %c0_15] : memref<1x3x224x224xbf16, #tpu.memory_space<vmem>>, vector<1x1x224x224xbf16>
    %16 = vector.shape_cast %15 : vector<1x1x224x224xbf16> to vector<224x224xbf16>
    %17 = vector.shape_cast %14 : vector<224x224xbf16> to vector<1x1x224x224xbf16>
    tpu.vector_store %arg4[%c0_13, %c1, %c0_14, %c0_15], %17 {strides = array<i32>} : memref<1x3x224x224xbf16, #tpu.memory_space<vmem>>, vector<1x1x224x224xbf16>,
    %18 = vector.extract_strided_slice %4 {offsets = [64, 0], sizes = [32, 224], strides = [1, 1]} : vector<96x224xf32> to vector<32x224xf32>
    %cst_16 = arith.constant dense<0.000000e+00> : vector<224x224xf32>
    %19 = tpu.matmul %5, %18, %cst_16 {dimension_numbers = #tpu.dot_dimension_numbers<[1], [0], [0], [1], [0, 0, 1, 1], [], []>} : vector<224x32xf32>, vector<32x224xf32>, vector<224x224xf32> -> vector<224x224xf32>
    %20 = arith.truncf %19 : vector<224x224xf32> to vector<224x224xbf16>
    %c0_17 = arith.constant 0 : index
    %c2 = arith.constant 2 : index
    %c0_18 = arith.constant 0 : index
    %c0_19 = arith.constant 0 : index
    %21 = vector.load %arg4[%c0_17, %c2, %c0_18, %c0_19] : memref<1x3x224x224xbf16, #tpu.memory_space<vmem>>, vector<1x1x224x224xbf16>
    %22 = vector.shape_cast %21 : vector<1x1x224x224xbf16> to vector<224x224xbf16>
    %23 = vector.shape_cast %20 : vector<224x224xbf16> to vector<1x1x224x224xbf16>
    tpu.vector_store %arg4[%c0_17, %c2, %c0_18, %c0_19], %23 {strides = array<i32>} : memref<1x3x224x224xbf16, #tpu.memory_space<vmem>>, vector<1x1x224x224xbf16>,
    return
  }
  func.func @transform_0(%arg0: i32) -> (i32, i32, i32, i32) {
    %c0_i32 = arith.constant 0 : i32
    %c0_i32_0 = arith.constant 0 : i32
    %c0_i32_1 = arith.constant 0 : i32
    %c0_i32_2 = arith.constant 0 : i32
    return %arg0, %c0_i32, %c0_i32_0, %c0_i32_1 : i32, i32, i32, i32
  }
  func.func @transform_1(%arg0: i32) -> (i32, i32) {
    %c0_i32 = arith.constant 0 : i32
    %c0_i32_0 = arith.constant 0 : i32
    %c0_i32_1 = arith.constant 0 : i32
    return %c0_i32, %c0_i32_0 : i32, i32
  }
  func.func @transform_2(%arg0: i32) -> (i32, i32) {
    %c0_i32 = arith.constant 0 : i32
    %c0_i32_0 = arith.constant 0 : i32
    %c0_i32_1 = arith.constant 0 : i32
    return %c0_i32, %c0_i32_0 : i32, i32
  }
  func.func @transform_3(%arg0: i32) -> (i32, i32, i32, i32) {
    %c0_i32 = arith.constant 0 : i32
    %c0_i32_0 = arith.constant 0 : i32
    %c0_i32_1 = arith.constant 0 : i32
    %c0_i32_2 = arith.constant 0 : i32
    return %arg0, %c0_i32, %c0_i32_0, %c0_i32_1 : i32, i32, i32, i32
  }
}

module attributes {stable_mosaic.version = 11 : i64} {
  func.func @_student_kernel(%arg0: i32, %arg1: memref<1x196x768xbf16, #tpu.memory_space<vmem>>, %arg2: memref<768x128xbf16, #tpu.memory_space<vmem>>, %arg3: memref<1x128xf32, #tpu.memory_space<vmem>>, %arg4: memref<128x10xf32, #tpu.memory_space<vmem>>, %arg5: memref<1x10xf32, #tpu.memory_space<vmem>>, %arg6: memref<1x1x10xf32, #tpu.memory_space<vmem>>) attributes {dimension_semantics = [#tpu.dimension_semantics<parallel>], iteration_bounds = array<i64: 2>, scalar_prefetch = 0 : i64, scratch_operands = 0 : i64, tpu.core_type = #tpu.core_type<tc>, window_params = [{transform_indices = @transform_0, window_bounds = array<i64: 1, 196, 768>}, {pipeline_mode = #tpu.pipeline_mode<synchronous>, transform_indices = @transform_1, window_bounds = array<i64: 768, 128>}, {pipeline_mode = #tpu.pipeline_mode<synchronous>, transform_indices = @transform_2, window_bounds = array<i64: 1, 128>}, {pipeline_mode = #tpu.pipeline_mode<synchronous>, transform_indices = @transform_3, window_bounds = array<i64: 128, 10>}, {pipeline_mode = #tpu.pipeline_mode<synchronous>, transform_indices = @transform_4, window_bounds = array<i64: 1, 10>}, {transform_indices = @transform_5, window_bounds = array<i64: 1, 1, 10>}]} {
    %c0 = arith.constant 0 : index
    %c0_0 = arith.constant 0 : index
    %c0_1 = arith.constant 0 : index
    %0 = vector.load %arg1[%c0, %c0_0, %c0_1] : memref<1x196x768xbf16, #tpu.memory_space<vmem>>, vector<1x196x768xbf16>
    %1 = vector.shape_cast %0 : vector<1x196x768xbf16> to vector<196x768xbf16>
    %c0_2 = arith.constant 0 : index
    %c0_3 = arith.constant 0 : index
    %2 = vector.load %arg2[%c0_2, %c0_3] : memref<768x128xbf16, #tpu.memory_space<vmem>>, vector<768x128xbf16>
    %cst = arith.constant dense<0.000000e+00> : vector<196x128xf32>
    %3 = tpu.matmul %1, %2, %cst {dimension_numbers = #tpu.dot_dimension_numbers<[1], [0], [0], [1], [0, 0, 1, 1], [], []>} : vector<196x768xbf16>, vector<768x128xbf16>, vector<196x128xf32> -> vector<196x128xf32>
    %c0_4 = arith.constant 0 : index
    %c0_5 = arith.constant 0 : index
    %4 = vector.load %arg3[%c0_4, %c0_5] : memref<1x128xf32, #tpu.memory_space<vmem>>, vector<1x128xf32>
    %5 = vector.broadcast %4 : vector<1x128xf32> to vector<196x128xf32>
    %6 = arith.addf %3, %5 : vector<196x128xf32>
    %7 = arith.mulf %6, %6 : vector<196x128xf32>
    %8 = arith.mulf %6, %7 : vector<196x128xf32>
    %cst_6 = arith.constant 4.471500e-02 : f32
    %9 = vector.broadcast %cst_6 : f32 to vector<196x128xf32>
    %10 = arith.mulf %9, %8 : vector<196x128xf32>
    %11 = arith.addf %6, %10 : vector<196x128xf32>
    %cst_7 = arith.constant 0.797884583 : f32
    %12 = vector.broadcast %cst_7 : f32 to vector<196x128xf32>
    %13 = arith.mulf %12, %11 : vector<196x128xf32>
    %14 = math.tanh %13 : vector<196x128xf32>
    %cst_8 = arith.constant 1.000000e+00 : f32
    %15 = vector.broadcast %cst_8 : f32 to vector<196x128xf32>
    %16 = arith.addf %15, %14 : vector<196x128xf32>
    %cst_9 = arith.constant 5.000000e-01 : f32
    %17 = vector.broadcast %cst_9 : f32 to vector<196x128xf32>
    %18 = arith.mulf %17, %16 : vector<196x128xf32>
    %19 = arith.mulf %6, %18 : vector<196x128xf32>
    %cst_10 = arith.constant dense<0.000000e+00> : vector<128xf32>
    %20 = vector.multi_reduction <add>, %19, %cst_10 [0] : vector<196x128xf32> to vector<128xf32>
    %21 = vector.shape_cast %20 : vector<128xf32> to vector<1x128xf32>
    %cst_11 = arith.constant 1.960000e+02 : f32
    %22 = vector.broadcast %cst_11 : f32 to vector<1x128xf32>
    %23 = arith.divf %21, %22 : vector<1x128xf32>
    %c0_12 = arith.constant 0 : index
    %c0_13 = arith.constant 0 : index
    %24 = vector.load %arg4[%c0_12, %c0_13] : memref<128x10xf32, #tpu.memory_space<vmem>>, vector<128x10xf32>
    %cst_14 = arith.constant dense<0.000000e+00> : vector<1x10xf32>
    %25 = tpu.matmul %23, %24, %cst_14 {dimension_numbers = #tpu.dot_dimension_numbers<[1], [0], [0], [1], [0, 0, 1, 1], [], []>} : vector<1x128xf32>, vector<128x10xf32>, vector<1x10xf32> -> vector<1x10xf32>
    %c0_15 = arith.constant 0 : index
    %c0_16 = arith.constant 0 : index
    %26 = vector.load %arg5[%c0_15, %c0_16] : memref<1x10xf32, #tpu.memory_space<vmem>>, vector<1x10xf32>
    %27 = arith.addf %25, %26 : vector<1x10xf32>
    %c0_17 = arith.constant 0 : index
    %c0_18 = arith.constant 0 : index
    %c0_19 = arith.constant 0 : index
    %28 = vector.load %arg6[%c0_17, %c0_18, %c0_19] : memref<1x1x10xf32, #tpu.memory_space<vmem>>, vector<1x1x10xf32>
    %29 = vector.shape_cast %28 : vector<1x1x10xf32> to vector<1x10xf32>
    %30 = vector.shape_cast %27 : vector<1x10xf32> to vector<1x1x10xf32>
    tpu.vector_store %arg6[%c0_17, %c0_18, %c0_19], %30 {strides = array<i32>} : memref<1x1x10xf32, #tpu.memory_space<vmem>>, vector<1x1x10xf32>,
    return
  }
  func.func @transform_0(%arg0: i32) -> (i32, i32, i32) {
    %c0_i32 = arith.constant 0 : i32
    %c0_i32_0 = arith.constant 0 : i32
    %c0_i32_1 = arith.constant 0 : i32
    return %arg0, %c0_i32, %c0_i32_0 : i32, i32, i32
  }
  func.func @transform_1(%arg0: i32) -> (i32, i32) {
    %c0_i32 = arith.constant 0 : i32
    %c0_i32_0 = arith.constant 0 : i32
    %c0_i32_1 = arith.constant 0 : i32
    return %c0_i32, %c0_i32_0 : i32, i32
  }
  func.func @transform_2(%arg0: i32) -> (i32, i32) {
    %c0_i32 = arith.constant 0 : i32
    %c0_i32_0 = arith.constant 0 : i32
    %c0_i32_1 = arith.constant 0 : i32
    return %c0_i32, %c0_i32_0 : i32, i32
  }
  func.func @transform_3(%arg0: i32) -> (i32, i32) {
    %c0_i32 = arith.constant 0 : i32
    %c0_i32_0 = arith.constant 0 : i32
    %c0_i32_1 = arith.constant 0 : i32
    return %c0_i32, %c0_i32_0 : i32, i32
  }
  func.func @transform_4(%arg0: i32) -> (i32, i32) {
    %c0_i32 = arith.constant 0 : i32
    %c0_i32_0 = arith.constant 0 : i32
    %c0_i32_1 = arith.constant 0 : i32
    return %c0_i32, %c0_i32_0 : i32, i32
  }
  func.func @transform_5(%arg0: i32) -> (i32, i32, i32) {
    %c0_i32 = arith.constant 0 : i32
    %c0_i32_0 = arith.constant 0 : i32
    %c0_i32_1 = arith.constant 0 : i32
    return %arg0, %c0_i32, %c0_i32_0 : i32, i32, i32
  }
}

module attributes {stable_mosaic.version = 11 : i64} {
  func.func @_teacher_kernel(%arg0: i32, %arg1: memref<1x16x192xbf16, #tpu.memory_space<vmem>>, %arg2: memref<192x64xbf16, #tpu.memory_space<vmem>>, %arg3: memref<1x64xf32, #tpu.memory_space<vmem>>, %arg4: memref<1x64xf32, #tpu.memory_space<vmem>>, %arg5: memref<17x64xf32, #tpu.memory_space<vmem>>, %arg6: memref<2x1x64xf32, #tpu.memory_space<vmem>>, %arg7: memref<2x1x64xf32, #tpu.memory_space<vmem>>, %arg8: memref<2x64x192xbf16, #tpu.memory_space<vmem>>, %arg9: memref<2x1x192xf32, #tpu.memory_space<vmem>>, %arg10: memref<2x64x64xbf16, #tpu.memory_space<vmem>>, %arg11: memref<2x1x64xf32, #tpu.memory_space<vmem>>, %arg12: memref<2x1x64xf32, #tpu.memory_space<vmem>>, %arg13: memref<2x1x64xf32, #tpu.memory_space<vmem>>, %arg14: memref<2x64x128xbf16, #tpu.memory_space<vmem>>, %arg15: memref<2x1x128xf32, #tpu.memory_space<vmem>>, %arg16: memref<2x128x64xbf16, #tpu.memory_space<vmem>>, %arg17: memref<2x1x64xf32, #tpu.memory_space<vmem>>, %arg18: memref<1x2x17x17xf32, #tpu.memory_space<vmem>>, %arg19: memref<17x64xf32, #tpu.memory_space<vmem>>, %arg20: memref<17x64xf32, #tpu.memory_space<vmem>>) attributes {dimension_semantics = [#tpu.dimension_semantics<parallel>], iteration_bounds = array<i64: 2>, scalar_prefetch = 0 : i64, scratch_operands = 2 : i64, tpu.core_type = #tpu.core_type<tc>, window_params = [{transform_indices = @transform_0, window_bounds = array<i64: 1, 16, 192>}, {pipeline_mode = #tpu.pipeline_mode<synchronous>, transform_indices = @transform_1, window_bounds = array<i64: 192, 64>}, {pipeline_mode = #tpu.pipeline_mode<synchronous>, transform_indices = @transform_2, window_bounds = array<i64: 1, 64>}, {pipeline_mode = #tpu.pipeline_mode<synchronous>, transform_indices = @transform_3, window_bounds = array<i64: 1, 64>}, {pipeline_mode = #tpu.pipeline_mode<synchronous>, transform_indices = @transform_4, window_bounds = array<i64: 17, 64>}, {pipeline_mode = #tpu.pipeline_mode<synchronous>, transform_indices = @transform_5, window_bounds = array<i64: 2, 1, 64>}, {pipeline_mode = #tpu.pipeline_mode<synchronous>, transform_indices = @transform_6, window_bounds = array<i64: 2, 1, 64>}, {pipeline_mode = #tpu.pipeline_mode<synchronous>, transform_indices = @transform_7, window_bounds = array<i64: 2, 64, 192>}, {pipeline_mode = #tpu.pipeline_mode<synchronous>, transform_indices = @transform_8, window_bounds = array<i64: 2, 1, 192>}, {pipeline_mode = #tpu.pipeline_mode<synchronous>, transform_indices = @transform_9, window_bounds = array<i64: 2, 64, 64>}, {pipeline_mode = #tpu.pipeline_mode<synchronous>, transform_indices = @transform_10, window_bounds = array<i64: 2, 1, 64>}, {pipeline_mode = #tpu.pipeline_mode<synchronous>, transform_indices = @transform_11, window_bounds = array<i64: 2, 1, 64>}, {pipeline_mode = #tpu.pipeline_mode<synchronous>, transform_indices = @transform_12, window_bounds = array<i64: 2, 1, 64>}, {pipeline_mode = #tpu.pipeline_mode<synchronous>, transform_indices = @transform_13, window_bounds = array<i64: 2, 64, 128>}, {pipeline_mode = #tpu.pipeline_mode<synchronous>, transform_indices = @transform_14, window_bounds = array<i64: 2, 1, 128>}, {pipeline_mode = #tpu.pipeline_mode<synchronous>, transform_indices = @transform_15, window_bounds = array<i64: 2, 128, 64>}, {pipeline_mode = #tpu.pipeline_mode<synchronous>, transform_indices = @transform_16, window_bounds = array<i64: 2, 1, 64>}, {transform_indices = @transform_17, window_bounds = array<i64: 1, 2, 17, 17>}]} {
    %c0 = arith.constant 0 : index
    %c0_0 = arith.constant 0 : index
    %c0_1 = arith.constant 0 : index
    %0 = vector.load %arg1[%c0, %c0_0, %c0_1] : memref<1x16x192xbf16, #tpu.memory_space<vmem>>, vector<1x16x192xbf16>
    %1 = vector.shape_cast %0 : vector<1x16x192xbf16> to vector<16x192xbf16>
    %c0_2 = arith.constant 0 : index
    %c0_3 = arith.constant 0 : index
    %2 = vector.load %arg2[%c0_2, %c0_3] : memref<192x64xbf16, #tpu.memory_space<vmem>>, vector<192x64xbf16>
    %cst = arith.constant dense<0.000000e+00> : vector<16x64xf32>
    %3 = tpu.matmul %1, %2, %cst {dimension_numbers = #tpu.dot_dimension_numbers<[1], [0], [0], [1], [0, 0, 1, 1], [], []>} : vector<16x192xbf16>, vector<192x64xbf16>, vector<16x64xf32> -> vector<16x64xf32>
    %c0_4 = arith.constant 0 : index
    %c0_5 = arith.constant 0 : index
    %4 = vector.load %arg3[%c0_4, %c0_5] : memref<1x64xf32, #tpu.memory_space<vmem>>, vector<1x64xf32>
    %5 = vector.broadcast %4 : vector<1x64xf32> to vector<16x64xf32>
    %6 = arith.addf %3, %5 : vector<16x64xf32>
    %c0_6 = arith.constant 0 : index
    %c0_7 = arith.constant 0 : index
    %7 = vector.load %arg5[%c0_6, %c0_7] : memref<17x64xf32, #tpu.memory_space<vmem>>, vector<17x64xf32>
    %c0_8 = arith.constant 0 : index
    %c0_9 = arith.constant 0 : index
    %8 = vector.load %arg4[%c0_8, %c0_9] : memref<1x64xf32, #tpu.memory_space<vmem>>, vector<1x64xf32>
    %9 = vector.extract_strided_slice %7 {offsets = [0, 0], sizes = [1, 64], strides = [1, 1]} : vector<17x64xf32> to vector<1x64xf32>
    %10 = arith.addf %8, %9 : vector<1x64xf32>
    %c0_10 = arith.constant 0 : index
    %c0_11 = arith.constant 0 : index
    %11 = vector.load %arg19[%c0_10, %c0_11] : memref<17x64xf32, #tpu.memory_space<vmem>>, vector<1x64xf32>
    tpu.vector_store %arg19[%c0_10, %c0_11], %10 {strides = array<i32>} : memref<17x64xf32, #tpu.memory_space<vmem>>, vector<1x64xf32>,
    %12 = vector.extract_strided_slice %7 {offsets = [1, 0], sizes = [16, 64], strides = [1, 1]} : vector<17x64xf32> to vector<16x64xf32>
    %13 = arith.addf %6, %12 : vector<16x64xf32>
    %c1 = arith.constant 1 : index
    %c0_12 = arith.constant 0 : index
    %14 = vector.load %arg19[%c1, %c0_12] : memref<17x64xf32, #tpu.memory_space<vmem>>, vector<16x64xf32>
    tpu.vector_store %arg19[%c1, %c0_12], %13 {strides = array<i32>} : memref<17x64xf32, #tpu.memory_space<vmem>>, vector<16x64xf32>,
    %c0_13 = arith.constant 0 : index
    %c0_14 = arith.constant 0 : index
    %15 = vector.load %arg19[%c0_13, %c0_14] : memref<17x64xf32, #tpu.memory_space<vmem>>, vector<17x64xf32>
    %c0_15 = arith.constant 0 : index
    %c0_16 = arith.constant 0 : index
    %c0_17 = arith.constant 0 : index
    %16 = vector.load %arg6[%c0_15, %c0_16, %c0_17] : memref<2x1x64xf32, #tpu.memory_space<vmem>>, vector<1x1x64xf32>
    %17 = vector.shape_cast %16 : vector<1x1x64xf32> to vector<1x64xf32>
    %c0_18 = arith.constant 0 : index
    %c0_19 = arith.constant 0 : index
    %c0_20 = arith.constant 0 : index
    %18 = vector.load %arg7[%c0_18, %c0_19, %c0_20] : memref<2x1x64xf32, #tpu.memory_space<vmem>>, vector<1x1x64xf32>
    %19 = vector.shape_cast %18 : vector<1x1x64xf32> to vector<1x64xf32>
    %cst_21 = arith.constant dense<0.000000e+00> : vector<17xf32>
    %20 = vector.multi_reduction <add>, %15, %cst_21 [1] : vector<17x64xf32> to vector<17xf32>
    %21 = vector.shape_cast %20 : vector<17xf32> to vector<17x1xf32>
    %cst_22 = arith.constant 6.400000e+01 : f32
    %22 = vector.broadcast %cst_22 : f32 to vector<17x1xf32>
    %23 = arith.divf %21, %22 : vector<17x1xf32>
    %24 = vector.broadcast %23 : vector<17x1xf32> to vector<17x64xf32>
    %25 = arith.subf %15, %24 : vector<17x64xf32>
    %26 = arith.mulf %25, %25 : vector<17x64xf32>
    %cst_23 = arith.constant dense<0.000000e+00> : vector<17xf32>
    %27 = vector.multi_reduction <add>, %26, %cst_23 [1] : vector<17x64xf32> to vector<17xf32>
    %28 = vector.shape_cast %27 : vector<17xf32> to vector<17x1xf32>
    %cst_24 = arith.constant 6.400000e+01 : f32
    %29 = vector.broadcast %cst_24 : f32 to vector<17x1xf32>
    %30 = arith.divf %28, %29 : vector<17x1xf32>
    %31 = vector.broadcast %23 : vector<17x1xf32> to vector<17x64xf32>
    %32 = arith.subf %15, %31 : vector<17x64xf32>
    %cst_25 = arith.constant 9.99999974E-6 : f32
    %33 = vector.broadcast %cst_25 : f32 to vector<17x1xf32>
    %34 = arith.addf %30, %33 : vector<17x1xf32>
    %35 = math.rsqrt %34 : vector<17x1xf32>
    %36 = vector.broadcast %35 : vector<17x1xf32> to vector<17x64xf32>
    %37 = arith.mulf %32, %36 : vector<17x64xf32>
    %38 = vector.broadcast %17 : vector<1x64xf32> to vector<17x64xf32>
    %39 = arith.mulf %37, %38 : vector<17x64xf32>
    %40 = vector.broadcast %19 : vector<1x64xf32> to vector<17x64xf32>
    %41 = arith.addf %39, %40 : vector<17x64xf32>
    %42 = arith.truncf %41 : vector<17x64xf32> to vector<17x64xbf16>
    %c0_26 = arith.constant 0 : index
    %c0_27 = arith.constant 0 : index
    %c0_28 = arith.constant 0 : index
    %43 = vector.load %arg8[%c0_26, %c0_27, %c0_28] : memref<2x64x192xbf16, #tpu.memory_space<vmem>>, vector<1x64x192xbf16>
    %44 = vector.shape_cast %43 : vector<1x64x192xbf16> to vector<64x192xbf16>
    %cst_29 = arith.constant dense<0.000000e+00> : vector<17x192xf32>
    %45 = tpu.matmul %42, %44, %cst_29 {dimension_numbers = #tpu.dot_dimension_numbers<[1], [0], [0], [1], [0, 0, 1, 1], [], []>} : vector<17x64xbf16>, vector<64x192xbf16>, vector<17x192xf32> -> vector<17x192xf32>
    %c0_30 = arith.constant 0 : index
    %c0_31 = arith.constant 0 : index
    %c0_32 = arith.constant 0 : index
    %46 = vector.load %arg9[%c0_30, %c0_31, %c0_32] : memref<2x1x192xf32, #tpu.memory_space<vmem>>, vector<1x1x192xf32>
    %47 = vector.shape_cast %46 : vector<1x1x192xf32> to vector<1x192xf32>
    %48 = vector.broadcast %47 : vector<1x192xf32> to vector<17x192xf32>
    %49 = arith.addf %45, %48 : vector<17x192xf32>
    %cst_33 = arith.constant 0.000000e+00 : f32
    %50 = vector.broadcast %cst_33 : f32 to vector<17x17xf32>
    %51 = vector.extract_strided_slice %49 {offsets = [0, 0], sizes = [17, 16], strides = [1, 1]} : vector<17x192xf32> to vector<17x16xf32>
    %52 = vector.extract_strided_slice %49 {offsets = [0, 64], sizes = [17, 16], strides = [1, 1]} : vector<17x192xf32> to vector<17x16xf32>
    %53 = vector.extract_strided_slice %49 {offsets = [0, 128], sizes = [17, 16], strides = [1, 1]} : vector<17x192xf32> to vector<17x16xf32>
    %cst_34 = arith.constant dense<0.000000e+00> : vector<17x17xf32>
    %54 = tpu.matmul %51, %52, %cst_34 {dimension_numbers = #tpu.dot_dimension_numbers<[1], [1], [0], [0], [0, 0, 1, 0], [], []>} : vector<17x16xf32>, vector<17x16xf32>, vector<17x17xf32> -> vector<17x17xf32>
    %cst_35 = arith.constant 2.500000e-01 : f32
    %55 = vector.broadcast %cst_35 : f32 to vector<17x17xf32>
    %56 = arith.mulf %54, %55 : vector<17x17xf32>
    %cst_36 = arith.constant dense<0xFF800000> : vector<17xf32>
    %57 = vector.multi_reduction <maximumf>, %56, %cst_36 [1] : vector<17x17xf32> to vector<17xf32>
    %58 = vector.shape_cast %57 : vector<17xf32> to vector<17x1xf32>
    %59 = vector.broadcast %58 : vector<17x1xf32> to vector<17x17xf32>
    %60 = arith.subf %56, %59 : vector<17x17xf32>
    %61 = math.exp %60 : vector<17x17xf32>
    %cst_37 = arith.constant dense<0.000000e+00> : vector<17xf32>
    %62 = vector.multi_reduction <add>, %61, %cst_37 [1] : vector<17x17xf32> to vector<17xf32>
    %63 = vector.shape_cast %62 : vector<17xf32> to vector<17x1xf32>
    %64 = vector.broadcast %63 : vector<17x1xf32> to vector<17x17xf32>
    %65 = arith.divf %61, %64 : vector<17x17xf32>
    %66 = arith.addf %50, %65 : vector<17x17xf32>
    %cst_38 = arith.constant dense<0.000000e+00> : vector<17x16xf32>
    %67 = tpu.matmul %65, %53, %cst_38 {dimension_numbers = #tpu.dot_dimension_numbers<[1], [0], [0], [1], [0, 0, 1, 1], [], []>} : vector<17x17xf32>, vector<17x16xf32>, vector<17x16xf32> -> vector<17x16xf32>
    %c0_39 = arith.constant 0 : index
    %c0_40 = arith.constant 0 : index
    %68 = vector.load %arg20[%c0_39, %c0_40] : memref<17x64xf32, #tpu.memory_space<vmem>>, vector<17x16xf32>
    tpu.vector_store %arg20[%c0_39, %c0_40], %67 {strides = array<i32>} : memref<17x64xf32, #tpu.memory_space<vmem>>, vector<17x16xf32>,
    %69 = vector.extract_strided_slice %49 {offsets = [0, 16], sizes = [17, 16], strides = [1, 1]} : vector<17x192xf32> to vector<17x16xf32>
    %70 = vector.extract_strided_slice %49 {offsets = [0, 80], sizes = [17, 16], strides = [1, 1]} : vector<17x192xf32> to vector<17x16xf32>
    %71 = vector.extract_strided_slice %49 {offsets = [0, 144], sizes = [17, 16], strides = [1, 1]} : vector<17x192xf32> to vector<17x16xf32>
    %cst_41 = arith.constant dense<0.000000e+00> : vector<17x17xf32>
    %72 = tpu.matmul %69, %70, %cst_41 {dimension_numbers = #tpu.dot_dimension_numbers<[1], [1], [0], [0], [0, 0, 1, 0], [], []>} : vector<17x16xf32>, vector<17x16xf32>, vector<17x17xf32> -> vector<17x17xf32>
    %cst_42 = arith.constant 2.500000e-01 : f32
    %73 = vector.broadcast %cst_42 : f32 to vector<17x17xf32>
    %74 = arith.mulf %72, %73 : vector<17x17xf32>
    %cst_43 = arith.constant dense<0xFF800000> : vector<17xf32>
    %75 = vector.multi_reduction <maximumf>, %74, %cst_43 [1] : vector<17x17xf32> to vector<17xf32>
    %76 = vector.shape_cast %75 : vector<17xf32> to vector<17x1xf32>
    %77 = vector.broadcast %76 : vector<17x1xf32> to vector<17x17xf32>
    %78 = arith.subf %74, %77 : vector<17x17xf32>
    %79 = math.exp %78 : vector<17x17xf32>
    %cst_44 = arith.constant dense<0.000000e+00> : vector<17xf32>
    %80 = vector.multi_reduction <add>, %79, %cst_44 [1] : vector<17x17xf32> to vector<17xf32>
    %81 = vector.shape_cast %80 : vector<17xf32> to vector<17x1xf32>
    %82 = vector.broadcast %81 : vector<17x1xf32> to vector<17x17xf32>
    %83 = arith.divf %79, %82 : vector<17x17xf32>
    %84 = arith.addf %66, %83 : vector<17x17xf32>
    %cst_45 = arith.constant dense<0.000000e+00> : vector<17x16xf32>
    %85 = tpu.matmul %83, %71, %cst_45 {dimension_numbers = #tpu.dot_dimension_numbers<[1], [0], [0], [1], [0, 0, 1, 1], [], []>} : vector<17x17xf32>, vector<17x16xf32>, vector<17x16xf32> -> vector<17x16xf32>
    %c0_46 = arith.constant 0 : index
    %c16 = arith.constant 16 : index
    %86 = vector.load %arg20[%c0_46, %c16] : memref<17x64xf32, #tpu.memory_space<vmem>>, vector<17x16xf32>
    tpu.vector_store %arg20[%c0_46, %c16], %85 {strides = array<i32>} : memref<17x64xf32, #tpu.memory_space<vmem>>, vector<17x16xf32>,
    %87 = vector.extract_strided_slice %49 {offsets = [0, 32], sizes = [17, 16], strides = [1, 1]} : vector<17x192xf32> to vector<17x16xf32>
    %88 = vector.extract_strided_slice %49 {offsets = [0, 96], sizes = [17, 16], strides = [1, 1]} : vector<17x192xf32> to vector<17x16xf32>
    %89 = vector.extract_strided_slice %49 {offsets = [0, 160], sizes = [17, 16], strides = [1, 1]} : vector<17x192xf32> to vector<17x16xf32>
    %cst_47 = arith.constant dense<0.000000e+00> : vector<17x17xf32>
    %90 = tpu.matmul %87, %88, %cst_47 {dimension_numbers = #tpu.dot_dimension_numbers<[1], [1], [0], [0], [0, 0, 1, 0], [], []>} : vector<17x16xf32>, vector<17x16xf32>, vector<17x17xf32> -> vector<17x17xf32>
    %cst_48 = arith.constant 2.500000e-01 : f32
    %91 = vector.broadcast %cst_48 : f32 to vector<17x17xf32>
    %92 = arith.mulf %90, %91 : vector<17x17xf32>
    %cst_49 = arith.constant dense<0xFF800000> : vector<17xf32>
    %93 = vector.multi_reduction <maximumf>, %92, %cst_49 [1] : vector<17x17xf32> to vector<17xf32>
    %94 = vector.shape_cast %93 : vector<17xf32> to vector<17x1xf32>
    %95 = vector.broadcast %94 : vector<17x1xf32> to vector<17x17xf32>
    %96 = arith.subf %92, %95 : vector<17x17xf32>
    %97 = math.exp %96 : vector<17x17xf32>
    %cst_50 = arith.constant dense<0.000000e+00> : vector<17xf32>
    %98 = vector.multi_reduction <add>, %97, %cst_50 [1] : vector<17x17xf32> to vector<17xf32>
    %99 = vector.shape_cast %98 : vector<17xf32> to vector<17x1xf32>
    %100 = vector.broadcast %99 : vector<17x1xf32> to vector<17x17xf32>
    %101 = arith.divf %97, %100 : vector<17x17xf32>
    %102 = arith.addf %84, %101 : vector<17x17xf32>
    %cst_51 = arith.constant dense<0.000000e+00> : vector<17x16xf32>
    %103 = tpu.matmul %101, %89, %cst_51 {dimension_numbers = #tpu.dot_dimension_numbers<[1], [0], [0], [1], [0, 0, 1, 1], [], []>} : vector<17x17xf32>, vector<17x16xf32>, vector<17x16xf32> -> vector<17x16xf32>
    %c0_52 = arith.constant 0 : index
    %c32 = arith.constant 32 : index
    %104 = vector.load %arg20[%c0_52, %c32] : memref<17x64xf32, #tpu.memory_space<vmem>>, vector<17x16xf32>
    tpu.vector_store %arg20[%c0_52, %c32], %103 {strides = array<i32>} : memref<17x64xf32, #tpu.memory_space<vmem>>, vector<17x16xf32>,
    %105 = vector.extract_strided_slice %49 {offsets = [0, 48], sizes = [17, 16], strides = [1, 1]} : vector<17x192xf32> to vector<17x16xf32>
    %106 = vector.extract_strided_slice %49 {offsets = [0, 112], sizes = [17, 16], strides = [1, 1]} : vector<17x192xf32> to vector<17x16xf32>
    %107 = vector.extract_strided_slice %49 {offsets = [0, 176], sizes = [17, 16], strides = [1, 1]} : vector<17x192xf32> to vector<17x16xf32>
    %cst_53 = arith.constant dense<0.000000e+00> : vector<17x17xf32>
    %108 = tpu.matmul %105, %106, %cst_53 {dimension_numbers = #tpu.dot_dimension_numbers<[1], [1], [0], [0], [0, 0, 1, 0], [], []>} : vector<17x16xf32>, vector<17x16xf32>, vector<17x17xf32> -> vector<17x17xf32>
    %cst_54 = arith.constant 2.500000e-01 : f32
    %109 = vector.broadcast %cst_54 : f32 to vector<17x17xf32>
    %110 = arith.mulf %108, %109 : vector<17x17xf32>
    %cst_55 = arith.constant dense<0xFF800000> : vector<17xf32>
    %111 = vector.multi_reduction <maximumf>, %110, %cst_55 [1] : vector<17x17xf32> to vector<17xf32>
    %112 = vector.shape_cast %111 : vector<17xf32> to vector<17x1xf32>
    %113 = vector.broadcast %112 : vector<17x1xf32> to vector<17x17xf32>
    %114 = arith.subf %110, %113 : vector<17x17xf32>
    %115 = math.exp %114 : vector<17x17xf32>
    %cst_56 = arith.constant dense<0.000000e+00> : vector<17xf32>
    %116 = vector.multi_reduction <add>, %115, %cst_56 [1] : vector<17x17xf32> to vector<17xf32>
    %117 = vector.shape_cast %116 : vector<17xf32> to vector<17x1xf32>
    %118 = vector.broadcast %117 : vector<17x1xf32> to vector<17x17xf32>
    %119 = arith.divf %115, %118 : vector<17x17xf32>
    %120 = arith.addf %102, %119 : vector<17x17xf32>
    %cst_57 = arith.constant dense<0.000000e+00> : vector<17x16xf32>
    %121 = tpu.matmul %119, %107, %cst_57 {dimension_numbers = #tpu.dot_dimension_numbers<[1], [0], [0], [1], [0, 0, 1, 1], [], []>} : vector<17x17xf32>, vector<17x16xf32>, vector<17x16xf32> -> vector<17x16xf32>
    %c0_58 = arith.constant 0 : index
    %c48 = arith.constant 48 : index
    %122 = vector.load %arg20[%c0_58, %c48] : memref<17x64xf32, #tpu.memory_space<vmem>>, vector<17x16xf32>
    tpu.vector_store %arg20[%c0_58, %c48], %121 {strides = array<i32>} : memref<17x64xf32, #tpu.memory_space<vmem>>, vector<17x16xf32>,
    %cst_59 = arith.constant 2.500000e-01 : f32
    %123 = vector.broadcast %cst_59 : f32 to vector<17x17xf32>
    %124 = arith.mulf %120, %123 : vector<17x17xf32>
    %c0_60 = arith.constant 0 : index
    %c0_61 = arith.constant 0 : index
    %c0_62 = arith.constant 0 : index
    %c0_63 = arith.constant 0 : index
    %125 = vector.load %arg18[%c0_60, %c0_61, %c0_62, %c0_63] : memref<1x2x17x17xf32, #tpu.memory_space<vmem>>, vector<1x1x17x17xf32>
    %126 = vector.shape_cast %125 : vector<1x1x17x17xf32> to vector<17x17xf32>
    %127 = vector.shape_cast %124 : vector<17x17xf32> to vector<1x1x17x17xf32>
    tpu.vector_store %arg18[%c0_60, %c0_61, %c0_62, %c0_63], %127 {strides = array<i32>} : memref<1x2x17x17xf32, #tpu.memory_space<vmem>>, vector<1x1x17x17xf32>,
    %c0_64 = arith.constant 0 : index
    %c0_65 = arith.constant 0 : index
    %128 = vector.load %arg20[%c0_64, %c0_65] : memref<17x64xf32, #tpu.memory_space<vmem>>, vector<17x64xf32>
    %129 = arith.truncf %128 : vector<17x64xf32> to vector<17x64xbf16>
    %c0_66 = arith.constant 0 : index
    %c0_67 = arith.constant 0 : index
    %c0_68 = arith.constant 0 : index
    %130 = vector.load %arg10[%c0_66, %c0_67, %c0_68] : memref<2x64x64xbf16, #tpu.memory_space<vmem>>, vector<1x64x64xbf16>
    %131 = vector.shape_cast %130 : vector<1x64x64xbf16> to vector<64x64xbf16>
    %cst_69 = arith.constant dense<0.000000e+00> : vector<17x64xf32>
    %132 = tpu.matmul %129, %131, %cst_69 {dimension_numbers = #tpu.dot_dimension_numbers<[1], [0], [0], [1], [0, 0, 1, 1], [], []>} : vector<17x64xbf16>, vector<64x64xbf16>, vector<17x64xf32> -> vector<17x64xf32>
    %c0_70 = arith.constant 0 : index
    %c0_71 = arith.constant 0 : index
    %c0_72 = arith.constant 0 : index
    %133 = vector.load %arg11[%c0_70, %c0_71, %c0_72] : memref<2x1x64xf32, #tpu.memory_space<vmem>>, vector<1x1x64xf32>
    %134 = vector.shape_cast %133 : vector<1x1x64xf32> to vector<1x64xf32>
    %135 = vector.broadcast %134 : vector<1x64xf32> to vector<17x64xf32>
    %136 = arith.addf %132, %135 : vector<17x64xf32>
    %137 = arith.addf %15, %136 : vector<17x64xf32>
    %c0_73 = arith.constant 0 : index
    %c0_74 = arith.constant 0 : index
    %c0_75 = arith.constant 0 : index
    %138 = vector.load %arg12[%c0_73, %c0_74, %c0_75] : memref<2x1x64xf32, #tpu.memory_space<vmem>>, vector<1x1x64xf32>
    %139 = vector.shape_cast %138 : vector<1x1x64xf32> to vector<1x64xf32>
    %c0_76 = arith.constant 0 : index
    %c0_77 = arith.constant 0 : index
    %c0_78 = arith.constant 0 : index
    %140 = vector.load %arg13[%c0_76, %c0_77, %c0_78] : memref<2x1x64xf32, #tpu.memory_space<vmem>>, vector<1x1x64xf32>
    %141 = vector.shape_cast %140 : vector<1x1x64xf32> to vector<1x64xf32>
    %cst_79 = arith.constant dense<0.000000e+00> : vector<17xf32>
    %142 = vector.multi_reduction <add>, %137, %cst_79 [1] : vector<17x64xf32> to vector<17xf32>
    %143 = vector.shape_cast %142 : vector<17xf32> to vector<17x1xf32>
    %cst_80 = arith.constant 6.400000e+01 : f32
    %144 = vector.broadcast %cst_80 : f32 to vector<17x1xf32>
    %145 = arith.divf %143, %144 : vector<17x1xf32>
    %146 = vector.broadcast %145 : vector<17x1xf32> to vector<17x64xf32>
    %147 = arith.subf %137, %146 : vector<17x64xf32>
    %148 = arith.mulf %147, %147 : vector<17x64xf32>
    %cst_81 = arith.constant dense<0.000000e+00> : vector<17xf32>
    %149 = vector.multi_reduction <add>, %148, %cst_81 [1] : vector<17x64xf32> to vector<17xf32>
    %150 = vector.shape_cast %149 : vector<17xf32> to vector<17x1xf32>
    %cst_82 = arith.constant 6.400000e+01 : f32
    %151 = vector.broadcast %cst_82 : f32 to vector<17x1xf32>
    %152 = arith.divf %150, %151 : vector<17x1xf32>
    %153 = vector.broadcast %145 : vector<17x1xf32> to vector<17x64xf32>
    %154 = arith.subf %137, %153 : vector<17x64xf32>
    %cst_83 = arith.constant 9.99999974E-6 : f32
    %155 = vector.broadcast %cst_83 : f32 to vector<17x1xf32>
    %156 = arith.addf %152, %155 : vector<17x1xf32>
    %157 = math.rsqrt %156 : vector<17x1xf32>
    %158 = vector.broadcast %157 : vector<17x1xf32> to vector<17x64xf32>
    %159 = arith.mulf %154, %158 : vector<17x64xf32>
    %160 = vector.broadcast %139 : vector<1x64xf32> to vector<17x64xf32>
    %161 = arith.mulf %159, %160 : vector<17x64xf32>
    %162 = vector.broadcast %141 : vector<1x64xf32> to vector<17x64xf32>
    %163 = arith.addf %161, %162 : vector<17x64xf32>
    %164 = arith.truncf %163 : vector<17x64xf32> to vector<17x64xbf16>
    %c0_84 = arith.constant 0 : index
    %c0_85 = arith.constant 0 : index
    %c0_86 = arith.constant 0 : index
    %165 = vector.load %arg14[%c0_84, %c0_85, %c0_86] : memref<2x64x128xbf16, #tpu.memory_space<vmem>>, vector<1x64x128xbf16>
    %166 = vector.shape_cast %165 : vector<1x64x128xbf16> to vector<64x128xbf16>
    %cst_87 = arith.constant dense<0.000000e+00> : vector<17x128xf32>
    %167 = tpu.matmul %164, %166, %cst_87 {dimension_numbers = #tpu.dot_dimension_numbers<[1], [0], [0], [1], [0, 0, 1, 1], [], []>} : vector<17x64xbf16>, vector<64x128xbf16>, vector<17x128xf32> -> vector<17x128xf32>
    %c0_88 = arith.constant 0 : index
    %c0_89 = arith.constant 0 : index
    %c0_90 = arith.constant 0 : index
    %168 = vector.load %arg15[%c0_88, %c0_89, %c0_90] : memref<2x1x128xf32, #tpu.memory_space<vmem>>, vector<1x1x128xf32>
    %169 = vector.shape_cast %168 : vector<1x1x128xf32> to vector<1x128xf32>
    %170 = vector.broadcast %169 : vector<1x128xf32> to vector<17x128xf32>
    %171 = arith.addf %167, %170 : vector<17x128xf32>
    %172 = arith.mulf %171, %171 : vector<17x128xf32>
    %173 = arith.mulf %171, %172 : vector<17x128xf32>
    %cst_91 = arith.constant 4.471500e-02 : f32
    %174 = vector.broadcast %cst_91 : f32 to vector<17x128xf32>
    %175 = arith.mulf %174, %173 : vector<17x128xf32>
    %176 = arith.addf %171, %175 : vector<17x128xf32>
    %cst_92 = arith.constant 0.797884583 : f32
    %177 = vector.broadcast %cst_92 : f32 to vector<17x128xf32>
    %178 = arith.mulf %177, %176 : vector<17x128xf32>
    %179 = math.tanh %178 : vector<17x128xf32>
    %cst_93 = arith.constant 1.000000e+00 : f32
    %180 = vector.broadcast %cst_93 : f32 to vector<17x128xf32>
    %181 = arith.addf %180, %179 : vector<17x128xf32>
    %cst_94 = arith.constant 5.000000e-01 : f32
    %182 = vector.broadcast %cst_94 : f32 to vector<17x128xf32>
    %183 = arith.mulf %182, %181 : vector<17x128xf32>
    %184 = arith.mulf %171, %183 : vector<17x128xf32>
    %185 = arith.truncf %184 : vector<17x128xf32> to vector<17x128xbf16>
    %c0_95 = arith.constant 0 : index
    %c0_96 = arith.constant 0 : index
    %c0_97 = arith.constant 0 : index
    %186 = vector.load %arg16[%c0_95, %c0_96, %c0_97] : memref<2x128x64xbf16, #tpu.memory_space<vmem>>, vector<1x128x64xbf16>
    %187 = vector.shape_cast %186 : vector<1x128x64xbf16> to vector<128x64xbf16>
    %cst_98 = arith.constant dense<0.000000e+00> : vector<17x64xf32>
    %188 = tpu.matmul %185, %187, %cst_98 {dimension_numbers = #tpu.dot_dimension_numbers<[1], [0], [0], [1], [0, 0, 1, 1], [], []>} : vector<17x128xbf16>, vector<128x64xbf16>, vector<17x64xf32> -> vector<17x64xf32>
    %c0_99 = arith.constant 0 : index
    %c0_100 = arith.constant 0 : index
    %c0_101 = arith.constant 0 : index
    %189 = vector.load %arg17[%c0_99, %c0_100, %c0_101] : memref<2x1x64xf32, #tpu.memory_space<vmem>>, vector<1x1x64xf32>
    %190 = vector.shape_cast %189 : vector<1x1x64xf32> to vector<1x64xf32>
    %191 = vector.broadcast %190 : vector<1x64xf32> to vector<17x64xf32>
    %192 = arith.addf %188, %191 : vector<17x64xf32>
    %193 = arith.addf %137, %192 : vector<17x64xf32>
    %c1_102 = arith.constant 1 : index
    %c0_103 = arith.constant 0 : index
    %c0_104 = arith.constant 0 : index
    %194 = vector.load %arg6[%c1_102, %c0_103, %c0_104] : memref<2x1x64xf32, #tpu.memory_space<vmem>>, vector<1x1x64xf32>
    %195 = vector.shape_cast %194 : vector<1x1x64xf32> to vector<1x64xf32>
    %c1_105 = arith.constant 1 : index
    %c0_106 = arith.constant 0 : index
    %c0_107 = arith.constant 0 : index
    %196 = vector.load %arg7[%c1_105, %c0_106, %c0_107] : memref<2x1x64xf32, #tpu.memory_space<vmem>>, vector<1x1x64xf32>
    %197 = vector.shape_cast %196 : vector<1x1x64xf32> to vector<1x64xf32>
    %cst_108 = arith.constant dense<0.000000e+00> : vector<17xf32>
    %198 = vector.multi_reduction <add>, %193, %cst_108 [1] : vector<17x64xf32> to vector<17xf32>
    %199 = vector.shape_cast %198 : vector<17xf32> to vector<17x1xf32>
    %cst_109 = arith.constant 6.400000e+01 : f32
    %200 = vector.broadcast %cst_109 : f32 to vector<17x1xf32>
    %201 = arith.divf %199, %200 : vector<17x1xf32>
    %202 = vector.broadcast %201 : vector<17x1xf32> to vector<17x64xf32>
    %203 = arith.subf %193, %202 : vector<17x64xf32>
    %204 = arith.mulf %203, %203 : vector<17x64xf32>
    %cst_110 = arith.constant dense<0.000000e+00> : vector<17xf32>
    %205 = vector.multi_reduction <add>, %204, %cst_110 [1] : vector<17x64xf32> to vector<17xf32>
    %206 = vector.shape_cast %205 : vector<17xf32> to vector<17x1xf32>
    %cst_111 = arith.constant 6.400000e+01 : f32
    %207 = vector.broadcast %cst_111 : f32 to vector<17x1xf32>
    %208 = arith.divf %206, %207 : vector<17x1xf32>
    %209 = vector.broadcast %201 : vector<17x1xf32> to vector<17x64xf32>
    %210 = arith.subf %193, %209 : vector<17x64xf32>
    %cst_112 = arith.constant 9.99999974E-6 : f32
    %211 = vector.broadcast %cst_112 : f32 to vector<17x1xf32>
    %212 = arith.addf %208, %211 : vector<17x1xf32>
    %213 = math.rsqrt %212 : vector<17x1xf32>
    %214 = vector.broadcast %213 : vector<17x1xf32> to vector<17x64xf32>
    %215 = arith.mulf %210, %214 : vector<17x64xf32>
    %216 = vector.broadcast %195 : vector<1x64xf32> to vector<17x64xf32>
    %217 = arith.mulf %215, %216 : vector<17x64xf32>
    %218 = vector.broadcast %197 : vector<1x64xf32> to vector<17x64xf32>
    %219 = arith.addf %217, %218 : vector<17x64xf32>
    %220 = arith.truncf %219 : vector<17x64xf32> to vector<17x64xbf16>
    %c1_113 = arith.constant 1 : index
    %c0_114 = arith.constant 0 : index
    %c0_115 = arith.constant 0 : index
    %221 = vector.load %arg8[%c1_113, %c0_114, %c0_115] : memref<2x64x192xbf16, #tpu.memory_space<vmem>>, vector<1x64x192xbf16>
    %222 = vector.shape_cast %221 : vector<1x64x192xbf16> to vector<64x192xbf16>
    %cst_116 = arith.constant dense<0.000000e+00> : vector<17x192xf32>
    %223 = tpu.matmul %220, %222, %cst_116 {dimension_numbers = #tpu.dot_dimension_numbers<[1], [0], [0], [1], [0, 0, 1, 1], [], []>} : vector<17x64xbf16>, vector<64x192xbf16>, vector<17x192xf32> -> vector<17x192xf32>
    %c1_117 = arith.constant 1 : index
    %c0_118 = arith.constant 0 : index
    %c0_119 = arith.constant 0 : index
    %224 = vector.load %arg9[%c1_117, %c0_118, %c0_119] : memref<2x1x192xf32, #tpu.memory_space<vmem>>, vector<1x1x192xf32>
    %225 = vector.shape_cast %224 : vector<1x1x192xf32> to vector<1x192xf32>
    %226 = vector.broadcast %225 : vector<1x192xf32> to vector<17x192xf32>
    %227 = arith.addf %223, %226 : vector<17x192xf32>
    %cst_120 = arith.constant 0.000000e+00 : f32
    %228 = vector.broadcast %cst_120 : f32 to vector<17x17xf32>
    %229 = vector.extract_strided_slice %227 {offsets = [0, 0], sizes = [17, 16], strides = [1, 1]} : vector<17x192xf32> to vector<17x16xf32>
    %230 = vector.extract_strided_slice %227 {offsets = [0, 64], sizes = [17, 16], strides = [1, 1]} : vector<17x192xf32> to vector<17x16xf32>
    %231 = vector.extract_strided_slice %227 {offsets = [0, 128], sizes = [17, 16], strides = [1, 1]} : vector<17x192xf32> to vector<17x16xf32>
    %cst_121 = arith.constant dense<0.000000e+00> : vector<17x17xf32>
    %232 = tpu.matmul %229, %230, %cst_121 {dimension_numbers = #tpu.dot_dimension_numbers<[1], [1], [0], [0], [0, 0, 1, 0], [], []>} : vector<17x16xf32>, vector<17x16xf32>, vector<17x17xf32> -> vector<17x17xf32>
    %cst_122 = arith.constant 2.500000e-01 : f32
    %233 = vector.broadcast %cst_122 : f32 to vector<17x17xf32>
    %234 = arith.mulf %232, %233 : vector<17x17xf32>
    %cst_123 = arith.constant dense<0xFF800000> : vector<17xf32>
    %235 = vector.multi_reduction <maximumf>, %234, %cst_123 [1] : vector<17x17xf32> to vector<17xf32>
    %236 = vector.shape_cast %235 : vector<17xf32> to vector<17x1xf32>
    %237 = vector.broadcast %236 : vector<17x1xf32> to vector<17x17xf32>
    %238 = arith.subf %234, %237 : vector<17x17xf32>
    %239 = math.exp %238 : vector<17x17xf32>
    %cst_124 = arith.constant dense<0.000000e+00> : vector<17xf32>
    %240 = vector.multi_reduction <add>, %239, %cst_124 [1] : vector<17x17xf32> to vector<17xf32>
    %241 = vector.shape_cast %240 : vector<17xf32> to vector<17x1xf32>
    %242 = vector.broadcast %241 : vector<17x1xf32> to vector<17x17xf32>
    %243 = arith.divf %239, %242 : vector<17x17xf32>
    %244 = arith.addf %228, %243 : vector<17x17xf32>
    %cst_125 = arith.constant dense<0.000000e+00> : vector<17x16xf32>
    %245 = tpu.matmul %243, %231, %cst_125 {dimension_numbers = #tpu.dot_dimension_numbers<[1], [0], [0], [1], [0, 0, 1, 1], [], []>} : vector<17x17xf32>, vector<17x16xf32>, vector<17x16xf32> -> vector<17x16xf32>
    %c0_126 = arith.constant 0 : index
    %c0_127 = arith.constant 0 : index
    %246 = vector.load %arg20[%c0_126, %c0_127] : memref<17x64xf32, #tpu.memory_space<vmem>>, vector<17x16xf32>
    tpu.vector_store %arg20[%c0_126, %c0_127], %245 {strides = array<i32>} : memref<17x64xf32, #tpu.memory_space<vmem>>, vector<17x16xf32>,
    %247 = vector.extract_strided_slice %227 {offsets = [0, 16], sizes = [17, 16], strides = [1, 1]} : vector<17x192xf32> to vector<17x16xf32>
    %248 = vector.extract_strided_slice %227 {offsets = [0, 80], sizes = [17, 16], strides = [1, 1]} : vector<17x192xf32> to vector<17x16xf32>
    %249 = vector.extract_strided_slice %227 {offsets = [0, 144], sizes = [17, 16], strides = [1, 1]} : vector<17x192xf32> to vector<17x16xf32>
    %cst_128 = arith.constant dense<0.000000e+00> : vector<17x17xf32>
    %250 = tpu.matmul %247, %248, %cst_128 {dimension_numbers = #tpu.dot_dimension_numbers<[1], [1], [0], [0], [0, 0, 1, 0], [], []>} : vector<17x16xf32>, vector<17x16xf32>, vector<17x17xf32> -> vector<17x17xf32>
    %cst_129 = arith.constant 2.500000e-01 : f32
    %251 = vector.broadcast %cst_129 : f32 to vector<17x17xf32>
    %252 = arith.mulf %250, %251 : vector<17x17xf32>
    %cst_130 = arith.constant dense<0xFF800000> : vector<17xf32>
    %253 = vector.multi_reduction <maximumf>, %252, %cst_130 [1] : vector<17x17xf32> to vector<17xf32>
    %254 = vector.shape_cast %253 : vector<17xf32> to vector<17x1xf32>
    %255 = vector.broadcast %254 : vector<17x1xf32> to vector<17x17xf32>
    %256 = arith.subf %252, %255 : vector<17x17xf32>
    %257 = math.exp %256 : vector<17x17xf32>
    %cst_131 = arith.constant dense<0.000000e+00> : vector<17xf32>
    %258 = vector.multi_reduction <add>, %257, %cst_131 [1] : vector<17x17xf32> to vector<17xf32>
    %259 = vector.shape_cast %258 : vector<17xf32> to vector<17x1xf32>
    %260 = vector.broadcast %259 : vector<17x1xf32> to vector<17x17xf32>
    %261 = arith.divf %257, %260 : vector<17x17xf32>
    %262 = arith.addf %244, %261 : vector<17x17xf32>
    %cst_132 = arith.constant dense<0.000000e+00> : vector<17x16xf32>
    %263 = tpu.matmul %261, %249, %cst_132 {dimension_numbers = #tpu.dot_dimension_numbers<[1], [0], [0], [1], [0, 0, 1, 1], [], []>} : vector<17x17xf32>, vector<17x16xf32>, vector<17x16xf32> -> vector<17x16xf32>
    %c0_133 = arith.constant 0 : index
    %c16_134 = arith.constant 16 : index
    %264 = vector.load %arg20[%c0_133, %c16_134] : memref<17x64xf32, #tpu.memory_space<vmem>>, vector<17x16xf32>
    tpu.vector_store %arg20[%c0_133, %c16_134], %263 {strides = array<i32>} : memref<17x64xf32, #tpu.memory_space<vmem>>, vector<17x16xf32>,
    %265 = vector.extract_strided_slice %227 {offsets = [0, 32], sizes = [17, 16], strides = [1, 1]} : vector<17x192xf32> to vector<17x16xf32>
    %266 = vector.extract_strided_slice %227 {offsets = [0, 96], sizes = [17, 16], strides = [1, 1]} : vector<17x192xf32> to vector<17x16xf32>
    %267 = vector.extract_strided_slice %227 {offsets = [0, 160], sizes = [17, 16], strides = [1, 1]} : vector<17x192xf32> to vector<17x16xf32>
    %cst_135 = arith.constant dense<0.000000e+00> : vector<17x17xf32>
    %268 = tpu.matmul %265, %266, %cst_135 {dimension_numbers = #tpu.dot_dimension_numbers<[1], [1], [0], [0], [0, 0, 1, 0], [], []>} : vector<17x16xf32>, vector<17x16xf32>, vector<17x17xf32> -> vector<17x17xf32>
    %cst_136 = arith.constant 2.500000e-01 : f32
    %269 = vector.broadcast %cst_136 : f32 to vector<17x17xf32>
    %270 = arith.mulf %268, %269 : vector<17x17xf32>
    %cst_137 = arith.constant dense<0xFF800000> : vector<17xf32>
    %271 = vector.multi_reduction <maximumf>, %270, %cst_137 [1] : vector<17x17xf32> to vector<17xf32>
    %272 = vector.shape_cast %271 : vector<17xf32> to vector<17x1xf32>
    %273 = vector.broadcast %272 : vector<17x1xf32> to vector<17x17xf32>
    %274 = arith.subf %270, %273 : vector<17x17xf32>
    %275 = math.exp %274 : vector<17x17xf32>
    %cst_138 = arith.constant dense<0.000000e+00> : vector<17xf32>
    %276 = vector.multi_reduction <add>, %275, %cst_138 [1] : vector<17x17xf32> to vector<17xf32>
    %277 = vector.shape_cast %276 : vector<17xf32> to vector<17x1xf32>
    %278 = vector.broadcast %277 : vector<17x1xf32> to vector<17x17xf32>
    %279 = arith.divf %275, %278 : vector<17x17xf32>
    %280 = arith.addf %262, %279 : vector<17x17xf32>
    %cst_139 = arith.constant dense<0.000000e+00> : vector<17x16xf32>
    %281 = tpu.matmul %279, %267, %cst_139 {dimension_numbers = #tpu.dot_dimension_numbers<[1], [0], [0], [1], [0, 0, 1, 1], [], []>} : vector<17x17xf32>, vector<17x16xf32>, vector<17x16xf32> -> vector<17x16xf32>
    %c0_140 = arith.constant 0 : index
    %c32_141 = arith.constant 32 : index
    %282 = vector.load %arg20[%c0_140, %c32_141] : memref<17x64xf32, #tpu.memory_space<vmem>>, vector<17x16xf32>
    tpu.vector_store %arg20[%c0_140, %c32_141], %281 {strides = array<i32>} : memref<17x64xf32, #tpu.memory_space<vmem>>, vector<17x16xf32>,
    %283 = vector.extract_strided_slice %227 {offsets = [0, 48], sizes = [17, 16], strides = [1, 1]} : vector<17x192xf32> to vector<17x16xf32>
    %284 = vector.extract_strided_slice %227 {offsets = [0, 112], sizes = [17, 16], strides = [1, 1]} : vector<17x192xf32> to vector<17x16xf32>
    %285 = vector.extract_strided_slice %227 {offsets = [0, 176], sizes = [17, 16], strides = [1, 1]} : vector<17x192xf32> to vector<17x16xf32>
    %cst_142 = arith.constant dense<0.000000e+00> : vector<17x17xf32>
    %286 = tpu.matmul %283, %284, %cst_142 {dimension_numbers = #tpu.dot_dimension_numbers<[1], [1], [0], [0], [0, 0, 1, 0], [], []>} : vector<17x16xf32>, vector<17x16xf32>, vector<17x17xf32> -> vector<17x17xf32>
    %cst_143 = arith.constant 2.500000e-01 : f32
    %287 = vector.broadcast %cst_143 : f32 to vector<17x17xf32>
    %288 = arith.mulf %286, %287 : vector<17x17xf32>
    %cst_144 = arith.constant dense<0xFF800000> : vector<17xf32>
    %289 = vector.multi_reduction <maximumf>, %288, %cst_144 [1] : vector<17x17xf32> to vector<17xf32>
    %290 = vector.shape_cast %289 : vector<17xf32> to vector<17x1xf32>
    %291 = vector.broadcast %290 : vector<17x1xf32> to vector<17x17xf32>
    %292 = arith.subf %288, %291 : vector<17x17xf32>
    %293 = math.exp %292 : vector<17x17xf32>
    %cst_145 = arith.constant dense<0.000000e+00> : vector<17xf32>
    %294 = vector.multi_reduction <add>, %293, %cst_145 [1] : vector<17x17xf32> to vector<17xf32>
    %295 = vector.shape_cast %294 : vector<17xf32> to vector<17x1xf32>
    %296 = vector.broadcast %295 : vector<17x1xf32> to vector<17x17xf32>
    %297 = arith.divf %293, %296 : vector<17x17xf32>
    %298 = arith.addf %280, %297 : vector<17x17xf32>
    %cst_146 = arith.constant dense<0.000000e+00> : vector<17x16xf32>
    %299 = tpu.matmul %297, %285, %cst_146 {dimension_numbers = #tpu.dot_dimension_numbers<[1], [0], [0], [1], [0, 0, 1, 1], [], []>} : vector<17x17xf32>, vector<17x16xf32>, vector<17x16xf32> -> vector<17x16xf32>
    %c0_147 = arith.constant 0 : index
    %c48_148 = arith.constant 48 : index
    %300 = vector.load %arg20[%c0_147, %c48_148] : memref<17x64xf32, #tpu.memory_space<vmem>>, vector<17x16xf32>
    tpu.vector_store %arg20[%c0_147, %c48_148], %299 {strides = array<i32>} : memref<17x64xf32, #tpu.memory_space<vmem>>, vector<17x16xf32>,
    %cst_149 = arith.constant 2.500000e-01 : f32
    %301 = vector.broadcast %cst_149 : f32 to vector<17x17xf32>
    %302 = arith.mulf %298, %301 : vector<17x17xf32>
    %c0_150 = arith.constant 0 : index
    %c1_151 = arith.constant 1 : index
    %c0_152 = arith.constant 0 : index
    %c0_153 = arith.constant 0 : index
    %303 = vector.load %arg18[%c0_150, %c1_151, %c0_152, %c0_153] : memref<1x2x17x17xf32, #tpu.memory_space<vmem>>, vector<1x1x17x17xf32>
    %304 = vector.shape_cast %303 : vector<1x1x17x17xf32> to vector<17x17xf32>
    %305 = vector.shape_cast %302 : vector<17x17xf32> to vector<1x1x17x17xf32>
    tpu.vector_store %arg18[%c0_150, %c1_151, %c0_152, %c0_153], %305 {strides = array<i32>} : memref<1x2x17x17xf32, #tpu.memory_space<vmem>>, vector<1x1x17x17xf32>,
    return
  }
  func.func @transform_0(%arg0: i32) -> (i32, i32, i32) {
    %c0_i32 = arith.constant 0 : i32
    %c0_i32_0 = arith.constant 0 : i32
    %c0_i32_1 = arith.constant 0 : i32
    return %arg0, %c0_i32, %c0_i32_0 : i32, i32, i32
  }
  func.func @transform_1(%arg0: i32) -> (i32, i32) {
    %c0_i32 = arith.constant 0 : i32
    %c0_i32_0 = arith.constant 0 : i32
    %c0_i32_1 = arith.constant 0 : i32
    return %c0_i32, %c0_i32_0 : i32, i32
  }
  func.func @transform_2(%arg0: i32) -> (i32, i32) {
    %c0_i32 = arith.constant 0 : i32
    %c0_i32_0 = arith.constant 0 : i32
    %c0_i32_1 = arith.constant 0 : i32
    return %c0_i32, %c0_i32_0 : i32, i32
  }
  func.func @transform_3(%arg0: i32) -> (i32, i32) {
    %c0_i32 = arith.constant 0 : i32
    %c0_i32_0 = arith.constant 0 : i32
    %c0_i32_1 = arith.constant 0 : i32
    return %c0_i32, %c0_i32_0 : i32, i32
  }
  func.func @transform_4(%arg0: i32) -> (i32, i32) {
    %c0_i32 = arith.constant 0 : i32
    %c0_i32_0 = arith.constant 0 : i32
    %c0_i32_1 = arith.constant 0 : i32
    return %c0_i32, %c0_i32_0 : i32, i32
  }
  func.func @transform_5(%arg0: i32) -> (i32, i32, i32) {
    %c0_i32 = arith.constant 0 : i32
    %c0_i32_0 = arith.constant 0 : i32
    %c0_i32_1 = arith.constant 0 : i32
    %c0_i32_2 = arith.constant 0 : i32
    return %c0_i32, %c0_i32_0, %c0_i32_1 : i32, i32, i32
  }
  func.func @transform_6(%arg0: i32) -> (i32, i32, i32) {
    %c0_i32 = arith.constant 0 : i32
    %c0_i32_0 = arith.constant 0 : i32
    %c0_i32_1 = arith.constant 0 : i32
    %c0_i32_2 = arith.constant 0 : i32
    return %c0_i32, %c0_i32_0, %c0_i32_1 : i32, i32, i32
  }
  func.func @transform_7(%arg0: i32) -> (i32, i32, i32) {
    %c0_i32 = arith.constant 0 : i32
    %c0_i32_0 = arith.constant 0 : i32
    %c0_i32_1 = arith.constant 0 : i32
    %c0_i32_2 = arith.constant 0 : i32
    return %c0_i32, %c0_i32_0, %c0_i32_1 : i32, i32, i32
  }
  func.func @transform_8(%arg0: i32) -> (i32, i32, i32) {
    %c0_i32 = arith.constant 0 : i32
    %c0_i32_0 = arith.constant 0 : i32
    %c0_i32_1 = arith.constant 0 : i32
    %c0_i32_2 = arith.constant 0 : i32
    return %c0_i32, %c0_i32_0, %c0_i32_1 : i32, i32, i32
  }
  func.func @transform_9(%arg0: i32) -> (i32, i32, i32) {
    %c0_i32 = arith.constant 0 : i32
    %c0_i32_0 = arith.constant 0 : i32
    %c0_i32_1 = arith.constant 0 : i32
    %c0_i32_2 = arith.constant 0 : i32
    return %c0_i32, %c0_i32_0, %c0_i32_1 : i32, i32, i32
  }
  func.func @transform_10(%arg0: i32) -> (i32, i32, i32) {
    %c0_i32 = arith.constant 0 : i32
    %c0_i32_0 = arith.constant 0 : i32
    %c0_i32_1 = arith.constant 0 : i32
    %c0_i32_2 = arith.constant 0 : i32
    return %c0_i32, %c0_i32_0, %c0_i32_1 : i32, i32, i32
  }
  func.func @transform_11(%arg0: i32) -> (i32, i32, i32) {
    %c0_i32 = arith.constant 0 : i32
    %c0_i32_0 = arith.constant 0 : i32
    %c0_i32_1 = arith.constant 0 : i32
    %c0_i32_2 = arith.constant 0 : i32
    return %c0_i32, %c0_i32_0, %c0_i32_1 : i32, i32, i32
  }
  func.func @transform_12(%arg0: i32) -> (i32, i32, i32) {
    %c0_i32 = arith.constant 0 : i32
    %c0_i32_0 = arith.constant 0 : i32
    %c0_i32_1 = arith.constant 0 : i32
    %c0_i32_2 = arith.constant 0 : i32
    return %c0_i32, %c0_i32_0, %c0_i32_1 : i32, i32, i32
  }
  func.func @transform_13(%arg0: i32) -> (i32, i32, i32) {
    %c0_i32 = arith.constant 0 : i32
    %c0_i32_0 = arith.constant 0 : i32
    %c0_i32_1 = arith.constant 0 : i32
    %c0_i32_2 = arith.constant 0 : i32
    return %c0_i32, %c0_i32_0, %c0_i32_1 : i32, i32, i32
  }
  func.func @transform_14(%arg0: i32) -> (i32, i32, i32) {
    %c0_i32 = arith.constant 0 : i32
    %c0_i32_0 = arith.constant 0 : i32
    %c0_i32_1 = arith.constant 0 : i32
    %c0_i32_2 = arith.constant 0 : i32
    return %c0_i32, %c0_i32_0, %c0_i32_1 : i32, i32, i32
  }
  func.func @transform_15(%arg0: i32) -> (i32, i32, i32) {
    %c0_i32 = arith.constant 0 : i32
    %c0_i32_0 = arith.constant 0 : i32
    %c0_i32_1 = arith.constant 0 : i32
    %c0_i32_2 = arith.constant 0 : i32
    return %c0_i32, %c0_i32_0, %c0_i32_1 : i32, i32, i32
  }
  func.func @transform_16(%arg0: i32) -> (i32, i32, i32) {
    %c0_i32 = arith.constant 0 : i32
    %c0_i32_0 = arith.constant 0 : i32
    %c0_i32_1 = arith.constant 0 : i32
    %c0_i32_2 = arith.constant 0 : i32
    return %c0_i32, %c0_i32_0, %c0_i32_1 : i32, i32, i32
  }
  func.func @transform_17(%arg0: i32) -> (i32, i32, i32, i32) {
    %c0_i32 = arith.constant 0 : i32
    %c0_i32_0 = arith.constant 0 : i32
    %c0_i32_1 = arith.constant 0 : i32
    %c0_i32_2 = arith.constant 0 : i32
    return %arg0, %c0_i32, %c0_i32_0, %c0_i32_1 : i32, i32, i32, i32
  }
}

</mosaic_0001>

<bundles_post_ra>
// kernel: new_model_forward.3
= control target key start
LH: loop header
LB: loop body
LE: loop exit
PB: predicated region body
PF: predicated region fallthrough
CT: control target
= control target key end

     0   :  { %8 = vsyncpa [#allocation3], 0  ;;  %s3280_s0 = inlined_call_operand.hbm [shape: f32[2,3,32,32], index: 0, kind: input, shape index: {}]   ;;  %s3281_s1 = inlined_call_operand.hbm [shape: f32[32,224], index: 1, kind: input, shape index: {}]   ;;  %s3282_s2 = inlined_call_operand.hbm [shape: f32[224,32], index: 2, kind: input, shape index: {}]   ;;  %s3283_s3 = inlined_call_operand.vmem [shape: bf16[2,3,224,224], index: 3, kind: output, shape index: {}]  }
   0x1   :  { %10 = vsyncpa [#allocation3 + $0x1], 0 }
   0x2   :  { %11 = vsyncpa [#allocation5], 0  ;;  %s2495_s12 = smov 0   ;;  %s2497_s13 = smov 0  }
   0x3   :  { %s2499_s14 = smov 0   ;;  %s2501_s15 = smov 0  }
   0x4 LB: > { %s2514_s16 = sadd.s32 4294967295, %s2465_s15   ;;  %p37_p0 = scmp.ne.s32.totalorder %s2457_s13, %s2453_s12  ;;  %s2465_s15 = sphi %s2501_s15, %s3300_s15   ;;  %s2461_s14 = sphi %s2499_s14, %s3299_s14   ;;  %s2457_s13 = sphi %s2497_s13, %s3298_s13   ;;  %s2453_s12 = sphi %s2495_s12, %s3297_s12  }
   0x5   : > { %p3284_p1 = scmp.eq.s32.totalorder %s2514_s16, 0  ;;  %p1905_p2 = scmp.ge.s32.totalorder %s2465_s15, 1 }
   0x6   : > { %p116_p3 = scmp.lt.s32.totalorder %s2465_s15, 3  ;;  %s2467_s19 = smov [#allocation4]  }
   0x7   : > { %p2522_p4 = por %p3284_p1, %p37_p0  ;;  %s128_s20 = sshll.u32 %s2467_s19, 4  ;;  %s129_s20 = int_to_ptr.vmem [resolvable:$true] %s128_s20 }
   0x8   : > { %p2526_p5 = pnand %p1905_p2, %p116_p3  ;;  %s2468_s22 = smov [#allocation6]  }
   0x9   : > { %s3287_s17 = scalar_select %p2522_p4, 1, 0 }
   0xa   : > { %s3288_s18 = scalar_select %p2526_p5, 1, 0 }
   0xb   : > { %p2286_p6 = pneg %p2526_p5  ;;  %s141_s23 = sshll.u32 %s2468_s22, 4  ;;  %s2538_s23 = int_to_ptr.vmem [resolvable:$true] %s141_s23 }
   0xc   : > { %s2341_s26 = scalar_lea.hbm %s3281_s1, 1024 }
   0xd   : > { %p2534_p7 = pnand %p2286_p6, %p3284_p1  ;;  %p2342_p8 = scmp.ne.s32.totalorder %s3281_s1, %s2341_s26 }
   0xe   : > { %p2348_p12 = scmp.lt.u32.totalorder %s2341_s26, %s3281_s1 }
   0xf   : > { %p2343_p9 = pneg %p2534_p7 }
  0x11   : > { %p2344_p10 = pnand %p2343_p9, %p2342_p8 }
  0x13   : > { %p2345_p11 = pneg %p2344_p10 }
  0x15   : > { %p2350_p13 = pnand %p2348_p12, %p2345_p11 }
  0x17   : > { %2353 = shalt.err (!%p2350_p13)
}
  0x18   : > { %s2354_s4 = scalar_lea.vmem %s129_s20, 1024  ;;  %p2362_p6 = scmp.lt.s32.totalorder %s129_s20, %s129_s20 }
  0x19   : > { %p2355_p0 = scmp.ne.s32.totalorder %s129_s20, %s2354_s4  ;;  %p2363_p1 = scmp.lt.s32.totalorder %s2354_s4, %s2354_s4 }
  0x1b   : > { %p2357_p2 = pnand %p2355_p0, %p2343_p9  ;;  %p2364_p4 = por %p2363_p1, %p2362_p6 }
  0x1d   : > { %p2358_p3 = pneg %p2357_p2 }
  0x1f   : > { %p2365_p5 = pnand %p2364_p4, %p2358_p3 }
  0x21   : > { %2368 = shalt.err (!%p2365_p5)
}
  0x22   : > { %s2469_s5 = smov 256   ;;  %s2470_s6 = smov 16  }
  0x23   : > { %2289 = dma.hbm_to_vmem [thread:$0]  (!%p2534_p7), %s3281_s1, 1024, %s129_s20, [#allocation5], %s2469_s5, %s2469_s5, %s2470_s6  }
  0x24   : > { %s2369_s11 = scalar_lea.hbm %s3282_s2, 3584 }
  0x25   : > { %p2370_p8 = scmp.ne.s32.totalorder %s3282_s2, %s2369_s11  ;;  %p2376_p5 = scmp.lt.u32.totalorder %s2369_s11, %s3282_s2 }
  0x27   : > { %p2372_p1 = pnand %p2370_p8, %p2343_p9 }
  0x29   : > { %p2373_p4 = pneg %p2372_p1 }
  0x2b   : > { %p2378_p10 = pnand %p2376_p5, %p2373_p4 }
  0x2d   : > { %2381 = shalt.err (!%p2378_p10)
}
  0x2e   : > { %s2382_s20 = scalar_lea.vmem %s2538_s23, 3584  ;;  %p2390_p0 = scmp.lt.s32.totalorder %s2538_s23, %s2538_s23 }
  0x2f   : > { %p2383_p11 = scmp.ne.s32.totalorder %s2538_s23, %s2382_s20  ;;  %p2391_p2 = scmp.lt.s32.totalorder %s2382_s20, %s2382_s20 }
  0x31   : > { %p2385_p12 = pnand %p2383_p11, %p2343_p9  ;;  %p2392_p3 = por %p2391_p2, %p2390_p0 }
  0x33   : > { %p2386_p13 = pneg %p2385_p12 }
  0x35   : > { %p2393_p6 = pnand %p2392_p3, %p2386_p13 }
  0x37   : > { %2396 = shalt.err (!%p2393_p6)
}
  0x38   : > { %s2471_s25 = smov 128   ;;  %s2472_s26 = smov 8  }
  0x39   : > { %2292 = dma.hbm_to_vmem [thread:$0]  (!%p2534_p7), %s3282_s2, 3584, %s2538_s23, [#allocation5], %s2471_s25, %s2471_s25, %s2472_s26  }
  0x3a   : > { %s2591_s29 = sadd.s32 1, %s2465_s15   ;;  %s24_s4 = sadd.s32 1, %s2461_s14 }
  0x3b   : > { %s21_s30 = ssub.s32 %s2465_s15, %s2591_s29  ;;  %p31_p8 = scmp.ne.s32.totalorder %s2461_s14, %s2457_s13 }
  0x3c   : > { %p22_p9 = scmp.eq.s32.totalorder %s21_s30, 0  ;;  %p32_p1 = scmp.eq.s32.totalorder %s2465_s15, 0 }
  0x3d   : > { %p2299_p5 = scmp.lt.s32.totalorder %s2465_s15, 2  ;;  %s155_s21 = sand.u32 1, %s2461_s14  }
  0x3e   : > { %s2600_s5 = scalar_select %p22_p9, %s2461_s14, %s24_s4  }
  0x3f   : > { %p33_p4 = por %p32_p1, %p31_p8  ;;  %s2273_s6 = smul.u32 1536, %s2465_s15 }
  0x40   : > { %s2272_s7 = smul.u32 96, %s155_s21  ;;  %s2616_s15 = scalar_lea.sflag [#allocation3], %s155_s21 }
  0x41   : > { %p2605_p10 = pnand %p2299_p5, %p33_p4  ;;  %s2612_s10 = scalar_lea.hbm %s3280_s0, %s2273_s6 }
  0x42   : > { %s159_s11 = scalar_lea.vmem [#allocation2], %s2272_s7  ;;  %s2397_s19 = scalar_lea.hbm %s2612_s10, 1536 }
  0x43   : > { %s166_s12 = sshll.u32 %s159_s11, 4  ;;  %p2398_p7 = scmp.ne.s32.totalorder %s2612_s10, %s2397_s19  ;;  %s2614_s12 = int_to_ptr.vmem [resolvable:$true] %s166_s12 }
  0x44   : > { %p2399_p11 = pneg %p2605_p10  ;;  %s2402_s20 = scalar_lea.hbm %s3280_s0, 3072 }
  0x45   : > { %p2403_p0 = scmp.lt.u32.totalorder %s2612_s10, %s3280_s0  ;;  %p2404_p2 = scmp.lt.u32.totalorder %s2402_s20, %s2397_s19 }
  0x46   : > { %p2400_p12 = pnand %p2399_p11, %p2398_p7  ;;  %p2406_p6 = scmp.lt.u32.totalorder %s2397_s19, %s2612_s10 }
  0x47   : > { %p2405_p3 = por %p2404_p2, %p2403_p0 }
  0x48   : > { %p2401_p13 = pneg %p2400_p12 }
  0x49   : > { %p2407_p9 = por %p2406_p6, %p2405_p3 }
  0x4b   : > { %p2408_p8 = pnand %p2407_p9, %p2401_p13 }
  0x4d   : > { %2411 = shalt.err (!%p2408_p8)
}
  0x4e   : > { %s2412_s30 = scalar_lea.vmem %s2614_s12, 1536  ;;  %s2473_s4 = smov [#allocation2]  }
  0x4f   : > { %p2413_p1 = scmp.ne.s32.totalorder %s2614_s12, %s2412_s30  ;;  %s2417_s21 = sshll.u32 %s2473_s4, 4  ;;  %s2418_s21 = int_to_ptr.vmem [resolvable:$false] %s2417_s21 }
  0x50   : > { %s2419_s6 = scalar_lea.vmem %s2418_s21, 3072  ;;  %p2420_p7 = scmp.lt.s32.totalorder %s2614_s12, %s2418_s21 }
  0x51   : > { %p2415_p4 = pnand %p2413_p1, %p2399_p11  ;;  %p2421_p12 = scmp.lt.s32.totalorder %s2419_s6, %s2412_s30 }
  0x53   : > { %p2416_p5 = pneg %p2415_p4  ;;  %p2422_p0 = por %p2421_p12, %p2420_p7 }
  0x55   : > { %p2423_p2 = pnand %p2422_p0, %p2416_p5 }
  0x57   : > { %2426 = shalt.err (!%p2423_p2)
}
  0x58   : > { %2296 = dma.hbm_to_vmem [thread:$0]  (!%p2605_p10), %s2612_s10, 1536, %s2614_s12, %s2616_s15, %s2471_s25, %s2471_s25, %s2472_s26  }
  0x59   : > { %p3291_p11 = scmp.ne.s32.totalorder %s3288_s18, 0 }
  0x5a   : > { %s180_s7 = sand.u32 (!%p3291_p11), 1, %s2457_s13   ;;  %p3292_p13 = scmp.ne.s32.totalorder (!%p3291_p11), %s3287_s17, 0 }
  0x5b   : > { %178 = sbr.rel (%p3291_p11) target bundleno = 748 (0x2ec), region = 32  ;;  %s181_s9 = scalar_lea.sflag (!%p3291_p11), [#allocation3], %s180_s7 }
  0x5c   : > { %s2274_s23 = smul.u32 (!%p3291_p11), 96, %s180_s7 }
  0x5e   : > { %s2650_s11 = scalar_lea.vmem (!%p3291_p11), [#allocation2], %s2274_s23 }
  0x62   : > { %2444 = dma.done.wait (%p3292_p13), %s181_s9, 1536  }
  0x63   : > { %2446 = vsyncadd (%p3292_p13), %s181_s9, 4294965760  ;;  %p3293_p3 = scmp.eq.s32.totalorder %s2514_s16, 0 }
  0x65   : > { %2448 = dma.done.wait (%p3293_p3), [#allocation5], 4608   ;;  %p3294_p10 = pmov %p3293_p3 }
  0x66   : > { %v2474_v0 = vmov 0.0   ;;  %v233_v1 = vld [vmem:[#allocation4 + $0x8] sm:$0xff]  ;;  %v235_v2 = vld [vmem:[#allocation4 + $0x18] sm:$0xff]  ;;  %v232_v3 = vld [vmem:[#allocation4] sm:$0xff]  ;;  %vm240_vm0 = vcmask 261120   ;;  %p215_p6 = scmp.lt.s32.totalorder %s2514_s16, 1 }
  0x67   : > { %2450 = vsyncadd (%p3294_p10), [#allocation5], 4294962688  ;;  %341 = vmatprep.mubr.f32.mxu0 %v2474_v0  ;;  %638 = vmatprep.mubr.f32.mxu1 %v2474_v0  ;;  %v2236_v4 = vpack.c.bf16 %v235_v2, %v233_v1  ;;  %v234_v5 = vld [vmem:[#allocation4 + $0x10] sm:$0xff]  ;;  %v237_v6 = vld [vmem:[#allocation4 + $0x28] sm:$0xff]  ;;  %vm927_vm1 = vcmask 1043456   ;;  %vm928_vm2 = vcmask 785412  }
  0x68   : > { %v239_v7 = vld [vmem:[#allocation4 + $0x38] sm:$0xff]  ;;  %v2238_v8 = vpack.c.bf16 %v234_v5, %v232_v3  ;;  %v236_v10 = vld [vmem:[#allocation4 + $0x20] sm:$0xff]  ;;  %v238_v11 = vld [vmem:[#allocation4 + $0x30] sm:$0xff]  ;;  %s3302_s16 = smov (!%p215_p6, %s2514_s16), 1 }
  0x69   : > { %v2240_v9 = vpack.c.bf16 %v239_v7, %v237_v6  ;;  %2237 = vmatprep.subr.bf16.mxu0 %v2236_v4  ;;  %v2242_v12 = vpack.c.bf16 %v238_v11, %v236_v10  ;;  %v220_v13 = vld [vmem:[%s2650_s11] sm:$0xff]  ;;  %v221_v14 = vld [vmem:[%s2650_s11 + $0x8] sm:$0xff]  ;;  %v222_v15 = vld [vmem:[%s2650_s11 + $0x10] sm:$0xff]  ;;  %s2275_s17 = smul.u32 672, %s3302_s16 }
  0x6a   : > { %2239 = vmatpush1.bf16.msra.mxu0 %v2238_v8  ;;  %v223_v16 = vld [vmem:[%s2650_s11 + $0x18] sm:$0xff]  ;;  %v224_v17 = vld [vmem:[%s2650_s11 + $0x20] sm:$0xff]  ;;  %v225_v18 = vld [vmem:[%s2650_s11 + $0x28] sm:$0xff] }
  0x6b   : > { %2241 = vmatprep.subr.bf16.mxu0 %v2240_v9  ;;  %v226_v19 = vld [vmem:[%s2650_s11 + $0x30] sm:$0xff]  ;;  %v227_v20 = vld [vmem:[%s2650_s11 + $0x38] sm:$0xff]  ;;  %v228_v21 = vld [vmem:[%s2650_s11 + $0x40] sm:$0xff]  ;;  %s3009_s26 = scalar_lea.vmem %s3283_s3, %s2275_s17 }
  0x6c   : > { %v229_v22 = vld [vmem:[%s2650_s11 + $0x48] sm:$0xff]  ;;  %v230_v23 = vld [vmem:[%s2650_s11 + $0x50] sm:$0xff]  ;;  %v231_v24 = vld [vmem:[%s2650_s11 + $0x58] sm:$0xff] }
  0x6d   : > { %v2698_v39 = vld [vmem:[#allocation6] sm:$0xff]  ;;  %v2707_v44 = vld [vmem:[#allocation6 + $0x48] sm:$0xff]  ;;  %v2715_v49 = vld [vmem:[#allocation6 + $0x50] sm:$0xff] }
  0x6e   : > { %2243 = vmatpush1.bf16.msra.mxu0 %v2242_v12  ;;  %v2700_v40 = vld [vmem:[#allocation6 + $0x40] sm:$0xff]  ;;  %v2710_v46 = vld [vmem:[#allocation6 + $0x8] sm:$0xff]  ;;  %v2720_v50 = vld [vmem:[#allocation6 + $0x10] sm:$0xff] }
  0x6f   : > { %v2725_v54 = vld [vmem:[#allocation6 + $0x58] sm:$0xff]  ;;  %v2735_v59 = vld [vmem:[#allocation6 + $0x60] sm:$0xff]  ;;  %v2745_v1 = vld [vmem:[#allocation6 + $0x68] sm:$0xff] }
  0x70   : > { %v2730_v56 = vld [vmem:[#allocation6 + $0x18] sm:$0xff]  ;;  %v2740_v60 = vld [vmem:[#allocation6 + $0x20] sm:$0xff]  ;;  %v2750_v3 = vld [vmem:[#allocation6 + $0x28] sm:$0xff] }
  0x71   : > { %1914 = vmatmul.mubr.msk.f32.vlgmr.msra.gmra.mrb[0].mxu0 %vm240_vm0, %v220_v13  ;;  %v2755_v5 = vld [vmem:[#allocation6 + $0x70] sm:$0xff]  ;;  %v2765_v9 = vld [vmem:[#allocation6 + $0x78] sm:$0xff]  ;;  %vm3011_vm3 = vmor %vm928_vm2, %vm927_vm1 }
  0x72   : > { %347 = vmatprep.mubr.f32.mxu0 %v2474_v0  ;;  %v2760_v7 = vld [vmem:[#allocation6 + $0x30] sm:$0xff]  ;;  %v2770_v13 = vld [vmem:[#allocation6 + $0x38] sm:$0xff] }
  0x75   : > { %1915 = vmatmul.mubr.msk.f32.gmra.mrb[2].mxu0 %vm240_vm0, %v221_v14  ;;  %v2775_v14 = vld [vmem:[#allocation6 + $0x80] sm:$0xff] }
  0x76   : > { %353 = vmatprep.mubr.f32.mxu0 %v2474_v0 }
  0x79   : > { %1916 = vmatmul.mubr.msk.f32.gmra.mrb[4].mxu0 %vm240_vm0, %v222_v15  ;;  %v2783_v15 = vld [vmem:[#allocation6 + $0x88] sm:$0xff] }
  0x7a   : > { %359 = vmatprep.mubr.f32.mxu0 %v2474_v0 }
  0x7d   : > { %1917 = vmatmul.mubr.msk.f32.gmra.mrb[6].mxu0 %vm240_vm0, %v223_v16  ;;  %v2791_v16 = vld [vmem:[#allocation6 + $0x90] sm:$0xff] }
  0x7e   : > { %365 = vmatprep.mubr.f32.mxu0 %v2474_v0 }
  0x81   : > { %1918 = vmatmul.mubr.msk.f32.gmra.mrb[8].mxu0 %vm240_vm0, %v224_v17  ;;  %v2799_v17 = vld [vmem:[#allocation6 + $0x98] sm:$0xff] }
  0x82   : > { %371 = vmatprep.mubr.f32.mxu0 %v2474_v0 }
  0x85   : > { %1919 = vmatmul.mubr.msk.f32.gmra.mrb[10].mxu0 %vm240_vm0, %v225_v18  ;;  %v2807_v18 = vld [vmem:[#allocation6 + $0xa0] sm:$0xff] }
  0x86   : > { %377 = vmatprep.mubr.f32.mxu0 %v2474_v0 }
  0x89   : > { %1920 = vmatmul.mubr.msk.f32.gmra.mrb[12].mxu0 %vm240_vm0, %v226_v19  ;;  %v2815_v19 = vld [vmem:[#allocation6 + $0xa8] sm:$0xff] }
  0x8a   : > { %383 = vmatprep.mubr.f32.mxu0 %v2474_v0 }
  0x8d   : > { %1921 = vmatmul.mubr.msk.f32.gmra.mrb[14].mxu0 %vm240_vm0, %v227_v20  ;;  %v2823_v20 = vld [vmem:[#allocation6 + $0xb0] sm:$0xff] }
  0x8e   : > { %389 = vmatprep.mubr.f32.mxu0 %v2474_v0 }
  0x91   : > { %1922 = vmatmul.mubr.msk.f32.gmra.mrb[16].mxu0 %vm240_vm0, %v228_v21  ;;  %v2831_v21 = vld [vmem:[#allocation6 + $0xb8] sm:$0xff] }
  0x92   : > { %395 = vmatprep.mubr.f32.mxu0 %v2474_v0 }
  0x95   : > { %1923 = vmatmul.mubr.msk.f32.gmra.mrb[18].mxu0 %vm240_vm0, %v229_v22  ;;  %v2839_v22 = vld [vmem:[#allocation6 + $0xc0] sm:$0xff] }
  0x96   : > { %401 = vmatprep.mubr.f32.mxu0 %v2474_v0 }
  0x99   : > { %1924 = vmatmul.mubr.msk.f32.gmra.mrb[20].mxu0 %vm240_vm0, %v230_v23  ;;  %v2847_v23 = vld [vmem:[#allocation6 + $0xc8] sm:$0xff] }
  0x9a   : > { %407 = vmatprep.mubr.f32.mxu0 %v2474_v0 }
  0x9d   : > { %1925 = vmatmul.mubr.msk.f32.gmra.mrb[22].mxu0 %vm240_vm0, %v231_v24  ;;  %v2855_v24 = vld [vmem:[#allocation6 + $0xd0] sm:$0xff] }
  0x9e   : > { %590 = vmatprep.mubr.f32.mxu0 %v2474_v0 }
 0x144   : > { %v343_v25 = vpop.f32.mrb[0].mxu0 }
 0x145   : > { %v345_v26 = vpop.f32.mrb[1].mxu0 }
 0x148   : > { %v349_v27 = vpop.f32.mrb[2].mxu0 }
 0x149   : > { %v2246_v28 = vpack.c.bf16 %v349_v27, %v343_v25  ;;  %v351_v29 = vpop.f32.mrb[3].mxu0  ;;  %v2863_v25 = vld [vmem:[#allocation6 + $0xd8] sm:$0xff] }
 0x14a   : > { %v2244_v30 = vpack.c.bf16 %v351_v29, %v345_v26 }
 0x14c   : > { %v355_v31 = vpop.f32.mrb[4].mxu0  ;;  %2245 = vmatprep.subr.bf16.mxu0 %v2244_v30  ;;  %2268 = vmatprep.subr.bf16.mxu1 %v2244_v30 }
 0x14d   : > { %v357_v32 = vpop.f32.mrb[5].mxu0  ;;  %2247 = vmatpush1.bf16.msra.mxu0 %v2246_v28  ;;  %2270 = vmatpush1.bf16.msra.mxu1 %v2246_v28 }
 0x150   : > { %v361_v33 = vpop.f32.mrb[6].mxu0 }
 0x151   : > { %v2250_v34 = vpack.c.bf16 %v361_v33, %v355_v31  ;;  %v363_v35 = vpop.f32.mrb[7].mxu0 }
 0x152   : > { %v2248_v36 = vpack.c.bf16 %v363_v35, %v357_v32 }
 0x154   : > { %v367_v37 = vpop.f32.mrb[8].mxu0  ;;  %2249 = vmatprep.subr.bf16.mxu0 %v2248_v36  ;;  %2269 = vmatprep.subr.bf16.mxu1 %v2248_v36 }
 0x155   : > { %v369_v38 = vpop.f32.mrb[9].mxu0  ;;  %2251 = vmatpush1.bf16.msra.mxu0 %v2250_v34  ;;  %2271 = vmatpush1.bf16.msra.mxu1 %v2250_v34 }
 0x158   : > { %v373_v41 = vpop.f32.mrb[10].mxu0  ;;  %1926 = vmatmul.mubr.msk.f32.vlgmr.msra.gmra.mrb[24].mxu0 %vm240_vm0, %v2698_v39  ;;  %1934 = vmatmul.mubr.msk.f32.vlgmr.msra.gmra.mrb[0].mxu1 %vm240_vm0, %v2700_v40 }
 0x159   : > { %v2254_v42 = vpack.c.bf16 %v373_v41, %v367_v37  ;;  %v375_v43 = vpop.f32.mrb[11].mxu0  ;;  %644 = vmatprep.mubr.f32.mxu1 %v2474_v0  ;;  %596 = vmatprep.mubr.f32.mxu0 %v2474_v0 }
 0x15a   : > { %v2252_v45 = vpack.c.bf16 %v375_v43, %v369_v38 }
 0x15c   : > { %v379_v47 = vpop.f32.mrb[12].mxu0  ;;  %2253 = vmatprep.subr.bf16.mxu0 %v2252_v45  ;;  %1935 = vmatmul.mubr.msk.f32.gmra.mrb[2].mxu1 %vm240_vm0, %v2707_v44 }
 0x15d   : > { %v381_v48 = vpop.f32.mrb[13].mxu0  ;;  %2255 = vmatpush1.bf16.msra.mxu0 %v2254_v42  ;;  %650 = vmatprep.mubr.f32.mxu1 %v2474_v0 }
 0x15e   : > { %1927 = vmatmul.mubr.msk.f32.gmra.mrb[26].mxu0 %vm240_vm0, %v2710_v46 }
 0x15f   : > { %602 = vmatprep.mubr.f32.mxu0 %v2474_v0 }
 0x160   : > { %v385_v51 = vpop.f32.mrb[14].mxu0  ;;  %1936 = vmatmul.mubr.msk.f32.gmra.mrb[4].mxu1 %vm240_vm0, %v2715_v49 }
 0x161   : > { %v2258_v52 = vpack.c.bf16 %v385_v51, %v379_v47  ;;  %v387_v53 = vpop.f32.mrb[15].mxu0  ;;  %656 = vmatprep.mubr.f32.mxu1 %v2474_v0 }
 0x162   : > { %v2256_v55 = vpack.c.bf16 %v387_v53, %v381_v48  ;;  %1928 = vmatmul.mubr.msk.f32.gmra.mrb[28].mxu0 %vm240_vm0, %v2720_v50 }
 0x163   : > { %608 = vmatprep.mubr.f32.mxu0 %v2474_v0 }
 0x164   : > { %v391_v57 = vpop.f32.mrb[16].mxu0  ;;  %2257 = vmatprep.subr.bf16.mxu0 %v2256_v55  ;;  %1937 = vmatmul.mubr.msk.f32.gmra.mrb[6].mxu1 %vm240_vm0, %v2725_v54 }
 0x165   : > { %v393_v58 = vpop.f32.mrb[17].mxu0  ;;  %2259 = vmatpush1.bf16.msra.mxu0 %v2258_v52  ;;  %662 = vmatprep.mubr.f32.mxu1 %v2474_v0 }
 0x166   : > { %1929 = vmatmul.mubr.msk.f32.gmra.mrb[30].mxu0 %vm240_vm0, %v2730_v56 }
 0x167   : > { %614 = vmatprep.mubr.f32.mxu0 %v2474_v0 }
 0x168   : > { %v397_v61 = vpop.f32.mrb[18].mxu0  ;;  %1938 = vmatmul.mubr.msk.f32.gmra.mrb[8].mxu1 %vm240_vm0, %v2735_v59 }
 0x169   : > { %v2262_v62 = vpack.c.bf16 %v397_v61, %v391_v57  ;;  %v399_v63 = vpop.f32.mrb[19].mxu0  ;;  %668 = vmatprep.mubr.f32.mxu1 %v2474_v0 }
 0x16a   : > { %v2260_v2 = vpack.c.bf16 %v399_v63, %v393_v58  ;;  %1930 = vmatmul.mubr.msk.f32.gmra.mrb[32].mxu0 %vm240_vm0, %v2740_v60 }
 0x16b   : > { %620 = vmatprep.mubr.f32.mxu0 %v2474_v0 }
 0x16c   : > { %2261 = vmatprep.subr.bf16.mxu1 %v2260_v2  ;;  %1939 = vmatmul.mubr.msk.f32.gmra.mrb[10].mxu1 %vm240_vm0, %v2745_v1  ;;  %v403_v4 = vpop.f32.mrb[20].mxu0 }
 0x16d   : > { %2263 = vmatpush1.bf16.msra.mxu1 %v2262_v62  ;;  %674 = vmatprep.mubr.f32.mxu1 %v2474_v0  ;;  %v405_v6 = vpop.f32.mrb[21].mxu0 }
 0x16e   : > { %1931 = vmatmul.mubr.msk.f32.gmra.mrb[34].mxu0 %vm240_vm0, %v2750_v3 }
 0x16f   : > { %626 = vmatprep.mubr.f32.mxu0 %v2474_v0 }
 0x170   : > { %1940 = vmatmul.mubr.msk.f32.gmra.mrb[12].mxu1 %vm240_vm0, %v2755_v5  ;;  %v409_v8 = vpop.f32.mrb[22].mxu0 }
 0x171   : > { %680 = vmatprep.mubr.f32.mxu1 %v2474_v0  ;;  %v2266_v10 = vpack.c.bf16 %v409_v8, %v403_v4  ;;  %v411_v11 = vpop.f32.mrb[23].mxu0 }
 0x172   : > { %v2264_v12 = vpack.c.bf16 %v411_v11, %v405_v6  ;;  %1932 = vmatmul.mubr.msk.f32.gmra.mrb[36].mxu0 %vm240_vm0, %v2760_v7 }
 0x173   : > { %632 = vmatprep.mubr.f32.mxu0 %v2474_v0 }
 0x174   : > { %1941 = vmatmul.mubr.msk.f32.gmra.mrb[14].mxu1 %vm240_vm0, %v2765_v9  ;;  %2265 = vmatprep.subr.bf16.mxu1 %v2264_v12 }
 0x175   : > { %686 = vmatprep.mubr.f32.mxu1 %v2474_v0  ;;  %2267 = vmatpush1.bf16.msra.mxu1 %v2266_v10 }
 0x176   : > { %1933 = vmatmul.mubr.msk.f32.gmra.mrb[38].mxu0 %vm240_vm0, %v2770_v13 }
 0x177   : > { %1022 = vmatprep.mubr.f32.mxu0 %v2474_v0 }
 0x178   : > { %1942 = vmatmul.mubr.msk.f32.gmra.mrb[16].mxu1 %vm240_vm0, %v2775_v14 }
 0x179   : > { %692 = vmatprep.mubr.f32.mxu1 %v2474_v0 }
 0x17a   : > { %1982 = vmatmul.mubr.msk.f32.vlgmr.msra.gmra.mrb[40].mxu0 %vm240_vm0, %v2698_v39 }
 0x17b   : > { %1028 = vmatprep.mubr.f32.mxu0 %v2474_v0 }
 0x17c   : > { %1943 = vmatmul.mubr.msk.f32.gmra.mrb[18].mxu1 %vm240_vm0, %v2783_v15 }
 0x17d   : > { %698 = vmatprep.mubr.f32.mxu1 %v2474_v0 }
 0x17e   : > { %1983 = vmatmul.mubr.msk.f32.gmra.mrb[42].mxu0 %vm240_vm0, %v2710_v46 }
 0x17f   : > { %1034 = vmatprep.mubr.f32.mxu0 %v2474_v0 }
 0x180   : > { %1944 = vmatmul.mubr.msk.f32.gmra.mrb[20].mxu1 %vm240_vm0, %v2791_v16 }
 0x181   : > { %704 = vmatprep.mubr.f32.mxu1 %v2474_v0 }
 0x182   : > { %1984 = vmatmul.mubr.msk.f32.gmra.mrb[44].mxu0 %vm240_vm0, %v2720_v50 }
 0x183   : > { %1040 = vmatprep.mubr.f32.mxu0 %v2474_v0 }
 0x184   : > { %1945 = vmatmul.mubr.msk.f32.gmra.mrb[22].mxu1 %vm240_vm0, %v2799_v17 }
 0x185   : > { %710 = vmatprep.mubr.f32.mxu1 %v2474_v0 }
 0x186   : > { %1985 = vmatmul.mubr.msk.f32.gmra.mrb[46].mxu0 %vm240_vm0, %v2730_v56 }
 0x187   : > { %1046 = vmatprep.mubr.f32.mxu0 %v2474_v0 }
 0x188   : > { %1946 = vmatmul.mubr.msk.f32.gmra.mrb[24].mxu1 %vm240_vm0, %v2807_v18 }
 0x189   : > { %716 = vmatprep.mubr.f32.mxu1 %v2474_v0 }
 0x18a   : > { %1986 = vmatmul.mubr.msk.f32.gmra.mrb[48].mxu0 %vm240_vm0, %v2740_v60 }
 0x18b   : > { %1052 = vmatprep.mubr.f32.mxu0 %v2474_v0 }
 0x18c   : > { %1947 = vmatmul.mubr.msk.f32.gmra.mrb[26].mxu1 %vm240_vm0, %v2815_v19 }
 0x18d   : > { %722 = vmatprep.mubr.f32.mxu1 %v2474_v0 }
 0x18e   : > { %1987 = vmatmul.mubr.msk.f32.gmra.mrb[50].mxu0 %vm240_vm0, %v2750_v3 }
 0x18f   : > { %1058 = vmatprep.mubr.f32.mxu0 %v2474_v0 }
 0x190   : > { %1948 = vmatmul.mubr.msk.f32.gmra.mrb[28].mxu1 %vm240_vm0, %v2823_v20 }
 0x191   : > { %728 = vmatprep.mubr.f32.mxu1 %v2474_v0 }
 0x192   : > { %1988 = vmatmul.mubr.msk.f32.gmra.mrb[52].mxu0 %vm240_vm0, %v2760_v7 }
 0x193   : > { %1064 = vmatprep.mubr.f32.mxu0 %v2474_v0 }
 0x194   : > { %1949 = vmatmul.mubr.msk.f32.gmra.mrb[30].mxu1 %vm240_vm0, %v2831_v21 }
 0x195   : > { %734 = vmatprep.mubr.f32.mxu1 %v2474_v0 }
 0x196   : > { %1989 = vmatmul.mubr.msk.f32.gmra.mrb[54].mxu0 %vm240_vm0, %v2770_v13 }
 0x197   : > { %1070 = vmatprep.mubr.f32.mxu0 %v2474_v0 }
 0x198   : > { %1950 = vmatmul.mubr.msk.f32.gmra.mrb[32].mxu1 %vm240_vm0, %v2839_v22 }
 0x199   : > { %740 = vmatprep.mubr.f32.mxu1 %v2474_v0 }
 0x19a   : > { %1990 = vmatmul.mubr.msk.f32.gmra.mrb[56].mxu0 %vm240_vm0, %v2700_v40 }
 0x19b   : > { %1076 = vmatprep.mubr.f32.mxu0 %v2474_v0 }
 0x19c   : > { %1951 = vmatmul.mubr.msk.f32.gmra.mrb[34].mxu1 %vm240_vm0, %v2847_v23 }
 0x19d   : > { %746 = vmatprep.mubr.f32.mxu1 %v2474_v0 }
 0x19e   : > { %1991 = vmatmul.mubr.msk.f32.gmra.mrb[58].mxu0 %vm240_vm0, %v2707_v44 }
 0x19f   : > { %1082 = vmatprep.mubr.f32.mxu0 %v2474_v0 }
 0x1a0   : > { %1952 = vmatmul.mubr.msk.f32.gmra.mrb[36].mxu1 %vm240_vm0, %v2855_v24 }
 0x1a1   : > { %752 = vmatprep.mubr.f32.mxu1 %v2474_v0 }
 0x1a2   : > { %1992 = vmatmul.mubr.msk.f32.gmra.mrb[60].mxu0 %vm240_vm0, %v2715_v49 }
 0x1a3   : > { %1088 = vmatprep.mubr.f32.mxu0 %v2474_v0 }
 0x1a4   : > { %1953 = vmatmul.mubr.msk.f32.gmra.mrb[38].mxu1 %vm240_vm0, %v2863_v25 }
 0x1a5   : > { %1452 = vmatprep.mubr.f32.mxu1 %v2474_v0 }
 0x1a6   : > { %1993 = vmatmul.mubr.msk.f32.gmra.mrb[62].mxu0 %vm240_vm0, %v2725_v54 }
 0x1a7   : > { %1094 = vmatprep.mubr.f32.mxu0 %v2474_v0 }
 0x1a8   : > { %2066 = vmatmul.mubr.msk.f32.vlgmr.msra.gmra.mrb[40].mxu1 %vm240_vm0, %v2698_v39 }
 0x1a9   : > { %1458 = vmatprep.mubr.f32.mxu1 %v2474_v0 }
 0x1aa   : > { %1994 = vmatmul.mubr.msk.f32.gmra.mrb[64].mxu0 %vm240_vm0, %v2735_v59 }
 0x1ab   : > { %1100 = vmatprep.mubr.f32.mxu0 %v2474_v0 }
 0x1ac   : > { %2067 = vmatmul.mubr.msk.f32.gmra.mrb[42].mxu1 %vm240_vm0, %v2710_v46 }
 0x1ad   : > { %1464 = vmatprep.mubr.f32.mxu1 %v2474_v0 }
 0x1ae   : > { %1995 = vmatmul.mubr.msk.f32.gmra.mrb[66].mxu0 %vm240_vm0, %v2745_v1 }
 0x1af   : > { %1106 = vmatprep.mubr.f32.mxu0 %v2474_v0 }
 0x1b0   : > { %2068 = vmatmul.mubr.msk.f32.gmra.mrb[44].mxu1 %vm240_vm0, %v2720_v50 }
 0x1b1   : > { %1470 = vmatprep.mubr.f32.mxu1 %v2474_v0 }
 0x1b2   : > { %1996 = vmatmul.mubr.msk.f32.gmra.mrb[68].mxu0 %vm240_vm0, %v2755_v5 }
 0x1b3   : > { %1112 = vmatprep.mubr.f32.mxu0 %v2474_v0 }
 0x1b4   : > { %2069 = vmatmul.mubr.msk.f32.gmra.mrb[46].mxu1 %vm240_vm0, %v2730_v56 }
 0x1b5   : > { %1476 = vmatprep.mubr.f32.mxu1 %v2474_v0 }
 0x1b6   : > { %1997 = vmatmul.mubr.msk.f32.gmra.mrb[70].mxu0 %vm240_vm0, %v2765_v9 }
 0x1b7   : > { %1118 = vmatprep.mubr.f32.mxu0 %v2474_v0 }
 0x1b8   : > { %2070 = vmatmul.mubr.msk.f32.gmra.mrb[48].mxu1 %vm240_vm0, %v2740_v60 }
 0x1b9   : > { %1482 = vmatprep.mubr.f32.mxu1 %v2474_v0 }
 0x1ba   : > { %1998 = vmatmul.mubr.msk.f32.gmra.mrb[72].mxu0 %vm240_vm0, %v2775_v14 }
 0x1bb   : > { %1124 = vmatprep.mubr.f32.mxu0 %v2474_v0 }
 0x1bc   : > { %2071 = vmatmul.mubr.msk.f32.gmra.mrb[50].mxu1 %vm240_vm0, %v2750_v3 }
 0x1bd   : > { %1488 = vmatprep.mubr.f32.mxu1 %v2474_v0 }
 0x1be   : > { %1999 = vmatmul.mubr.msk.f32.gmra.mrb[74].mxu0 %vm240_vm0, %v2783_v15 }
 0x1bf   : > { %1130 = vmatprep.mubr.f32.mxu0 %v2474_v0 }
 0x1c0   : > { %2072 = vmatmul.mubr.msk.f32.gmra.mrb[52].mxu1 %vm240_vm0, %v2760_v7 }
 0x1c1   : > { %1494 = vmatprep.mubr.f32.mxu1 %v2474_v0 }
 0x1c2   : > { %2000 = vmatmul.mubr.msk.f32.gmra.mrb[76].mxu0 %vm240_vm0, %v2791_v16 }
 0x1c3   : > { %1136 = vmatprep.mubr.f32.mxu0 %v2474_v0 }
 0x1c4   : > { %2073 = vmatmul.mubr.msk.f32.gmra.mrb[54].mxu1 %vm240_vm0, %v2770_v13 }
 0x1c5   : > { %1500 = vmatprep.mubr.f32.mxu1 %v2474_v0 }
 0x1c6   : > { %2001 = vmatmul.mubr.msk.f32.gmra.mrb[78].mxu0 %vm240_vm0, %v2799_v17 }
 0x1c7   : > { %1142 = vmatprep.mubr.f32.mxu0 %v2474_v0 }
 0x1c8   : > { %2074 = vmatmul.mubr.msk.f32.gmra.mrb[56].mxu1 %vm240_vm0, %v2700_v40 }
 0x1c9   : > { %1506 = vmatprep.mubr.f32.mxu1 %v2474_v0 }
 0x1ca   : > { %2002 = vmatmul.mubr.msk.f32.gmra.mrb[80].mxu0 %vm240_vm0, %v2807_v18 }
 0x1cb   : > { %1148 = vmatprep.mubr.f32.mxu0 %v2474_v0 }
 0x1cc   : > { %2075 = vmatmul.mubr.msk.f32.gmra.mrb[58].mxu1 %vm240_vm0, %v2707_v44 }
 0x1cd   : > { %1512 = vmatprep.mubr.f32.mxu1 %v2474_v0 }
 0x1ce   : > { %2003 = vmatmul.mubr.msk.f32.gmra.mrb[82].mxu0 %vm240_vm0, %v2815_v19 }
 0x1cf   : > { %1154 = vmatprep.mubr.f32.mxu0 %v2474_v0 }
 0x1d0   : > { %2076 = vmatmul.mubr.msk.f32.gmra.mrb[60].mxu1 %vm240_vm0, %v2715_v49 }
 0x1d1   : > { %1518 = vmatprep.mubr.f32.mxu1 %v2474_v0 }
 0x1d2   : > { %2004 = vmatmul.mubr.msk.f32.gmra.mrb[84].mxu0 %vm240_vm0, %v2823_v20 }
 0x1d3   : > { %1160 = vmatprep.mubr.f32.mxu0 %v2474_v0 }
 0x1d4   : > { %2077 = vmatmul.mubr.msk.f32.gmra.mrb[62].mxu1 %vm240_vm0, %v2725_v54 }
 0x1d5   : > { %1524 = vmatprep.mubr.f32.mxu1 %v2474_v0 }
 0x1d6   : > { %2005 = vmatmul.mubr.msk.f32.gmra.mrb[86].mxu0 %vm240_vm0, %v2831_v21 }
 0x1d7   : > { %1166 = vmatprep.mubr.f32.mxu0 %v2474_v0 }
 0x1d8   : > { %2078 = vmatmul.mubr.msk.f32.gmra.mrb[64].mxu1 %vm240_vm0, %v2735_v59 }
 0x1d9   : > { %1530 = vmatprep.mubr.f32.mxu1 %v2474_v0 }
 0x1da   : > { %2006 = vmatmul.mubr.msk.f32.gmra.mrb[88].mxu0 %vm240_vm0, %v2839_v22 }
 0x1db   : > { %1172 = vmatprep.mubr.f32.mxu0 %v2474_v0 }
 0x1dc   : > { %2079 = vmatmul.mubr.msk.f32.gmra.mrb[66].mxu1 %vm240_vm0, %v2745_v1 }
 0x1dd   : > { %1536 = vmatprep.mubr.f32.mxu1 %v2474_v0 }
 0x1de   : > { %2007 = vmatmul.mubr.msk.f32.gmra.mrb[90].mxu0 %vm240_vm0, %v2847_v23 }
 0x1df   : > { %1178 = vmatprep.mubr.f32.mxu0 %v2474_v0 }
 0x1e0   : > { %2080 = vmatmul.mubr.msk.f32.gmra.mrb[68].mxu1 %vm240_vm0, %v2755_v5 }
 0x1e1   : > { %1542 = vmatprep.mubr.f32.mxu1 %v2474_v0 }
 0x1e2   : > { %2008 = vmatmul.mubr.msk.f32.gmra.mrb[92].mxu0 %vm240_vm0, %v2855_v24 }
 0x1e3   : > { %1184 = vmatprep.mubr.f32.mxu0 %v2474_v0 }
 0x1e4   : > { %2081 = vmatmul.mubr.msk.f32.gmra.mrb[70].mxu1 %vm240_vm0, %v2765_v9 }
 0x1e5   : > { %1548 = vmatprep.mubr.f32.mxu1 %v2474_v0 }
 0x1e6   : > { %2009 = vmatmul.mubr.msk.f32.gmra.mrb[94].mxu0 %vm240_vm0, %v2863_v25 }
 0x1e8   : > { %2082 = vmatmul.mubr.msk.f32.gmra.mrb[72].mxu1 %vm240_vm0, %v2775_v14 }
 0x1e9   : > { %1554 = vmatprep.mubr.f32.mxu1 %v2474_v0 }
 0x1ec   : > { %2083 = vmatmul.mubr.msk.f32.gmra.mrb[74].mxu1 %vm240_vm0, %v2783_v15 }
 0x1ed   : > { %1560 = vmatprep.mubr.f32.mxu1 %v2474_v0 }
 0x1f0   : > { %2084 = vmatmul.mubr.msk.f32.gmra.mrb[76].mxu1 %vm240_vm0, %v2791_v16 }
 0x1f1   : > { %1566 = vmatprep.mubr.f32.mxu1 %v2474_v0 }
 0x1f4   : > { %2085 = vmatmul.mubr.msk.f32.gmra.mrb[78].mxu1 %vm240_vm0, %v2799_v17 }
 0x1f5   : > { %1572 = vmatprep.mubr.f32.mxu1 %v2474_v0 }
 0x1f8   : > { %2086 = vmatmul.mubr.msk.f32.gmra.mrb[80].mxu1 %vm240_vm0, %v2807_v18 }
 0x1f9   : > { %1578 = vmatprep.mubr.f32.mxu1 %v2474_v0 }
 0x1fc   : > { %2087 = vmatmul.mubr.msk.f32.gmra.mrb[82].mxu1 %vm240_vm0, %v2815_v19 }
 0x1fd   : > { %1584 = vmatprep.mubr.f32.mxu1 %v2474_v0 }
 0x200   : > { %2088 = vmatmul.mubr.msk.f32.gmra.mrb[84].mxu1 %vm240_vm0, %v2823_v20 }
 0x201   : > { %1590 = vmatprep.mubr.f32.mxu1 %v2474_v0 }
 0x204   : > { %2089 = vmatmul.mubr.msk.f32.gmra.mrb[86].mxu1 %vm240_vm0, %v2831_v21 }
 0x205   : > { %1596 = vmatprep.mubr.f32.mxu1 %v2474_v0 }
 0x208   : > { %2090 = vmatmul.mubr.msk.f32.gmra.mrb[88].mxu1 %vm240_vm0, %v2839_v22 }
 0x209   : > { %1602 = vmatprep.mubr.f32.mxu1 %v2474_v0 }
 0x20c   : > { %2091 = vmatmul.mubr.msk.f32.gmra.mrb[90].mxu1 %vm240_vm0, %v2847_v23 }
 0x20d   : > { %1608 = vmatprep.mubr.f32.mxu1 %v2474_v0 }
 0x210   : > { %2092 = vmatmul.mubr.msk.f32.gmra.mrb[92].mxu1 %vm240_vm0, %v2855_v24 }
 0x211   : > { %1614 = vmatprep.mubr.f32.mxu1 %v2474_v0 }
 0x214   : > { %2093 = vmatmul.mubr.msk.f32.gmra.mrb[94].mxu1 %vm240_vm0, %v2863_v25 }
 0x22b   : > { %v640_v26 = vpop.f32.mrb[0].mxu1  ;;  %v592_v27 = vpop.f32.mrb[24].mxu0 }
 0x22c   : > { %v642_v28 = vpop.f32.mrb[1].mxu1  ;;  %v594_v29 = vpop.f32.mrb[25].mxu0 }
 0x22d   : > { %v2160_v30 = vpack.c.bf16 %v642_v28, %v640_v26  ;;  %v2152_v31 = vpack.c.bf16 %v594_v29, %v592_v27 }
 0x22f   : > { %938 = vst.msk [vmem:[%s3009_s26 + $0x40] sm:$0xff] %vm3011_vm3, %v2160_v30  ;;  %v646_v32 = vpop.f32.mrb[2].mxu1  ;;  %930 = vst.msk [vmem:[%s3009_s26] sm:$0xff] %vm3011_vm3, %v2152_v31 }
 0x230   : > { %v648_v33 = vpop.f32.mrb[3].mxu1 }
 0x231   : > { %v2161_v34 = vpack.c.bf16 %v648_v33, %v646_v32  ;;  %v598_v35 = vpop.f32.mrb[26].mxu0 }
 0x232   : > { %v600_v36 = vpop.f32.mrb[27].mxu0 }
 0x233   : > { %939 = vst.msk [vmem:[%s3009_s26 + $0x48] sm:$0xff] %vm3011_vm3, %v2161_v34  ;;  %v652_v37 = vpop.f32.mrb[4].mxu1  ;;  %v2153_v38 = vpack.c.bf16 %v600_v36, %v598_v35 }
 0x234   : > { %v654_v39 = vpop.f32.mrb[5].mxu1 }
 0x235   : > { %v2162_v40 = vpack.c.bf16 %v654_v39, %v652_v37  ;;  %931 = vst.msk [vmem:[%s3009_s26 + $0x8] sm:$0xff] %vm3011_vm3, %v2153_v38  ;;  %v604_v41 = vpop.f32.mrb[28].mxu0 }
 0x236   : > { %v606_v42 = vpop.f32.mrb[29].mxu0 }
 0x237   : > { %940 = vst.msk [vmem:[%s3009_s26 + $0x50] sm:$0xff] %vm3011_vm3, %v2162_v40  ;;  %v658_v43 = vpop.f32.mrb[6].mxu1  ;;  %v2154_v44 = vpack.c.bf16 %v606_v42, %v604_v41 }
 0x238   : > { %v660_v45 = vpop.f32.mrb[7].mxu1 }
 0x239   : > { %v2163_v46 = vpack.c.bf16 %v660_v45, %v658_v43  ;;  %932 = vst.msk [vmem:[%s3009_s26 + $0x10] sm:$0xff] %vm3011_vm3, %v2154_v44  ;;  %v610_v47 = vpop.f32.mrb[30].mxu0 }
 0x23a   : > { %v612_v48 = vpop.f32.mrb[31].mxu0 }
 0x23b   : > { %941 = vst.msk [vmem:[%s3009_s26 + $0x58] sm:$0xff] %vm3011_vm3, %v2163_v46  ;;  %v664_v49 = vpop.f32.mrb[8].mxu1  ;;  %v2155_v50 = vpack.c.bf16 %v612_v48, %v610_v47 }
 0x23c   : > { %v666_v51 = vpop.f32.mrb[9].mxu1 }
 0x23d   : > { %v2164_v52 = vpack.c.bf16 %v666_v51, %v664_v49  ;;  %933 = vst.msk [vmem:[%s3009_s26 + $0x18] sm:$0xff] %vm3011_vm3, %v2155_v50  ;;  %v616_v53 = vpop.f32.mrb[32].mxu0 }
 0x23e   : > { %v618_v54 = vpop.f32.mrb[33].mxu0 }
 0x23f   : > { %942 = vst.msk [vmem:[%s3009_s26 + $0x60] sm:$0xff] %vm3011_vm3, %v2164_v52  ;;  %v670_v55 = vpop.f32.mrb[10].mxu1  ;;  %v2156_v56 = vpack.c.bf16 %v618_v54, %v616_v53 }
 0x240   : > { %v672_v57 = vpop.f32.mrb[11].mxu1 }
 0x241   : > { %v2165_v58 = vpack.c.bf16 %v672_v57, %v670_v55  ;;  %934 = vst.msk [vmem:[%s3009_s26 + $0x20] sm:$0xff] %vm3011_vm3, %v2156_v56  ;;  %v622_v59 = vpop.f32.mrb[34].mxu0 }
 0x242   : > { %v624_v60 = vpop.f32.mrb[35].mxu0 }
 0x243   : > { %943 = vst.msk [vmem:[%s3009_s26 + $0x68] sm:$0xff] %vm3011_vm3, %v2165_v58  ;;  %v676_v61 = vpop.f32.mrb[12].mxu1  ;;  %v2157_v62 = vpack.c.bf16 %v624_v60, %v622_v59 }
 0x244   : > { %v678_v63 = vpop.f32.mrb[13].mxu1 }
 0x245   : > { %v2166_v1 = vpack.c.bf16 %v678_v63, %v676_v61  ;;  %935 = vst.msk [vmem:[%s3009_s26 + $0x28] sm:$0xff] %vm3011_vm3, %v2157_v62  ;;  %v628_v2 = vpop.f32.mrb[36].mxu0 }
 0x246   : > { %v630_v3 = vpop.f32.mrb[37].mxu0 }
 0x247   : > { %944 = vst.msk [vmem:[%s3009_s26 + $0x70] sm:$0xff] %vm3011_vm3, %v2166_v1  ;;  %v682_v4 = vpop.f32.mrb[14].mxu1  ;;  %v2158_v5 = vpack.c.bf16 %v630_v3, %v628_v2 }
 0x248   : > { %v684_v6 = vpop.f32.mrb[15].mxu1 }
 0x249   : > { %v2167_v7 = vpack.c.bf16 %v684_v6, %v682_v4  ;;  %936 = vst.msk [vmem:[%s3009_s26 + $0x30] sm:$0xff] %vm3011_vm3, %v2158_v5  ;;  %v634_v8 = vpop.f32.mrb[38].mxu0 }
 0x24a   : > { %v636_v9 = vpop.f32.mrb[39].mxu0 }
 0x24b   : > { %945 = vst.msk [vmem:[%s3009_s26 + $0x78] sm:$0xff] %vm3011_vm3, %v2167_v7  ;;  %v688_v10 = vpop.f32.mrb[16].mxu1  ;;  %v2159_v11 = vpack.c.bf16 %v636_v9, %v634_v8 }
 0x24c   : > { %v690_v12 = vpop.f32.mrb[17].mxu1 }
 0x24d   : > { %v2168_v13 = vpack.c.bf16 %v690_v12, %v688_v10  ;;  %937 = vst.msk [vmem:[%s3009_s26 + $0x38] sm:$0xff] %vm3011_vm3, %v2159_v11  ;;  %v1024_v14 = vpop.f32.mrb[40].mxu0 }
 0x24e   : > { %v1026_v15 = vpop.f32.mrb[41].mxu0 }
 0x24f   : > { %946 = vst.msk [vmem:[%s3009_s26 + $0x80] sm:$0xff] %vm3011_vm3, %v2168_v13  ;;  %v694_v16 = vpop.f32.mrb[18].mxu1  ;;  %v2180_v17 = vpack.c.bf16 %v1026_v15, %v1024_v14 }
 0x250   : > { %v696_v18 = vpop.f32.mrb[19].mxu1 }
 0x251   : > { %v2169_v19 = vpack.c.bf16 %v696_v18, %v694_v16  ;;  %2038 = vst.msk [vmem:[%s3009_s26 + $0xe0] sm:$0xff] %vm3011_vm3, %v2180_v17  ;;  %v1030_v20 = vpop.f32.mrb[42].mxu0 }
 0x252   : > { %v1032_v21 = vpop.f32.mrb[43].mxu0 }
 0x253   : > { %947 = vst.msk [vmem:[%s3009_s26 + $0x88] sm:$0xff] %vm3011_vm3, %v2169_v19  ;;  %v700_v22 = vpop.f32.mrb[20].mxu1  ;;  %v2181_v23 = vpack.c.bf16 %v1032_v21, %v1030_v20 }
 0x254   : > { %v702_v24 = vpop.f32.mrb[21].mxu1 }
 0x255   : > { %v2170_v25 = vpack.c.bf16 %v702_v24, %v700_v22  ;;  %2039 = vst.msk [vmem:[%s3009_s26 + $0xe8] sm:$0xff] %vm3011_vm3, %v2181_v23  ;;  %v1036_v26 = vpop.f32.mrb[44].mxu0 }
 0x256   : > { %v1038_v27 = vpop.f32.mrb[45].mxu0 }
 0x257   : > { %948 = vst.msk [vmem:[%s3009_s26 + $0x90] sm:$0xff] %vm3011_vm3, %v2170_v25  ;;  %v706_v28 = vpop.f32.mrb[22].mxu1  ;;  %v2182_v29 = vpack.c.bf16 %v1038_v27, %v1036_v26 }
 0x258   : > { %v708_v30 = vpop.f32.mrb[23].mxu1 }
 0x259   : > { %v2171_v31 = vpack.c.bf16 %v708_v30, %v706_v28  ;;  %2040 = vst.msk [vmem:[%s3009_s26 + $0xf0] sm:$0xff] %vm3011_vm3, %v2182_v29  ;;  %v1042_v32 = vpop.f32.mrb[46].mxu0 }
 0x25a   : > { %v1044_v33 = vpop.f32.mrb[47].mxu0 }
 0x25b   : > { %949 = vst.msk [vmem:[%s3009_s26 + $0x98] sm:$0xff] %vm3011_vm3, %v2171_v31  ;;  %v712_v34 = vpop.f32.mrb[24].mxu1  ;;  %v2183_v35 = vpack.c.bf16 %v1044_v33, %v1042_v32 }
 0x25c   : > { %v714_v36 = vpop.f32.mrb[25].mxu1 }
 0x25d   : > { %v2172_v37 = vpack.c.bf16 %v714_v36, %v712_v34  ;;  %2041 = vst.msk [vmem:[%s3009_s26 + $0xf8] sm:$0xff] %vm3011_vm3, %v2183_v35  ;;  %v1048_v38 = vpop.f32.mrb[48].mxu0 }
 0x25e   : > { %v1050_v39 = vpop.f32.mrb[49].mxu0 }
 0x25f   : > { %950 = vst.msk [vmem:[%s3009_s26 + $0xa0] sm:$0xff] %vm3011_vm3, %v2172_v37  ;;  %v718_v40 = vpop.f32.mrb[26].mxu1  ;;  %v2184_v41 = vpack.c.bf16 %v1050_v39, %v1048_v38 }
 0x260   : > { %v720_v42 = vpop.f32.mrb[27].mxu1 }
 0x261   : > { %v2173_v43 = vpack.c.bf16 %v720_v42, %v718_v40  ;;  %2042 = vst.msk [vmem:[%s3009_s26 + $0x100] sm:$0xff] %vm3011_vm3, %v2184_v41  ;;  %v1054_v44 = vpop.f32.mrb[50].mxu0 }
 0x262   : > { %v1056_v45 = vpop.f32.mrb[51].mxu0 }
 0x263   : > { %951 = vst.msk [vmem:[%s3009_s26 + $0xa8] sm:$0xff] %vm3011_vm3, %v2173_v43  ;;  %v724_v46 = vpop.f32.mrb[28].mxu1  ;;  %v2185_v47 = vpack.c.bf16 %v1056_v45, %v1054_v44 }
 0x264   : > { %v726_v48 = vpop.f32.mrb[29].mxu1 }
 0x265   : > { %v2174_v49 = vpack.c.bf16 %v726_v48, %v724_v46  ;;  %2043 = vst.msk [vmem:[%s3009_s26 + $0x108] sm:$0xff] %vm3011_vm3, %v2185_v47  ;;  %v1060_v50 = vpop.f32.mrb[52].mxu0 }
 0x266   : > { %v1062_v51 = vpop.f32.mrb[53].mxu0 }
 0x267   : > { %952 = vst.msk [vmem:[%s3009_s26 + $0xb0] sm:$0xff] %vm3011_vm3, %v2174_v49  ;;  %v730_v52 = vpop.f32.mrb[30].mxu1  ;;  %v2186_v53 = vpack.c.bf16 %v1062_v51, %v1060_v50 }
 0x268   : > { %v732_v54 = vpop.f32.mrb[31].mxu1 }
 0x269   : > { %v2175_v55 = vpack.c.bf16 %v732_v54, %v730_v52  ;;  %2044 = vst.msk [vmem:[%s3009_s26 + $0x110] sm:$0xff] %vm3011_vm3, %v2186_v53  ;;  %v1066_v56 = vpop.f32.mrb[54].mxu0 }
 0x26a   : > { %v1068_v57 = vpop.f32.mrb[55].mxu0 }
 0x26b   : > { %953 = vst.msk [vmem:[%s3009_s26 + $0xb8] sm:$0xff] %vm3011_vm3, %v2175_v55  ;;  %v736_v58 = vpop.f32.mrb[32].mxu1  ;;  %v2187_v59 = vpack.c.bf16 %v1068_v57, %v1066_v56 }
 0x26c   : > { %v738_v60 = vpop.f32.mrb[33].mxu1 }
 0x26d   : > { %v2176_v61 = vpack.c.bf16 %v738_v60, %v736_v58  ;;  %2045 = vst.msk [vmem:[%s3009_s26 + $0x118] sm:$0xff] %vm3011_vm3, %v2187_v59  ;;  %v1072_v62 = vpop.f32.mrb[56].mxu0 }
 0x26e   : > { %v1074_v63 = vpop.f32.mrb[57].mxu0 }
 0x26f   : > { %954 = vst.msk [vmem:[%s3009_s26 + $0xc0] sm:$0xff] %vm3011_vm3, %v2176_v61  ;;  %v742_v1 = vpop.f32.mrb[34].mxu1  ;;  %v2188_v2 = vpack.c.bf16 %v1074_v63, %v1072_v62 }
 0x270   : > { %v744_v3 = vpop.f32.mrb[35].mxu1 }
 0x271   : > { %v2177_v4 = vpack.c.bf16 %v744_v3, %v742_v1  ;;  %2046 = vst.msk [vmem:[%s3009_s26 + $0x120] sm:$0xff] %vm3011_vm3, %v2188_v2  ;;  %v1078_v5 = vpop.f32.mrb[58].mxu0 }
 0x272   : > { %v1080_v6 = vpop.f32.mrb[59].mxu0 }
 0x273   : > { %955 = vst.msk [vmem:[%s3009_s26 + $0xc8] sm:$0xff] %vm3011_vm3, %v2177_v4  ;;  %v748_v7 = vpop.f32.mrb[36].mxu1  ;;  %v2189_v8 = vpack.c.bf16 %v1080_v6, %v1078_v5 }
 0x274   : > { %v750_v9 = vpop.f32.mrb[37].mxu1 }
 0x275   : > { %v2178_v10 = vpack.c.bf16 %v750_v9, %v748_v7  ;;  %2047 = vst.msk [vmem:[%s3009_s26 + $0x128] sm:$0xff] %vm3011_vm3, %v2189_v8  ;;  %v1084_v11 = vpop.f32.mrb[60].mxu0 }
 0x276   : > { %v1086_v12 = vpop.f32.mrb[61].mxu0 }
 0x277   : > { %956 = vst.msk [vmem:[%s3009_s26 + $0xd0] sm:$0xff] %vm3011_vm3, %v2178_v10  ;;  %v754_v13 = vpop.f32.mrb[38].mxu1  ;;  %v2190_v14 = vpack.c.bf16 %v1086_v12, %v1084_v11 }
 0x278   : > { %v756_v15 = vpop.f32.mrb[39].mxu1 }
 0x279   : > { %v2179_v16 = vpack.c.bf16 %v756_v15, %v754_v13  ;;  %2048 = vst.msk [vmem:[%s3009_s26 + $0x130] sm:$0xff] %vm3011_vm3, %v2190_v14  ;;  %v1090_v17 = vpop.f32.mrb[62].mxu0 }
 0x27a   : > { %v1092_v18 = vpop.f32.mrb[63].mxu0 }
 0x27b   : > { %957 = vst.msk [vmem:[%s3009_s26 + $0xd8] sm:$0xff] %vm3011_vm3, %v2179_v16  ;;  %v1454_v19 = vpop.f32.mrb[40].mxu1  ;;  %v2191_v20 = vpack.c.bf16 %v1092_v18, %v1090_v17 }
 0x27c   : > { %v1456_v21 = vpop.f32.mrb[41].mxu1 }
 0x27d   : > { %v2208_v22 = vpack.c.bf16 %v1456_v21, %v1454_v19  ;;  %2049 = vst.msk [vmem:[%s3009_s26 + $0x138] sm:$0xff] %vm3011_vm3, %v2191_v20  ;;  %v1096_v23 = vpop.f32.mrb[64].mxu0 }
 0x27e   : > { %v1098_v24 = vpop.f32.mrb[65].mxu0 }
 0x27f   : > { %2122 = vst.msk [vmem:[%s3009_s26 + $0x1c0] sm:$0xff] %vm3011_vm3, %v2208_v22  ;;  %v1460_v25 = vpop.f32.mrb[42].mxu1  ;;  %v2192_v26 = vpack.c.bf16 %v1098_v24, %v1096_v23 }
 0x280   : > { %v1462_v27 = vpop.f32.mrb[43].mxu1 }
 0x281   : > { %v2209_v28 = vpack.c.bf16 %v1462_v27, %v1460_v25  ;;  %2050 = vst.msk [vmem:[%s3009_s26 + $0x140] sm:$0xff] %vm3011_vm3, %v2192_v26  ;;  %v1102_v29 = vpop.f32.mrb[66].mxu0 }
 0x282   : > { %v1104_v30 = vpop.f32.mrb[67].mxu0 }
 0x283   : > { %2123 = vst.msk [vmem:[%s3009_s26 + $0x1c8] sm:$0xff] %vm3011_vm3, %v2209_v28  ;;  %v1466_v31 = vpop.f32.mrb[44].mxu1  ;;  %v2193_v32 = vpack.c.bf16 %v1104_v30, %v1102_v29 }
 0x284   : > { %v1468_v33 = vpop.f32.mrb[45].mxu1 }
 0x285   : > { %v2210_v34 = vpack.c.bf16 %v1468_v33, %v1466_v31  ;;  %2051 = vst.msk [vmem:[%s3009_s26 + $0x148] sm:$0xff] %vm3011_vm3, %v2193_v32  ;;  %v1108_v35 = vpop.f32.mrb[68].mxu0 }
 0x286   : > { %v1110_v36 = vpop.f32.mrb[69].mxu0 }
 0x287   : > { %2124 = vst.msk [vmem:[%s3009_s26 + $0x1d0] sm:$0xff] %vm3011_vm3, %v2210_v34  ;;  %v1472_v37 = vpop.f32.mrb[46].mxu1  ;;  %v2194_v38 = vpack.c.bf16 %v1110_v36, %v1108_v35 }
 0x288   : > { %v1474_v39 = vpop.f32.mrb[47].mxu1 }
 0x289   : > { %v2211_v40 = vpack.c.bf16 %v1474_v39, %v1472_v37  ;;  %2052 = vst.msk [vmem:[%s3009_s26 + $0x150] sm:$0xff] %vm3011_vm3, %v2194_v38  ;;  %v1114_v41 = vpop.f32.mrb[70].mxu0 }
 0x28a   : > { %v1116_v42 = vpop.f32.mrb[71].mxu0 }
 0x28b   : > { %2125 = vst.msk [vmem:[%s3009_s26 + $0x1d8] sm:$0xff] %vm3011_vm3, %v2211_v40  ;;  %v1478_v43 = vpop.f32.mrb[48].mxu1  ;;  %v2195_v44 = vpack.c.bf16 %v1116_v42, %v1114_v41 }
 0x28c   : > { %v1480_v45 = vpop.f32.mrb[49].mxu1 }
 0x28d   : > { %v2212_v46 = vpack.c.bf16 %v1480_v45, %v1478_v43  ;;  %2053 = vst.msk [vmem:[%s3009_s26 + $0x158] sm:$0xff] %vm3011_vm3, %v2195_v44  ;;  %v1120_v47 = vpop.f32.mrb[72].mxu0 }
 0x28e   : > { %v1122_v48 = vpop.f32.mrb[73].mxu0 }
 0x28f   : > { %2126 = vst.msk [vmem:[%s3009_s26 + $0x1e0] sm:$0xff] %vm3011_vm3, %v2212_v46  ;;  %v1484_v49 = vpop.f32.mrb[50].mxu1  ;;  %v2196_v50 = vpack.c.bf16 %v1122_v48, %v1120_v47 }
 0x290   : > { %v1486_v51 = vpop.f32.mrb[51].mxu1 }
 0x291   : > { %v2213_v52 = vpack.c.bf16 %v1486_v51, %v1484_v49  ;;  %2054 = vst.msk [vmem:[%s3009_s26 + $0x160] sm:$0xff] %vm3011_vm3, %v2196_v50  ;;  %v1126_v53 = vpop.f32.mrb[74].mxu0 }
 0x292   : > { %v1128_v54 = vpop.f32.mrb[75].mxu0 }
 0x293   : > { %2127 = vst.msk [vmem:[%s3009_s26 + $0x1e8] sm:$0xff] %vm3011_vm3, %v2213_v52  ;;  %v1490_v55 = vpop.f32.mrb[52].mxu1  ;;  %v2197_v56 = vpack.c.bf16 %v1128_v54, %v1126_v53 }
 0x294   : > { %v1492_v57 = vpop.f32.mrb[53].mxu1 }
 0x295   : > { %v2214_v58 = vpack.c.bf16 %v1492_v57, %v1490_v55  ;;  %2055 = vst.msk [vmem:[%s3009_s26 + $0x168] sm:$0xff] %vm3011_vm3, %v2197_v56  ;;  %v1132_v59 = vpop.f32.mrb[76].mxu0 }
 0x296   : > { %v1134_v60 = vpop.f32.mrb[77].mxu0 }
 0x297   : > { %2128 = vst.msk [vmem:[%s3009_s26 + $0x1f0] sm:$0xff] %vm3011_vm3, %v2214_v58  ;;  %v1496_v61 = vpop.f32.mrb[54].mxu1  ;;  %v2198_v62 = vpack.c.bf16 %v1134_v60, %v1132_v59 }
 0x298   : > { %v1498_v63 = vpop.f32.mrb[55].mxu1 }
 0x299   : > { %v2215_v1 = vpack.c.bf16 %v1498_v63, %v1496_v61  ;;  %2056 = vst.msk [vmem:[%s3009_s26 + $0x170] sm:$0xff] %vm3011_vm3, %v2198_v62  ;;  %v1138_v2 = vpop.f32.mrb[78].mxu0 }
 0x29a   : > { %v1140_v3 = vpop.f32.mrb[79].mxu0 }
 0x29b   : > { %2129 = vst.msk [vmem:[%s3009_s26 + $0x1f8] sm:$0xff] %vm3011_vm3, %v2215_v1  ;;  %v1502_v4 = vpop.f32.mrb[56].mxu1  ;;  %v2199_v5 = vpack.c.bf16 %v1140_v3, %v1138_v2 }
 0x29c   : > { %v1504_v6 = vpop.f32.mrb[57].mxu1 }
 0x29d   : > { %v2216_v7 = vpack.c.bf16 %v1504_v6, %v1502_v4  ;;  %2057 = vst.msk [vmem:[%s3009_s26 + $0x178] sm:$0xff] %vm3011_vm3, %v2199_v5  ;;  %v1144_v8 = vpop.f32.mrb[80].mxu0 }
 0x29e   : > { %v1146_v9 = vpop.f32.mrb[81].mxu0 }
 0x29f   : > { %2130 = vst.msk [vmem:[%s3009_s26 + $0x200] sm:$0xff] %vm3011_vm3, %v2216_v7  ;;  %v1508_v10 = vpop.f32.mrb[58].mxu1  ;;  %v2200_v11 = vpack.c.bf16 %v1146_v9, %v1144_v8 }
 0x2a0   : > { %v1510_v12 = vpop.f32.mrb[59].mxu1 }
 0x2a1   : > { %v2217_v13 = vpack.c.bf16 %v1510_v12, %v1508_v10  ;;  %2058 = vst.msk [vmem:[%s3009_s26 + $0x180] sm:$0xff] %vm3011_vm3, %v2200_v11  ;;  %v1150_v14 = vpop.f32.mrb[82].mxu0 }
 0x2a2   : > { %v1152_v15 = vpop.f32.mrb[83].mxu0 }
 0x2a3   : > { %2131 = vst.msk [vmem:[%s3009_s26 + $0x208] sm:$0xff] %vm3011_vm3, %v2217_v13  ;;  %v1514_v16 = vpop.f32.mrb[60].mxu1  ;;  %v2201_v17 = vpack.c.bf16 %v1152_v15, %v1150_v14 }
 0x2a4   : > { %v1516_v18 = vpop.f32.mrb[61].mxu1 }
 0x2a5   : > { %v2218_v19 = vpack.c.bf16 %v1516_v18, %v1514_v16  ;;  %2059 = vst.msk [vmem:[%s3009_s26 + $0x188] sm:$0xff] %vm3011_vm3, %v2201_v17  ;;  %v1156_v20 = vpop.f32.mrb[84].mxu0 }
 0x2a6   : > { %v1158_v21 = vpop.f32.mrb[85].mxu0 }
 0x2a7   : > { %2132 = vst.msk [vmem:[%s3009_s26 + $0x210] sm:$0xff] %vm3011_vm3, %v2218_v19  ;;  %v1520_v22 = vpop.f32.mrb[62].mxu1  ;;  %v2202_v23 = vpack.c.bf16 %v1158_v21, %v1156_v20 }
 0x2a8   : > { %v1522_v24 = vpop.f32.mrb[63].mxu1 }
 0x2a9   : > { %v2219_v25 = vpack.c.bf16 %v1522_v24, %v1520_v22  ;;  %2060 = vst.msk [vmem:[%s3009_s26 + $0x190] sm:$0xff] %vm3011_vm3, %v2202_v23  ;;  %v1162_v26 = vpop.f32.mrb[86].mxu0 }
 0x2aa   : > { %v1164_v27 = vpop.f32.mrb[87].mxu0 }
 0x2ab   : > { %2133 = vst.msk [vmem:[%s3009_s26 + $0x218] sm:$0xff] %vm3011_vm3, %v2219_v25  ;;  %v1526_v28 = vpop.f32.mrb[64].mxu1  ;;  %v2203_v29 = vpack.c.bf16 %v1164_v27, %v1162_v26 }
 0x2ac   : > { %v1528_v30 = vpop.f32.mrb[65].mxu1 }
 0x2ad   : > { %v2220_v31 = vpack.c.bf16 %v1528_v30, %v1526_v28  ;;  %2061 = vst.msk [vmem:[%s3009_s26 + $0x198] sm:$0xff] %vm3011_vm3, %v2203_v29  ;;  %v1168_v32 = vpop.f32.mrb[88].mxu0 }
 0x2ae   : > { %v1170_v33 = vpop.f32.mrb[89].mxu0 }
 0x2af   : > { %2134 = vst.msk [vmem:[%s3009_s26 + $0x220] sm:$0xff] %vm3011_vm3, %v2220_v31  ;;  %v1532_v34 = vpop.f32.mrb[66].mxu1  ;;  %v2204_v35 = vpack.c.bf16 %v1170_v33, %v1168_v32 }
 0x2b0   : > { %v1534_v36 = vpop.f32.mrb[67].mxu1 }
 0x2b1   : > { %v2221_v37 = vpack.c.bf16 %v1534_v36, %v1532_v34  ;;  %2062 = vst.msk [vmem:[%s3009_s26 + $0x1a0] sm:$0xff] %vm3011_vm3, %v2204_v35  ;;  %v1174_v38 = vpop.f32.mrb[90].mxu0 }
 0x2b2   : > { %v1176_v39 = vpop.f32.mrb[91].mxu0 }
 0x2b3   : > { %2135 = vst.msk [vmem:[%s3009_s26 + $0x228] sm:$0xff] %vm3011_vm3, %v2221_v37  ;;  %v1538_v40 = vpop.f32.mrb[68].mxu1  ;;  %v2205_v41 = vpack.c.bf16 %v1176_v39, %v1174_v38 }
 0x2b4   : > { %v1540_v42 = vpop.f32.mrb[69].mxu1 }
 0x2b5   : > { %v2222_v43 = vpack.c.bf16 %v1540_v42, %v1538_v40  ;;  %2063 = vst.msk [vmem:[%s3009_s26 + $0x1a8] sm:$0xff] %vm3011_vm3, %v2205_v41  ;;  %v1180_v44 = vpop.f32.mrb[92].mxu0 }
 0x2b6   : > { %v1182_v45 = vpop.f32.mrb[93].mxu0 }
 0x2b7   : > { %2136 = vst.msk [vmem:[%s3009_s26 + $0x230] sm:$0xff] %vm3011_vm3, %v2222_v43  ;;  %v1544_v46 = vpop.f32.mrb[70].mxu1  ;;  %v2206_v47 = vpack.c.bf16 %v1182_v45, %v1180_v44 }
 0x2b8   : > { %v1546_v48 = vpop.f32.mrb[71].mxu1 }
 0x2b9   : > { %v2223_v49 = vpack.c.bf16 %v1546_v48, %v1544_v46  ;;  %2064 = vst.msk [vmem:[%s3009_s26 + $0x1b0] sm:$0xff] %vm3011_vm3, %v2206_v47  ;;  %v1186_v50 = vpop.f32.mrb[94].mxu0 }
 0x2ba   : > { %v1188_v51 = vpop.f32.mrb[95].mxu0 }
 0x2bb   : > { %2137 = vst.msk [vmem:[%s3009_s26 + $0x238] sm:$0xff] %vm3011_vm3, %v2223_v49  ;;  %v1550_v52 = vpop.f32.mrb[72].mxu1  ;;  %v2207_v53 = vpack.c.bf16 %v1188_v51, %v1186_v50 }
 0x2bc   : > { %v1552_v54 = vpop.f32.mrb[73].mxu1 }
 0x2bd   : > { %v2224_v55 = vpack.c.bf16 %v1552_v54, %v1550_v52  ;;  %2065 = vst.msk [vmem:[%s3009_s26 + $0x1b8] sm:$0xff] %vm3011_vm3, %v2207_v53 }
 0x2bf   : > { %2138 = vst.msk [vmem:[%s3009_s26 + $0x240] sm:$0xff] %vm3011_vm3, %v2224_v55  ;;  %v1556_v56 = vpop.f32.mrb[74].mxu1 }
 0x2c0   : > { %v1558_v57 = vpop.f32.mrb[75].mxu1 }
 0x2c1   : > { %v2225_v58 = vpack.c.bf16 %v1558_v57, %v1556_v56 }
 0x2c3   : > { %2139 = vst.msk [vmem:[%s3009_s26 + $0x248] sm:$0xff] %vm3011_vm3, %v2225_v58  ;;  %v1562_v59 = vpop.f32.mrb[76].mxu1 }
 0x2c4   : > { %v1564_v60 = vpop.f32.mrb[77].mxu1 }
 0x2c5   : > { %v2226_v61 = vpack.c.bf16 %v1564_v60, %v1562_v59 }
 0x2c7   : > { %2140 = vst.msk [vmem:[%s3009_s26 + $0x250] sm:$0xff] %vm3011_vm3, %v2226_v61  ;;  %v1568_v62 = vpop.f32.mrb[78].mxu1 }
 0x2c8   : > { %v1570_v63 = vpop.f32.mrb[79].mxu1 }
 0x2c9   : > { %v2227_v1 = vpack.c.bf16 %v1570_v63, %v1568_v62 }
 0x2cb   : > { %2141 = vst.msk [vmem:[%s3009_s26 + $0x258] sm:$0xff] %vm3011_vm3, %v2227_v1  ;;  %v1574_v2 = vpop.f32.mrb[80].mxu1 }
 0x2cc   : > { %v1576_v3 = vpop.f32.mrb[81].mxu1 }
 0x2cd   : > { %v2228_v4 = vpack.c.bf16 %v1576_v3, %v1574_v2 }
 0x2cf   : > { %2142 = vst.msk [vmem:[%s3009_s26 + $0x260] sm:$0xff] %vm3011_vm3, %v2228_v4  ;;  %v1580_v5 = vpop.f32.mrb[82].mxu1 }
 0x2d0   : > { %v1582_v6 = vpop.f32.mrb[83].mxu1 }
 0x2d1   : > { %v2229_v7 = vpack.c.bf16 %v1582_v6, %v1580_v5 }
 0x2d3   : > { %2143 = vst.msk [vmem:[%s3009_s26 + $0x268] sm:$0xff] %vm3011_vm3, %v2229_v7  ;;  %v1586_v8 = vpop.f32.mrb[84].mxu1 }
 0x2d4   : > { %v1588_v9 = vpop.f32.mrb[85].mxu1 }
 0x2d5   : > { %v2230_v10 = vpack.c.bf16 %v1588_v9, %v1586_v8 }
 0x2d7   : > { %2144 = vst.msk [vmem:[%s3009_s26 + $0x270] sm:$0xff] %vm3011_vm3, %v2230_v10  ;;  %v1592_v11 = vpop.f32.mrb[86].mxu1 }
 0x2d8   : > { %v1594_v12 = vpop.f32.mrb[87].mxu1 }
 0x2d9   : > { %v2231_v13 = vpack.c.bf16 %v1594_v12, %v1592_v11 }
 0x2db   : > { %2145 = vst.msk [vmem:[%s3009_s26 + $0x278] sm:$0xff] %vm3011_vm3, %v2231_v13  ;;  %v1598_v14 = vpop.f32.mrb[88].mxu1 }
 0x2dc   : > { %v1600_v15 = vpop.f32.mrb[89].mxu1 }
 0x2dd   : > { %v2232_v16 = vpack.c.bf16 %v1600_v15, %v1598_v14 }
 0x2df   : > { %2146 = vst.msk [vmem:[%s3009_s26 + $0x280] sm:$0xff] %vm3011_vm3, %v2232_v16  ;;  %v1604_v17 = vpop.f32.mrb[90].mxu1 }
 0x2e0   : > { %v1606_v18 = vpop.f32.mrb[91].mxu1 }
 0x2e1   : > { %v2233_v19 = vpack.c.bf16 %v1606_v18, %v1604_v17 }
 0x2e3   : > { %2147 = vst.msk [vmem:[%s3009_s26 + $0x288] sm:$0xff] %vm3011_vm3, %v2233_v19  ;;  %v1610_v20 = vpop.f32.mrb[92].mxu1 }
 0x2e4   : > { %v1612_v21 = vpop.f32.mrb[93].mxu1 }
 0x2e5   : > { %v2234_v22 = vpack.c.bf16 %v1612_v21, %v1610_v20 }
 0x2e7   : > { %2148 = vst.msk [vmem:[%s3009_s26 + $0x290] sm:$0xff] %vm3011_vm3, %v2234_v22  ;;  %v1616_v23 = vpop.f32.mrb[94].mxu1 }
 0x2e8   : > { %v1618_v24 = vpop.f32.mrb[95].mxu1 }
 0x2e9   : > { %v2235_v25 = vpack.c.bf16 %v1618_v24, %v1616_v23 }
 0x2eb   : > { %2149 = vst.msk [vmem:[%s3009_s26 + $0x298] sm:$0xff] %vm3011_vm3, %v2235_v25 }
 0x2ec PF: > { %p14_p9 = scmp.ge.s32.totalorder %s2591_s29, 4   ;;  %s3297_s12 = smov %s2457_s13 }
 0x2ed   : > { %s3298_s13 = smov %s2461_s14  ;;  %s3299_s14 = smov %s2600_s5 }
 0x2ee   : > { %s3300_s15 = smov %s2591_s29  ;;  %16 = sbr.rel (!%p14_p9) target bundleno = 4 (0x4), region = 82 }
 0x2f5   :  { %1839 = vsyncpa [#allocation3], 1 }
 0x2f6   :  { %1841 = vsyncpa [#allocation3 + $0x1], 1 }
 0x2f7   :  { %1842 = vsyncpa [#allocation5], 1 }

// kernel: new_model_forward.5
= control target key start
LH: loop header
LB: loop body
LE: loop exit
PB: predicated region body
PF: predicated region fallthrough
CT: control target
= control target key end

     0   :  { %10 = vsyncpa [#allocation3], 0  ;;  %s3402_s0 = inlined_call_operand.vmem [shape: bf16[2,196,768], index: 0, kind: input, shape index: {}]   ;;  %s3403_s1 = inlined_call_operand.vmem [shape: bf16[768,128], index: 1, kind: input, shape index: {}]   ;;  %s3404_s2 = inlined_call_operand.vmem [shape: f32[1,128], index: 2, kind: input, shape index: {}]   ;;  %s3405_s3 = inlined_call_operand.vmem [shape: f32[128,10], index: 3, kind: input, shape index: {}]   ;;  %s3406_s4 = inlined_call_operand.vmem [shape: f32[1,10], index: 4, kind: input, shape index: {}]   ;;  %s3407_s5 = inlined_call_operand.hbm [shape: f32[2,1,10], index: 5, kind: output, shape index: {}]  }
   0x1   :  { %12 = vsyncpa [#allocation3 + $0x1], 0  ;;  %s2756_s18 = smov 0   ;;  %s2758_s19 = smov 0  }
   0x2   :  { %s2760_s20 = smov 0   ;;  %s2762_s21 = smov 0  }
   0x3 LB: > { %s2777_s22 = sadd.s32 4294967295, %s2720_s21   ;;  %s1894_s23 = sadd.s32 4294967294, %s2720_s21   ;;  %s2720_s21 = sphi %s2762_s21, %s3413_s21   ;;  %s2716_s20 = sphi %s2760_s20, %s3412_s20   ;;  %s2712_s19 = sphi %s2758_s19, %s3411_s19   ;;  %s2708_s18 = sphi %s2756_s18, %s3410_s18  }
   0x4   : > { %s2781_s24 = sadd.s32 1, %s2720_s21   ;;  %s135_s25 = sadd.s32 1, %s2716_s20 }
   0x5   : > { %s132_s26 = ssub.s32 %s2720_s21, %s2781_s24  ;;  %p145_p0 = scmp.ne.s32.totalorder %s2716_s20, %s2712_s19 }
   0x6   : > { %p133_p1 = scmp.eq.s32.totalorder %s132_s26, 0  ;;  %p146_p2 = scmp.eq.s32.totalorder %s2777_s22, 1 }
   0x7   : > { %p151_p3 = scmp.ne.s32.totalorder %s2712_s19, %s2708_s18  ;;  %p152_p4 = scmp.eq.s32.totalorder %s1894_s23, 1 }
   0x8   : > { %s2792_s27 = scalar_select %p133_p1, %s2716_s20, %s135_s25  }
   0x9   : > { %p2794_p5 = por %p146_p2, %p145_p0  ;;  %p2798_p6 = por %p152_p4, %p151_p3 }
   0xa   : > { %p1897_p7 = scmp.ge.s32.totalorder %s2720_s21, 1  ;;  %p190_p8 = scmp.lt.s32.totalorder %s2720_s21, 3 }
   0xc   : > { %p191_p9 = pnand %p1897_p7, %p190_p8 }
   0xd   : > { %v2446_v0 = vld [vmem:[%s3403_s1 + $0x40] sm:$0xff] (!%p191_p9)   ;;  %v2448_v2 = vld [vmem:[%s3403_s1 + $0x48] sm:$0xff] (!%p191_p9)   ;;  %p217_p10 = scmp.lt.s32.totalorder (!%p191_p9), %s2777_s22, 1  ;;  %v2450_v4 = vld [vmem:[%s3403_s1 + $0x50] sm:$0xff] (!%p191_p9)   ;;  %vm2723_vm0 = vmmov (!%p191_p9), 0   ;;  %vm1726_vm1 = vcmask (!%p191_p9), 1043456  }
   0xe   : > { %194 = sbr.rel (%p191_p9) target bundleno = 687 (0x2af), region = 40  ;;  %v2447_v1 = vld [vmem:[%s3403_s1] sm:$0xff] (!%p191_p9)   ;;  %2029 = vmatprep.subr.bf16.mxu0 (!%p191_p9), %v2446_v0  ;;  %2387 = vmatprep.subr.bf16.mxu1 (!%p191_p9), %v2446_v0  ;;  %v2449_v3 = vld [vmem:[%s3403_s1 + $0x8] sm:$0xff] (!%p191_p9)   ;;  %v2451_v5 = vld [vmem:[%s3403_s1 + $0x10] sm:$0xff] (!%p191_p9)   ;;  %s215_s16 = sand.u32 (!%p191_p9), 1, %s2712_s19   ;;  %vm1824_vm2 = vcmask (!%p191_p9), 73728  }
   0xf   : > { %2030 = vmatpush3.bf16.msra.mxu0 (!%p191_p9), %v2447_v1  ;;  %2395 = vmatpush3.bf16.msra.mxu1 (!%p191_p9), %v2447_v1  ;;  %v2452_v6 = vld [vmem:[%s3403_s1 + $0x58] sm:$0xff] (!%p191_p9)   ;;  %v2454_v8 = vld [vmem:[%s3403_s1 + $0x60] sm:$0xff] (!%p191_p9)   ;;  %v2456_v10 = vld [vmem:[%s3403_s1 + $0x68] sm:$0xff] (!%p191_p9)   ;;  %s2026_s25 = sshll.u32 (!%p191_p9), %s2777_s22, 4  ;;  %s1827_s9 = scalar_lea.sflag (!%p191_p9), [#allocation3], %s215_s16 }
  0x10   : > { %2031 = vmatprep.subr.bf16.mxu0 (!%p191_p9), %v2448_v2  ;;  %2388 = vmatprep.subr.bf16.mxu1 (!%p191_p9), %v2448_v2  ;;  %v2453_v7 = vld [vmem:[%s3403_s1 + $0x18] sm:$0xff] (!%p191_p9)   ;;  %v2455_v9 = vld [vmem:[%s3403_s1 + $0x20] sm:$0xff] (!%p191_p9)   ;;  %v2457_v13 = vld [vmem:[%s3403_s1 + $0x28] sm:$0xff] (!%p191_p9)   ;;  %s3360_s8 = scalar_lea.hbm (!%p191_p9), %s3407_s5, %s2026_s25 }
  0x11   : > { %v2458_v14 = vld [vmem:[%s3403_s1 + $0x70] sm:$0xff] (!%p191_p9)   ;;  %v2460_v16 = vld [vmem:[%s3403_s1 + $0x78] sm:$0xff] (!%p191_p9)   ;;  %v2468_v18 = vld [vmem:[%s3403_s1 + $0x140] sm:$0xff] (!%p191_p9)  }
  0x12   : > { %v2459_v15 = vld [vmem:[%s3403_s1 + $0x30] sm:$0xff] (!%p191_p9)   ;;  %v2461_v17 = vld [vmem:[%s3403_s1 + $0x38] sm:$0xff] (!%p191_p9)   ;;  %v2470_v21 = vld [vmem:[%s3403_s1 + $0xc0] sm:$0xff] (!%p191_p9)  }
  0x13   : > { %2032 = vmatpush3.bf16.msra.mxu0 (!%p191_p9), %v2449_v3  ;;  %2396 = vmatpush3.bf16.msra.mxu1 (!%p191_p9), %v2449_v3  ;;  %v2469_v22 = vld [vmem:[%s3403_s1 + $0x100] sm:$0xff] (!%p191_p9)   ;;  %v2476_v26 = vld [vmem:[%s3403_s1 + $0x148] sm:$0xff] (!%p191_p9)   ;;  %v2482_v32 = vld [vmem:[%s3403_s1 + $0x150] sm:$0xff] (!%p191_p9)  }
  0x14   : > { %2033 = vmatprep.subr.bf16.mxu0 (!%p191_p9), %v2450_v4  ;;  %2389 = vmatprep.subr.bf16.mxu1 (!%p191_p9), %v2450_v4  ;;  %v2475_v25 = vld [vmem:[%s3403_s1 + $0x80] sm:$0xff] (!%p191_p9)   ;;  %v2480_v27 = vld [vmem:[%s3403_s1 + $0xc8] sm:$0xff] (!%p191_p9)   ;;  %v2490_v34 = vld [vmem:[%s3403_s1 + $0xd0] sm:$0xff] (!%p191_p9)  }
  0x15   : > { %s218_s15 = scalar_select %p217_p10, %s2777_s22, 1  ;;  %v2479_v28 = vld [vmem:[%s3403_s1 + $0x108] sm:$0xff]   ;;  %v2487_v36 = vld [vmem:[%s3403_s1 + $0x110] sm:$0xff]   ;;  %v2492_v38 = vld [vmem:[%s3403_s1 + $0x158] sm:$0xff]  }
  0x16   : > { %v2481_v29 = vld [vmem:[%s3403_s1 + $0x88] sm:$0xff]   ;;  %v2491_v37 = vld [vmem:[%s3403_s1 + $0x90] sm:$0xff]   ;;  %v2500_v39 = vld [vmem:[%s3403_s1 + $0xd8] sm:$0xff]   ;;  %s2725_s22 = smov [#allocation2]  }
  0x17   : > { %s2403_s26 = smul.u32 600, %s218_s15  ;;  %2034 = vmatpush3.bf16.msra.mxu0 %v2451_v5  ;;  %2397 = vmatpush3.bf16.msra.mxu1 %v2451_v5  ;;  %v2493_v40 = vld [vmem:[%s3403_s1 + $0x118] sm:$0xff]   ;;  %v2502_v44 = vld [vmem:[%s3403_s1 + $0x160] sm:$0xff]   ;;  %v2512_v50 = vld [vmem:[%s3403_s1 + $0x168] sm:$0xff]   ;;  %s2662_s12 = sshll.u32 %s2725_s22, 4  ;;  %s2663_s12 = int_to_ptr.vmem [resolvable:$false] %s2662_s12 }
  0x18   : > { %2035 = vmatprep.subr.bf16.mxu0 %v2452_v6  ;;  %2390 = vmatprep.subr.bf16.mxu1 %v2452_v6  ;;  %v2501_v41 = vld [vmem:[%s3403_s1 + $0x98] sm:$0xff]   ;;  %v2504_v45 = vld [vmem:[%s3403_s1 + $0xe0] sm:$0xff]   ;;  %v2513_v51 = vld [vmem:[%s3403_s1 + $0xe8] sm:$0xff]   ;;  %s2664_s13 = scalar_lea.vmem %s2663_s12, 32 }
  0x19   : > { %s2836_s11 = scalar_lea.vmem %s3402_s0, %s2403_s26  ;;  %v2503_v48 = vld [vmem:[%s3403_s1 + $0x120] sm:$0xff]   ;;  %v2514_v53 = vld [vmem:[%s3403_s1 + $0x128] sm:$0xff]   ;;  %v2521_v58 = vld [vmem:[%s3403_s1 + $0xf0] sm:$0xff]   ;;  %s216_s26 = scalar_lea.vmem [#allocation2], %s215_s16 }
  0x1a   : > { %v2464_v11 = vld [vmem:[%s2836_s11 + $0x4] ss:$24 sps:$4 sm:$0xff]   ;;  %v2467_v12 = vld [vmem:[%s2836_s11 + $0x154] ss:$24 sps:$4 sm:$0xff]   ;;  %v2462_v19 = vld [vmem:[%s2836_s11] ss:$24 sps:$4 sm:$0xff]  }
  0x1b   : > { %2036 = vmatpush3.bf16.msra.mxu0 %v2453_v7  ;;  %2398 = vmatpush3.bf16.msra.mxu1 %v2453_v7  ;;  %v2465_v20 = vld [vmem:[%s2836_s11 + $0x150] ss:$24 sps:$4 sm:$0xff]   ;;  %v2471_v23 = vld [vmem:[%s2836_s11 + $0x34] ss:$24 sps:$4 sm:$0xff]   ;;  %v2473_v24 = vld [vmem:[%s2836_s11 + $0x184] ss:$24 sps:$4 sm:$0xff]  }
  0x1c   : > { %2037 = vmatprep.subr.bf16.mxu0 %v2454_v8  ;;  %2391 = vmatprep.subr.bf16.mxu1 %v2454_v8  ;;  %v2477_v30 = vld [vmem:[%s2836_s11 + $0x30] ss:$24 sps:$4 sm:$0xff]   ;;  %v2478_v31 = vld [vmem:[%s2836_s11 + $0x180] ss:$24 sps:$4 sm:$0xff]   ;;  %v2483_v33 = vld [vmem:[%s2836_s11 + $0x64] ss:$24 sps:$4 sm:$0xff]  }
  0x1d   : > { %1102 = vmatprep.mubr.bf16.mxu0 %v2464_v11  ;;  %1158 = vmatprep.mubr.bf16.mxu1 %v2467_v12  ;;  %v2485_v35 = vld [vmem:[%s2836_s11 + $0x1b4] ss:$24 sps:$4 sm:$0xff]   ;;  %v2488_v42 = vld [vmem:[%s2836_s11 + $0x60] ss:$24 sps:$4 sm:$0xff]   ;;  %v2489_v43 = vld [vmem:[%s2836_s11 + $0x1b0] ss:$24 sps:$4 sm:$0xff]  }
  0x1e   : > { %v2494_v46 = vld [vmem:[%s2836_s11 + $0x94] ss:$24 sps:$4 sm:$0xff]   ;;  %v2496_v47 = vld [vmem:[%s2836_s11 + $0x1e4] ss:$24 sps:$4 sm:$0xff]   ;;  %v2498_v52 = vld [vmem:[%s2836_s11 + $0x90] ss:$24 sps:$4 sm:$0xff]  }
  0x1f   : > { %2038 = vmatpush3.bf16.msra.mxu0 %v2455_v9  ;;  %2399 = vmatpush3.bf16.msra.mxu1 %v2455_v9  ;;  %v2509_v49 = vld [vmem:[%s3403_s1 + $0xa0] sm:$0xff]   ;;  %v2515_v54 = vld [vmem:[%s3403_s1 + $0xa8] sm:$0xff]   ;;  %v2522_v59 = vld [vmem:[%s3403_s1 + $0xb0] sm:$0xff]   ;;  %s1839_s30 = sshll.u32 %s216_s26, 4  ;;  %s3362_s30 = int_to_ptr.vmem [resolvable:$true] %s1839_s30 }
  0x20   : > { %2039 = vmatprep.subr.bf16.mxu0 %v2456_v10  ;;  %2392 = vmatprep.subr.bf16.mxu1 %v2456_v10  ;;  %v2499_v55 = vld [vmem:[%s2836_s11 + $0x1e0] ss:$24 sps:$4 sm:$0xff]   ;;  %v2505_v56 = vld [vmem:[%s2836_s11 + $0xc4] ss:$24 sps:$4 sm:$0xff]   ;;  %v2507_v57 = vld [vmem:[%s2836_s11 + $0x214] ss:$24 sps:$4 sm:$0xff]   ;;  %p2665_p0 = scmp.lt.s32.totalorder %s3362_s30, %s2663_s12 }
  0x21   : > { %v2523_v60 = vld [vmem:[%s3403_s1 + $0x170] sm:$0xff]   ;;  %v295_v61 = vld [vmem:[%s2836_s11 + $0x240] sm:$0x33]  ;;  %v2525_v63 = vld [vmem:[%s3403_s1 + $0xf8] sm:$0xff]   ;;  %s2658_s10 = scalar_lea.vmem %s3362_s30, 16 }
  0x22   : > { %v2524_v62 = vld [vmem:[%s3403_s1 + $0x130] sm:$0xff]   ;;  %v2526_v0 = vld [vmem:[%s3403_s1 + $0xb8] sm:$0xff]   ;;  %v1973_v4 = vcombine.high %v295_v61, %v295_v61  ;;  %v1972_v8 = vcombine.low %v295_v61, %v295_v61  ;;  %v2531_v10 = vld [vmem:[%s2836_s11 + $0xc] ss:$24 sps:$4 sm:$0xff]   ;;  %p2659_p11 = scmp.ne.s32.totalorder %s3362_s30, %s2658_s10  ;;  %p2666_p1 = scmp.lt.s32.totalorder %s2664_s13, %s2658_s10 }
  0x23   : > { %2040 = vmatpush3.bf16.msra.mxu0 %v2457_v13  ;;  %2400 = vmatpush3.bf16.msra.mxu1 %v2457_v13  ;;  %v2510_v1 = vld [vmem:[%s2836_s11 + $0xc0] ss:$24 sps:$4 sm:$0xff]   ;;  %v2511_v2 = vld [vmem:[%s2836_s11 + $0x210] ss:$24 sps:$4 sm:$0xff]   ;;  %v2516_v3 = vld [vmem:[%s2836_s11 + $0xf4] ss:$24 sps:$4 sm:$0xff]  }
  0x24   : > { %2041 = vmatprep.subr.bf16.mxu0 %v2458_v14  ;;  %2393 = vmatprep.subr.bf16.mxu1 %v2458_v14  ;;  %v2533_v5 = vld [vmem:[%s3403_s1 + $0x178] sm:$0xff]   ;;  %v2519_v7 = vld [vmem:[%s2836_s11 + $0xf0] ss:$24 sps:$4 sm:$0xff]   ;;  %v2539_v14 = vld [vmem:[%s2836_s11 + $0x14] ss:$24 sps:$4 sm:$0xff]   ;;  %p2660_p12 = pnand %p2659_p11, %p2794_p5  ;;  %p2667_p2 = por %p2666_p1, %p2665_p0 }
  0x25   : > { %v2534_v6 = vld [vmem:[%s3403_s1 + $0x138] sm:$0xff]   ;;  %v2529_v11 = vld [vmem:[%s2836_s11 + $0x8] ss:$24 sps:$4 sm:$0xff]  }
  0x26   : > { %v2527_v9 = vld [vmem:[%s2836_s11 + $0x124] ss:$24 sps:$4 sm:$0xff]   ;;  %v2532_v12 = vld [vmem:[%s2836_s11 + $0x120] ss:$24 sps:$4 sm:$0xff]   ;;  %p2661_p13 = pneg %p2660_p12 }
  0x27   : > { %2042 = vmatpush3.bf16.msra.mxu0 %v2459_v15  ;;  %2401 = vmatpush3.bf16.msra.mxu1 %v2459_v15  ;;  %v2535_v13 = vld [vmem:[%s2836_s11 + $0x3c] ss:$24 sps:$4 sm:$0xff]   ;;  %v2537_v15 = vld [vmem:[%s2836_s11 + $0x10] ss:$24 sps:$4 sm:$0xff]  }
  0x28   : > { %2043 = vmatprep.subr.bf16.mxu0 %v2460_v16  ;;  %2394 = vmatprep.subr.bf16.mxu1 %v2460_v16  ;;  %v2540_v16 = vld [vmem:[%s2836_s11 + $0x38] ss:$24 sps:$4 sm:$0xff]   ;;  %p2668_p3 = pnand %p2667_p2, %p2661_p13 }
  0x2b   : > { %2044 = vmatpush3.bf16.msra.mxu0 %v2461_v17  ;;  %2402 = vmatpush3.bf16.msra.mxu1 %v2461_v17  ;;  %v2541_v17 = vld [vmem:[%s2836_s11 + $0x6c] ss:$24 sps:$4 sm:$0xff]  }
  0x2c   : > { %2217 = vmatprep.subr.bf16.mxu0 %v2468_v18  ;;  %2123 = vmatprep.subr.bf16.mxu1 %v2470_v21  ;;  %v2543_v18 = vld [vmem:[%s2836_s11 + $0x44] ss:$24 sps:$4 sm:$0xff]  }
  0x2d   : > { %v2547_v21 = vld [vmem:[%s2836_s11 + $0x9c] ss:$24 sps:$4 sm:$0xff]  }
  0x2e   : > { %1103 = vmatmul.mubr.bf16.vlgmr.msra.gmra.mrb[0].mxu0 %v2462_v19  ;;  %1159 = vmatmul.mubr.bf16.vlgmr.msra.gmra.mrb[0].mxu1 %v2465_v20  ;;  %v2545_v19 = vld [vmem:[%s2836_s11 + $0x68] ss:$24 sps:$4 sm:$0xff]  }
  0x2f   : > { %2218 = vmatpush3.bf16.msra.mxu0 %v2469_v22  ;;  %1110 = vmatprep.mubr.bf16.mxu0 %v2471_v23  ;;  %v2546_v20 = vld [vmem:[%s2836_s11 + $0x40] ss:$24 sps:$4 sm:$0xff]   ;;  %v2549_v22 = vld [vmem:[%s2836_s11 + $0x74] ss:$24 sps:$4 sm:$0xff]  }
  0x30   : > { %1166 = vmatprep.mubr.bf16.mxu1 %v2473_v24  ;;  %2124 = vmatpush3.bf16.msra.mxu1 %v2475_v25  ;;  %v2551_v23 = vld [vmem:[%s2836_s11 + $0x98] ss:$24 sps:$4 sm:$0xff]   ;;  %v2553_v25 = vld [vmem:[%s2836_s11 + $0xcc] ss:$24 sps:$4 sm:$0xff]  }
  0x31   : > { %2219 = vmatprep.subr.bf16.mxu0 %v2476_v26  ;;  %2125 = vmatprep.subr.bf16.mxu1 %v2480_v27  ;;  %v2552_v24 = vld [vmem:[%s2836_s11 + $0x70] ss:$24 sps:$4 sm:$0xff]   ;;  %v2555_v26 = vld [vmem:[%s2836_s11 + $0xa4] ss:$24 sps:$4 sm:$0xff]  }
  0x32   : > { %v2557_v27 = vld [vmem:[%s2836_s11 + $0xc8] ss:$24 sps:$4 sm:$0xff]  }
  0x33   : > { %2220 = vmatpush3.bf16.msra.mxu0 %v2479_v28  ;;  %v2558_v28 = vld [vmem:[%s2836_s11 + $0xa0] ss:$24 sps:$4 sm:$0xff]  }
  0x34   : > { %2126 = vmatpush3.bf16.msra.mxu1 %v2481_v29  ;;  %2221 = vmatprep.subr.bf16.mxu0 %v2482_v32  ;;  %v2559_v29 = vld [vmem:[%s2836_s11 + $0xfc] ss:$24 sps:$4 sm:$0xff]   ;;  %v2564_v32 = vld [vmem:[%s2836_s11 + $0xd0] ss:$24 sps:$4 sm:$0xff]  }
  0x35   : > { %2127 = vmatprep.subr.bf16.mxu1 %v2490_v34  ;;  %v2567_v34 = vld [vmem:[%s2836_s11 + $0x104] ss:$24 sps:$4 sm:$0xff]  }
  0x36   : > { %1111 = vmatmul.mubr.bf16.gmra.mrb[4].mxu0 %v2477_v30  ;;  %1167 = vmatmul.mubr.bf16.gmra.mrb[4].mxu1 %v2478_v31  ;;  %v2561_v30 = vld [vmem:[%s2836_s11 + $0xd4] ss:$24 sps:$4 sm:$0xff]   ;;  %v2563_v31 = vld [vmem:[%s2836_s11 + $0xf8] ss:$24 sps:$4 sm:$0xff]  }
  0x37   : > { %1118 = vmatprep.mubr.bf16.mxu0 %v2483_v33  ;;  %1174 = vmatprep.mubr.bf16.mxu1 %v2485_v35  ;;  %v2565_v33 = vld [vmem:[%s2836_s11 + $0x12c] ss:$24 sps:$4 sm:$0xff]   ;;  %v2569_v35 = vld [vmem:[%s2836_s11 + $0x128] ss:$24 sps:$4 sm:$0xff]  }
  0x38   : > { %2222 = vmatpush3.bf16.msra.mxu0 %v2487_v36  ;;  %2128 = vmatpush3.bf16.msra.mxu1 %v2491_v37  ;;  %v2570_v36 = vld [vmem:[%s2836_s11 + $0x100] ss:$24 sps:$4 sm:$0xff]   ;;  %v2571_v37 = vld [vmem:[%s2836_s11 + $0x15c] ss:$24 sps:$4 sm:$0xff]  }
  0x39   : > { %2223 = vmatprep.subr.bf16.mxu0 %v2492_v38  ;;  %2129 = vmatprep.subr.bf16.mxu1 %v2500_v39  ;;  %v2573_v38 = vld [vmem:[%s2836_s11 + $0x134] ss:$24 sps:$4 sm:$0xff]   ;;  %v2575_v39 = vld [vmem:[%s2836_s11 + $0x158] ss:$24 sps:$4 sm:$0xff]  }
  0x3c   : > { %2224 = vmatpush3.bf16.msra.mxu0 %v2493_v40  ;;  %2130 = vmatpush3.bf16.msra.mxu1 %v2501_v41  ;;  %v2576_v40 = vld [vmem:[%s2836_s11 + $0x130] ss:$24 sps:$4 sm:$0xff]   ;;  %v2577_v41 = vld [vmem:[%s2836_s11 + $0x18c] ss:$24 sps:$4 sm:$0xff]  }
  0x3d   : > { %2225 = vmatprep.subr.bf16.mxu0 %v2502_v44  ;;  %2131 = vmatprep.subr.bf16.mxu1 %v2504_v45  ;;  %v2582_v44 = vld [vmem:[%s2836_s11 + $0x160] ss:$24 sps:$4 sm:$0xff]   ;;  %v2583_v45 = vld [vmem:[%s2836_s11 + $0x1bc] ss:$24 sps:$4 sm:$0xff]  }
  0x3e   : > { %1119 = vmatmul.mubr.bf16.gmra.mrb[8].mxu0 %v2488_v42  ;;  %1175 = vmatmul.mubr.bf16.gmra.mrb[8].mxu1 %v2489_v43  ;;  %v2579_v42 = vld [vmem:[%s2836_s11 + $0x164] ss:$24 sps:$4 sm:$0xff]   ;;  %v2581_v43 = vld [vmem:[%s2836_s11 + $0x188] ss:$24 sps:$4 sm:$0xff]  }
  0x3f   : > { %1126 = vmatprep.mubr.bf16.mxu0 %v2494_v46  ;;  %1182 = vmatprep.mubr.bf16.mxu1 %v2496_v47  ;;  %v2585_v46 = vld [vmem:[%s2836_s11 + $0x194] ss:$24 sps:$4 sm:$0xff]   ;;  %v2587_v47 = vld [vmem:[%s2836_s11 + $0x1b8] ss:$24 sps:$4 sm:$0xff]  }
  0x40   : > { %2226 = vmatpush3.bf16.msra.mxu0 %v2503_v48  ;;  %2132 = vmatpush3.bf16.msra.mxu1 %v2509_v49  ;;  %v2588_v48 = vld [vmem:[%s2836_s11 + $0x190] ss:$24 sps:$4 sm:$0xff]   ;;  %v2589_v49 = vld [vmem:[%s2836_s11 + $0x1ec] ss:$24 sps:$4 sm:$0xff]  }
  0x41   : > { %2227 = vmatprep.subr.bf16.mxu0 %v2512_v50  ;;  %2133 = vmatprep.subr.bf16.mxu1 %v2513_v51  ;;  %v2591_v50 = vld [vmem:[%s2836_s11 + $0x1c4] ss:$24 sps:$4 sm:$0xff]   ;;  %v2593_v51 = vld [vmem:[%s2836_s11 + $0x1e8] ss:$24 sps:$4 sm:$0xff]  }
  0x44   : > { %2228 = vmatpush3.bf16.msra.mxu0 %v2514_v53  ;;  %2134 = vmatpush3.bf16.msra.mxu1 %v2515_v54  ;;  %v2595_v53 = vld [vmem:[%s2836_s11 + $0x21c] ss:$24 sps:$4 sm:$0xff]  }
  0x45   : > { %2135 = vmatprep.subr.bf16.mxu1 %v2521_v58  ;;  %2229 = vmatprep.subr.bf16.mxu0 %v2523_v60  ;;  %v2597_v54 = vld [vmem:[%s2836_s11 + $0x1f4] ss:$24 sps:$4 sm:$0xff]  }
  0x46   : > { %1127 = vmatmul.mubr.bf16.gmra.mrb[12].mxu0 %v2498_v52  ;;  %1183 = vmatmul.mubr.bf16.gmra.mrb[12].mxu1 %v2499_v55  ;;  %v2594_v52 = vld [vmem:[%s2836_s11 + $0x1c0] ss:$24 sps:$4 sm:$0xff]   ;;  %v296_v55 = vld [vmem:[%s2836_s11 + $0x248] sm:$0x33]  ;;  %v297_v60 = vld [vmem:[%s2836_s11 + $0x250] sm:$0x33] }
  0x47   : > { %1134 = vmatprep.mubr.bf16.mxu0 %v2505_v56  ;;  %1190 = vmatprep.mubr.bf16.mxu1 %v2507_v57  ;;  %v2599_v56 = vld [vmem:[%s2836_s11 + $0x218] ss:$24 sps:$4 sm:$0xff]   ;;  %v1975_v58 = vcombine.high %v296_v55, %v296_v55  ;;  %v1974_v61 = vcombine.low %v296_v55, %v296_v55 }
  0x48   : > { %2136 = vmatpush3.bf16.msra.mxu1 %v2522_v59  ;;  %2230 = vmatpush3.bf16.msra.mxu0 %v2524_v62  ;;  %v2600_v57 = vld [vmem:[%s2836_s11 + $0x1f0] ss:$24 sps:$4 sm:$0xff]   ;;  %v2602_v59 = vld [vmem:[%s2836_s11 + $0x224] ss:$24 sps:$4 sm:$0xff]   ;;  %v2605_v62 = vld [vmem:[%s2836_s11 + $0x220] ss:$24 sps:$4 sm:$0xff]  }
  0x49   : > { %2137 = vmatprep.subr.bf16.mxu1 %v2525_v63  ;;  %2231 = vmatprep.subr.bf16.mxu0 %v2533_v5  ;;  %v1977_v63 = vcombine.high %v297_v60, %v297_v60 }
  0x4c   : > { %2138 = vmatpush3.bf16.msra.mxu1 %v2526_v0  ;;  %2232 = vmatpush3.bf16.msra.mxu0 %v2534_v6  ;;  %v1976_v0 = vcombine.low %v297_v60, %v297_v60 }
  0x4e   : > { %1135 = vmatmul.mubr.bf16.gmra.mrb[16].mxu0 %v2510_v1  ;;  %1191 = vmatmul.mubr.bf16.gmra.mrb[16].mxu1 %v2511_v2 }
  0x4f   : > { %1142 = vmatprep.mubr.bf16.mxu0 %v2516_v3  ;;  %1198 = vmatprep.mubr.bf16.mxu1 %v1973_v4 }
  0x56   : > { %1143 = vmatmul.mubr.bf16.gmra.mrb[20].mxu0 %v2519_v7  ;;  %1199 = vmatmul.mubr.bf16.gmra.mrb[20].mxu1 %v1972_v8 }
  0x57   : > { %1150 = vmatprep.mubr.bf16.mxu0 %v2527_v9  ;;  %1238 = vmatprep.mubr.bf16.mxu1 %v2531_v10  ;;  %v2722_v9 = vmov 0.0|0.0  }
  0x58   : > { %2363 = vmatprep.subr.bf16.mxu1 %v2722_v9 }
  0x5e   : > { %1151 = vmatmul.mubr.bf16.gmra.mrb[24].mxu0 %v2532_v12  ;;  %1239 = vmatmul.mubr.bf16.vlgmr.msra.gmra.mrb[24].mxu1 %v2529_v11 }
  0x5f   : > { %1246 = vmatprep.mubr.bf16.mxu1 %v2535_v13  ;;  %1374 = vmatprep.mubr.bf16.mxu0 %v2539_v14  ;;  %v1737_v14 = vld [vmem:[%s3405_s3] sm:$0xff] }
  0x66   : > { %1247 = vmatmul.mubr.bf16.gmra.mrb[28].mxu1 %v2540_v16  ;;  %1375 = vmatmul.mubr.bf16.vlgmr.msra.gmra.mrb[28].mxu0 %v2537_v15  ;;  %v1738_v15 = vld [vmem:[%s3405_s3 + $0x8] sm:$0xff] }
  0x67   : > { %1254 = vmatprep.mubr.bf16.mxu1 %v2541_v17  ;;  %1382 = vmatprep.mubr.bf16.mxu0 %v2543_v18  ;;  %v2364_v16 = vpack.c.bf16 %v1738_v15, %v1737_v14 }
  0x69   : > { %2365 = vmatpush3.bf16.msra.mxu1 %v2364_v16  ;;  %v1743_v16 = vld [vmem:[%s3405_s3 + $0x30] sm:$0xff] }
  0x6a   : > { %2366 = vmatprep.subr.bf16.mxu1 %v2722_v9 }
  0x6e   : > { %1255 = vmatmul.mubr.bf16.gmra.mrb[32].mxu1 %v2545_v19  ;;  %1383 = vmatmul.mubr.bf16.gmra.mrb[32].mxu0 %v2546_v20 }
  0x6f   : > { %1262 = vmatprep.mubr.bf16.mxu1 %v2547_v21  ;;  %1390 = vmatprep.mubr.bf16.mxu0 %v2549_v22 }
  0x76   : > { %1263 = vmatmul.mubr.bf16.gmra.mrb[36].mxu1 %v2551_v23  ;;  %1391 = vmatmul.mubr.bf16.gmra.mrb[36].mxu0 %v2552_v24 }
  0x77   : > { %1270 = vmatprep.mubr.bf16.mxu1 %v2553_v25  ;;  %1398 = vmatprep.mubr.bf16.mxu0 %v2555_v26 }
  0x7e   : > { %1271 = vmatmul.mubr.bf16.gmra.mrb[40].mxu1 %v2557_v27  ;;  %1399 = vmatmul.mubr.bf16.gmra.mrb[40].mxu0 %v2558_v28 }
  0x7f   : > { %1278 = vmatprep.mubr.bf16.mxu1 %v2559_v29  ;;  %1406 = vmatprep.mubr.bf16.mxu0 %v2561_v30  ;;  %v1739_v29 = vld [vmem:[%s3405_s3 + $0x10] sm:$0xff]  ;;  %v1740_v30 = vld [vmem:[%s3405_s3 + $0x18] sm:$0xff] }
  0x86   : > { %1279 = vmatmul.mubr.bf16.gmra.mrb[44].mxu1 %v2563_v31  ;;  %1407 = vmatmul.mubr.bf16.gmra.mrb[44].mxu0 %v2564_v32  ;;  %v2367_v31 = vpack.c.bf16 %v1740_v30, %v1739_v29  ;;  %v3108_v30 = vld [vmem:[%s3404_s2] ss:$0 sm:$0xff] }
  0x87   : > { %1286 = vmatprep.mubr.bf16.mxu1 %v2565_v33  ;;  %1414 = vmatprep.mubr.bf16.mxu0 %v2567_v34 }
  0x88   : > { %2368 = vmatpush3.bf16.msra.mxu1 %v2367_v31 }
  0x89   : > { %2369 = vmatprep.subr.bf16.mxu1 %v2722_v9 }
  0x8e   : > { %1287 = vmatmul.mubr.bf16.gmra.mrb[48].mxu1 %v2569_v35  ;;  %1415 = vmatmul.mubr.bf16.gmra.mrb[48].mxu0 %v2570_v36 }
  0x8f   : > { %1294 = vmatprep.mubr.bf16.mxu1 %v2571_v37  ;;  %1422 = vmatprep.mubr.bf16.mxu0 %v2573_v38 }
  0x96   : > { %1295 = vmatmul.mubr.bf16.gmra.mrb[52].mxu1 %v2575_v39  ;;  %1423 = vmatmul.mubr.bf16.gmra.mrb[52].mxu0 %v2576_v40 }
  0x97   : > { %1302 = vmatprep.mubr.bf16.mxu1 %v2577_v41  ;;  %1430 = vmatprep.mubr.bf16.mxu0 %v2579_v42 }
  0x9e   : > { %1303 = vmatmul.mubr.bf16.gmra.mrb[56].mxu1 %v2581_v43  ;;  %1431 = vmatmul.mubr.bf16.gmra.mrb[56].mxu0 %v2582_v44 }
  0x9f   : > { %1310 = vmatprep.mubr.bf16.mxu1 %v2583_v45  ;;  %1438 = vmatprep.mubr.bf16.mxu0 %v2585_v46 }
  0xa6   : > { %1311 = vmatmul.mubr.bf16.gmra.mrb[60].mxu1 %v2587_v47  ;;  %1439 = vmatmul.mubr.bf16.gmra.mrb[60].mxu0 %v2588_v48 }
  0xa7   : > { %1318 = vmatprep.mubr.bf16.mxu1 %v2589_v49  ;;  %1446 = vmatprep.mubr.bf16.mxu0 %v2591_v50 }
  0xae   : > { %1319 = vmatmul.mubr.bf16.gmra.mrb[64].mxu1 %v2593_v51  ;;  %1447 = vmatmul.mubr.bf16.gmra.mrb[64].mxu0 %v2594_v52 }
  0xaf   : > { %1326 = vmatprep.mubr.bf16.mxu1 %v2595_v53  ;;  %1454 = vmatprep.mubr.bf16.mxu0 %v2597_v54 }
  0xb6   : > { %1327 = vmatmul.mubr.bf16.gmra.mrb[68].mxu1 %v2599_v56  ;;  %1455 = vmatmul.mubr.bf16.gmra.mrb[68].mxu0 %v2600_v57  ;;  %v1741_v56 = vld [vmem:[%s3405_s3 + $0x20] sm:$0xff]  ;;  %v1742_v57 = vld [vmem:[%s3405_s3 + $0x28] sm:$0xff] }
  0xb7   : > { %1334 = vmatprep.mubr.bf16.mxu1 %v1975_v58  ;;  %1462 = vmatprep.mubr.bf16.mxu0 %v2602_v59  ;;  %v2370_v58 = vpack.c.bf16 %v1742_v57, %v1741_v56 }
  0xb9   : > { %2371 = vmatpush3.bf16.msra.mxu1 %v2370_v58 }
  0xba   : > { %2372 = vmatprep.subr.bf16.mxu1 %v2722_v9 }
  0xbe   : > { %1335 = vmatmul.mubr.bf16.gmra.mrb[72].mxu1 %v1974_v61  ;;  %1463 = vmatmul.mubr.bf16.gmra.mrb[72].mxu0 %v2605_v62 }
  0xbf   : > { %1470 = vmatprep.mubr.bf16.mxu0 %v1977_v63 }
  0xc6   : > { %1471 = vmatmul.mubr.bf16.gmra.mrb[76].mxu0 %v1976_v0 }
 0x101   : > { %v2045_v1 = vpop.f32.mrb[0].mxu0  ;;  %v2087_v2 = vpop.f32.mrb[0].mxu1 }
 0x102   : > { %v2046_v3 = vpop.f32.mrb[1].mxu0  ;;  %v2088_v4 = vpop.f32.mrb[1].mxu1 }
 0x103   : > { %v3030_v5 = vadd.f32 %v2046_v3, %v2045_v1  ;;  %v2048_v6 = vpop.f32.mrb[2].mxu0  ;;  %v3032_v7 = vadd.f32 %v2088_v4, %v2087_v2  ;;  %v2090_v8 = vpop.f32.mrb[2].mxu1 }
 0x104   : > { %v2049_v10 = vpop.f32.mrb[3].mxu0  ;;  %v2091_v11 = vpop.f32.mrb[3].mxu1 }
 0x105   : > { %v3035_v12 = vadd.f32 %v2049_v10, %v2048_v6  ;;  %v3037_v13 = vadd.f32 %v2091_v11, %v2090_v8 }
 0x109   : > { %v2051_v17 = vpop.f32.mrb[4].mxu0  ;;  %v2093_v18 = vpop.f32.mrb[4].mxu1 }
 0x10a   : > { %v2052_v19 = vpop.f32.mrb[5].mxu0  ;;  %v2094_v20 = vpop.f32.mrb[5].mxu1 }
 0x10b   : > { %v3046_v21 = vadd.f32 %v2052_v19, %v2051_v17  ;;  %v2054_v22 = vpop.f32.mrb[6].mxu0  ;;  %v3048_v23 = vadd.f32 %v2094_v20, %v2093_v18  ;;  %v2096_v24 = vpop.f32.mrb[6].mxu1  ;;  %v1744_v17 = vld [vmem:[%s3405_s3 + $0x38] sm:$0xff] }
 0x10c   : > { %v2055_v25 = vpop.f32.mrb[7].mxu0  ;;  %v2097_v26 = vpop.f32.mrb[7].mxu1 }
 0x10d   : > { %v3050_v27 = vadd.f32 %v2055_v25, %v2054_v22  ;;  %v3052_v28 = vadd.f32 %v2097_v26, %v2096_v24  ;;  %v2373_v24 = vpack.c.bf16 %v1744_v17, %v1743_v16  ;;  %v1747_v17 = vld [vmem:[%s3405_s3 + $0x50] sm:$0xff] }
 0x10f   : > { %2374 = vmatpush3.bf16.msra.mxu1 %v2373_v24 }
 0x110   : > { %2375 = vmatprep.subr.bf16.mxu1 %v2722_v9 }
 0x111   : > { %v2057_v32 = vpop.f32.mrb[8].mxu0  ;;  %v2099_v33 = vpop.f32.mrb[8].mxu1 }
 0x112   : > { %v2058_v34 = vpop.f32.mrb[9].mxu0  ;;  %v2100_v35 = vpop.f32.mrb[9].mxu1 }
 0x113   : > { %v3061_v36 = vadd.f32 %v2058_v34, %v2057_v32  ;;  %v2060_v37 = vpop.f32.mrb[10].mxu0  ;;  %v3063_v38 = vadd.f32 %v2100_v35, %v2099_v33  ;;  %v2102_v39 = vpop.f32.mrb[10].mxu1  ;;  %v1105_v35 = vadd.f32 %v3030_v5, %v3108_v30  ;;  %v1746_v5 = vld [vmem:[%s3405_s3 + $0x48] sm:$0xff] }
 0x114   : > { %v2061_v40 = vpop.f32.mrb[11].mxu0  ;;  %v2103_v41 = vpop.f32.mrb[11].mxu1 }
 0x115   : > { %v3065_v42 = vadd.f32 %v2061_v40, %v2060_v37  ;;  %v3067_v43 = vadd.f32 %v2103_v41, %v2102_v39 }
 0x119   : > { %v2063_v44 = vpop.f32.mrb[12].mxu0  ;;  %v2105_v45 = vpop.f32.mrb[12].mxu1 }
 0x11a   : > { %v2064_v46 = vpop.f32.mrb[13].mxu0  ;;  %v2106_v47 = vpop.f32.mrb[13].mxu1 }
 0x11b   : > { %v3069_v48 = vadd.f32 %v2064_v46, %v2063_v44  ;;  %v2066_v49 = vpop.f32.mrb[14].mxu0  ;;  %v3071_v50 = vadd.f32 %v2106_v47, %v2105_v45  ;;  %v2108_v51 = vpop.f32.mrb[14].mxu1  ;;  %v1108_v46 = vadd.f32 %v3035_v12, %v3108_v30 }
 0x11c   : > { %v2067_v52 = vpop.f32.mrb[15].mxu0  ;;  %v2109_v53 = vpop.f32.mrb[15].mxu1 }
 0x11d   : > { %v3073_v54 = vadd.f32 %v2067_v52, %v2066_v49  ;;  %v3075_v55 = vadd.f32 %v2109_v53, %v2108_v51  ;;  %v1745_v52 = vld [vmem:[%s3405_s3 + $0x40] sm:$0xff] }
 0x11e   : > { %v2376_v53 = vpack.c.bf16 %v1746_v5, %v1745_v52 }
 0x120   : > { %2377 = vmatpush3.bf16.msra.mxu1 %v2376_v53 }
 0x121   : > { %v2069_v59 = vpop.f32.mrb[16].mxu0  ;;  %v2111_v60 = vpop.f32.mrb[16].mxu1  ;;  %2378 = vmatprep.subr.bf16.mxu1 %v2722_v9 }
 0x122   : > { %v2070_v61 = vpop.f32.mrb[17].mxu0  ;;  %v2112_v62 = vpop.f32.mrb[17].mxu1 }
 0x123   : > { %v3084_v63 = vadd.f32 %v2070_v61, %v2069_v59  ;;  %v2072_v0 = vpop.f32.mrb[18].mxu0  ;;  %v3086_v1 = vadd.f32 %v2112_v62, %v2111_v60  ;;  %v2114_v2 = vpop.f32.mrb[18].mxu1  ;;  %v1113_v60 = vadd.f32 %v3046_v21, %v3108_v30  ;;  %v1748_v21 = vld [vmem:[%s3405_s3 + $0x58] sm:$0xff] }
 0x124   : > { %v2073_v3 = vpop.f32.mrb[19].mxu0  ;;  %v2115_v4 = vpop.f32.mrb[19].mxu1  ;;  %v2379_v24 = vpack.c.bf16 %v1748_v21, %v1747_v17 }
 0x125   : > { %v3088_v6 = vadd.f32 %v2073_v3, %v2072_v0  ;;  %v3090_v8 = vadd.f32 %v2115_v4, %v2114_v2  ;;  %v1116_v3 = vadd.f32 %v3050_v27, %v3108_v30 }
 0x126   : > { %2380 = vmatpush3.bf16.msra.mxu1 %v2379_v24 }
 0x127   : > { %2381 = vmatprep.subr.bf16.mxu1 %v2722_v9 }
 0x129   : > { %v2075_v10 = vpop.f32.mrb[20].mxu0  ;;  %v2117_v11 = vpop.f32.mrb[20].mxu1 }
 0x12a   : > { %v2076_v14 = vpop.f32.mrb[21].mxu0  ;;  %v2118_v15 = vpop.f32.mrb[21].mxu1 }
 0x12b   : > { %v3098_v18 = vadd.f32 %v2076_v14, %v2075_v10  ;;  %v2078_v19 = vpop.f32.mrb[22].mxu0  ;;  %v3100_v20 = vadd.f32 %v2118_v15, %v2117_v11  ;;  %v2120_v22 = vpop.f32.mrb[22].mxu1 }
 0x12c   : > { %v2079_v25 = vpop.f32.mrb[23].mxu0  ;;  %v2121_v26 = vpop.f32.mrb[23].mxu1 }
 0x12d   : > { %v3102_v29 = vadd.f32 %v2079_v25, %v2078_v19  ;;  %v1749_v25 = vld [vmem:[%s3405_s3 + $0x60] sm:$0xff]  ;;  %v1750_v26 = vld [vmem:[%s3405_s3 + $0x68] sm:$0xff] }
 0x131   : > { %v2081_v31 = vpop.f32.mrb[24].mxu0  ;;  %v2139_v32 = vpop.f32.mrb[24].mxu1 }
 0x132   : > { %v2082_v33 = vpop.f32.mrb[25].mxu0  ;;  %v2140_v34 = vpop.f32.mrb[25].mxu1 }
 0x133   : > { %v3112_v37 = vadd.f32 %v2082_v33, %v2081_v31  ;;  %v2141_v39 = vadd.f32 %v2140_v34, %v2139_v32  ;;  %v2084_v40 = vpop.f32.mrb[26].mxu0  ;;  %v2142_v41 = vpop.f32.mrb[26].mxu1 }
 0x134   : > { %v2085_v44 = vpop.f32.mrb[27].mxu0  ;;  %v2143_v45 = vpop.f32.mrb[27].mxu1 }
 0x135   : > { %v1241_v47 = vadd.f32 %v2141_v39, %v1105_v35  ;;  %v3116_v49 = vadd.f32 %v2085_v44, %v2084_v40  ;;  %v2144_v51 = vadd.f32 %v2143_v45, %v2142_v41  ;;  %v2382_v35 = vpack.c.bf16 %v1750_v26, %v1749_v25  ;;  %v1751_v39 = vld [vmem:[%s3405_s3 + $0x70] sm:$0xff]  ;;  %v1752_v40 = vld [vmem:[%s3405_s3 + $0x78] sm:$0xff] }
 0x136   : > { %v2724_v41 = vmov 0.0   ;;  %v1121_v44 = vadd.f32 %v3061_v36, %v3108_v30  ;;  %v1124_v36 = vadd.f32 %v3065_v42, %v3108_v30  ;;  %v1129_v42 = vadd.f32 %v3069_v48, %v3108_v30 }
 0x137   : > { %v1244_v56 = vadd.f32 %v2144_v51, %v1108_v46  ;;  %2360 = vmatprep.mubr.msk.f32.mxu1 %vm2723_vm0, %v2724_v41  ;;  %2383 = vmatpush3.bf16.msra.mxu1 %v2382_v35 }
 0x138   : > { %2384 = vmatprep.subr.bf16.mxu1 %v2722_v9 }
 0x139   : > { %v2145_v57 = vpop.f32.mrb[28].mxu1  ;;  %v2233_v58 = vpop.f32.mrb[28].mxu0 }
 0x13a   : > { %v2146_v12 = vpop.f32.mrb[29].mxu1  ;;  %v2234_v59 = vpop.f32.mrb[29].mxu0 }
 0x13b   : > { %v2147_v61 = vadd.f32 %v2146_v12, %v2145_v57  ;;  %v2235_v62 = vadd.f32 %v2234_v59, %v2233_v58  ;;  %v2148_v0 = vpop.f32.mrb[30].mxu1  ;;  %v2236_v2 = vpop.f32.mrb[30].mxu0  ;;  %v2385_v12 = vpack.c.bf16 %v1752_v40, %v1751_v39 }
 0x13c   : > { %v2149_v4 = vpop.f32.mrb[31].mxu1  ;;  %v2237_v10 = vpop.f32.mrb[31].mxu0 }
 0x13d   : > { %v1249_v11 = vadd.f32 %v2147_v61, %v1113_v60  ;;  %v3129_v14 = vadd.f32 %v2235_v62, %v1241_v47  ;;  %v2150_v15 = vadd.f32 %v2149_v4, %v2148_v0  ;;  %v2238_v16 = vadd.f32 %v2237_v10, %v2236_v2  ;;  %2386 = vmatpush3.bf16.msra.mxu1 %v2385_v12 }
 0x13f   : > { %v1478_v19 = vmul.f32 %v3129_v14, %v3129_v14  ;;  %v1252_v22 = vadd.f32 %v2150_v15, %v1116_v3  ;;  %v3139_v27 = vadd.f32 %v2238_v16, %v1244_v56 }
 0x141   : > { %v1503_v31 = vmul.f32 %v1478_v19, %v3129_v14  ;;  %v1479_v32 = vmul.f32 %v3139_v27, %v3139_v27  ;;  %v2151_v33 = vpop.f32.mrb[32].mxu1  ;;  %v2239_v34 = vpop.f32.mrb[32].mxu0 }
 0x142   : > { %v2152_v45 = vpop.f32.mrb[33].mxu1  ;;  %v2240_v46 = vpop.f32.mrb[33].mxu0 }
 0x143   : > { %v1528_v47 = vmul.f32 0.044715, %v1503_v31  ;;  %v1504_v51 = vmul.f32 %v1479_v32, %v3139_v27  ;;  %v2153_v52 = vadd.f32 %v2152_v45, %v2151_v33  ;;  %v2241_v5 = vadd.f32 %v2240_v46, %v2239_v34  ;;  %v2154_v53 = vpop.f32.mrb[34].mxu1  ;;  %v2242_v56 = vpop.f32.mrb[34].mxu0 }
 0x144   : > { %v2155_v57 = vpop.f32.mrb[35].mxu1  ;;  %v2243_v58 = vpop.f32.mrb[35].mxu0  ;;  %v1132_v34 = vadd.f32 %v3073_v54, %v3108_v30 }
 0x145   : > { %v1553_v59 = vadd.f32 %v1528_v47, %v3129_v14  ;;  %v1529_v60 = vmul.f32 0.044715, %v1504_v51  ;;  %v1257_v61 = vadd.f32 %v2153_v52, %v1121_v44  ;;  %v3161_v62 = vadd.f32 %v2241_v5, %v1249_v11 }
 0x146   : > { %v2156_v0 = vadd.f32 %v2155_v57, %v2154_v53  ;;  %v2244_v2 = vadd.f32 %v2243_v58, %v2242_v56 }
 0x147   : > { %v1578_v3 = vmul.f32 0.7978846, %v1553_v59  ;;  %v1554_v4 = vadd.f32 %v1529_v60, %v3139_v27  ;;  %v1480_v10 = vmul.f32 %v3161_v62, %v3161_v62 }
 0x148   : > { %v1260_v15 = vadd.f32 %v2156_v0, %v1124_v36  ;;  %v3169_v16 = vadd.f32 %v2244_v2, %v1252_v22  ;;  %v1137_v0 = vadd.f32 %v3084_v63, %v3108_v30 }
 0x149   : > { %2608 = vtanh.f32 %v1578_v3  ;;  %v1579_v11 = vmul.f32 0.7978846, %v1554_v4  ;;  %v1505_v17 = vmul.f32 %v1480_v10, %v3161_v62  ;;  %v2157_v21 = vpop.f32.mrb[36].mxu1  ;;  %v2245_v19 = vpop.f32.mrb[36].mxu0 }
 0x14a   : > { %v1481_v9 = vmul.f32 %v3169_v16, %v3169_v16  ;;  %v2158_v24 = vpop.f32.mrb[37].mxu1  ;;  %v2246_v25 = vpop.f32.mrb[37].mxu0 }
 0x14b   : > { %2610 = vtanh.f32 %v1579_v11  ;;  %v1530_v26 = vmul.f32 0.044715, %v1505_v17  ;;  %v2159_v31 = vadd.f32 %v2158_v24, %v2157_v21  ;;  %v2247_v22 = vadd.f32 %v2246_v25, %v2245_v19  ;;  %v2160_v32 = vpop.f32.mrb[38].mxu1  ;;  %v2248_v33 = vpop.f32.mrb[38].mxu0 }
 0x14c   : > { %v1506_v35 = vmul.f32 %v1481_v9, %v3169_v16  ;;  %v2161_v39 = vpop.f32.mrb[39].mxu1  ;;  %v2249_v40 = vpop.f32.mrb[39].mxu0  ;;  %v1140_v11 = vadd.f32 %v3088_v6, %v3108_v30 }
 0x14d   : > { %v1555_v48 = vadd.f32 %v1530_v26, %v3161_v62  ;;  %v1265_v41 = vadd.f32 %v2159_v31, %v1129_v42  ;;  %v3180_v44 = vadd.f32 %v2247_v22, %v1257_v61  ;;  %v2162_v45 = vadd.f32 %v2161_v39, %v2160_v32 }
 0x14e   : > { %v1531_v46 = vmul.f32 0.044715, %v1506_v35  ;;  %v2250_v47 = vadd.f32 %v2249_v40, %v2248_v33 }
 0x14f   : > { %v1580_v51 = vmul.f32 0.7978846, %v1555_v48  ;;  %v1482_v52 = vmul.f32 %v3180_v44, %v3180_v44  ;;  %v1268_v5 = vadd.f32 %v2162_v45, %v1132_v34  ;;  %v1145_v45 = vadd.f32 %v3098_v18, %v3108_v30 }
 0x150   : > { %v1556_v53 = vadd.f32 %v1531_v46, %v3169_v16  ;;  %v3185_v54 = vadd.f32 %v2250_v47, %v1260_v15 }
 0x151   : > { %2612 = vtanh.f32 %v1580_v51  ;;  %v1507_v56 = vmul.f32 %v1482_v52, %v3180_v44  ;;  %v2163_v57 = vpop.f32.mrb[40].mxu1  ;;  %v2251_v58 = vpop.f32.mrb[40].mxu0 }
 0x152   : > { %v1581_v12 = vmul.f32 0.7978846, %v1556_v53  ;;  %v1483_v59 = vmul.f32 %v3185_v54, %v3185_v54  ;;  %v2164_v60 = vpop.f32.mrb[41].mxu1  ;;  %v2252_v61 = vpop.f32.mrb[41].mxu0 }
 0x153   : > { %v2609_v36 = vpop.eup %2608  ;;  %v1532_v2 = vmul.f32 0.044715, %v1507_v56  ;;  %v2165_v3 = vadd.f32 %v2164_v60, %v2163_v57  ;;  %v2253_v4 = vadd.f32 %v2252_v61, %v2251_v58  ;;  %v2166_v10 = vpop.f32.mrb[42].mxu1 }
 0x154   : > { %v2254_v15 = vpop.f32.mrb[42].mxu0  ;;  %v1628_v17 = vadd.f32 1.0, %v2609_v36  ;;  %2614 = vtanh.f32 %v1581_v12  ;;  %v1508_v21 = vmul.f32 %v1483_v59, %v3185_v54  ;;  %v2167_v19 = vpop.f32.mrb[43].mxu1  ;;  %v1148_v12 = vadd.f32 %v3102_v29, %v3108_v30 }
 0x155   : > { %v2255_v42 = vpop.f32.mrb[43].mxu0  ;;  %v2611_v9 = vpop.eup %2610  ;;  %v1557_v24 = vadd.f32 %v1532_v2, %v3180_v44  ;;  %v1273_v25 = vadd.f32 %v2165_v3, %v1137_v0  ;;  %v3196_v26 = vadd.f32 %v2253_v4, %v1265_v41  ;;  %v2168_v63 = vadd.f32 %v2167_v19, %v2166_v10 }
 0x156   : > { %v1653_v31 = vmul.f32 0.5, %v1628_v17  ;;  %v1629_v22 = vadd.f32 1.0, %v2611_v9  ;;  %v1533_v32 = vmul.f32 0.044715, %v1508_v21  ;;  %v2256_v33 = vadd.f32 %v2255_v42, %v2254_v15 }
 0x157   : > { %v1582_v34 = vmul.f32 0.7978846, %v1557_v24  ;;  %v1484_v6 = vmul.f32 %v3196_v26, %v3196_v26  ;;  %v1276_v35 = vadd.f32 %v2168_v63, %v1140_v11 }
 0x158   : > { %v1654_v39 = vmul.f32 0.5, %v1629_v22  ;;  %v1558_v40 = vadd.f32 %v1533_v32, %v3185_v54  ;;  %v3201_v48 = vadd.f32 %v2256_v33, %v1268_v5  ;;  %v1678_v51 = vmul.f32 %v1653_v31, %v3129_v14 }
 0x159   : > { %2616 = vtanh.f32 %v1582_v34  ;;  %v1509_v41 = vmul.f32 %v1484_v6, %v3196_v26  ;;  %v2169_v46 = vpop.f32.mrb[44].mxu1  ;;  %v2257_v47 = vpop.f32.mrb[44].mxu0 }
 0x15a   : > { %v1679_v52 = vmul.f32 %v1654_v39, %v3139_v27  ;;  %v1583_v53 = vmul.f32 0.7978846, %v1558_v40  ;;  %v1485_v56 = vmul.f32 %v3201_v48, %v3201_v48  ;;  %v2170_v57 = vpop.f32.mrb[45].mxu1  ;;  %v2258_v58 = vpop.f32.mrb[45].mxu0  ;;  %v1153_v39 = vadd.f32 %v3112_v37, %v3108_v30 }
 0x15b   : > { %v2613_v5 = vpop.eup %2612  ;;  %v1534_v18 = vmul.f32 0.044715, %v1509_v41  ;;  %v2171_v59 = vadd.f32 %v2170_v57, %v2169_v46  ;;  %v2259_v60 = vadd.f32 %v2258_v58, %v2257_v47  ;;  %v2172_v61 = vpop.f32.mrb[46].mxu1  ;;  %v1156_v58 = vadd.f32 %v3116_v49, %v3108_v30 }
 0x15c   : > { %v2260_v36 = vpop.f32.mrb[46].mxu0  ;;  %v1703_v0 = vadd.f32 %v1679_v52, %v1678_v51  ;;  %v1630_v2 = vadd.f32 1.0, %v2613_v5  ;;  %2618 = vtanh.f32 %v1583_v53  ;;  %v1510_v14 = vmul.f32 %v1485_v56, %v3201_v48  ;;  %v2173_v27 = vpop.f32.mrb[47].mxu1 }
 0x15d   : > { %v2261_v3 = vpop.f32.mrb[47].mxu0  ;;  %v1559_v4 = vadd.f32 %v1534_v18, %v3196_v26  ;;  %v1281_v10 = vadd.f32 %v2171_v59, %v1145_v45  ;;  %v3214_v15 = vadd.f32 %v2259_v60, %v1273_v25  ;;  %v2174_v11 = vadd.f32 %v2173_v27, %v2172_v61 }
 0x15e   : > { %v2615_v17 = vpop.eup %2614  ;;  %v1655_v29 = vmul.f32 0.5, %v1630_v2  ;;  %v1535_v21 = vmul.f32 0.044715, %v1510_v14  ;;  %v2262_v19 = vadd.f32 %v2261_v3, %v2260_v36 }
 0x15f   : > { %v1631_v42 = vadd.f32 1.0, %v2615_v17  ;;  %v1584_v9 = vmul.f32 0.7978846, %v1559_v4  ;;  %v1486_v24 = vmul.f32 %v3214_v15, %v3214_v15  ;;  %v1284_v63 = vadd.f32 %v2174_v11, %v1148_v12 }
 0x160   : > { %v1680_v31 = vmul.f32 %v1655_v29, %v3161_v62  ;;  %v1560_v22 = vadd.f32 %v1535_v21, %v3201_v48  ;;  %v3220_v32 = vadd.f32 %v2262_v19, %v1276_v35 }
 0x161   : > { %v1656_v33 = vmul.f32 0.5, %v1631_v42  ;;  %2620 = vtanh.f32 %v1584_v9  ;;  %v1511_v25 = vmul.f32 %v1486_v24, %v3214_v15  ;;  %v2175_v34 = vpop.f32.mrb[48].mxu1  ;;  %v2263_v6 = vpop.f32.mrb[48].mxu0  ;;  %v1161_v24 = vadd.f32 %v3032_v7, %v3108_v30 }
 0x162   : > { %v1704_v40 = vadd.f32 %v1703_v0, %v1680_v31  ;;  %v1585_v45 = vmul.f32 0.7978846, %v1560_v22  ;;  %v1487_v41 = vmul.f32 %v3220_v32, %v3220_v32  ;;  %v2176_v46 = vpop.f32.mrb[49].mxu1  ;;  %v2264_v62 = vpop.f32.mrb[49].mxu0 }
 0x163   : > { %v2617_v47 = vpop.eup %2616  ;;  %v1681_v35 = vmul.f32 %v1656_v33, %v3169_v16  ;;  %v1536_v51 = vmul.f32 0.044715, %v1511_v25  ;;  %v2177_v52 = vadd.f32 %v2176_v46, %v2175_v34  ;;  %v2265_v53 = vadd.f32 %v2264_v62, %v2263_v6  ;;  %v2178_v56 = vpop.f32.mrb[50].mxu1 }
 0x164   : > { %v2266_v57 = vpop.f32.mrb[50].mxu0  ;;  %v1632_v5 = vadd.f32 1.0, %v2617_v47  ;;  %2622 = vtanh.f32 %v1585_v45  ;;  %v1512_v37 = vmul.f32 %v1487_v41, %v3220_v32  ;;  %v2179_v12 = vpop.f32.mrb[51].mxu1  ;;  %v1164_v46 = vadd.f32 %v3037_v13, %v3108_v30 }
 0x165   : > { %v2267_v18 = vpop.f32.mrb[51].mxu0  ;;  %v1705_v59 = vadd.f32 %v1704_v40, %v1681_v35  ;;  %v1561_v60 = vadd.f32 %v1536_v51, %v3214_v15  ;;  %v1289_v61 = vadd.f32 %v2177_v52, %v1153_v39  ;;  %v3232_v36 = vadd.f32 %v2265_v53, %v1281_v10 }
 0x166   : > { %v2619_v16 = vpop.eup %2618  ;;  %v1657_v0 = vmul.f32 0.5, %v1632_v5  ;;  %v1537_v2 = vmul.f32 0.044715, %v1512_v37  ;;  %v2180_v14 = vadd.f32 %v2179_v12, %v2178_v56  ;;  %v2268_v27 = vadd.f32 %v2267_v18, %v2266_v57 }
 0x167   : > { %v1633_v3 = vadd.f32 1.0, %v2619_v16  ;;  %v1586_v4 = vmul.f32 0.7978846, %v1561_v60  ;;  %v1488_v49 = vmul.f32 %v3232_v36, %v3232_v36 }
 0x168   : > { %v1682_v11 = vmul.f32 %v1657_v0, %v3180_v44  ;;  %v1562_v17 = vadd.f32 %v1537_v2, %v3220_v32  ;;  %v1292_v29 = vadd.f32 %v2180_v14, %v1156_v58  ;;  %v3238_v21 = vadd.f32 %v2268_v27, %v1284_v63 }
 0x169   : > { %v1658_v19 = vmul.f32 0.5, %v1633_v3  ;;  %2624 = vtanh.f32 %v1586_v4  ;;  %v1513_v10 = vmul.f32 %v1488_v49, %v3232_v36  ;;  %v2181_v42 = vpop.f32.mrb[52].mxu1  ;;  %v2269_v9 = vpop.f32.mrb[52].mxu0  ;;  %v1169_v3 = vadd.f32 %v3048_v23, %v3108_v30 }
 0x16a   : > { %v1706_v31 = vadd.f32 %v1705_v59, %v1682_v11  ;;  %v1587_v22 = vmul.f32 0.7978846, %v1562_v17  ;;  %v1489_v33 = vmul.f32 %v3238_v21, %v3238_v21  ;;  %v2182_v44 = vpop.f32.mrb[53].mxu1  ;;  %v2270_v25 = vpop.f32.mrb[53].mxu0 }
 0x16b   : > { %v2621_v34 = vpop.eup %2620  ;;  %v1683_v63 = vmul.f32 %v1658_v19, %v3185_v54  ;;  %v1538_v6 = vmul.f32 0.044715, %v1513_v10  ;;  %v2183_v39 = vadd.f32 %v2182_v44, %v2181_v42  ;;  %v2271_v40 = vadd.f32 %v2270_v25, %v2269_v9  ;;  %v2184_v45 = vpop.f32.mrb[54].mxu1 }
 0x16c   : > { %v2272_v41 = vpop.f32.mrb[54].mxu0  ;;  %v1634_v62 = vadd.f32 1.0, %v2621_v34  ;;  %2626 = vtanh.f32 %v1587_v22  ;;  %v1514_v7 = vmul.f32 %v1489_v33, %v3238_v21  ;;  %v2185_v47 = vpop.f32.mrb[55].mxu1  ;;  %v1172_v22 = vadd.f32 %v3052_v28, %v3108_v30 }
 0x16d   : > { %v2273_v35 = vpop.f32.mrb[55].mxu0  ;;  %v1707_v51 = vadd.f32 %v1706_v31, %v1683_v63  ;;  %v1563_v52 = vadd.f32 %v1538_v6, %v3232_v36  ;;  %v1297_v53 = vadd.f32 %v2183_v39, %v1161_v24  ;;  %v3250_v56 = vadd.f32 %v2271_v40, %v1289_v61 }
 0x16e   : > { %v2623_v54 = vpop.eup %2622  ;;  %v1659_v57 = vmul.f32 0.5, %v1634_v62  ;;  %v1539_v58 = vmul.f32 0.044715, %v1514_v7  ;;  %v2186_v5 = vadd.f32 %v2185_v47, %v2184_v45  ;;  %v2274_v37 = vadd.f32 %v2273_v35, %v2272_v41 }
 0x16f   : > { %v1635_v12 = vadd.f32 1.0, %v2623_v54  ;;  %v1588_v18 = vmul.f32 0.7978846, %v1563_v52  ;;  %v1490_v13 = vmul.f32 %v3250_v56, %v3250_v56 }
 0x170   : > { %v1684_v59 = vmul.f32 %v1659_v57, %v3196_v26  ;;  %v1564_v60 = vadd.f32 %v1539_v58, %v3238_v21  ;;  %v1300_v16 = vadd.f32 %v2186_v5, %v1164_v46  ;;  %v3256_v0 = vadd.f32 %v2274_v37, %v1292_v29 }
 0x171   : > { %v1660_v2 = vmul.f32 0.5, %v1635_v12  ;;  %2628 = vtanh.f32 %v1588_v18  ;;  %v1515_v61 = vmul.f32 %v1490_v13, %v3250_v56  ;;  %v2187_v14 = vpop.f32.mrb[56].mxu1  ;;  %v2275_v27 = vpop.f32.mrb[56].mxu0  ;;  %v1177_v5 = vadd.f32 %v3063_v38, %v3108_v30 }
 0x172   : > { %v1708_v4 = vadd.f32 %v1707_v51, %v1684_v59  ;;  %v1589_v49 = vmul.f32 0.7978846, %v1564_v60  ;;  %v1491_v11 = vmul.f32 %v3256_v0, %v3256_v0  ;;  %v2188_v26 = vpop.f32.mrb[57].mxu1  ;;  %v2276_v17 = vpop.f32.mrb[57].mxu0 }
 0x173   : > { %v2625_v19 = vpop.eup %2624  ;;  %v1685_v29 = vmul.f32 %v1660_v2, %v3201_v48  ;;  %v1540_v10 = vmul.f32 0.044715, %v1515_v61  ;;  %v2189_v42 = vadd.f32 %v2188_v26, %v2187_v14  ;;  %v2277_v9 = vadd.f32 %v2276_v17, %v2275_v27  ;;  %v2190_v24 = vpop.f32.mrb[58].mxu1 }
 0x174   : > { %v2278_v31 = vpop.f32.mrb[58].mxu0  ;;  %v1636_v33 = vadd.f32 1.0, %v2625_v19  ;;  %2630 = vtanh.f32 %v1589_v49  ;;  %v1516_v23 = vmul.f32 %v1491_v11, %v3256_v0  ;;  %v2191_v44 = vpop.f32.mrb[59].mxu1 }
 0x175   : > { %v2279_v25 = vpop.f32.mrb[59].mxu0  ;;  %v1709_v34 = vadd.f32 %v1708_v4, %v1685_v29  ;;  %v1565_v63 = vadd.f32 %v1540_v10, %v3250_v56  ;;  %v1305_v6 = vadd.f32 %v2189_v42, %v1169_v3  ;;  %v3268_v39 = vadd.f32 %v2277_v9, %v1297_v53 }
 0x176   : > { %v2627_v48 = vpop.eup %2626  ;;  %v1661_v40 = vmul.f32 0.5, %v1636_v33  ;;  %v1541_v45 = vmul.f32 0.044715, %v1516_v23  ;;  %v2192_v41 = vadd.f32 %v2191_v44, %v2190_v24  ;;  %v2280_v46 = vadd.f32 %v2279_v25, %v2278_v31 }
 0x177   : > { %v1637_v62 = vadd.f32 1.0, %v2627_v48  ;;  %v1590_v7 = vmul.f32 0.7978846, %v1565_v63  ;;  %v1492_v28 = vmul.f32 %v3268_v39, %v3268_v39  ;;  %v1180_v3 = vadd.f32 %v3067_v43, %v3108_v30 }
 0x178   : > { %v1686_v47 = vmul.f32 %v1661_v40, %v3214_v15  ;;  %v1566_v35 = vadd.f32 %v1541_v45, %v3256_v0  ;;  %v1308_v51 = vadd.f32 %v2192_v41, %v1172_v22  ;;  %v3274_v52 = vadd.f32 %v2280_v46, %v1300_v16 }
 0x179   : > { %v1662_v54 = vmul.f32 0.5, %v1637_v62  ;;  %2632 = vtanh.f32 %v1590_v7  ;;  %v1517_v53 = vmul.f32 %v1492_v28, %v3268_v39  ;;  %v2193_v57 = vpop.f32.mrb[60].mxu1  ;;  %v2281_v58 = vpop.f32.mrb[60].mxu0  ;;  %v1185_v40 = vadd.f32 %v3071_v50, %v3108_v30 }
 0x17a   : > { %v1710_v37 = vadd.f32 %v1709_v34, %v1686_v47  ;;  %v1591_v12 = vmul.f32 0.7978846, %v1566_v35  ;;  %v1493_v18 = vmul.f32 %v3274_v52, %v3274_v52  ;;  %v2194_v15 = vpop.f32.mrb[61].mxu1  ;;  %v2282_v13 = vpop.f32.mrb[61].mxu0 }
 0x17b   : > { %v2629_v59 = vpop.eup %2628  ;;  %v1687_v60 = vmul.f32 %v1662_v54, %v3220_v32  ;;  %v1542_v16 = vmul.f32 0.044715, %v1517_v53  ;;  %v2195_v2 = vadd.f32 %v2194_v15, %v2193_v57  ;;  %v2283_v61 = vadd.f32 %v2282_v13, %v2281_v58  ;;  %v2196_v14 = vpop.f32.mrb[62].mxu1 }
 0x17c   : > { %v2284_v27 = vpop.f32.mrb[62].mxu0  ;;  %v1638_v4 = vadd.f32 1.0, %v2629_v59  ;;  %2634 = vtanh.f32 %v1591_v12  ;;  %v1518_v38 = vmul.f32 %v1493_v18, %v3274_v52  ;;  %v2197_v49 = vpop.f32.mrb[63].mxu1  ;;  %v1188_v57 = vadd.f32 %v3075_v55, %v3108_v30 }
 0x17d   : > { %v2285_v11 = vpop.f32.mrb[63].mxu0  ;;  %v1711_v26 = vadd.f32 %v1710_v37, %v1687_v60  ;;  %v1567_v17 = vadd.f32 %v1542_v16, %v3268_v39  ;;  %v1313_v19 = vadd.f32 %v2195_v2, %v1177_v5  ;;  %v3286_v29 = vadd.f32 %v2283_v61, %v1305_v6 }
 0x17e   : > { %v2631_v32 = vpop.eup %2630  ;;  %v1663_v10 = vmul.f32 0.5, %v1638_v4  ;;  %v1543_v42 = vmul.f32 0.044715, %v1518_v38  ;;  %v2198_v9 = vadd.f32 %v2197_v49, %v2196_v14  ;;  %v2286_v24 = vadd.f32 %v2285_v11, %v2284_v27 }
 0x17f   : > { %v1639_v31 = vadd.f32 1.0, %v2631_v32  ;;  %v1592_v22 = vmul.f32 0.7978846, %v1567_v17  ;;  %v1494_v43 = vmul.f32 %v3286_v29, %v3286_v29 }
 0x180   : > { %v1688_v33 = vmul.f32 %v1663_v10, %v3232_v36  ;;  %v1568_v23 = vadd.f32 %v1543_v42, %v3274_v52  ;;  %v1316_v44 = vadd.f32 %v2198_v9, %v1180_v3  ;;  %v3292_v25 = vadd.f32 %v2286_v24, %v1308_v51 }
 0x181   : > { %v1664_v34 = vmul.f32 0.5, %v1639_v31  ;;  %2636 = vtanh.f32 %v1592_v22  ;;  %v1519_v63 = vmul.f32 %v1494_v43, %v3286_v29  ;;  %v2199_v6 = vpop.f32.mrb[64].mxu1  ;;  %v2287_v48 = vpop.f32.mrb[64].mxu0 }
 0x182   : > { %v1712_v45 = vadd.f32 %v1711_v26, %v1688_v33  ;;  %v1593_v41 = vmul.f32 0.7978846, %v1568_v23  ;;  %v1495_v46 = vmul.f32 %v3292_v25, %v3292_v25  ;;  %v2200_v36 = vpop.f32.mrb[65].mxu1  ;;  %v2288_v62 = vpop.f32.mrb[65].mxu0 }
 0x183   : > { %v2633_v7 = vpop.eup %2632  ;;  %v1689_v28 = vmul.f32 %v1664_v34, %v3238_v21  ;;  %v1544_v47 = vmul.f32 0.044715, %v1519_v63  ;;  %v2201_v35 = vadd.f32 %v2200_v36, %v2199_v6  ;;  %v2289_v51 = vadd.f32 %v2288_v62, %v2287_v48  ;;  %v2202_v54 = vpop.f32.mrb[66].mxu1 }
 0x184   : > { %v2290_v53 = vpop.f32.mrb[66].mxu0  ;;  %v1640_v58 = vadd.f32 1.0, %v2633_v7  ;;  %2638 = vtanh.f32 %v1593_v41  ;;  %v1520_v50 = vmul.f32 %v1495_v46, %v3292_v25  ;;  %v2203_v5 = vpop.f32.mrb[67].mxu1  ;;  %v1196_v34 = vadd.f32 %v3090_v8, %v3108_v30 }
 0x185   : > { %v2291_v37 = vpop.f32.mrb[67].mxu0  ;;  %v1713_v12 = vadd.f32 %v1712_v45, %v1689_v28  ;;  %v1569_v18 = vadd.f32 %v1544_v47, %v3286_v29  ;;  %v1321_v15 = vadd.f32 %v2201_v35, %v1185_v40  ;;  %v3304_v13 = vadd.f32 %v2289_v51, %v1313_v19 }
 0x186   : > { %v2635_v21 = vpop.eup %2634  ;;  %v1665_v59 = vmul.f32 0.5, %v1640_v58  ;;  %v1545_v60 = vmul.f32 0.044715, %v1520_v50  ;;  %v2204_v16 = vadd.f32 %v2203_v5, %v2202_v54  ;;  %v2292_v2 = vadd.f32 %v2291_v37, %v2290_v53 }
 0x187   : > { %v1641_v61 = vadd.f32 1.0, %v2635_v21  ;;  %v1594_v14 = vmul.f32 0.7978846, %v1569_v18  ;;  %v1496_v55 = vmul.f32 %v3304_v13, %v3304_v13  ;;  %v1193_v19 = vadd.f32 %v3086_v1, %v3108_v30 }
 0x188   : > { %v1690_v27 = vmul.f32 %v1665_v59, %v3250_v56  ;;  %v1570_v3 = vadd.f32 %v1545_v60, %v3292_v25  ;;  %v1324_v4 = vadd.f32 %v2204_v16, %v1188_v57  ;;  %v3310_v38 = vadd.f32 %v2292_v2, %v1316_v44 }
 0x189   : > { %v1666_v49 = vmul.f32 0.5, %v1641_v61  ;;  %2640 = vtanh.f32 %v1594_v14  ;;  %v1521_v11 = vmul.f32 %v1496_v55, %v3304_v13  ;;  %v2205_v26 = vpop.f32.mrb[68].mxu1  ;;  %v2293_v17 = vpop.f32.mrb[68].mxu0 }
 0x18a   : > { %v1714_v32 = vadd.f32 %v1713_v12, %v1690_v27  ;;  %v1595_v10 = vmul.f32 0.7978846, %v1570_v3  ;;  %v1497_v42 = vmul.f32 %v3310_v38, %v3310_v38  ;;  %v2206_v56 = vpop.f32.mrb[69].mxu1  ;;  %v2294_v9 = vpop.f32.mrb[69].mxu0  ;;  %v1201_v12 = vadd.f32 %v3100_v20, %v3108_v30 }
 0x18b   : > { %v2637_v24 = vpop.eup %2636  ;;  %v1691_v31 = vmul.f32 %v1666_v49, %v3256_v0  ;;  %v1546_v22 = vmul.f32 0.044715, %v1521_v11  ;;  %v2207_v43 = vadd.f32 %v2206_v56, %v2205_v26  ;;  %v2295_v33 = vadd.f32 %v2294_v9, %v2293_v17  ;;  %v2208_v23 = vpop.f32.mrb[70].mxu1 }
 0x18c   : > { %v2296_v44 = vpop.f32.mrb[70].mxu0  ;;  %v1642_v63 = vadd.f32 1.0, %v2637_v24  ;;  %2642 = vtanh.f32 %v1595_v10  ;;  %v1522_v1 = vmul.f32 %v1497_v42, %v3310_v38  ;;  %v2209_v6 = vpop.f32.mrb[71].mxu1 }
 0x18d   : > { %v2297_v48 = vpop.f32.mrb[71].mxu0  ;;  %v1715_v40 = vadd.f32 %v1714_v32, %v1691_v31  ;;  %v1571_v45 = vadd.f32 %v1546_v22, %v3304_v13  ;;  %v1329_v41 = vadd.f32 %v2207_v43, %v1193_v19  ;;  %v3322_v46 = vadd.f32 %v2295_v33, %v1321_v15 }
 0x18e   : > { %v2639_v0 = vpop.eup %2638  ;;  %v1667_v36 = vmul.f32 0.5, %v1642_v63  ;;  %v1547_v62 = vmul.f32 0.044715, %v1522_v1  ;;  %v2210_v7 = vadd.f32 %v2209_v6, %v2208_v23  ;;  %v2298_v28 = vadd.f32 %v2297_v48, %v2296_v44 }
 0x18f   : > { %v1643_v47 = vadd.f32 1.0, %v2639_v0  ;;  %v1596_v35 = vmul.f32 0.7978846, %v1571_v45  ;;  %v1498_v8 = vmul.f32 %v3322_v46, %v3322_v46 }
 0x190   : > { %v1692_v51 = vmul.f32 %v1667_v36, %v3268_v39  ;;  %v1572_v54 = vadd.f32 %v1547_v62, %v3310_v38  ;;  %v1332_v53 = vadd.f32 %v2210_v7, %v1196_v34  ;;  %v3328_v57 = vadd.f32 %v2298_v28, %v1324_v4 }
 0x191   : > { %v1668_v58 = vmul.f32 0.5, %v1643_v47  ;;  %2644 = vtanh.f32 %v1596_v35  ;;  %v1523_v50 = vmul.f32 %v1498_v8, %v3322_v46  ;;  %v2211_v5 = vpop.f32.mrb[72].mxu1  ;;  %v2299_v37 = vpop.f32.mrb[72].mxu0 }
 0x192   : > { %v1716_v18 = vadd.f32 %v1715_v40, %v1692_v51  ;;  %v1597_v15 = vmul.f32 0.7978846, %v1572_v54  ;;  %v1499_v21 = vmul.f32 %v3328_v57, %v3328_v57  ;;  %v2212_v39 = vpop.f32.mrb[73].mxu1  ;;  %v2300_v59 = vpop.f32.mrb[73].mxu0 }
 0x193   : > { %v2641_v60 = vpop.eup %2640  ;;  %v1693_v16 = vmul.f32 %v1668_v58, %v3274_v52  ;;  %v1548_v2 = vmul.f32 0.044715, %v1523_v50  ;;  %v2213_v61 = vadd.f32 %v2212_v39, %v2211_v5  ;;  %v2301_v14 = vadd.f32 %v2300_v59, %v2299_v37  ;;  %v2302_v55 = vpop.f32.mrb[74].mxu0 }
 0x194   : > { %v2214_v27 = vpop.f32.mrb[74].mxu1  ;;  %v1644_v3 = vadd.f32 1.0, %v2641_v60  ;;  %2646 = vtanh.f32 %v1597_v15  ;;  %v1524_v4 = vmul.f32 %v1499_v21, %v3328_v57  ;;  %v2303_v20 = vpop.f32.mrb[75].mxu0 }
 0x195   : > { %v2215_v30 = vpop.f32.mrb[75].mxu1  ;;  %v1717_v49 = vadd.f32 %v1716_v18, %v1693_v16  ;;  %v1573_v11 = vadd.f32 %v1548_v2, %v3322_v46  ;;  %v1337_v26 = vadd.f32 %v2213_v61, %v1201_v12  ;;  %v3338_v17 = vadd.f32 %v2301_v14, %v1329_v41 }
 0x196   : > { %v2643_v19 = vpop.eup %2642  ;;  %v1669_v32 = vmul.f32 0.5, %v1644_v3  ;;  %v1549_v52 = vmul.f32 0.044715, %v1524_v4  ;;  %v2304_v10 = vadd.f32 %v2303_v20, %v2302_v55 }
 0x197   : > { %v1645_v42 = vadd.f32 1.0, %v2643_v19  ;;  %v1598_v56 = vmul.f32 0.7978846, %v1573_v11  ;;  %v1500_v9 = vmul.f32 %v3338_v17, %v3338_v17 }
 0x198   : > { %v1694_v24 = vmul.f32 %v1669_v32, %v3286_v29  ;;  %v1574_v31 = vadd.f32 %v1549_v52, %v3328_v57  ;;  %v1468_v22 = vadd.f32 %v2304_v10, %v1332_v53 }
 0x199   : > { %v1670_v43 = vmul.f32 0.5, %v1645_v42  ;;  %2648 = vtanh.f32 %v1598_v56  ;;  %v1525_v33 = vmul.f32 %v1500_v9, %v3338_v17  ;;  %v2305_v23 = vpop.f32.mrb[76].mxu0 }
 0x19a   : > { %v1718_v44 = vadd.f32 %v1717_v49, %v1694_v24  ;;  %v1599_v34 = vmul.f32 0.7978846, %v1574_v31  ;;  %v1501_v63 = vmul.f32 %v1468_v22, %v1468_v22  ;;  %v2306_v1 = vpop.f32.mrb[77].mxu0 }
 0x19b   : > { %v2645_v6 = vpop.eup %2644  ;;  %v1695_v48 = vmul.f32 %v1670_v43, %v3292_v25  ;;  %v1550_v40 = vmul.f32 0.044715, %v1525_v33  ;;  %v2307_v45 = vadd.f32 %v2306_v1, %v2305_v23  ;;  %v2308_v41 = vpop.f32.mrb[78].mxu0 }
 0x19c   : > { %v1646_v0 = vadd.f32 1.0, %v2645_v6  ;;  %2650 = vtanh.f32 %v1599_v34  ;;  %v1526_v29 = vmul.f32 %v1501_v63, %v1468_v22  ;;  %v2309_v36 = vpop.f32.mrb[79].mxu0 }
 0x19d   : > { %v1719_v62 = vadd.f32 %v1718_v44, %v1695_v48  ;;  %v1575_v7 = vadd.f32 %v1550_v40, %v3338_v17  ;;  %v1473_v28 = vadd.f32 %v2307_v45, %v1337_v26 }
 0x19e   : > { %v2647_v47 = vpop.eup %2646  ;;  %v1671_v35 = vmul.f32 0.5, %v1646_v0  ;;  %v1551_v8 = vmul.f32 0.044715, %v1526_v29 }
 0x19f   : > { %v1647_v51 = vadd.f32 1.0, %v2647_v47  ;;  %v1600_v54 = vmul.f32 0.7978846, %v1575_v7  ;;  %v1502_v53 = vmul.f32 %v1473_v28, %v1473_v28 }
 0x1a0   : > { %v1696_v58 = vmul.f32 %v1671_v35, %v3304_v13  ;;  %v1576_v25 = vadd.f32 %v1551_v8, %v1468_v22 }
 0x1a1   : > { %v1672_v50 = vmul.f32 0.5, %v1647_v51  ;;  %2652 = vtanh.f32 %v1600_v54  ;;  %v1527_v5 = vmul.f32 %v1502_v53, %v1473_v28 }
 0x1a2   : > { %v1720_v37 = vadd.f32 %v1719_v62, %v1696_v58  ;;  %v1601_v12 = vmul.f32 0.7978846, %v1576_v25 }
 0x1a3   : > { %v2649_v18 = vpop.eup %2648  ;;  %v1697_v15 = vmul.f32 %v1672_v50, %v3310_v38  ;;  %v1552_v21 = vmul.f32 0.044715, %v1527_v5 }
 0x1a4   : > { %v1648_v39 = vadd.f32 1.0, %v2649_v18  ;;  %2654 = vtanh.f32 %v1601_v12 }
 0x1a5   : > { %v1721_v59 = vadd.f32 %v1720_v37, %v1697_v15  ;;  %v1577_v60 = vadd.f32 %v1552_v21, %v1473_v28 }
 0x1a6   : > { %v2651_v16 = vpop.eup %2650  ;;  %v1673_v2 = vmul.f32 0.5, %v1648_v39 }
 0x1a7   : > { %v1649_v61 = vadd.f32 1.0, %v2651_v16  ;;  %v1602_v14 = vmul.f32 0.7978846, %v1577_v60 }
 0x1a8   : > { %v1698_v13 = vmul.f32 %v1673_v2, %v3322_v46 }
 0x1a9   : > { %v1674_v55 = vmul.f32 0.5, %v1649_v61  ;;  %2656 = vtanh.f32 %v1602_v14 }
 0x1aa   : > { %v1722_v27 = vadd.f32 %v1721_v59, %v1698_v13 }
 0x1ab   : > { %v2653_v3 = vpop.eup %2652  ;;  %v1699_v4 = vmul.f32 %v1674_v55, %v3328_v57 }
 0x1ac   : > { %v1650_v20 = vadd.f32 1.0, %v2653_v3 }
 0x1ad   : > { %v1723_v30 = vadd.f32 %v1722_v27, %v1699_v4 }
 0x1ae   : > { %v2655_v38 = vpop.eup %2654  ;;  %v1675_v49 = vmul.f32 0.5, %v1650_v20 }
 0x1af   : > { %v1651_v11 = vadd.f32 1.0, %v2655_v38 }
 0x1b0   : > { %v1700_v26 = vmul.f32 %v1675_v49, %v3338_v17 }
 0x1b1   : > { %v1676_v19 = vmul.f32 0.5, %v1651_v11 }
 0x1b2   : > { %v1724_v32 = vadd.f32 %v1723_v30, %v1700_v26 }
 0x1b3   : > { %v2657_v52 = vpop.eup %2656  ;;  %v1701_v10 = vmul.f32 %v1676_v19, %v1468_v22  ;;  %v1753_v22 = vld [vmem:[%s3406_s4] sm:$0x1] }
 0x1b4   : > { %v1652_v42 = vadd.f32 1.0, %v2657_v52 }
 0x1b5   : > { %v1725_v46 = vadd.f32 %v1724_v32, %v1701_v10 }
 0x1b6   : > { %v1677_v56 = vmul.f32 0.5, %v1652_v42 }
 0x1b8   : > { %v1702_v9 = vmul.f32 %v1677_v56, %v1473_v28 }
 0x1ba   : > { %v1727_v24 = vsel %vm1726_vm1, %v1702_v9, 0.0 }
 0x1bb   : > { %v1728_v57 = vadd.f32 %v1727_v24, %v1725_v46 }
 0x1bd   : > { %v1729_v31 = vrot.slane %v1728_v57, 4 }
 0x1bf   : > { %v1730_v43 = vadd.f32 %v1729_v31, %v1728_v57 }
 0x1c1   : > { %v1731_v33 = vrot.slane %v1730_v43, 2 }
 0x1c3   : > { %v1732_v23 = vadd.f32 %v1731_v33, %v1730_v43 }
 0x1c5   : > { %v1733_v44 = vrot.slane %v1732_v23, 1 }
 0x1c7   : > { %v1734_v34 = vadd.f32 %v1733_v44, %v1732_v23 }
 0x1c9   : > { %v1736_v17 = vmul.f32 0.0051020407, %v1734_v34 }
 0x1cb   : > { %2361 = vmatmul.mubr.f32.vlgmr.msra.gmra.mrb[76].mxu1 %v1736_v17 }
 0x29e   : > { %v1820_v63 = vpop.f32.mrb[76].mxu1 }
 0x29f   : > { %v1821_v1 = vadd.f32 %v1820_v63, %v1753_v22  ;;  %v2362_v6 = vpop.f32.mrb[77].mxu1 }
 0x2a1   : > { %1825 = vst.msk [vmem:[%s216_s26] sm:$0x1] %vm1824_vm2, %v1821_v1 }
 0x2a2   : > { %2671 = shalt.err (!%p2668_p3)
}
 0x2a3   : > { %s2672_s14 = scalar_lea.hbm %s3360_s8, 16  ;;  %s2676_s16 = scalar_lea.hbm %s3407_s5, 32 }
 0x2a4   : > { %p2673_p4 = scmp.ne.s32.totalorder %s3360_s8, %s2672_s14  ;;  %p2677_p9 = scmp.lt.u32.totalorder %s3360_s8, %s3407_s5 }
 0x2a5   : > { %p2678_p10 = scmp.lt.u32.totalorder %s2676_s16, %s2672_s14  ;;  %p2680_p12 = scmp.lt.u32.totalorder %s2672_s14, %s3360_s8 }
 0x2a6   : > { %p2674_p7 = pnand %p2673_p4, %p2794_p5 }
 0x2a7   : > { %p2679_p11 = por %p2678_p10, %p2677_p9 }
 0x2a8   : > { %p2675_p8 = pneg %p2674_p7 }
 0x2a9   : > { %p2681_p13 = por %p2680_p12, %p2679_p11 }
 0x2ab   : > { %p2682_p0 = pnand %p2681_p13, %p2675_p8 }
 0x2ad   : > { %2685 = shalt.err (!%p2682_p0)
}
 0x2ae   : > { %2404 = dma.vmem_to_hbm [thread:$0]  (%p2794_p5), %s3362_s30, 16, %s3360_s8, %s1827_s9  }
 0x2af PF: > { %p2410_p1 = scmp.ge.s32.totalorder %s2720_s21, 2  ;;  %s1851_s25 = sand.u32 1, %s2708_s18  }
 0x2b0   : > { %s1852_s26 = scalar_lea.sflag [#allocation3], %s1851_s25 }
 0x2b1   : > { %p2407_p2 = pnand %p2410_p1, %p2798_p6 }
 0x2b3   : > { %2703 = dma.done.wait (!%p2407_p2), %s1852_s26, 16  }
 0x2b4   : > { %2705 = vsyncadd (!%p2407_p2), %s1852_s26, 4294967280  ;;  %p15_p3 = scmp.ge.s32.totalorder %s2781_s24, 4   ;;  %s3410_s18 = smov %s2712_s19 }
 0x2b5   : > { %s3411_s19 = smov %s2716_s20  ;;  %s3412_s20 = smov %s2792_s27 }
 0x2b6   : > { %s3413_s21 = smov %s2781_s24  ;;  %17 = sbr.rel (!%p15_p3) target bundleno = 3 (0x3), region = 75 }
 0x2bd   :  { %1856 = vsyncpa [#allocation3], 1 }
 0x2be   :  { %1858 = vsyncpa [#allocation3 + $0x1], 1 }

// kernel: squeeze.8
= control target key start
LH: loop header
LB: loop body
LE: loop exit
PB: predicated region body
PF: predicated region fallthrough
CT: control target
= control target key end

     0   :  { %s38_s6 = smov 3  ;;  %s7_s9 = smov 3  ;;  %vm12_vm0 = vcmask 7168   ;;  %vm28_vm1 = vcmask 72704   ;;  %vm4_vm2 = vcmask 138240   ;;  %vm16_vm3 = vcmask 130048   ;;  %s289_s0 = inlined_call_operand.vmem [shape: f32[2,1,17,17], index: 0, kind: input, shape index: {}]   ;;  %s290_s1 = inlined_call_operand.vmem [shape: f32[2,289], index: 1, kind: output, shape index: {}]  }
   0x1   :  { %v165_v0 = vld [vmem:[%s289_s0 + $0xe] ss:$24 sm:%s38_s6]   ;;  %s10_s10 = smov 3  ;;  %s197_s11 = smov 110   ;;  %v161_v1 = vld [vmem:[%s289_s0 + $0xf] ss:$24 sm:%s7_s9]  }
   0x2   :  { %40 = vrot.lane.b32.xlu1 %v165_v0, %s197_s11  ;;  %s46_s14 = smov 3  ;;  %v162_v2 = vld [vmem:[%s289_s0 + $0xf] ss:$24 sm:%s10_s10]   ;;  %s23_s19 = smov 3  ;;  %vm19_vm4 = vcmask 1048568   ;;  %vm32_vm5 = vcmask 64512  }
   0x3   :  { %v166_v3 = vld [vmem:[%s289_s0 + $0x6] ss:$24 sm:%s46_s14]   ;;  %v13_v4 = vsel %vm12_vm0, %v162_v2, %v161_v1  ;;  %v163_v5 = vld [vmem:[%s289_s0 + $0x7] ss:$24 sm:%s23_s19]   ;;  %s26_s22 = smov 3  ;;  %s198_s23 = smov 127  }
   0x4   :  { %14 = vrot.lane.b32.xlu0 %v13_v4, %s198_s23  ;;  %v164_v6 = vld [vmem:[%s289_s0 + $0x7] ss:$24 sm:%s26_s22]   ;;  %s61_s26 = smov 3  ;;  %s199_s27 = smov 102   ;;  %vm35_vm6 = vcmask 1048504   ;;  %vm42_vm7 = vcmask 1040240  }
   0x5   :  { %v29_v7 = vsel %vm28_vm1, %v164_v6, %v163_v5  ;;  %v168_v8 = vld [vmem:[%s289_s0 + $0x5] ss:$24 sm:%s61_s26]   ;;  %s53_s30 = smov 3  ;;  %s76_s2 = smov 3  ;;  %vm50_vm8 = vcmask 974640   ;;  %vm65_vm9 = vcmask 835240  }
   0x6   :  { %48 = vrot.lane.b32.xlu1 %v166_v3, %s199_s27  ;;  %s200_s3 = smov 119   ;;  %s201_s4 = smov 85   ;;  %v167_v9 = vld [vmem:[%s289_s0 + $0xd] ss:$24 sm:%s53_s30]   ;;  %vm57_vm10 = vcmask 900840   ;;  %vm80_vm11 = vcmask 695840  }
   0x7   :  { %v170_v10 = vld [vmem:[%s289_s0 + $0x4] ss:$24 sm:%s76_s2]   ;;  %s68_s9 = smov 3  ;;  %s91_s10 = smov 3  ;;  %vm72_vm12 = vcmask 761440   ;;  %vm95_vm13 = vcmask 556440  }
   0x8   :  { %30 = vrot.lane.b32.xlu0 %v29_v7, %s200_s3  ;;  %s202_s11 = smov 93   ;;  %s203_s12 = smov 68   ;;  %v169_v11 = vld [vmem:[%s289_s0 + $0xc] ss:$24 sm:%s68_s9]   ;;  %vm87_vm14 = vcmask 622040   ;;  %vm110_vm15 = vcmask 417040  }
   0x9   :  { %s83_s15 = smov 3  ;;  %v172_v12 = vld [vmem:[%s289_s0 + $0x3] ss:$24 sm:%s91_s10]   ;;  %s106_s18 = smov 3  ;;  %vm102_vm0 = vcmask 482640   ;;  %vm125_vm1 = vcmask 277640  }
   0xa   :  { %63 = vrot.lane.b32.xlu1 %v168_v8, %s201_s4  ;;  %s204_s19 = smov 76   ;;  %v171_v13 = vld [vmem:[%s289_s0 + $0xb] ss:$24 sm:%s83_s15]   ;;  %s2_s22 = smov 3 }
   0xb   :  { %s205_s23 = smov 51   ;;  %v3_v14 = vld [vmem:[%s289_s0] ss:$24 sm:%s2_s22]   ;;  %v174_v15 = vld [vmem:[%s289_s0 + $0x2] ss:$24 sm:%s106_s18]   ;;  %s98_s28 = smov 3 }
   0xc   :  { %55 = vrot.lane.b32.xlu0 %v167_v9, %s202_s11  ;;  %5 = vst.msk [vmem:[#allocation0] sm:$0x3] %vm4_vm2, %v3_v14   ;;  %s121_s29 = smov 3  ;;  %s206_s30 = smov 59   ;;  %v173_v16 = vld [vmem:[%s289_s0 + $0xa] ss:$24 sm:%s98_s28]  }
   0xd   :  { %s207_s2 = smov 34   ;;  %v176_v17 = vld [vmem:[%s289_s0 + $0x1] ss:$24 sm:%s121_s29]   ;;  %s113_s7 = smov 3  ;;  %vm117_vm2 = vcmask 343240  }
   0xe   :  { %78 = vrot.lane.b32.xlu1 %v170_v10, %s203_s12  ;;  %s136_s8 = smov 3  ;;  %s208_s9 = smov 42   ;;  %v175_v18 = vld [vmem:[%s289_s0 + $0x9] ss:$24 sm:%s113_s7]  }
   0xf   :  { %s209_s10 = smov 17   ;;  %v178_v19 = vld [vmem:[%s289_s0 + $0x8] ss:$24 sm:%s136_s8]   ;;  %s128_s15 = smov 3 }
  0x10   :  { %70 = vrot.lane.b32.xlu0 %v169_v11, %s204_s19  ;;  %s210_s16 = smov 25   ;;  %s211_s17 = smov 8   ;;  %v177_v20 = vld [vmem:[%s289_s0 + $0x10] ss:$24 sm:%s128_s15]  }
  0x11   :  { %s212_s0 = smov 16  }
  0x12   :  { %93 = vrot.lane.b32.xlu1 %v172_v12, %s205_s23 }
  0x14   :  { %85 = vrot.lane.b32.xlu0 %v171_v13, %s206_s30 }
  0x16   :  { %108 = vrot.lane.b32.xlu1 %v174_v15, %s207_s2 }
  0x18   :  { %100 = vrot.lane.b32.xlu0 %v173_v16, %s208_s9 }
  0x1a   :  { %123 = vrot.lane.b32.xlu1 %v176_v17, %s209_s10 }
  0x1c   :  { %115 = vrot.lane.b32.xlu0 %v175_v18, %s210_s16 }
  0x1e   :  { %138 = vrot.lane.b32.xlu1 %v178_v19, %s211_s17 }
  0x20   :  { %130 = vrot.lane.b32.xlu0 %v177_v20, %s212_s0 }
  0x74   :  { %v41_v21 = vpop.permute.xlu1 %40  }
  0x76   :  { %v15_v22 = vpop.permute.xlu0 %14  }
  0x77   :  { %18 = vst.msk [vmem:[#allocation0 + $0x10] sm:$0x3] %vm16_vm3, %v15_v22   ;;  %vm140_vm3 = vcmask 203840  }
  0x78   :  { %21 = vst.msk [vmem:[#allocation0 + $0x8] sm:$0x3] %vm19_vm4, %v15_v22   ;;  %v49_v23 = vpop.permute.xlu1 %48   ;;  %vm132_vm4 = vcmask 269440  }
  0x7a   :  { %v31_v24 = vpop.permute.xlu0 %30  }
  0x7b   :  { %34 = vst.msk [vmem:[#allocation0 + $0x8] sm:$0x3] %vm32_vm5, %v31_v24  }
  0x7c   :  { %36 = vst.msk [vmem:[#allocation0] sm:$0x3] %vm35_vm6, %v31_v24   ;;  %v64_v25 = vpop.permute.xlu1 %63  }
  0x7d   :  { %44 = vst.msk [vmem:[#allocation0 + $0x8] sm:$0x3] %vm42_vm7, %v41_v21  }
  0x7e   :  { %51 = vst.msk [vmem:[#allocation0] sm:$0x3] %vm50_vm8, %v49_v23   ;;  %v56_v26 = vpop.permute.xlu0 %55  }
  0x7f   :  { %66 = vst.msk [vmem:[#allocation0] sm:$0x3] %vm65_vm9, %v64_v25  }
  0x80   :  { %59 = vst.msk [vmem:[#allocation0 + $0x8] sm:$0x3] %vm57_vm10, %v56_v26   ;;  %v79_v27 = vpop.permute.xlu1 %78  }
  0x81   :  { %81 = vst.msk [vmem:[#allocation0] sm:$0x3] %vm80_vm11, %v79_v27  }
  0x82   :  { %v71_v28 = vpop.permute.xlu0 %70  }
  0x83   :  { %74 = vst.msk [vmem:[#allocation0 + $0x8] sm:$0x3] %vm72_vm12, %v71_v28  }
  0x84   :  { %v94_v29 = vpop.permute.xlu1 %93  }
  0x85   :  { %96 = vst.msk [vmem:[#allocation0] sm:$0x3] %vm95_vm13, %v94_v29  }
  0x86   :  { %v86_v30 = vpop.permute.xlu0 %85  }
  0x87   :  { %89 = vst.msk [vmem:[#allocation0 + $0x8] sm:$0x3] %vm87_vm14, %v86_v30  }
  0x88   :  { %v109_v31 = vpop.permute.xlu1 %108  }
  0x89   :  { %111 = vst.msk [vmem:[#allocation0] sm:$0x3] %vm110_vm15, %v109_v31  }
  0x8a   :  { %v101_v32 = vpop.permute.xlu0 %100  }
  0x8b   :  { %104 = vst.msk [vmem:[#allocation0 + $0x8] sm:$0x3] %vm102_vm0, %v101_v32  }
  0x8c   :  { %v124_v33 = vpop.permute.xlu1 %123  }
  0x8d   :  { %126 = vst.msk [vmem:[#allocation0] sm:$0x3] %vm125_vm1, %v124_v33  }
  0x8e   :  { %v116_v34 = vpop.permute.xlu0 %115  }
  0x8f   :  { %119 = vst.msk [vmem:[#allocation0 + $0x8] sm:$0x3] %vm117_vm2, %v116_v34  }
  0x90   :  { %v139_v35 = vpop.permute.xlu1 %138  }
  0x91   :  { %142 = vst.msk [vmem:[#allocation0 + $0x8] sm:$0x3] %vm140_vm3, %v139_v35  }
  0x92   :  { %v131_v36 = vpop.permute.xlu0 %130  }
  0x93   :  { %134 = vst.msk [vmem:[#allocation0 + $0x10] sm:$0x3] %vm132_vm4, %v131_v36  }
  0x94   :  { %v146_v37 = vld [vmem:[#allocation0] sm:$0x3] }
  0x95   :  { %148 = vst [vmem:[%s290_s1] sm:$0x3] %v146_v37 }
  0x98   :  { %v150_v38 = vld [vmem:[#allocation0 + $0x8] sm:$0x3] }
  0x99   :  { %179 = vst [vmem:[%s290_s1 + $0x2] sm:$0x3] %v150_v38 }
  0x9a   :  { %v155_v39 = vld [vmem:[#allocation0 + $0x10] sm:$0x3] }
  0x9b   :  { %180 = vst [vmem:[%s290_s1 + $0x4] sm:$0x3] %v155_v39 }

// kernel: new_model_forward.4
= control target key start
LH: loop header
LB: loop body
LE: loop exit
PB: predicated region body
PF: predicated region fallthrough
CT: control target
= control target key end

     0   :  { %s4605_s24 = smov 0   ;;  %s5403_s0 = inlined_call_operand.vmem [shape: bf16[2,16,192], index: 0, kind: input, shape index: {}]   ;;  %s5404_s1 = inlined_call_operand.vmem [shape: bf16[192,64], index: 1, kind: input, shape index: {}]   ;;  %s5405_s2 = inlined_call_operand.vmem [shape: f32[1,64], index: 2, kind: input, shape index: {}]   ;;  %s5406_s3 = inlined_call_operand.vmem [shape: f32[1,64], index: 3, kind: input, shape index: {}]   ;;  %s5407_s4 = inlined_call_operand.vmem [shape: f32[17,64], index: 4, kind: input, shape index: {}]   ;;  %s5408_s5 = inlined_call_operand.vmem [shape: f32[2,1,64], index: 5, kind: input, shape index: {}]   ;;  %s5409_s6 = inlined_call_operand.vmem [shape: f32[2,1,64], index: 6, kind: input, shape index: {}]   ;;  %s5410_s7 = inlined_call_operand.vmem [shape: bf16[2,64,192], index: 7, kind: input, shape index: {}]   ;;  %s5411_s8 = inlined_call_operand.vmem [shape: f32[2,1,192], index: 8, kind: input, shape index: {}]   ;;  %s5412_s9 = inlined_call_operand.vmem [shape: bf16[2,64,64], index: 9, kind: input, shape index: {}]   ;;  %s5413_s10 = inlined_call_operand.vmem [shape: f32[2,1,64], index: 10, kind: input, shape index: {}]   ;;  %s5414_s11 = inlined_call_operand.vmem [shape: f32[2,1,64], index: 11, kind: input, shape index: {}]   ;;  %s5415_s12 = inlined_call_operand.vmem [shape: f32[2,1,64], index: 12, kind: input, shape index: {}]   ;;  %s5416_s13 = inlined_call_operand.vmem [shape: bf16[2,64,128], index: 13, kind: input, shape index: {}]   ;;  %s5417_s14 = inlined_call_operand.vmem [shape: f32[2,1,128], index: 14, kind: input, shape index: {}]   ;;  %s5418_s15 = inlined_call_operand.vmem [shape: bf16[2,128,64], index: 15, kind: input, shape index: {}]   ;;  %s5419_s16 = inlined_call_operand.vmem [shape: f32[2,1,64], index: 16, kind: input, shape index: {}]   ;;  %s5420_s17 = inlined_call_operand.vmem [shape: f32[2,2,17,17], index: 17, kind: output, shape index: {}]  }
   0x1   :  { %5432 = sst [smem:[#allocation4_spill]] %s5403_s0 }
   0x2   :  { %5433 = sst [smem:[#allocation5_spill]] %s5404_s1 }
   0x3 LB: > { %s3596_s25 = sadd.s32 4294967295, %s4502_s24   ;;  %p3600_p0 = scmp.ge.s32.totalorder %s4502_s24, 1  ;;  %s4502_s24 = sphi %s4605_s24, %s27_s24  }
   0x4   : > { %p487_p1 = scmp.lt.s32.totalorder %s4502_s24, 3 }
   0x6   : > { %p488_p2 = pnand %p3600_p0, %p487_p1 }
   0x7   : > { %s5434_s28 = sld [smem:[#allocation5_spill]] (!%p488_p2)  ;;  %v4504_v1 = vmov (!%p488_p2), 0   ;;  %p539_p3 = scmp.lt.s32.totalorder (!%p488_p2), %s3596_s25, 1  ;;  %vm664_vm0 = vcmask (!%p488_p2), 523264   ;;  %v709_v15 = vld [vmem:[%s5407_s4] sm:$0xff] (!%p488_p2)  ;;  %vm714_vm1 = vcmask (!%p488_p2), 516096  }
   0x8   : > { %491 = sbr.rel (%p488_p2) target bundleno = 5633 (0x1601), region = 88  ;;  %668 = vmatprep.subr.bf16.mxu0 (!%p488_p2), %v4504_v1  ;;  %894 = vmatprep.mubr.bf16.mxu1 (!%p488_p2), %v4504_v1  ;;  %s5435_s23 = sld [smem:[#allocation4_spill]] (!%p488_p2)  ;;  %v712_v16 = vld [vmem:[%s5406_s3] sm:$0x1] (!%p488_p2)  ;;  %v710_v18 = vld [vmem:[%s5407_s4 + $0x8] sm:$0xff] (!%p488_p2)  ;;  %v720_v20 = vrot.slane (!%p488_p2), %v709_v15, 1 }
   0x9   : > { %v713_v17 = vadd.f32 (!%p488_p2), %v712_v16, %v709_v15  ;;  %v711_v19 = vld [vmem:[%s5407_s4 + $0x10] sm:$0x1] (!%p488_p2)  ;;  %v721_v21 = vrot.slane (!%p488_p2), %v710_v18, 1  ;;  %vm719_vm2 = vcmask (!%p488_p2), 1046528   ;;  %v3604_v22 = vld [vmem:[%s5405_s2] ss:$0 sm:$0xff] (!%p488_p2) }
   0xa   : > { %v723_v23 = vrot.slane (!%p488_p2), %v711_v19, 1  ;;  %v4333_v55 = vld [vmem:[%s5410_s7 + $0x4] ss:$8 sps:$4 sm:$0xff] (!%p488_p2)   ;;  %v4335_v56 = vld [vmem:[%s5410_s7] ss:$8 sps:$4 sm:$0xff] (!%p488_p2)   ;;  %s4506_s29 = smov (!%p488_p2), 64  }
   0xb   : > { %715 = vst.msk [vmem:[#allocation2] sm:$0x1] (!%p488_p2), %vm714_vm1, %v713_v17  ;;  %v722_v25 = vsel (!%p488_p2), %vm719_vm2, %v720_v20, %v721_v21  ;;  %v4336_v57 = vld [vmem:[%s5410_s7 + $0x14] ss:$8 sps:$4 sm:$0xff] (!%p488_p2)   ;;  %862 = vmatprep.subr.bf16.mxu1 (!%p488_p2), %v4333_v55  ;;  %v4338_v58 = vld [vmem:[%s5410_s7 + $0x10] ss:$8 sps:$4 sm:$0xff] (!%p488_p2)  }
   0xc   : > { %v724_v29 = vsel (!%p488_p2), %vm719_vm2, %v721_v21, %v723_v23  ;;  %863 = vmatpush1.bf16.msra.mxu1 (!%p488_p2), %v4335_v56  ;;  %v4339_v59 = vld [vmem:[%s5410_s7 + $0x24] ss:$8 sps:$4 sm:$0xff] (!%p488_p2)   ;;  %v4341_v60 = vld [vmem:[%s5410_s7 + $0x20] ss:$8 sps:$4 sm:$0xff] (!%p488_p2)   ;;  %v4342_v61 = vld [vmem:[%s5410_s7 + $0x34] ss:$8 sps:$4 sm:$0xff] (!%p488_p2)  }
   0xd   : > { %v4318_v0 = vld [vmem:[%s5434_s28] sm:$0xff] (!%p488_p2)   ;;  %v4319_v2 = vld [vmem:[%s5434_s28 + $0x8] sm:$0xff] (!%p488_p2)   ;;  %v4320_v3 = vld [vmem:[%s5434_s28 + $0x10] sm:$0xff] (!%p488_p2)   ;;  %864 = vmatprep.subr.bf16.mxu1 (!%p488_p2), %v4336_v57  ;;  %vm4507_vm3 = vmmov (!%p488_p2), 0   ;;  %vm922_vm4 = vcmask (!%p488_p2), 130048   ;;  %vm1065_vm6 = vcmask (!%p488_p2), 1040384  }
   0xe   : > { %669 = vmatpush1.bf16.msra.mxu0 (!%p488_p2), %v4318_v0  ;;  %v4321_v4 = vld [vmem:[%s5434_s28 + $0x18] sm:$0xff] (!%p488_p2)   ;;  %v4322_v5 = vld [vmem:[%s5434_s28 + $0x20] sm:$0xff] (!%p488_p2)   ;;  %v4323_v7 = vld [vmem:[%s5434_s28 + $0x28] sm:$0xff] (!%p488_p2)   ;;  %vm1018_vm7 = vcmask (!%p488_p2), 138240   ;;  %vm1025_vm8 = vcmask (!%p488_p2), 131072   ;;  %s5430_s0 = smov (!%p488_p2), 48  }
   0xf   : > { %670 = vmatprep.subr.bf16.mxu0 %v4504_v1  ;;  %s5444_s25 = smov (!%p539_p3, %s3596_s25), 1  ;;  %v4324_v8 = vld [vmem:[%s5434_s28 + $0x30] sm:$0xff]   ;;  %v4325_v9 = vld [vmem:[%s5434_s28 + $0x38] sm:$0xff]   ;;  %v4326_v10 = vld [vmem:[%s5434_s28 + $0x40] sm:$0xff]   ;;  %s5428_s30 = smov 112   ;;  %vm1151_vm9 = vcmask 122880  }
  0x10   : > { %s3765_s19 = sshll.u32 %s5444_s25, 4  ;;  %v4327_v11 = vld [vmem:[%s5434_s28 + $0x48] sm:$0xff]   ;;  %v4328_v12 = vld [vmem:[%s5434_s28 + $0x50] sm:$0xff]   ;;  %v4329_v13 = vld [vmem:[%s5434_s28 + $0x58] sm:$0xff]   ;;  %865 = vmatpush1.bf16.msra.mxu1 %v4338_v58  ;;  %s4511_s18 = smov 32   ;;  %vm1409_vm10 = vcmask 261248  }
  0x11   : > { %s543_s26 = scalar_lea.vmem %s5435_s23, %s3765_s19  ;;  %866 = vmatprep.subr.bf16.mxu1 %v4339_v59  ;;  %v4344_v62 = vld [vmem:[%s5410_s7 + $0x30] ss:$8 sps:$4 sm:$0xff]   ;;  %v3621_v16 = vld [vmem:[%s5409_s6] ss:$0 sm:$0xff]  ;;  %vm4761_vm5 = vmpackc.low %vm922_vm4, %vm922_vm4  ;;  %s5424_s19 = smov 16   ;;  %vm1412_vm11 = vcmask 254080  }
  0x12   : > { %671 = vmatpush1.bf16.msra.mxu0 %v4319_v2  ;;  %v4332_v6 = vld [vmem:[%s543_s26 + $0x4] ss:$8 sps:$4 sm:$0xff]   ;;  %v4330_v14 = vld [vmem:[%s543_s26] ss:$8 sps:$4 sm:$0xff]   ;;  %s5426_s1 = smov 96   ;;  %s5422_s20 = smov 80  }
  0x13   : > { %672 = vmatprep.subr.bf16.mxu0 %v4504_v1  ;;  %3619 = vmatprep.mubr.msk.bf16.mxu0 %vm664_vm0, %v4332_v6  ;;  %s4228_s21 = smul.u32 48, %s5444_s25  ;;  %vm1668_vm12 = vcmask 392448   ;;  %vm1671_vm13 = vcmask 385280   ;;  %vm1927_vm14 = vcmask 523648   ;;  %vm1930_vm15 = vcmask 516480   ;;  %s5438_s26 = smov 48  }
  0x14   : > { %867 = vmatpush1.bf16.msra.mxu1 %v4341_v60  ;;  %s5440_s22 = smov 96   ;;  %s5442_s23 = smov 80  }
  0x15   : > { %868 = vmatprep.subr.bf16.mxu1 %v4342_v61  ;;  %s4971_s27 = scalar_lea.vmem %s5420_s17, %s4228_s21  ;;  %s5439_s21 = smov 112  }
  0x16   : > { %673 = vmatpush1.bf16.msra.mxu0 %v4320_v3 }
  0x17   : > { %674 = vmatprep.subr.bf16.mxu0 %v4504_v1 }
  0x18   : > { %869 = vmatpush1.bf16.msra.mxu1 %v4344_v62 }
  0x1a   : > { %675 = vmatpush1.bf16.msra.mxu0 %v4321_v4 }
  0x1b   : > { %676 = vmatprep.subr.bf16.mxu0 %v4504_v1 }
  0x1e   : > { %677 = vmatpush1.bf16.msra.mxu0 %v4322_v5 }
  0x1f   : > { %678 = vmatprep.subr.bf16.mxu0 %v4504_v1 }
  0x22   : > { %679 = vmatpush1.bf16.msra.mxu0 %v4323_v7 }
  0x23   : > { %680 = vmatprep.subr.bf16.mxu0 %v4504_v1 }
  0x26   : > { %681 = vmatpush1.bf16.msra.mxu0 %v4324_v8 }
  0x27   : > { %682 = vmatprep.subr.bf16.mxu0 %v4504_v1 }
  0x2a   : > { %683 = vmatpush1.bf16.msra.mxu0 %v4325_v9 }
  0x2b   : > { %684 = vmatprep.subr.bf16.mxu0 %v4504_v1 }
  0x2e   : > { %685 = vmatpush1.bf16.msra.mxu0 %v4326_v10 }
  0x2f   : > { %686 = vmatprep.subr.bf16.mxu0 %v4504_v1 }
  0x32   : > { %687 = vmatpush1.bf16.msra.mxu0 %v4327_v11  ;;  %v3620_v11 = vld [vmem:[%s5408_s5] ss:$0 sm:$0xff] }
  0x33   : > { %688 = vmatprep.subr.bf16.mxu0 %v4504_v1 }
  0x36   : > { %689 = vmatpush1.bf16.msra.mxu0 %v4328_v12 }
  0x37   : > { %690 = vmatprep.subr.bf16.mxu0 %v4504_v1 }
  0x3a   : > { %691 = vmatpush1.bf16.msra.mxu0 %v4329_v13 }
  0x3d   : > { %701 = vmatmul.mubr.bf16.vlgmr.msra.gmra.mrb[0].mxu0 %v4330_v14 }
 0x110   : > { %v702_v24 = vpop.f32.mrb[0].mxu0 }
 0x111   : > { %v703_v26 = vadd.f32 %v3604_v22, %v702_v24  ;;  %v704_v27 = vpop.f32.mrb[1].mxu0 }
 0x112   : > { %v705_v28 = vpop.f32.mrb[2].mxu0 }
 0x113   : > { %v727_v30 = vadd.f32 %v722_v25, %v703_v26  ;;  %v706_v31 = vadd.f32 %v3604_v22, %v705_v28  ;;  %v707_v32 = vpop.f32.mrb[3].mxu0  ;;  %v806_v25 = vlaneseq  ;;  %v804_v28 = vld [vmem:[%s5411_s8] sm:$0x3] }
 0x115   : > { %729 = vst.msk [vmem:[#allocation2 + $0x1] sm:$0xff] %vm664_vm0, %v727_v30  ;;  %v728_v33 = vadd.f32 %v724_v29, %v706_v31  ;;  %v4726_v26 = vshrl.u32 %v806_v25, 7  ;;  %v4505_v30 = vmov 0.0|0.0  }
 0x116   : > { %4168 = vmatprep.subr.bf16.mxu1 %v4505_v30  ;;  %4179 = vmatprep.subr.bf16.mxu0 %v4505_v30 }
 0x117   : > { %730 = vst.msk [vmem:[#allocation2 + $0x9] sm:$0xff] %vm664_vm0, %v728_v33  ;;  %v808_v27 = vsub.s32 0, %v4726_v26  ;;  %v812_v29 = vsub.s32 1, %v4726_v26 }
 0x119   : > { %v809_v31 = vrot.slane %v804_v28, %v808_v27  ;;  %v813_v33 = vrot.slane %v804_v28, %v812_v29 }
 0x11c   : > { %v731_v34 = vld [vmem:[#allocation2] sm:$0xff] }
 0x11d   : > { %v736_v35 = vsel %vm664_vm0, %v731_v34, 0.0 }
 0x11e   : > { %737 = vadd.xlane.f32.xlu0 %v736_v35  ;;  %v733_v36 = vld [vmem:[#allocation2 + $0x10] sm:$0x1]  ;;  %v732_v37 = vld [vmem:[#allocation2 + $0x8] sm:$0xff] }
 0x11f   : > { %v742_v38 = vsel %vm714_vm1, %v733_v36, 0.0  ;;  %v739_v39 = vsel %vm664_vm0, %v732_v37, 0.0 }
 0x120   : > { %743 = vadd.xlane.f32.xlu1 %v742_v38 }
 0x122   : > { %740 = vadd.xlane.f32.xlu0 %v739_v39 }
 0x1ab   : > { %v738_v40 = vpop.xlane.xlu0 %737 }
 0x1ac   : > { %v746_v41 = vmul.f32 0.015625, %v738_v40 }
 0x1ad   : > { %v744_v42 = vpop.xlane.xlu1 %743 }
 0x1ae   : > { %v749_v43 = vsub.f32 %v731_v34, %v746_v41  ;;  %v748_v44 = vmul.f32 0.015625, %v744_v42 }
 0x1af   : > { %v741_v45 = vpop.xlane.xlu0 %740 }
 0x1b0   : > { %v751_v46 = vsub.f32 %v733_v36, %v748_v44  ;;  %v747_v47 = vmul.f32 0.015625, %v741_v45  ;;  %v752_v48 = vmul.f32 %v749_v43, %v749_v43  ;;  %v4508_v44 = vmov 0.0  }
 0x1b1   : > { %3935 = vmatprep.mubr.msk.f32.mxu0 %vm4507_vm3, %v4508_v44 }
 0x1b2   : > { %v750_v49 = vsub.f32 %v732_v37, %v747_v47  ;;  %v755_v50 = vsel %vm664_vm0, %v752_v48, 0.0  ;;  %v754_v51 = vmul.f32 %v751_v46, %v751_v46 }
 0x1b3   : > { %756 = vadd.xlane.f32.xlu1 %v755_v50 }
 0x1b4   : > { %v753_v52 = vmul.f32 %v750_v49, %v750_v49  ;;  %v761_v53 = vsel %vm714_vm1, %v754_v51, 0.0 }
 0x1b6   : > { %v758_v54 = vsel %vm664_vm0, %v753_v52, 0.0 }
 0x1b7   : > { %762 = vadd.xlane.f32.xlu1 %v761_v53  ;;  %759 = vadd.xlane.f32.xlu0 %v758_v54 }
 0x240   : > { %v757_v63 = vpop.xlane.xlu1 %756 }
 0x241   : > { %v764_v0 = vmul.f32 0.015625, %v757_v63 }
 0x243   : > { %v767_v2 = vadd.f32 1e-05, %v764_v0 }
 0x244   : > { %v763_v3 = vpop.xlane.xlu1 %762  ;;  %v760_v4 = vpop.xlane.xlu0 %759 }
 0x245   : > { %4373 = vrsqrt.f32 %v767_v2  ;;  %v766_v5 = vmul.f32 0.015625, %v763_v3  ;;  %v765_v6 = vmul.f32 0.015625, %v760_v4 }
 0x247   : > { %v769_v7 = vadd.f32 1e-05, %v766_v5  ;;  %v768_v8 = vadd.f32 1e-05, %v765_v6 }
 0x249   : > { %4375 = vrsqrt.f32 %v769_v7 }
 0x24a   : > { %4377 = vrsqrt.f32 %v768_v8 }
 0x24f   : > { %v4374_v9 = vpop.eup %4373 }
 0x250   : > { %v773_v10 = vmul.f32 %v4374_v9, %v749_v43 }
 0x252   : > { %v782_v15 = vmul.f32 %v3620_v11, %v773_v10 }
 0x253   : > { %v4376_v12 = vpop.eup %4375 }
 0x254   : > { %v4378_v13 = vpop.eup %4377  ;;  %v775_v18 = vmul.f32 %v4376_v12, %v751_v46  ;;  %v791_v19 = vadd.f32 %v3621_v16, %v782_v15 }
 0x255   : > { %v774_v14 = vmul.f32 %v4378_v13, %v750_v49 }
 0x256   : > { %v784_v22 = vmul.f32 %v3620_v11, %v775_v18 }
 0x257   : > { %v783_v17 = vmul.f32 %v3620_v11, %v774_v14 }
 0x258   : > { %v793_v23 = vadd.f32 %v3621_v16, %v784_v22 }
 0x259   : > { %v792_v20 = vadd.f32 %v3621_v16, %v783_v17 }
 0x25a   : > { %v795_v24 = vpack.c.bf16 %v793_v23, %v793_v23 }
 0x25b   : > { %v794_v21 = vpack.c.bf16 %v792_v20, %v791_v19 }
 0x25d   : > { %3630 = vmatmul.mubr.msk.bf16.vlgmr.msra.gmra.mrb[0].mxu1 %vm664_vm0, %v794_v21 }
 0x25e   : > { %904 = vmatprep.mubr.bf16.mxu1 %v4504_v1 }
 0x265   : > { %3631 = vmatmul.mubr.msk.bf16.gmra.mrb[4].mxu1 %vm664_vm0, %v795_v24 }
 0x266   : > { %3890 = vmatprep.mubr.msk.f32.mxu1 %vm4507_vm3, %v4508_v44 }
 0x330   : > { %v896_v32 = vpop.f32.mrb[0].mxu1 }
 0x331   : > { %v898_v34 = vpop.f32.mrb[1].mxu1  ;;  %v4739_v36 = vadd.f32 %v896_v32, %v809_v31 }
 0x332   : > { %v900_v35 = vpop.f32.mrb[2].mxu1  ;;  %v899_v39 = vadd.f32 %v898_v34, %v813_v33 }
 0x333   : > { %v4741_v37 = vadd.f32 %v900_v35, %v809_v31  ;;  %v902_v38 = vpop.f32.mrb[3].mxu1 }
 0x334   : > { %v903_v40 = vadd.f32 %v902_v38, %v813_v33 }
 0x335   : > { %v4745_v41 = vpack.i.bf16 %v4741_v37, %v4739_v36 }
 0x336   : > { %v4173_v42 = vpack.c.bf16 %v903_v40, %v899_v39  ;;  %v4747_v43 = vpack.i.bf16 %v903_v40, %v899_v39 }
 0x337   : > { %4249 = vrot.lane.b32.xlu0 %v4745_v41, %s4506_s29 }
 0x338   : > { %v906_v45 = vpop.f32.mrb[4].mxu1 }
 0x339   : > { %v4755_v46 = vadd.f32 %v906_v45, %v809_v31  ;;  %v908_v47 = vpop.f32.mrb[5].mxu1 }
 0x33a   : > { %v910_v48 = vpop.f32.mrb[6].mxu1  ;;  %v4775_v56 = vadd.f32 %v908_v47, %v813_v33 }
 0x33b   : > { %v911_v49 = vpop.f32.mrb[7].mxu1  ;;  %920 = vrot.lane.b32.xlu1 %v4755_v46, %s4506_s29 }
 0x3a9   : > { %v4250_v50 = vpop.permute.xlu0 %4249 }
 0x3aa   : > { %v4252_v51 = vunpack.i.h.bf16 %v4250_v50  ;;  %v4251_v52 = vunpack.i.l.bf16 %v4250_v50 }
 0x3ac   : > { %v4169_v54 = vpack.c.bf16 %v4252_v51, %v4251_v52 }
 0x3ad   : > { %v921_v55 = vpop.permute.xlu1 %920 }
 0x3ae   : > { %4171 = vmatpush3.bf16.xpose.msk.msra.mxu1 %vm4761_vm5, %v4169_v54 }
 0x3af   : > { %3888 = vmatprep.subr.mxu1 %v4508_v44 }
 0x3b6   : > { %3889 = vmatpush3.xpose.msk.msra.mxu1 %vm922_vm4, %v921_v55 }
 0x3b7   : > { %4172 = vmatprep.subr.bf16.mxu1 %v4505_v30 }
 0x3b9   : > { %3891 = vmatmul.mubr.msk.f32.vlgmr.msra.gmra.mrb[8].mxu1 %vm922_vm4, %v4739_v36 }
 0x3ba   : > { %4174 = vmatpush3.bf16.msra.mxu1 %v4173_v42  ;;  %3893 = vmatprep.mubr.msk.f32.mxu1 %vm4507_vm3, %v4508_v44 }
 0x3bb   : > { %3903 = vmatprep.subr.mxu1 %v4508_v44 }
 0x3bd   : > { %3894 = vmatmul.mubr.msk.f32.gmra.mrb[10].mxu1 %vm922_vm4, %v4741_v37 }
 0x3be   : > { %3904 = vmatpush3.msk.msra.mxu1 %vm1065_vm6, %v4775_v56  ;;  %3896 = vmatprep.mubr.msk.f32.mxu1 %vm4507_vm3, %v4508_v44 }
 0x3bf   : > { %4175 = vmatprep.subr.bf16.mxu1 %v4505_v30 }
 0x3c1   : > { %3897 = vmatmul.mubr.msk.f32.gmra.mrb[12].mxu1 %vm922_vm4, %v4755_v46 }
 0x3c2   : > { %3905 = vmatprep.mubr.msk.f32.mxu1 %vm4507_vm3, %v4508_v44 }
 0x48c   : > { %v1001_v57 = vpop.f32.mrb[8].mxu1 }
 0x48d   : > { %v1015_v58 = vmul.f32 0.25, %v1001_v57  ;;  %v3892_v59 = vpop.f32.mrb[9].mxu1 }
 0x48f   : > { %v1019_v60 = vsel %vm1018_vm7, %v1015_v58, -inf }
 0x490   : > { %1020 = vmax.xlane.f32.xlu1 %v1019_v60  ;;  %v1006_v61 = vpop.f32.mrb[10].mxu1 }
 0x491   : > { %v1016_v62 = vmul.f32 0.25, %v1006_v61  ;;  %v3895_v63 = vpop.f32.mrb[11].mxu1 }
 0x493   : > { %v1022_v0 = vsel %vm1018_vm7, %v1016_v62, -inf }
 0x494   : > { %1023 = vmax.xlane.f32.xlu0 %v1022_v0  ;;  %v1011_v2 = vpop.f32.mrb[12].mxu1 }
 0x495   : > { %v1017_v3 = vmul.f32 0.25, %v1011_v2  ;;  %v3898_v4 = vpop.f32.mrb[13].mxu1 }
 0x497   : > { %v1026_v5 = vsel %vm1025_vm8, %v1017_v3, -inf }
 0x498   : > { %1027 = vmax.xlane.f32.xlu0 %v1026_v5 }
 0x51d   : > { %v1021_v6 = vpop.xlane.xlu1 %1020 }
 0x51e   : > { %v1029_v7 = vsub.f32 %v1015_v58, %v1021_v6 }
 0x520   : > { %v1032_v8 = vmul.f32 1.442695, %v1029_v7 }
 0x521   : > { %v1024_v9 = vpop.xlane.xlu0 %1023 }
 0x522   : > { %4379 = vpow2.f32 %v1032_v8  ;;  %v1030_v10 = vsub.f32 %v1016_v62, %v1024_v9 }
 0x524   : > { %v1034_v11 = vmul.f32 1.442695, %v1030_v10 }
 0x525   : > { %v1028_v16 = vpop.xlane.xlu0 %1027 }
 0x526   : > { %4381 = vpow2.f32 %v1034_v11  ;;  %v1031_v17 = vsub.f32 %v1017_v3, %v1028_v16 }
 0x528   : > { %v1036_v18 = vmul.f32 1.442695, %v1031_v17 }
 0x52a   : > { %4383 = vpow2.f32 %v1036_v18 }
 0x52c   : > { %v4380_v12 = vpop.eup %4379 }
 0x52d   : > { %v1038_v13 = vsel %vm1018_vm7, %v4380_v12, 0.0 }
 0x52e   : > { %1039 = vadd.xlane.f32.xlu1 %v1038_v13 }
 0x530   : > { %v4382_v14 = vpop.eup %4381 }
 0x531   : > { %v1041_v15 = vsel %vm1018_vm7, %v4382_v14, 0.0 }
 0x532   : > { %1042 = vadd.xlane.f32.xlu0 %v1041_v15 }
 0x534   : > { %v4384_v19 = vpop.eup %4383 }
 0x535   : > { %v1044_v20 = vsel %vm1025_vm8, %v4384_v19, 0.0 }
 0x53f   : > { %1163 = vrot.lane.b32.xlu1 %v4755_v46, %s5430_s0 }
 0x543   : > { %1153 = vrot.lane.b32.xlu1 %v4739_v36, %s5428_s30 }
 0x548   : > { %4254 = vrot.lane.b32.xlu0 %v4745_v41, %s5430_s0 }
 0x54c   : > { %1157 = vrot.lane.b32.xlu0 %v4755_v46, %s5428_s30 }
 0x567   : > { %1045 = vadd.xlane.f32.xlu1 %v1044_v20 }
 0x578   : > { %1155 = vrot.lane.b32.xlu1 %v4741_v37, %s5428_s30 }
 0x5bb   : > { %v1040_v21 = vpop.xlane.xlu1 %1039 }
 0x5bc   : > { %4385 = vrcp.f32 %v1040_v21 }
 0x5bf   : > { %v1043_v22 = vpop.xlane.xlu0 %1042  ;;  %v1164_v35 = vpop.permute.xlu1 %1163 }
 0x5c0   : > { %4387 = vrcp.f32 %v1043_v22 }
 0x5c3   : > { %v4255_v23 = vpop.permute.xlu0 %4254  ;;  %v1154_v38 = vpop.permute.xlu1 %1153 }
 0x5c4   : > { %v4257_v24 = vunpack.i.h.bf16 %v4255_v23  ;;  %v4256_v25 = vunpack.i.l.bf16 %v4255_v23 }
 0x5c6   : > { %v4386_v28 = vpop.eup %4385  ;;  %v4176_v31 = vpack.c.bf16 %v4257_v24, %v4256_v25 }
 0x5c7   : > { %v4804_v32 = vmul.f32 %v4386_v28, %v4380_v12  ;;  %v1158_v47 = vpop.permute.xlu0 %1157 }
 0x5c9   : > { %3906 = vmatmul.mubr.msk.f32.vlgmr.msra.gmra.mrb[14].mxu1 %vm1018_vm7, %v4804_v32 }
 0x5ca   : > { %v4388_v33 = vpop.eup %4387  ;;  %4178 = vmatpush3.bf16.xpose.msk.msra.mxu1 %vm4761_vm5, %v4176_v31  ;;  %3908 = vmatprep.mubr.msk.f32.mxu1 %vm4507_vm3, %v4508_v44 }
 0x5cb   : > { %v4812_v34 = vmul.f32 %v4388_v33, %v4382_v14  ;;  %3918 = vmatprep.subr.mxu1 %v4508_v44 }
 0x5cd   : > { %3909 = vmatmul.mubr.msk.f32.gmra.mrb[16].mxu1 %vm1018_vm7, %v4812_v34 }
 0x5ce   : > { %3911 = vmatprep.mubr.msk.f32.mxu1 %vm4507_vm3, %v4508_v44 }
 0x5d2   : > { %3919 = vmatpush3.xpose.msk.msra.mxu1 %vm922_vm4, %v1164_v35 }
 0x5d3   : > { %4186 = vmatprep.subr.bf16.mxu1 %v4505_v30 }
 0x5f4   : > { %v1046_v39 = vpop.xlane.xlu1 %1045 }
 0x5f5   : > { %4389 = vrcp.f32 %v1046_v39 }
 0x5f8   : > { %v1156_v45 = vpop.permute.xlu1 %1155 }
 0x5ff   : > { %v4390_v40 = vpop.eup %4389 }
 0x600   : > { %v4821_v42 = vmul.f32 %v4390_v40, %v4384_v19 }
 0x602   : > { %3912 = vmatmul.mubr.msk.f32.gmra.mrb[18].mxu1 %vm1018_vm7, %v4821_v42 }
 0x603   : > { %3920 = vmatprep.mubr.msk.f32.mxu1 %vm4507_vm3, %v4508_v44 }
 0x606   : > { %3921 = vmatmul.mubr.msk.f32.vlgmr.msra.gmra.mrb[20].mxu1 %vm922_vm4, %v1154_v38 }
 0x607   : > { %3923 = vmatprep.mubr.msk.f32.mxu1 %vm4507_vm3, %v4508_v44 }
 0x60a   : > { %3924 = vmatmul.mubr.msk.f32.gmra.mrb[22].mxu1 %vm922_vm4, %v1156_v45 }
 0x60b   : > { %3926 = vmatprep.mubr.msk.f32.mxu1 %vm4507_vm3, %v4508_v44 }
 0x60e   : > { %3927 = vmatmul.mubr.msk.f32.gmra.mrb[24].mxu1 %vm922_vm4, %v1158_v47 }
 0x60f   : > { %3965 = vmatprep.mubr.msk.f32.mxu1 %vm4507_vm3, %v4508_v44 }
 0x69c   : > { %v1135_v48 = vpop.f32.mrb[14].mxu1 }
 0x69d   : > { %1149 = vst.msk [vmem:[#allocation3] sm:$0xff] %vm922_vm4, %v1135_v48  ;;  %v3907_v49 = vpop.f32.mrb[15].mxu1 }
 0x6a0   : > { %v1140_v50 = vpop.f32.mrb[16].mxu1 }
 0x6a1   : > { %1150 = vst.msk [vmem:[#allocation3 + $0x8] sm:$0xff] %vm922_vm4, %v1140_v50  ;;  %v3910_v51 = vpop.f32.mrb[17].mxu1 }
 0x6d5   : > { %v1145_v52 = vpop.f32.mrb[18].mxu1 }
 0x6d6   : > { %1152 = vst.msk [vmem:[#allocation3 + $0x10] sm:$0x1] %vm1151_vm9, %v1145_v52  ;;  %v3913_v54 = vpop.f32.mrb[19].mxu1 }
 0x6d9   : > { %v1243_v55 = vpop.f32.mrb[20].mxu1 }
 0x6da   : > { %v1257_v57 = vmul.f32 0.25, %v1243_v55  ;;  %v3922_v58 = vpop.f32.mrb[21].mxu1 }
 0x6dc   : > { %v1260_v59 = vsel %vm1018_vm7, %v1257_v57, -inf }
 0x6dd   : > { %1261 = vmax.xlane.f32.xlu1 %v1260_v59  ;;  %v1248_v60 = vpop.f32.mrb[22].mxu1 }
 0x6de   : > { %v1258_v61 = vmul.f32 0.25, %v1248_v60  ;;  %v3925_v62 = vpop.f32.mrb[23].mxu1 }
 0x6e0   : > { %v1263_v63 = vsel %vm1018_vm7, %v1258_v61, -inf }
 0x6e1   : > { %1264 = vmax.xlane.f32.xlu0 %v1263_v63  ;;  %v1253_v0 = vpop.f32.mrb[24].mxu1 }
 0x6e2   : > { %v1259_v2 = vmul.f32 0.25, %v1253_v0  ;;  %v3928_v3 = vpop.f32.mrb[25].mxu1 }
 0x6e4   : > { %v1266_v4 = vsel %vm1025_vm8, %v1259_v2, -inf }
 0x6e5   : > { %1267 = vmax.xlane.f32.xlu0 %v1266_v4 }
 0x6ee   : > { %4259 = vrot.lane.b32.xlu1 %v4747_v43, %s5428_s30 }
 0x6f2   : > { %4264 = vrot.lane.b32.xlu1 %v4745_v41, %s4511_s18 }
 0x6f6   : > { %1424 = vrot.lane.b32.xlu1 %v4755_v46, %s4511_s18 }
 0x76a   : > { %v1262_v5 = vpop.xlane.xlu1 %1261 }
 0x76b   : > { %v1269_v6 = vsub.f32 %v1257_v57, %v1262_v5 }
 0x76d   : > { %v1272_v7 = vmul.f32 1.442695, %v1269_v6 }
 0x76e   : > { %v4260_v8 = vpop.permute.xlu1 %4259  ;;  %v1265_v9 = vpop.xlane.xlu0 %1264 }
 0x76f   : > { %4391 = vpow2.f32 %v1272_v7  ;;  %v4262_v10 = vunpack.i.h.bf16 %v4260_v8  ;;  %v4261_v11 = vunpack.i.l.bf16 %v4260_v8  ;;  %v1270_v12 = vsub.f32 %v1258_v61, %v1265_v9 }
 0x771   : > { %v4180_v13 = vpack.c.bf16 %v4262_v10, %v4261_v11  ;;  %v1274_v14 = vmul.f32 1.442695, %v1270_v12 }
 0x772   : > { %v1268_v19 = vpop.xlane.xlu0 %1267  ;;  %v4265_v23 = vpop.permute.xlu1 %4264 }
 0x773   : > { %4393 = vpow2.f32 %v1274_v14  ;;  %4181 = vmatpush3.bf16.msra.mxu0 %v4180_v13  ;;  %v1271_v20 = vsub.f32 %v1259_v2, %v1268_v19  ;;  %v4267_v31 = vunpack.i.h.bf16 %v4265_v23  ;;  %v4266_v33 = vunpack.i.l.bf16 %v4265_v23 }
 0x774   : > { %3933 = vmatprep.subr.mxu0 %v4508_v44 }
 0x775   : > { %v1276_v21 = vmul.f32 1.442695, %v1271_v20 }
 0x777   : > { %4395 = vpow2.f32 %v1276_v21 }
 0x779   : > { %v4392_v15 = vpop.eup %4391 }
 0x77a   : > { %v1278_v16 = vsel %vm1018_vm7, %v4392_v15, 0.0 }
 0x77b   : > { %1279 = vadd.xlane.f32.xlu0 %v1278_v16 }
 0x77d   : > { %v4394_v17 = vpop.eup %4393 }
 0x77e   : > { %v1281_v18 = vsel %vm1018_vm7, %v4394_v17, 0.0 }
 0x77f   : > { %1282 = vadd.xlane.f32.xlu1 %v1281_v18 }
 0x781   : > { %v4396_v22 = vpop.eup %4395 }
 0x790   : > { %4269 = vrot.lane.b32.xlu1 %v4745_v41, %s5424_s19  ;;  %v1284_v41 = vsel %vm1025_vm8, %v4396_v22, 0.0 }
 0x791   : > { %1302 = vrot.lane.b32.xlu0 %v4775_v56, %s5428_s30 }
 0x794   : > { %1416 = vrot.lane.b32.xlu1 %v4741_v37, %s5426_s1 }
 0x798   : > { %1683 = vrot.lane.b32.xlu1 %v4755_v46, %s5424_s19 }
 0x79c   : > { %1675 = vrot.lane.b32.xlu1 %v4741_v37, %s5422_s20  ;;  %v1425_v37 = vpop.permute.xlu1 %1424 }
 0x7b0   : > { %1285 = vadd.xlane.f32.xlu0 %v1284_v41 }
 0x7c6   : > { %1414 = vrot.lane.b32.xlu0 %v4739_v36, %s5426_s1 }
 0x7ca   : > { %1418 = vrot.lane.b32.xlu0 %v4755_v46, %s5426_s1 }
 0x7ce   : > { %1673 = vrot.lane.b32.xlu0 %v4739_v36, %s5422_s20  ;;  %v4183_v36 = vpack.c.bf16 %v4267_v31, %v4266_v33 }
 0x7d2   : > { %1677 = vrot.lane.b32.xlu0 %v4755_v46, %s5422_s20 }
 0x808   : > { %v1280_v24 = vpop.xlane.xlu0 %1279 }
 0x809   : > { %4397 = vrcp.f32 %v1280_v24 }
 0x80c   : > { %v1283_v25 = vpop.xlane.xlu1 %1282  ;;  %v1303_v28 = vpop.permute.xlu0 %1302 }
 0x80d   : > { %4399 = vrcp.f32 %v1283_v25  ;;  %3934 = vmatpush3.msk.msra.mxu0 %vm1065_vm6, %v1303_v28 }
 0x80e   : > { %4182 = vmatprep.subr.bf16.mxu0 %v4505_v30 }
 0x810   : > { %v4270_v45 = vpop.permute.xlu1 %4269 }
 0x811   : > { %v4272_v49 = vunpack.i.h.bf16 %v4270_v45  ;;  %v4271_v50 = vunpack.i.l.bf16 %v4270_v45 }
 0x813   : > { %v4398_v35 = vpop.eup %4397  ;;  %v4190_v51 = vpack.c.bf16 %v4272_v49, %v4271_v50 }
 0x814   : > { %v4872_v38 = vmul.f32 %v4398_v35, %v4392_v15  ;;  %v1417_v54 = vpop.permute.xlu1 %1416 }
 0x816   : > { %3936 = vmatmul.mubr.msk.f32.vlgmr.msra.gmra.mrb[4].mxu0 %vm1018_vm7, %v4872_v38 }
 0x817   : > { %v4400_v46 = vpop.eup %4399  ;;  %4185 = vmatpush3.bf16.xpose.msk.msra.mxu0 %vm4761_vm5, %v4183_v36  ;;  %3938 = vmatprep.mubr.msk.f32.mxu0 %vm4507_vm3, %v4508_v44 }
 0x818   : > { %v4880_v39 = vmul.f32 %v4400_v46, %v4394_v17  ;;  %3948 = vmatprep.subr.mxu0 %v4508_v44  ;;  %v1684_v57 = vpop.permute.xlu1 %1683 }
 0x81a   : > { %3939 = vmatmul.mubr.msk.f32.gmra.mrb[6].mxu0 %vm1018_vm7, %v4880_v39 }
 0x81b   : > { %3941 = vmatprep.mubr.msk.f32.mxu0 %vm4507_vm3, %v4508_v44 }
 0x81c   : > { %v1676_v59 = vpop.permute.xlu1 %1675 }
 0x81f   : > { %3949 = vmatpush3.xpose.msk.msra.mxu0 %vm922_vm4, %v1425_v37 }
 0x820   : > { %4189 = vmatprep.subr.bf16.mxu0 %v4505_v30 }
 0x83d   : > { %v1286_v40 = vpop.xlane.xlu0 %1285 }
 0x83e   : > { %4401 = vrcp.f32 %v1286_v40 }
 0x841   : > { %v1415_v52 = vpop.permute.xlu0 %1414 }
 0x845   : > { %v1419_v55 = vpop.permute.xlu0 %1418 }
 0x848   : > { %v4402_v47 = vpop.eup %4401 }
 0x849   : > { %v4889_v48 = vmul.f32 %v4402_v47, %v4396_v22  ;;  %v1674_v58 = vpop.permute.xlu0 %1673 }
 0x84b   : > { %3942 = vmatmul.mubr.msk.f32.gmra.mrb[8].mxu0 %vm1018_vm7, %v4889_v48 }
 0x84c   : > { %3950 = vmatprep.mubr.msk.f32.mxu0 %vm4507_vm3, %v4508_v44 }
 0x84d   : > { %v1678_v60 = vpop.permute.xlu0 %1677 }
 0x84f   : > { %3951 = vmatmul.mubr.msk.f32.vlgmr.msra.gmra.mrb[10].mxu0 %vm922_vm4, %v1415_v52 }
 0x850   : > { %4192 = vmatpush3.bf16.xpose.msk.msra.mxu0 %vm4761_vm5, %v4190_v51  ;;  %3953 = vmatprep.mubr.msk.f32.mxu0 %vm4507_vm3, %v4508_v44 }
 0x851   : > { %3978 = vmatprep.subr.mxu0 %v4508_v44 }
 0x853   : > { %3954 = vmatmul.mubr.msk.f32.gmra.mrb[12].mxu0 %vm922_vm4, %v1417_v54 }
 0x854   : > { %3956 = vmatprep.mubr.msk.f32.mxu0 %vm4507_vm3, %v4508_v44 }
 0x857   : > { %3957 = vmatmul.mubr.msk.f32.gmra.mrb[14].mxu0 %vm922_vm4, %v1419_v55 }
 0x858   : > { %3979 = vmatpush3.xpose.msk.msra.mxu0 %vm922_vm4, %v1684_v57  ;;  %3980 = vmatprep.mubr.msk.f32.mxu0 %vm4507_vm3, %v4508_v44 }
 0x85b   : > { %3981 = vmatmul.mubr.msk.f32.vlgmr.msra.gmra.mrb[16].mxu0 %vm922_vm4, %v1674_v58 }
 0x85c   : > { %3983 = vmatprep.mubr.msk.f32.mxu0 %vm4507_vm3, %v4508_v44 }
 0x85f   : > { %3984 = vmatmul.mubr.msk.f32.gmra.mrb[18].mxu0 %vm922_vm4, %v1676_v59 }
 0x860   : > { %3986 = vmatprep.mubr.msk.f32.mxu0 %vm4507_vm3, %v4508_v44 }
 0x863   : > { %3987 = vmatmul.mubr.msk.f32.gmra.mrb[20].mxu0 %vm922_vm4, %v1678_v60 }
 0x8e9   : > { %v4915_v61 = vpop.f32.mrb[4].mxu0 }
 0x8ea   : > { %v3937_v62 = vpop.f32.mrb[5].mxu0 }
 0x8ed   : > { %v4917_v63 = vpop.f32.mrb[6].mxu0 }
 0x8ee   : > { %v3940_v0 = vpop.f32.mrb[7].mxu0 }
 0x91e   : > { %v4919_v2 = vpop.f32.mrb[8].mxu0 }
 0x91f   : > { %v3943_v3 = vpop.f32.mrb[9].mxu0 }
 0x922   : > { %v1504_v4 = vpop.f32.mrb[10].mxu0 }
 0x923   : > { %v1518_v5 = vmul.f32 0.25, %v1504_v4  ;;  %v3952_v6 = vpop.f32.mrb[11].mxu0 }
 0x925   : > { %v1521_v7 = vsel %vm1018_vm7, %v1518_v5, -inf }
 0x926   : > { %1522 = vmax.xlane.f32.xlu1 %v1521_v7  ;;  %v1509_v8 = vpop.f32.mrb[12].mxu0 }
 0x927   : > { %v1519_v9 = vmul.f32 0.25, %v1509_v8  ;;  %v3955_v10 = vpop.f32.mrb[13].mxu0 }
 0x929   : > { %v1524_v11 = vsel %vm1018_vm7, %v1519_v9, -inf }
 0x92a   : > { %1525 = vmax.xlane.f32.xlu0 %v1524_v11  ;;  %v1514_v12 = vpop.f32.mrb[14].mxu0 }
 0x92b   : > { %v1520_v13 = vmul.f32 0.25, %v1514_v12  ;;  %v3958_v14 = vpop.f32.mrb[15].mxu0 }
 0x92d   : > { %v1527_v15 = vsel %vm1025_vm8, %v1520_v13, -inf }
 0x92e   : > { %1528 = vmax.xlane.f32.xlu0 %v1527_v15  ;;  %v1763_v16 = vpop.f32.mrb[16].mxu0 }
 0x92f   : > { %v1777_v17 = vmul.f32 0.25, %v1763_v16  ;;  %v3982_v18 = vpop.f32.mrb[17].mxu0 }
 0x931   : > { %v1780_v19 = vsel %vm1018_vm7, %v1777_v17, -inf }
 0x932   : > { %1781 = vmax.xlane.f32.xlu0 %v1780_v19  ;;  %v1768_v20 = vpop.f32.mrb[18].mxu0 }
 0x933   : > { %v1778_v21 = vmul.f32 0.25, %v1768_v20  ;;  %v3985_v22 = vpop.f32.mrb[19].mxu0 }
 0x935   : > { %v1783_v41 = vsel %vm1018_vm7, %v1778_v21, -inf }
 0x936   : > { %1784 = vmax.xlane.f32.xlu1 %v1783_v41  ;;  %v1773_v23 = vpop.f32.mrb[20].mxu0 }
 0x937   : > { %v1779_v37 = vmul.f32 0.25, %v1773_v23  ;;  %v3988_v24 = vpop.f32.mrb[21].mxu0 }
 0x938   : > { %v1293_v24 = vadd.f32 %v4872_v38, %v4804_v32 }
 0x939   : > { %v1786_v25 = vsel %vm1025_vm8, %v1779_v37, -inf }
 0x93a   : > { %1787 = vmax.xlane.f32.xlu0 %v1786_v25 }
 0x947   : > { %1561 = vrot.lane.b32.xlu1 %v4775_v56, %s5426_s1 }
 0x950   : > { %4274 = vrot.lane.b32.xlu0 %v4747_v43, %s5426_s1 }
 0x9b3   : > { %v1523_v28 = vpop.xlane.xlu1 %1522 }
 0x9b4   : > { %v1530_v31 = vsub.f32 %v1518_v5, %v1523_v28 }
 0x9b6   : > { %v1533_v33 = vmul.f32 1.442695, %v1530_v31 }
 0x9b7   : > { %v1526_v35 = vpop.xlane.xlu0 %1525 }
 0x9b8   : > { %4403 = vpow2.f32 %v1533_v33  ;;  %v1531_v36 = vsub.f32 %v1519_v9, %v1526_v35 }
 0x9ba   : > { %v1535_v46 = vmul.f32 1.442695, %v1531_v36 }
 0x9bb   : > { %v1529_v40 = vpop.xlane.xlu0 %1528 }
 0x9bc   : > { %4405 = vpow2.f32 %v1535_v46  ;;  %v1532_v45 = vsub.f32 %v1520_v13, %v1529_v40  ;;  %v1294_v46 = vadd.f32 %v4880_v39, %v4812_v34  ;;  %v1295_v34 = vadd.f32 %v4889_v48, %v4821_v42 }
 0x9be   : > { %v1537_v47 = vmul.f32 1.442695, %v1532_v45 }
 0x9bf   : > { %v1782_v49 = vpop.xlane.xlu0 %1781 }
 0x9c0   : > { %4407 = vpow2.f32 %v1537_v47  ;;  %v1789_v50 = vsub.f32 %v1777_v17, %v1782_v49 }
 0x9c2   : > { %v4404_v51 = vpop.eup %4403  ;;  %v1792_v52 = vmul.f32 1.442695, %v1789_v50 }
 0x9c3   : > { %v1785_v54 = vpop.xlane.xlu1 %1784  ;;  %v1539_v55 = vsel %vm1018_vm7, %v4404_v51, 0.0 }
 0x9c4   : > { %4409 = vpow2.f32 %v1792_v52  ;;  %v1790_v57 = vsub.f32 %v1778_v21, %v1785_v54  ;;  %1540 = vadd.xlane.f32.xlu1 %v1539_v55 }
 0x9c6   : > { %v4406_v58 = vpop.eup %4405  ;;  %v1794_v59 = vmul.f32 1.442695, %v1790_v57 }
 0x9c7   : > { %v1788_v60 = vpop.xlane.xlu0 %1787  ;;  %v1542_v62 = vsel %vm1018_vm7, %v4406_v58, 0.0  ;;  %v1562_v13 = vpop.permute.xlu1 %1561 }
 0x9c8   : > { %4411 = vpow2.f32 %v1794_v59  ;;  %v1791_v0 = vsub.f32 %v1779_v37, %v1788_v60  ;;  %1543 = vadd.xlane.f32.xlu0 %v1542_v62 }
 0x9ca   : > { %v4408_v3 = vpop.eup %4407  ;;  %v1796_v4 = vmul.f32 1.442695, %v1791_v0 }
 0x9cb   : > { %v4275_v5 = vpop.permute.xlu0 %4274  ;;  %v1545_v6 = vsel %vm1025_vm8, %v4408_v3, 0.0 }
 0x9cc   : > { %4413 = vpow2.f32 %v1796_v4  ;;  %v4277_v7 = vunpack.i.h.bf16 %v4275_v5  ;;  %v4276_v8 = vunpack.i.l.bf16 %v4275_v5  ;;  %1546 = vadd.xlane.f32.xlu1 %v1545_v6  ;;  %v4346_v5 = vld [vmem:[%s5412_s9 + $0x8] sm:$0xff]   ;;  %v4347_v6 = vld [vmem:[%s5412_s9 + $0x10] sm:$0xff]  }
 0x9ce   : > { %v4410_v9 = vpop.eup %4409  ;;  %v4187_v10 = vpack.c.bf16 %v4277_v7, %v4276_v8  ;;  %v4348_v7 = vld [vmem:[%s5412_s9 + $0x18] sm:$0xff]  }
 0x9cf   : > { %v1798_v11 = vsel %vm1018_vm7, %v4410_v9, 0.0 }
 0x9d0   : > { %1799 = vadd.xlane.f32.xlu0 %v1798_v11  ;;  %4188 = vmatpush3.bf16.msra.mxu1 %v4187_v10 }
 0x9d1   : > { %3963 = vmatprep.subr.mxu1 %v4508_v44 }
 0x9d2   : > { %v4412_v12 = vpop.eup %4411 }
 0x9d3   : > { %v1801_v14 = vsel %vm1018_vm7, %v4412_v12, 0.0 }
 0x9d4   : > { %1802 = vadd.xlane.f32.xlu1 %v1801_v14  ;;  %3964 = vmatpush3.msk.msra.mxu1 %vm1065_vm6, %v1562_v13 }
 0x9d5   : > { %4193 = vmatprep.subr.bf16.mxu1 %v4505_v30 }
 0x9d6   : > { %v4939_v15 = vpop.eup %4413 }
 0x9d7   : > { %v1804_v16 = vsel %vm1025_vm8, %v4939_v15, 0.0 }
 0x9d8   : > { %1805 = vadd.xlane.f32.xlu1 %v1804_v16 }
 0x9e6   : > { %1820 = vrot.lane.b32.xlu0 %v4775_v56, %s5422_s20 }
 0x9e9   : > { %4279 = vrot.lane.b32.xlu1 %v4747_v43, %s5422_s20 }
 0x9ea   : > { %1402 = vrot.lane.b32.xlu0 %v4917_v63, %s5424_s19 }
 0x9ed   : > { %1400 = vrot.lane.b32.xlu1 %v4915_v61, %s5424_s19 }
 0x9f1   : > { %1404 = vrot.lane.b32.xlu1 %v4919_v2, %s5424_s19 }
 0xa51   : > { %v1541_v17 = vpop.xlane.xlu1 %1540 }
 0xa52   : > { %4415 = vrcp.f32 %v1541_v17 }
 0xa55   : > { %v1544_v18 = vpop.xlane.xlu0 %1543 }
 0xa56   : > { %4417 = vrcp.f32 %v1544_v18 }
 0xa59   : > { %v1547_v19 = vpop.xlane.xlu1 %1546 }
 0xa5a   : > { %4419 = vrcp.f32 %v1547_v19 }
 0xa5c   : > { %v4416_v20 = vpop.eup %4415 }
 0xa5d   : > { %v1549_v56 = vmul.f32 %v4416_v20, %v4404_v51  ;;  %v1800_v21 = vpop.xlane.xlu0 %1799 }
 0xa5e   : > { %4421 = vrcp.f32 %v1800_v21 }
 0xa5f   : > { %3966 = vmatmul.mubr.msk.f32.vlgmr.msra.gmra.mrb[26].mxu1 %vm1018_vm7, %v1549_v56  ;;  %v1554_v28 = vadd.f32 %v1549_v56, %v1293_v24 }
 0xa60   : > { %v4418_v43 = vpop.eup %4417  ;;  %3968 = vmatprep.mubr.msk.f32.mxu1 %vm4507_vm3, %v4508_v44 }
 0xa61   : > { %v1803_v61 = vpop.xlane.xlu1 %1802  ;;  %v1821_v63 = vpop.permute.xlu0 %1820  ;;  %v1551_v2 = vmul.f32 %v4418_v43, %v4406_v58 }
 0xa62   : > { %4423 = vrcp.f32 %v1803_v61 }
 0xa63   : > { %3969 = vmatmul.mubr.msk.f32.gmra.mrb[28].mxu1 %vm1018_vm7, %v1551_v2  ;;  %v1555_v47 = vadd.f32 %v1551_v2, %v1294_v46 }
 0xa64   : > { %v4420_v22 = vpop.eup %4419  ;;  %3971 = vmatprep.mubr.msk.f32.mxu1 %vm4507_vm3, %v4508_v44 }
 0xa65   : > { %v1806_v41 = vpop.xlane.xlu1 %1805  ;;  %v1403_v23 = vpop.permute.xlu0 %1402  ;;  %v1553_v37 = vmul.f32 %v4420_v22, %v4408_v3  ;;  %v4345_v3 = vld [vmem:[%s5412_s9] sm:$0xff]  }
 0xa66   : > { %4425 = vrcp.f32 %v1806_v41  ;;  %1411 = vst.msk [vmem:[#allocation3 + $0x8] sm:$0xff] %vm1409_vm10, %v1403_v23  ;;  %4004 = vmatprep.subr.bf16.mxu0 %v4345_v3 }
 0xa67   : > { %3972 = vmatmul.mubr.msk.f32.gmra.mrb[30].mxu1 %vm1018_vm7, %v1553_v37  ;;  %v1556_v52 = vadd.f32 %v1553_v37, %v1295_v34  ;;  %4005 = vmatpush3.bf16.msra.mxu0 %v4345_v3  ;;  %v4352_v3 = vld [vmem:[%s5416_s13 + $0x18] sm:$0xff]  }
 0xa68   : > { %v4422_v25 = vpop.eup %4421  ;;  %3995 = vmatprep.mubr.msk.f32.mxu1 %vm4507_vm3, %v4508_v44  ;;  %4006 = vmatprep.subr.bf16.mxu0 %v4346_v5 }
 0xa69   : > { %v1808_v31 = vmul.f32 %v4422_v25, %v4410_v9  ;;  %v4280_v33 = vpop.permute.xlu1 %4279  ;;  %v4493_v25 = vld [vmem:[#allocation2] sm:$0xff] }
 0xa6a   : > { %v4282_v35 = vunpack.i.h.bf16 %v4280_v33  ;;  %v4281_v36 = vunpack.i.l.bf16 %v4280_v33  ;;  %v4494_v33 = vld [vmem:[#allocation2 + $0x10] sm:$0x1] }
 0xa6b   : > { %v1813_v40 = vadd.f32 %v1808_v31, %v1554_v28  ;;  %4007 = vmatpush3.bf16.msra.mxu0 %v4346_v5 }
 0xa6c   : > { %v4424_v45 = vpop.eup %4423  ;;  %v4194_v32 = vpack.c.bf16 %v4282_v35, %v4281_v36  ;;  %4008 = vmatprep.subr.bf16.mxu0 %v4347_v6  ;;  %v4495_v36 = vld [vmem:[#allocation2 + $0x8] sm:$0xff] }
 0xa6d   : > { %v1932_v38 = vmul.f32 0.25, %v1813_v40  ;;  %v1401_v49 = vpop.permute.xlu1 %1400  ;;  %v1810_v50 = vmul.f32 %v4424_v45, %v4412_v12 }
 0xa6e   : > { %1410 = vst.msk [vmem:[#allocation3] sm:$0xff] %vm1409_vm10, %v1401_v49  ;;  %4195 = vmatpush3.bf16.msra.mxu1 %v4194_v32 }
 0xa6f   : > { %1935 = vst.msk [vmem:[%s4971_s27] sm:$0xff] %vm1018_vm7, %v1932_v38  ;;  %3993 = vmatprep.subr.mxu1 %v4508_v44  ;;  %v1814_v39 = vadd.f32 %v1810_v50, %v1555_v47  ;;  %4009 = vmatpush3.bf16.msra.mxu0 %v4347_v6 }
 0xa70   : > { %v4426_v51 = vpop.eup %4425  ;;  %4010 = vmatprep.subr.bf16.mxu0 %v4348_v7 }
 0xa71   : > { %v1405_v54 = vpop.permute.xlu1 %1404  ;;  %v1933_v55 = vmul.f32 0.25, %v1814_v39  ;;  %v1812_v57 = vmul.f32 %v4426_v51, %v4939_v15 }
 0xa72   : > { %1413 = vst.msk [vmem:[#allocation3 + $0x10] sm:$0x1] %vm1412_vm11, %v1405_v54  ;;  %3994 = vmatpush3.msk.msra.mxu1 %vm1065_vm6, %v1821_v63  ;;  %v3672_v63 = vld [vmem:[%s5413_s10] ss:$0 sm:$0xff] }
 0xa73   : > { %3996 = vmatmul.mubr.msk.f32.vlgmr.msra.gmra.mrb[32].mxu1 %vm1018_vm7, %v1808_v31  ;;  %1936 = vst.msk [vmem:[%s4971_s27 + $0x8] sm:$0xff] %vm1018_vm7, %v1933_v55  ;;  %v1815_v42 = vadd.f32 %v1812_v57, %v1556_v52  ;;  %4011 = vmatpush3.bf16.msra.mxu0 %v4348_v7 }
 0xa74   : > { %3998 = vmatprep.mubr.msk.f32.mxu1 %vm4507_vm3, %v4508_v44 }
 0xa75   : > { %v1934_v48 = vmul.f32 0.25, %v1815_v42 }
 0xa77   : > { %3999 = vmatmul.mubr.msk.f32.gmra.mrb[34].mxu1 %vm1018_vm7, %v1810_v50  ;;  %1937 = vst.msk [vmem:[%s4971_s27 + $0x10] sm:$0x1] %vm1025_vm8, %v1934_v48 }
 0xa78   : > { %4001 = vmatprep.mubr.msk.f32.mxu1 %vm4507_vm3, %v4508_v44 }
 0xa7b   : > { %4002 = vmatmul.mubr.msk.f32.gmra.mrb[36].mxu1 %vm1018_vm7, %v1812_v57 }
 0xb32   : > { %v1642_v58 = vpop.f32.mrb[26].mxu1 }
 0xb33   : > { %1659 = vrot.lane.b32.xlu0 %v1642_v58, %s4511_s18  ;;  %v3967_v59 = vpop.f32.mrb[27].mxu1 }
 0xb36   : > { %v1647_v60 = vpop.f32.mrb[28].mxu1 }
 0xb37   : > { %1661 = vrot.lane.b32.xlu1 %v1647_v60, %s4511_s18  ;;  %v3970_v62 = vpop.f32.mrb[29].mxu1  ;;  %v4349_v60 = vld [vmem:[%s5416_s13] sm:$0xff]  }
 0xb38   : > { %4016 = vmatprep.subr.bf16.mxu1 %v4349_v60  ;;  %v4350_v62 = vld [vmem:[%s5416_s13 + $0x8] sm:$0xff]  }
 0xb39   : > { %4017 = vmatpush3.bf16.msra.mxu1 %v4349_v60 }
 0xb3a   : > { %v1652_v0 = vpop.f32.mrb[30].mxu1  ;;  %4018 = vmatprep.subr.bf16.mxu1 %v4350_v62 }
 0xb3b   : > { %1663 = vrot.lane.b32.xlu0 %v1652_v0, %s4511_s18  ;;  %v3973_v4 = vpop.f32.mrb[31].mxu1  ;;  %v4351_v0 = vld [vmem:[%s5416_s13 + $0x10] sm:$0xff]  }
 0xb3d   : > { %4019 = vmatpush3.bf16.msra.mxu1 %v4350_v62 }
 0xb3e   : > { %4020 = vmatprep.subr.bf16.mxu1 %v4351_v0 }
 0xb41   : > { %4021 = vmatpush3.bf16.msra.mxu1 %v4351_v0 }
 0xb42   : > { %4022 = vmatprep.subr.bf16.mxu1 %v4352_v3 }
 0xb45   : > { %4023 = vmatpush3.bf16.msra.mxu1 %v4352_v3 }
 0xb46   : > { %v1901_v8 = vpop.f32.mrb[32].mxu1 }
 0xb47   : > { %1918 = vrot.lane.b32.xlu1 %v1901_v8, %s5430_s0  ;;  %v3997_v9 = vpop.f32.mrb[33].mxu1 }
 0xb4a   : > { %v1906_v10 = vpop.f32.mrb[34].mxu1 }
 0xb4b   : > { %1920 = vrot.lane.b32.xlu0 %v1906_v10, %s5430_s0  ;;  %v4000_v11 = vpop.f32.mrb[35].mxu1 }
 0xb4e   : > { %v1911_v12 = vpop.f32.mrb[36].mxu1 }
 0xb4f   : > { %1922 = vrot.lane.b32.xlu1 %v1911_v12, %s5430_s0  ;;  %v4003_v13 = vpop.f32.mrb[37].mxu1 }
 0xba5   : > { %v1660_v14 = vpop.permute.xlu0 %1659 }
 0xba6   : > { %1669 = vst.msk [vmem:[#allocation3] sm:$0xff] %vm1668_vm12, %v1660_v14 }
 0xba9   : > { %v1662_v15 = vpop.permute.xlu1 %1661 }
 0xbaa   : > { %1670 = vst.msk [vmem:[#allocation3 + $0x8] sm:$0xff] %vm1668_vm12, %v1662_v15  ;;  %v3679_v15 = vld [vmem:[%s5414_s11] ss:$0 sm:$0xff] }
 0xbad   : > { %v1664_v16 = vpop.permute.xlu0 %1663 }
 0xbae   : > { %1672 = vst.msk [vmem:[#allocation3 + $0x10] sm:$0x1] %vm1671_vm13, %v1664_v16 }
 0xbb9   : > { %v1919_v17 = vpop.permute.xlu1 %1918 }
 0xbba   : > { %1928 = vst.msk [vmem:[#allocation3] sm:$0xff] %vm1927_vm14, %v1919_v17 }
 0xbbd   : > { %v1921_v18 = vpop.permute.xlu0 %1920 }
 0xbbe   : > { %1929 = vst.msk [vmem:[#allocation3 + $0x8] sm:$0xff] %vm1927_vm14, %v1921_v18 }
 0xbc1   : > { %v1923_v19 = vpop.permute.xlu1 %1922  ;;  %v1938_v20 = vld [vmem:[#allocation3] sm:$0xff] }
 0xbc2   : > { %1931 = vst.msk [vmem:[#allocation3 + $0x10] sm:$0x1] %vm1930_vm15, %v1923_v19 }
 0xbc5   : > { %v1939_v56 = vld [vmem:[#allocation3 + $0x8] sm:$0xff] }
 0xbc6   : > { %v1941_v21 = vpack.c.bf16 %v1939_v56, %v1938_v20  ;;  %v3680_v56 = vld [vmem:[%s5415_s12] ss:$0 sm:$0xff] }
 0xbc8   : > { %4012 = vmatprep.mubr.msk.bf16.mxu0 %vm664_vm0, %v1941_v21 }
 0xbc9   : > { %v1940_v43 = vld [vmem:[#allocation3 + $0x10] sm:$0x1] }
 0xbca   : > { %v1942_v61 = vpack.c.bf16 %v1940_v43, %v1940_v43 }
 0xbcc   : > { %4013 = vmatmul.mubr.msk.bf16.vlgmr.msra.gmra.mrb[24].mxu0 %vm664_vm0, %v1942_v61 }
 0xc9f   : > { %v4014_v2 = vpop.f32.mrb[24].mxu0 }
 0xca0   : > { %v2022_v22 = vpop.f32.mrb[25].mxu0  ;;  %v2031_v41 = vadd.f32 %v4014_v2, %v3672_v63 }
 0xca1   : > { %v2023_v23 = vadd.f32 %v3672_v63, %v2022_v22  ;;  %v4015_v37 = vpop.f32.mrb[26].mxu0 }
 0xca2   : > { %v2025_v24 = vpop.f32.mrb[27].mxu0  ;;  %v5024_v35 = vadd.f32 %v4494_v33, %v2031_v41  ;;  %v4354_v37 = vld [vmem:[%s5418_s15 + $0x8] sm:$0xff]  }
 0xca3   : > { %v5022_v28 = vadd.f32 %v4493_v25, %v2023_v23  ;;  %v2026_v31 = vadd.f32 %v3672_v63, %v2025_v24  ;;  %v4353_v23 = vld [vmem:[%s5418_s15] sm:$0xff]   ;;  %v4355_v24 = vld [vmem:[%s5418_s15 + $0x10] sm:$0xff]   ;;  %v4356_v25 = vld [vmem:[%s5418_s15 + $0x18] sm:$0xff]  }
 0xca4   : > { %v2047_v32 = vsel %vm714_vm1, %v5024_v35, 0.0  ;;  %4028 = vmatprep.subr.bf16.mxu0 %v4353_v23  ;;  %v4358_v33 = vld [vmem:[%s5418_s15 + $0x28] sm:$0xff]  }
 0xca5   : > { %v5026_v46 = vadd.f32 %v4495_v36, %v2026_v31  ;;  %v2041_v40 = vsel %vm664_vm0, %v5022_v28, 0.0  ;;  %4029 = vmatpush3.bf16.msra.mxu0 %v4353_v23  ;;  %v4357_v31 = vld [vmem:[%s5418_s15 + $0x20] sm:$0xff]   ;;  %v4359_v36 = vld [vmem:[%s5418_s15 + $0x30] sm:$0xff]  }
 0xca6   : > { %2042 = vadd.xlane.f32.xlu0 %v2041_v40  ;;  %4030 = vmatprep.subr.bf16.mxu0 %v4354_v37  ;;  %v4360_v40 = vld [vmem:[%s5418_s15 + $0x38] sm:$0xff]  }
 0xca7   : > { %v2044_v45 = vsel %vm664_vm0, %v5026_v46, 0.0 }
 0xca8   : > { %2045 = vadd.xlane.f32.xlu1 %v2044_v45  ;;  %v3681_v45 = vld [vmem:[%s5417_s14] ss:$0 sm:$0xff] }
 0xca9   : > { %4031 = vmatpush3.bf16.msra.mxu0 %v4354_v37 }
 0xcaa   : > { %2048 = vadd.xlane.f32.xlu0 %v2047_v32  ;;  %4032 = vmatprep.subr.bf16.mxu0 %v4355_v24 }
 0xcad   : > { %4033 = vmatpush3.bf16.msra.mxu0 %v4355_v24 }
 0xcae   : > { %4034 = vmatprep.subr.bf16.mxu0 %v4356_v25 }
 0xcb1   : > { %4035 = vmatpush3.bf16.msra.mxu0 %v4356_v25 }
 0xcb2   : > { %4036 = vmatprep.subr.bf16.mxu0 %v4357_v31 }
 0xcb5   : > { %4037 = vmatpush3.bf16.msra.mxu0 %v4357_v31 }
 0xcb6   : > { %4038 = vmatprep.subr.bf16.mxu0 %v4358_v33 }
 0xcb9   : > { %4039 = vmatpush3.bf16.msra.mxu0 %v4358_v33 }
 0xcba   : > { %4040 = vmatprep.subr.bf16.mxu0 %v4359_v36 }
 0xcbd   : > { %4041 = vmatpush3.bf16.msra.mxu0 %v4359_v36 }
 0xcbe   : > { %4042 = vmatprep.subr.bf16.mxu0 %v4360_v40 }
 0xcc1   : > { %4043 = vmatpush3.bf16.msra.mxu0 %v4360_v40 }
 0xcc2   : > { %4200 = vmatprep.subr.bf16.mxu0 %v4505_v30 }
 0xd33   : > { %v2043_v38 = vpop.xlane.xlu0 %2042 }
 0xd34   : > { %v2050_v47 = vmul.f32 0.015625, %v2043_v38 }
 0xd35   : > { %v2046_v49 = vpop.xlane.xlu1 %2045 }
 0xd36   : > { %v2053_v50 = vsub.f32 %v5022_v28, %v2050_v47  ;;  %v2051_v34 = vmul.f32 0.015625, %v2046_v49 }
 0xd37   : > { %v2049_v39 = vpop.xlane.xlu0 %2048 }
 0xd38   : > { %v2054_v51 = vsub.f32 %v5026_v46, %v2051_v34  ;;  %v2052_v52 = vmul.f32 0.015625, %v2049_v39  ;;  %v2056_v54 = vmul.f32 %v2053_v50, %v2053_v50 }
 0xd3a   : > { %v2055_v55 = vsub.f32 %v5024_v35, %v2052_v52  ;;  %v2059_v57 = vsel %vm664_vm0, %v2056_v54, 0.0  ;;  %v2057_v42 = vmul.f32 %v2054_v51, %v2054_v51 }
 0xd3b   : > { %2060 = vadd.xlane.f32.xlu0 %v2059_v57 }
 0xd3c   : > { %v2058_v48 = vmul.f32 %v2055_v55, %v2055_v55  ;;  %v2062_v58 = vsel %vm664_vm0, %v2057_v42, 0.0 }
 0xd3e   : > { %v2065_v59 = vsel %vm714_vm1, %v2058_v48, 0.0 }
 0xd3f   : > { %2063 = vadd.xlane.f32.xlu0 %v2062_v58  ;;  %2066 = vadd.xlane.f32.xlu1 %v2065_v59 }
 0xdc8   : > { %v2061_v4 = vpop.xlane.xlu0 %2060 }
 0xdc9   : > { %v2068_v5 = vmul.f32 0.015625, %v2061_v4 }
 0xdcb   : > { %v2071_v6 = vadd.f32 1e-05, %v2068_v5 }
 0xdcc   : > { %v2067_v7 = vpop.xlane.xlu1 %2066  ;;  %v2064_v8 = vpop.xlane.xlu0 %2063 }
 0xdcd   : > { %4427 = vrsqrt.f32 %v2071_v6  ;;  %v2070_v9 = vmul.f32 0.015625, %v2067_v7  ;;  %v2069_v10 = vmul.f32 0.015625, %v2064_v8 }
 0xdcf   : > { %v2073_v11 = vadd.f32 1e-05, %v2070_v9  ;;  %v2072_v12 = vadd.f32 1e-05, %v2069_v10 }
 0xdd1   : > { %4429 = vrsqrt.f32 %v2073_v11 }
 0xdd2   : > { %4431 = vrsqrt.f32 %v2072_v12 }
 0xdd7   : > { %v4428_v13 = vpop.eup %4427 }
 0xdd8   : > { %v2077_v14 = vmul.f32 %v4428_v13, %v2053_v50 }
 0xdda   : > { %v2086_v20 = vmul.f32 %v3679_v15, %v2077_v14 }
 0xddb   : > { %v4430_v16 = vpop.eup %4429 }
 0xddc   : > { %v4432_v17 = vpop.eup %4431  ;;  %v2079_v18 = vmul.f32 %v4430_v16, %v2055_v55  ;;  %v2095_v63 = vadd.f32 %v3680_v56, %v2086_v20  ;;  %v3688_v20 = vld [vmem:[%s5419_s16] ss:$0 sm:$0xff] }
 0xddd   : > { %v2078_v19 = vmul.f32 %v4432_v17, %v2054_v51 }
 0xdde   : > { %v2088_v21 = vmul.f32 %v3679_v15, %v2079_v18 }
 0xddf   : > { %v2087_v43 = vmul.f32 %v3679_v15, %v2078_v19 }
 0xde0   : > { %v2097_v61 = vadd.f32 %v3680_v56, %v2088_v21 }
 0xde1   : > { %v2096_v2 = vadd.f32 %v3680_v56, %v2087_v43 }
 0xde2   : > { %v2099_v22 = vpack.c.bf16 %v2097_v61, %v2097_v61 }
 0xde3   : > { %v2098_v41 = vpack.c.bf16 %v2096_v2, %v2095_v63 }
 0xde5   : > { %4024 = vmatprep.mubr.msk.bf16.mxu1 %vm664_vm0, %v2098_v41 }
 0xde6   : > { %4025 = vmatmul.mubr.msk.bf16.vlgmr.msra.gmra.mrb[40].mxu1 %vm664_vm0, %v2099_v22 }
 0xde7   : > { %2507 = vmatprep.mubr.bf16.mxu1 %v4504_v1 }
 0xeb9   : > { %v4026_v32 = vpop.f32.mrb[40].mxu1 }
 0xeba   : > { %v2188_v38 = vadd.f32 %v4026_v32, %v3681_v45  ;;  %v2179_v47 = vpop.f32.mrb[41].mxu1 }
 0xebb   : > { %v2180_v49 = vadd.f32 %v3681_v45, %v2179_v47  ;;  %v4027_v50 = vpop.f32.mrb[42].mxu1 }
 0xebc   : > { %v2195_v34 = vmul.f32 %v2188_v38, %v2188_v38  ;;  %v2182_v39 = vpop.f32.mrb[43].mxu1 }
 0xebd   : > { %v2193_v51 = vmul.f32 %v2180_v49, %v2180_v49  ;;  %v2183_v52 = vadd.f32 %v3681_v45, %v2182_v39 }
 0xebe   : > { %v2198_v54 = vmul.f32 %v2195_v34, %v2188_v38 }
 0xebf   : > { %v2196_v55 = vmul.f32 %v2193_v51, %v2180_v49  ;;  %v2194_v57 = vmul.f32 %v2183_v52, %v2183_v52 }
 0xec0   : > { %v2201_v42 = vmul.f32 0.044715, %v2198_v54  ;;  %v4361_v54 = vld [vmem:[%s5410_s7 + $0x40] ss:$8 sps:$4 sm:$0xff]  }
 0xec1   : > { %v2199_v48 = vmul.f32 0.044715, %v2196_v55  ;;  %v2197_v58 = vmul.f32 %v2194_v57, %v2183_v52  ;;  %v4366_v55 = vld [vmem:[%s5410_s7 + $0x54] ss:$8 sps:$4 sm:$0xff]   ;;  %v4364_v57 = vld [vmem:[%s5410_s7 + $0x50] ss:$8 sps:$4 sm:$0xff]  }
 0xec2   : > { %v2204_v59 = vadd.f32 %v2201_v42, %v2188_v38  ;;  %v4369_v42 = vld [vmem:[%s5410_s7 + $0x64] ss:$8 sps:$4 sm:$0xff]  }
 0xec3   : > { %v2202_v60 = vadd.f32 %v2199_v48, %v2180_v49  ;;  %v2200_v62 = vmul.f32 0.044715, %v2197_v58  ;;  %v4367_v48 = vld [vmem:[%s5410_s7 + $0x60] ss:$8 sps:$4 sm:$0xff]   ;;  %v4370_v58 = vld [vmem:[%s5410_s7 + $0x70] ss:$8 sps:$4 sm:$0xff]  }
 0xec4   : > { %v2207_v0 = vmul.f32 0.7978846, %v2204_v59  ;;  %v4372_v59 = vld [vmem:[%s5410_s7 + $0x74] ss:$8 sps:$4 sm:$0xff]  }
 0xec5   : > { %v2205_v3 = vmul.f32 0.7978846, %v2202_v60  ;;  %v2203_v4 = vadd.f32 %v2200_v62, %v2183_v52 }
 0xec6   : > { %4433 = vtanh.f32 %v2207_v0 }
 0xec7   : > { %4435 = vtanh.f32 %v2205_v3  ;;  %v2206_v5 = vmul.f32 0.7978846, %v2203_v4 }
 0xec9   : > { %4437 = vtanh.f32 %v2206_v5 }
 0xed0   : > { %v4434_v6 = vpop.eup %4433 }
 0xed1   : > { %v4436_v7 = vpop.eup %4435  ;;  %v2213_v8 = vadd.f32 1.0, %v4434_v6 }
 0xed2   : > { %v2211_v9 = vadd.f32 1.0, %v4436_v7 }
 0xed3   : > { %v4438_v10 = vpop.eup %4437  ;;  %v2216_v11 = vmul.f32 0.5, %v2213_v8 }
 0xed4   : > { %v2212_v12 = vadd.f32 1.0, %v4438_v10  ;;  %v2214_v13 = vmul.f32 0.5, %v2211_v9  ;;  %v3699_v10 = vld [vmem:[%s5408_s5 + $0x1] ss:$0 sm:$0xff] }
 0xed5   : > { %v2219_v15 = vmul.f32 %v2216_v11, %v2188_v38 }
 0xed6   : > { %v2215_v14 = vmul.f32 0.5, %v2212_v12  ;;  %v2217_v16 = vmul.f32 %v2214_v13, %v2180_v49 }
 0xed7   : > { %v2221_v19 = vpack.c.bf16 %v2219_v15, %v2219_v15 }
 0xed8   : > { %v2218_v17 = vmul.f32 %v2215_v14, %v2183_v52  ;;  %v4363_v52 = vld [vmem:[%s5410_s7 + $0x44] ss:$8 sps:$4 sm:$0xff]  }
 0xed9   : > { %2475 = vmatprep.subr.bf16.mxu1 %v4363_v52 }
 0xeda   : > { %v2220_v18 = vpack.c.bf16 %v2218_v17, %v2217_v16  ;;  %2476 = vmatpush1.bf16.msra.mxu1 %v4361_v54  ;;  %v3700_v16 = vld [vmem:[%s5409_s6 + $0x1] ss:$0 sm:$0xff] }
 0xedb   : > { %2477 = vmatprep.subr.bf16.mxu1 %v4366_v55 }
 0xedc   : > { %4044 = vmatprep.mubr.bf16.mxu0 %v2220_v18 }
 0xedd   : > { %4045 = vmatmul.mubr.bf16.vlgmr.msra.gmra.mrb[28].mxu0 %v2221_v19 }
 0xede   : > { %4069 = vmatprep.mubr.msk.f32.mxu0 %vm4507_vm3, %v4508_v44  ;;  %2478 = vmatpush1.bf16.msra.mxu1 %v4364_v57 }
 0xedf   : > { %2479 = vmatprep.subr.bf16.mxu1 %v4369_v42 }
 0xee2   : > { %2480 = vmatpush1.bf16.msra.mxu1 %v4367_v48 }
 0xee3   : > { %2481 = vmatprep.subr.bf16.mxu1 %v4372_v59 }
 0xee6   : > { %2482 = vmatpush1.bf16.msra.mxu1 %v4370_v58 }
 0xee7   : > { %4196 = vmatprep.subr.bf16.mxu1 %v4505_v30 }
 0xfb0   : > { %v4046_v56 = vpop.f32.mrb[28].mxu0 }
 0xfb1   : > { %v2327_v21 = vpop.f32.mrb[29].mxu0  ;;  %v2336_v43 = vadd.f32 %v4046_v56, %v3688_v20 }
 0xfb2   : > { %v2328_v61 = vadd.f32 %v3688_v20, %v2327_v21  ;;  %v4047_v63 = vpop.f32.mrb[30].mxu0 }
 0xfb3   : > { %v2330_v2 = vpop.f32.mrb[31].mxu0  ;;  %v2343_v24 = vadd.f32 %v2336_v43, %v5024_v35  ;;  %v3709_v63 = vld [vmem:[%s5411_s8 + $0x2] sm:$0x3] }
 0xfb4   : > { %v2331_v22 = vadd.f32 %v3688_v20, %v2330_v2  ;;  %v2341_v41 = vadd.f32 %v2328_v61, %v5022_v28  ;;  %v2422_v2 = vrot.slane %v3709_v63, %v808_v27 }
 0xfb5   : > { %v2354_v31 = vsel %vm714_vm1, %v2343_v24, 0.0 }
 0xfb6   : > { %v2348_v23 = vsel %vm664_vm0, %v2341_v41, 0.0  ;;  %v2342_v37 = vadd.f32 %v2331_v22, %v5026_v46 }
 0xfb7   : > { %2349 = vadd.xlane.f32.xlu0 %v2348_v23 }
 0xfb8   : > { %v2351_v25 = vsel %vm664_vm0, %v2342_v37, 0.0 }
 0xfb9   : > { %2352 = vadd.xlane.f32.xlu1 %v2351_v25 }
 0xfbb   : > { %2355 = vadd.xlane.f32.xlu0 %v2354_v31 }
0x1044   : > { %v2350_v33 = vpop.xlane.xlu0 %2349 }
0x1045   : > { %v2357_v36 = vmul.f32 0.015625, %v2350_v33 }
0x1046   : > { %v2353_v40 = vpop.xlane.xlu1 %2352 }
0x1047   : > { %v2360_v45 = vsub.f32 %v2341_v41, %v2357_v36  ;;  %v2358_v32 = vmul.f32 0.015625, %v2353_v40  ;;  %v2426_v41 = vrot.slane %v3709_v63, %v812_v29 }
0x1048   : > { %v2356_v38 = vpop.xlane.xlu0 %2355 }
0x1049   : > { %v2361_v28 = vsub.f32 %v2342_v37, %v2358_v32  ;;  %v2359_v47 = vmul.f32 0.015625, %v2356_v38  ;;  %v2363_v49 = vmul.f32 %v2360_v45, %v2360_v45 }
0x104b   : > { %v2362_v50 = vsub.f32 %v2343_v24, %v2359_v47  ;;  %v2366_v46 = vsel %vm664_vm0, %v2363_v49, 0.0  ;;  %v2364_v35 = vmul.f32 %v2361_v28, %v2361_v28 }
0x104c   : > { %2367 = vadd.xlane.f32.xlu1 %v2366_v46 }
0x104d   : > { %v2369_v34 = vsel %vm664_vm0, %v2364_v35, 0.0  ;;  %v2365_v39 = vmul.f32 %v2362_v50, %v2362_v50 }
0x104e   : > { %2370 = vadd.xlane.f32.xlu0 %v2369_v34 }
0x104f   : > { %v2372_v51 = vsel %vm714_vm1, %v2365_v39, 0.0 }
0x1050   : > { %2373 = vadd.xlane.f32.xlu1 %v2372_v51 }
0x10d9   : > { %v2368_v60 = vpop.xlane.xlu1 %2367 }
0x10da   : > { %v2375_v62 = vmul.f32 0.015625, %v2368_v60 }
0x10db   : > { %v2371_v0 = vpop.xlane.xlu0 %2370 }
0x10dc   : > { %v2378_v3 = vadd.f32 1e-05, %v2375_v62  ;;  %v2376_v4 = vmul.f32 0.015625, %v2371_v0 }
0x10dd   : > { %v2374_v5 = vpop.xlane.xlu1 %2373 }
0x10de   : > { %4439 = vrsqrt.f32 %v2378_v3  ;;  %v2379_v6 = vadd.f32 1e-05, %v2376_v4  ;;  %v2377_v7 = vmul.f32 0.015625, %v2374_v5 }
0x10e0   : > { %4441 = vrsqrt.f32 %v2379_v6  ;;  %v2380_v8 = vadd.f32 1e-05, %v2377_v7 }
0x10e2   : > { %4443 = vrsqrt.f32 %v2380_v8 }
0x10e8   : > { %v4440_v9 = vpop.eup %4439 }
0x10e9   : > { %v2384_v11 = vmul.f32 %v4440_v9, %v2360_v45 }
0x10ea   : > { %v4442_v12 = vpop.eup %4441 }
0x10eb   : > { %v2393_v13 = vmul.f32 %v3699_v10, %v2384_v11  ;;  %v2385_v14 = vmul.f32 %v4442_v12, %v2361_v28 }
0x10ec   : > { %v4444_v15 = vpop.eup %4443 }
0x10ed   : > { %v2394_v17 = vmul.f32 %v3699_v10, %v2385_v14  ;;  %v2386_v18 = vmul.f32 %v4444_v15, %v2362_v50  ;;  %v2402_v19 = vadd.f32 %v3700_v16, %v2393_v13 }
0x10ef   : > { %v2403_v20 = vadd.f32 %v3700_v16, %v2394_v17  ;;  %v2395_v21 = vmul.f32 %v3699_v10, %v2386_v18 }
0x10f1   : > { %v2405_v56 = vpack.c.bf16 %v2403_v20, %v2402_v19  ;;  %v2404_v43 = vadd.f32 %v3700_v16, %v2395_v21 }
0x10f3   : > { %3718 = vmatmul.mubr.msk.bf16.vlgmr.msra.gmra.mrb[44].mxu1 %vm664_vm0, %v2405_v56  ;;  %v2406_v61 = vpack.c.bf16 %v2404_v43, %v2404_v43 }
0x10f4   : > { %2517 = vmatprep.mubr.bf16.mxu1 %v4504_v1 }
0x10fb   : > { %3719 = vmatmul.mubr.msk.bf16.gmra.mrb[48].mxu1 %vm664_vm0, %v2406_v61 }
0x10fc   : > { %4054 = vmatprep.mubr.msk.f32.mxu1 %vm4507_vm3, %v4508_v44 }
0x11c6   : > { %v2509_v22 = vpop.f32.mrb[44].mxu1 }
0x11c7   : > { %v2511_v23 = vpop.f32.mrb[45].mxu1  ;;  %v2510_v37 = vadd.f32 %v2509_v22, %v2422_v2 }
0x11c8   : > { %v2513_v1 = vpop.f32.mrb[46].mxu1  ;;  %v2512_v31 = vadd.f32 %v2511_v23, %v2426_v41 }
0x11c9   : > { %v2514_v24 = vadd.f32 %v2513_v1, %v2422_v2  ;;  %v2515_v25 = vpop.f32.mrb[47].mxu1 }
0x11ca   : > { %v2516_v33 = vadd.f32 %v2515_v25, %v2426_v41 }
0x11cb   : > { %v4283_v36 = vpack.i.bf16 %v2514_v24, %v2510_v37 }
0x11cc   : > { %v4201_v40 = vpack.c.bf16 %v2516_v33, %v2512_v31  ;;  %v5146_v45 = vpack.i.bf16 %v2516_v33, %v2512_v31 }
0x11cd   : > { %4284 = vrot.lane.b32.xlu0 %v4283_v36, %s4506_s29 }
0x11ce   : > { %v2519_v32 = vpop.f32.mrb[48].mxu1  ;;  %4202 = vmatpush3.bf16.msra.mxu0 %v4201_v40 }
0x11cf   : > { %v2520_v27 = vadd.f32 %v2519_v32, %v2422_v2  ;;  %v2521_v38 = vpop.f32.mrb[49].mxu1  ;;  %4067 = vmatprep.subr.mxu0 %v4508_v44 }
0x11d0   : > { %v5150_v26 = vadd.f32 %v2521_v38, %v2426_v41  ;;  %v2523_v29 = vpop.f32.mrb[50].mxu1 }
0x11d1   : > { %v2524_v28 = vpop.f32.mrb[51].mxu1  ;;  %2533 = vrot.lane.b32.xlu1 %v2520_v27, %s4506_s29  ;;  %4294 = vrot.lane.b32.xlu0 %v4283_v36, %s4511_s18  ;;  %s5441_s29 = smov 16  }
0x11d2   : > { %4068 = vmatpush3.msk.msra.mxu0 %vm1065_vm6, %v5150_v26 }
0x11d3   : > { %4207 = vmatprep.subr.bf16.mxu0 %v4505_v30 }
0x11d5   : > { %4289 = vrot.lane.b32.xlu1 %v4283_v36, %s5438_s26  ;;  %2763 = vrot.lane.b32.xlu0 %v2514_v24, %s5439_s21 }
0x11d9   : > { %2771 = vrot.lane.b32.xlu1 %v2520_v27, %s5438_s26  ;;  %3030 = vrot.lane.b32.xlu0 %v2520_v27, %s4511_s18 }
0x11dd   : > { %2761 = vrot.lane.b32.xlu1 %v2510_v37, %s5439_s21  ;;  %3020 = vrot.lane.b32.xlu0 %v2510_v37, %s5440_s22 }
0x11e1   : > { %2765 = vrot.lane.b32.xlu1 %v2520_v27, %s5439_s21  ;;  %3024 = vrot.lane.b32.xlu0 %v2520_v27, %s5440_s22 }
0x11e5   : > { %4299 = vrot.lane.b32.xlu1 %v4283_v36, %s5441_s29  ;;  %3277 = vrot.lane.b32.xlu0 %v2510_v37, %s5442_s23 }
0x11e9   : > { %3022 = vrot.lane.b32.xlu1 %v2514_v24, %s5440_s22  ;;  %3281 = vrot.lane.b32.xlu0 %v2520_v27, %s5442_s23 }
0x11ed   : > { %3287 = vrot.lane.b32.xlu1 %v2520_v27, %s5441_s29 }
0x11f1   : > { %3279 = vrot.lane.b32.xlu1 %v2514_v24, %s5442_s23 }
0x123f   : > { %v4285_v47 = vpop.permute.xlu0 %4284 }
0x1240   : > { %v4287_v49 = vunpack.i.h.bf16 %v4285_v47  ;;  %v4286_v50 = vunpack.i.l.bf16 %v4285_v47 }
0x1242   : > { %v4197_v46 = vpack.c.bf16 %v4287_v49, %v4286_v50 }
0x1243   : > { %v2534_v35 = vpop.permute.xlu1 %2533  ;;  %v4295_v55 = vpop.permute.xlu0 %4294 }
0x1244   : > { %4199 = vmatpush3.bf16.xpose.msk.msra.mxu1 %vm4761_vm5, %v4197_v46  ;;  %v4297_v42 = vunpack.i.h.bf16 %v4295_v55  ;;  %v4296_v48 = vunpack.i.l.bf16 %v4295_v55 }
0x1245   : > { %4052 = vmatprep.subr.mxu1 %v4508_v44 }
0x1246   : > { %v4211_v59 = vpack.c.bf16 %v4297_v42, %v4296_v48 }
0x1247   : > { %v4290_v34 = vpop.permute.xlu1 %4289  ;;  %v2764_v60 = vpop.permute.xlu0 %2763 }
0x1248   : > { %v4292_v39 = vunpack.i.h.bf16 %v4290_v34  ;;  %v4291_v51 = vunpack.i.l.bf16 %v4290_v34 }
0x124a   : > { %v4204_v54 = vpack.c.bf16 %v4292_v39, %v4291_v51 }
0x124b   : > { %v2772_v52 = vpop.permute.xlu1 %2771  ;;  %v3031_v0 = vpop.permute.xlu0 %3030 }
0x124c   : > { %4053 = vmatpush3.xpose.msk.msra.mxu1 %vm922_vm4, %v2534_v35 }
0x124d   : > { %4203 = vmatprep.subr.bf16.mxu1 %v4505_v30 }
0x124f   : > { %4055 = vmatmul.mubr.msk.f32.vlgmr.msra.gmra.mrb[38].mxu1 %vm922_vm4, %v2510_v37  ;;  %v2762_v57 = vpop.permute.xlu1 %2761  ;;  %v3021_v5 = vpop.permute.xlu0 %3020 }
0x1250   : > { %4206 = vmatpush3.bf16.xpose.msk.msra.mxu1 %vm4761_vm5, %v4204_v54  ;;  %4057 = vmatprep.mubr.msk.f32.mxu1 %vm4507_vm3, %v4508_v44 }
0x1251   : > { %4082 = vmatprep.subr.mxu1 %v4508_v44 }
0x1253   : > { %4058 = vmatmul.mubr.msk.f32.gmra.mrb[52].mxu1 %vm922_vm4, %v2514_v24  ;;  %v2766_v58 = vpop.permute.xlu1 %2765  ;;  %v3025_v8 = vpop.permute.xlu0 %3024 }
0x1254   : > { %4060 = vmatprep.mubr.msk.f32.mxu1 %vm4507_vm3, %v4508_v44 }
0x1257   : > { %4061 = vmatmul.mubr.msk.f32.gmra.mrb[54].mxu1 %vm922_vm4, %v2520_v27  ;;  %v4300_v62 = vpop.permute.xlu1 %4299  ;;  %v3278_v53 = vpop.permute.xlu0 %3277 }
0x1258   : > { %4083 = vmatpush3.xpose.msk.msra.mxu1 %vm922_vm4, %v2772_v52  ;;  %4084 = vmatprep.mubr.msk.f32.mxu1 %vm4507_vm3, %v4508_v44  ;;  %v4302_v3 = vunpack.i.h.bf16 %v4300_v62  ;;  %v4301_v4 = vunpack.i.l.bf16 %v4300_v62 }
0x1259   : > { %4210 = vmatprep.subr.bf16.mxu1 %v4505_v30 }
0x125a   : > { %v4218_v6 = vpack.c.bf16 %v4302_v3, %v4301_v4 }
0x125b   : > { %4085 = vmatmul.mubr.msk.f32.vlgmr.msra.gmra.mrb[56].mxu1 %vm922_vm4, %v2762_v57  ;;  %v3023_v7 = vpop.permute.xlu1 %3022  ;;  %v3282_v11 = vpop.permute.xlu0 %3281 }
0x125c   : > { %4213 = vmatpush3.bf16.xpose.msk.msra.mxu1 %vm4761_vm5, %v4211_v59  ;;  %4087 = vmatprep.mubr.msk.f32.mxu1 %vm4507_vm3, %v4508_v44 }
0x125d   : > { %4112 = vmatprep.subr.mxu1 %v4508_v44 }
0x125f   : > { %4088 = vmatmul.mubr.msk.f32.gmra.mrb[58].mxu1 %vm922_vm4, %v2764_v60  ;;  %v3288_v9 = vpop.permute.xlu1 %3287 }
0x1260   : > { %4090 = vmatprep.mubr.msk.f32.mxu1 %vm4507_vm3, %v4508_v44 }
0x1263   : > { %4091 = vmatmul.mubr.msk.f32.gmra.mrb[60].mxu1 %vm922_vm4, %v2766_v58  ;;  %v3280_v10 = vpop.permute.xlu1 %3279 }
0x1264   : > { %4113 = vmatpush3.xpose.msk.msra.mxu1 %vm922_vm4, %v3031_v0  ;;  %4114 = vmatprep.mubr.msk.f32.mxu1 %vm4507_vm3, %v4508_v44 }
0x1265   : > { %4217 = vmatprep.subr.bf16.mxu1 %v4505_v30 }
0x1267   : > { %4115 = vmatmul.mubr.msk.f32.vlgmr.msra.gmra.mrb[62].mxu1 %vm922_vm4, %v3021_v5 }
0x1268   : > { %4220 = vmatpush3.bf16.xpose.msk.msra.mxu1 %vm4761_vm5, %v4218_v6  ;;  %4117 = vmatprep.mubr.msk.f32.mxu1 %vm4507_vm3, %v4508_v44 }
0x1269   : > { %4142 = vmatprep.subr.mxu1 %v4508_v44 }
0x126b   : > { %4118 = vmatmul.mubr.msk.f32.gmra.mrb[64].mxu1 %vm922_vm4, %v3023_v7 }
0x126c   : > { %4120 = vmatprep.mubr.msk.f32.mxu1 %vm4507_vm3, %v4508_v44 }
0x126f   : > { %4121 = vmatmul.mubr.msk.f32.gmra.mrb[66].mxu1 %vm922_vm4, %v3025_v8 }
0x1270   : > { %4143 = vmatpush3.xpose.msk.msra.mxu1 %vm922_vm4, %v3288_v9  ;;  %4144 = vmatprep.mubr.msk.f32.mxu1 %vm4507_vm3, %v4508_v44 }
0x1271   : > { %4224 = vmatprep.subr.bf16.mxu1 %v4505_v30 }
0x1273   : > { %4145 = vmatmul.mubr.msk.f32.vlgmr.msra.gmra.mrb[68].mxu1 %vm922_vm4, %v3278_v53 }
0x1274   : > { %4147 = vmatprep.mubr.msk.f32.mxu1 %vm4507_vm3, %v4508_v44 }
0x1277   : > { %4148 = vmatmul.mubr.msk.f32.gmra.mrb[70].mxu1 %vm922_vm4, %v3280_v10 }
0x1278   : > { %4150 = vmatprep.mubr.msk.f32.mxu1 %vm4507_vm3, %v4508_v44 }
0x127b   : > { %4151 = vmatmul.mubr.msk.f32.gmra.mrb[72].mxu1 %vm922_vm4, %v3282_v11 }
0x127c   : > { %4165 = vmatprep.mubr.msk.f32.mxu1 %vm4507_vm3, %v4508_v44 }
0x1322   : > { %v2613_v12 = vpop.f32.mrb[38].mxu1 }
0x1323   : > { %v5227_v13 = vmul.f32 0.25, %v2613_v12  ;;  %v4056_v14 = vpop.f32.mrb[39].mxu1 }
0x1325   : > { %v2630_v15 = vsel %vm1018_vm7, %v5227_v13, -inf }
0x1326   : > { %2631 = vmax.xlane.f32.xlu1 %v2630_v15  ;;  %v2618_v16 = vpop.f32.mrb[52].mxu1 }
0x1327   : > { %v2628_v17 = vmul.f32 0.25, %v2618_v16  ;;  %v4059_v18 = vpop.f32.mrb[53].mxu1 }
0x1329   : > { %v2633_v19 = vsel %vm1018_vm7, %v2628_v17, -inf }
0x132a   : > { %2634 = vmax.xlane.f32.xlu0 %v2633_v19  ;;  %v2623_v20 = vpop.f32.mrb[54].mxu1 }
0x132b   : > { %v5232_v56 = vmul.f32 0.25, %v2623_v20  ;;  %v4062_v21 = vpop.f32.mrb[55].mxu1 }
0x132d   : > { %v2636_v43 = vsel %vm1025_vm8, %v5232_v56, -inf }
0x132e   : > { %2637 = vmax.xlane.f32.xlu0 %v2636_v43  ;;  %v2851_v61 = vpop.f32.mrb[56].mxu1 }
0x132f   : > { %v2865_v63 = vmul.f32 0.25, %v2851_v61  ;;  %v4086_v2 = vpop.f32.mrb[57].mxu1 }
0x1331   : > { %v2868_v22 = vsel %vm1018_vm7, %v2865_v63, -inf }
0x1332   : > { %2869 = vmax.xlane.f32.xlu0 %v2868_v22  ;;  %v2856_v41 = vpop.f32.mrb[58].mxu1 }
0x1333   : > { %v5237_v23 = vmul.f32 0.25, %v2856_v41  ;;  %v4089_v1 = vpop.f32.mrb[59].mxu1 }
0x1335   : > { %v2871_v37 = vsel %vm1018_vm7, %v5237_v23, -inf }
0x1336   : > { %2872 = vmax.xlane.f32.xlu1 %v2871_v37  ;;  %v2861_v24 = vpop.f32.mrb[60].mxu1 }
0x1337   : > { %v2867_v25 = vmul.f32 0.25, %v2861_v24  ;;  %v4092_v31 = vpop.f32.mrb[61].mxu1 }
0x1339   : > { %v2874_v33 = vsel %vm1025_vm8, %v2867_v25, -inf }
0x133a   : > { %2875 = vmax.xlane.f32.xlu0 %v2874_v33  ;;  %v3110_v36 = vpop.f32.mrb[62].mxu1 }
0x133b   : > { %v5242_v40 = vmul.f32 0.25, %v3110_v36  ;;  %v4116_v32 = vpop.f32.mrb[63].mxu1 }
0x133d   : > { %v3127_v27 = vsel %vm1018_vm7, %v5242_v40, -inf }
0x133e   : > { %3128 = vmax.xlane.f32.xlu1 %v3127_v27  ;;  %v3115_v38 = vpop.f32.mrb[64].mxu1 }
0x133f   : > { %v3125_v29 = vmul.f32 0.25, %v3115_v38  ;;  %v4119_v28 = vpop.f32.mrb[65].mxu1 }
0x1341   : > { %v3130_v47 = vsel %vm1018_vm7, %v3125_v29, -inf }
0x1342   : > { %3131 = vmax.xlane.f32.xlu0 %v3130_v47  ;;  %v3120_v49 = vpop.f32.mrb[66].mxu1 }
0x1343   : > { %v3126_v50 = vmul.f32 0.25, %v3120_v49  ;;  %v4122_v46 = vpop.f32.mrb[67].mxu1 }
0x1345   : > { %v3133_v35 = vsel %vm1025_vm8, %v3126_v50, -inf }
0x1346   : > { %3134 = vmax.xlane.f32.xlu1 %v3133_v35  ;;  %v3367_v34 = vpop.f32.mrb[68].mxu1 }
0x1347   : > { %v3381_v39 = vmul.f32 0.25, %v3367_v34  ;;  %v4146_v51 = vpop.f32.mrb[69].mxu1 }
0x1349   : > { %v3384_v52 = vsel %vm1018_vm7, %v3381_v39, -inf }
0x134a   : > { %3385 = vmax.xlane.f32.xlu0 %v3384_v52  ;;  %v3372_v54 = vpop.f32.mrb[70].mxu1 }
0x134b   : > { %v4149_v55 = vpop.f32.mrb[71].mxu1  ;;  %v5254_v59 = vmul.f32 0.25, %v3372_v54 }
0x134d   : > { %v3387_v60 = vsel %vm1018_vm7, %v5254_v59, -inf }
0x134e   : > { %v3377_v57 = vpop.f32.mrb[72].mxu1 }
0x134f   : > { %v3383_v42 = vmul.f32 0.25, %v3377_v57  ;;  %v4152_v48 = vpop.f32.mrb[73].mxu1 }
0x1351   : > { %v3390_v58 = vsel %vm1025_vm8, %v3383_v42, -inf }
0x1352   : > { %3391 = vmax.xlane.f32.xlu0 %v3390_v58 }
0x1357   : > { %4304 = vrot.lane.b32.xlu1 %v5146_v45, %s5439_s21 }
0x1368   : > { %2910 = vrot.lane.b32.xlu0 %v5150_v26, %s5439_s21 }
0x137b   : > { %3388 = vmax.xlane.f32.xlu1 %v3387_v60 }
0x13b3   : > { %v2632_v62 = vpop.xlane.xlu1 %2631 }
0x13b4   : > { %v2639_v0 = vsub.f32 %v5227_v13, %v2632_v62 }
0x13b6   : > { %v2642_v3 = vmul.f32 1.442695, %v2639_v0 }
0x13b7   : > { %v2635_v4 = vpop.xlane.xlu0 %2634 }
0x13b8   : > { %4445 = vpow2.f32 %v2642_v3  ;;  %v2640_v5 = vsub.f32 %v2628_v17, %v2635_v4 }
0x13ba   : > { %v2644_v6 = vmul.f32 1.442695, %v2640_v5 }
0x13bb   : > { %v2638_v7 = vpop.xlane.xlu0 %2637 }
0x13bc   : > { %4447 = vpow2.f32 %v2644_v6 }
0x13bf   : > { %v2870_v8 = vpop.xlane.xlu0 %2869 }
0x13c0   : > { %v2877_v9 = vsub.f32 %v2865_v63, %v2870_v8 }
0x13c2   : > { %v5259_v53 = vpop.eup %4445  ;;  %v2880_v10 = vmul.f32 1.442695, %v2877_v9 }
0x13c3   : > { %v2648_v11 = vsel %vm1018_vm7, %v5259_v53, 0.0  ;;  %v2873_v17 = vpop.xlane.xlu1 %2872 }
0x13c4   : > { %4449 = vpow2.f32 %v2880_v10  ;;  %2649 = vadd.xlane.f32.xlu1 %v2648_v11 }
0x13c6   : > { %v5263_v12 = vpop.eup %4447 }
0x13c7   : > { %v2876_v13 = vpop.xlane.xlu0 %2875  ;;  %v2651_v14 = vsel %vm1018_vm7, %v5263_v12, 0.0 }
0x13c8   : > { %v2879_v15 = vsub.f32 %v2867_v25, %v2876_v13  ;;  %2652 = vadd.xlane.f32.xlu0 %v2651_v14 }
0x13ca   : > { %v2884_v16 = vmul.f32 1.442695, %v2879_v15 }
0x13cb   : > { %v3129_v19 = vpop.xlane.xlu1 %3128 }
0x13cc   : > { %4451 = vpow2.f32 %v2884_v16  ;;  %v3136_v34 = vsub.f32 %v5242_v40, %v3129_v19 }
0x13ce   : > { %v5267_v18 = vpop.eup %4449 }
0x13cf   : > { %v3132_v20 = vpop.xlane.xlu0 %3131  ;;  %v2886_v21 = vsel %vm1018_vm7, %v5267_v18, 0.0 }
0x13d0   : > { %v3137_v43 = vsub.f32 %v3125_v29, %v3132_v20  ;;  %2887 = vadd.xlane.f32.xlu0 %v2886_v21  ;;  %v2641_v29 = vsub.f32 %v5232_v56, %v2638_v7  ;;  %v3139_v56 = vmul.f32 1.442695, %v3136_v34 }
0x13d2   : > { %v3141_v61 = vmul.f32 1.442695, %v3137_v43  ;;  %v2646_v49 = vmul.f32 1.442695, %v2641_v29 }
0x13d3   : > { %v3135_v63 = vpop.xlane.xlu1 %3134 }
0x13d4   : > { %4453 = vpow2.f32 %v3141_v61  ;;  %v3138_v2 = vsub.f32 %v3126_v50, %v3135_v63  ;;  %v2878_v50 = vsub.f32 %v5237_v23, %v2873_v17 }
0x13d5   : > { %4309 = vrot.lane.b32.xlu1 %v5146_v45, %s5440_s22 }
0x13d6   : > { %v5273_v22 = vpop.eup %4451  ;;  %v3143_v41 = vmul.f32 1.442695, %v3138_v2  ;;  %v2882_v35 = vmul.f32 1.442695, %v2878_v50 }
0x13d7   : > { %v3386_v1 = vpop.xlane.xlu0 %3385  ;;  %v2892_v37 = vsel %vm1025_vm8, %v5273_v22, 0.0 }
0x13d8   : > { %4455 = vpow2.f32 %v3143_v41  ;;  %v3393_v24 = vsub.f32 %v3381_v39, %v3386_v1  ;;  %2893 = vadd.xlane.f32.xlu0 %v2892_v37 }
0x13da   : > { %v3396_v25 = vmul.f32 1.442695, %v3393_v24 }
0x13dc   : > { %4457 = vpow2.f32 %v3396_v25 }
0x13de   : > { %v5277_v31 = vpop.eup %4453 }
0x13df   : > { %v3392_v33 = vpop.xlane.xlu0 %3391  ;;  %v3148_v36 = vsel %vm1018_vm7, %v5277_v31, 0.0 }
0x13e0   : > { %v3395_v32 = vsub.f32 %v3383_v42, %v3392_v33  ;;  %3149 = vadd.xlane.f32.xlu0 %v3148_v36  ;;  %v4305_v42 = vpop.permute.xlu1 %4304 }
0x13e1   : > { %v4306_v6 = vunpack.i.l.bf16 %v4305_v42 }
0x13e2   : > { %v5281_v27 = vpop.eup %4455  ;;  %v3400_v38 = vmul.f32 1.442695, %v3395_v32 }
0x13e3   : > { %v3151_v28 = vsel %vm1025_vm8, %v5281_v27, 0.0  ;;  %v2911_v3 = vpop.permute.xlu0 %2910 }
0x13e4   : > { %4459 = vpow2.f32 %v3400_v38  ;;  %3152 = vadd.xlane.f32.xlu0 %v3151_v28 }
0x13e5   : > { %4461 = vpow2.f32 %v2646_v49 }
0x13e6   : > { %v5286_v47 = vpop.eup %4457  ;;  %4463 = vpow2.f32 %v2882_v35 }
0x13e7   : > { %v3402_v46 = vsel %vm1018_vm7, %v5286_v47, 0.0  ;;  %4465 = vpow2.f32 %v3139_v56 }
0x13e8   : > { %3403 = vadd.xlane.f32.xlu0 %v3402_v46 }
0x13ee   : > { %v5292_v39 = vpop.eup %4459 }
0x13ef   : > { %v3408_v51 = vsel %vm1025_vm8, %v5292_v39, 0.0  ;;  %v4462_v52 = vpop.eup %4461 }
0x13f0   : > { %3409 = vadd.xlane.f32.xlu0 %v3408_v51  ;;  %v2654_v23 = vsel %vm1025_vm8, %v4462_v52, 0.0  ;;  %v5297_v54 = vpop.eup %4463 }
0x13f1   : > { %v2889_v55 = vsel %vm1018_vm7, %v5297_v54, 0.0  ;;  %v5301_v57 = vpop.eup %4465 }
0x13f2   : > { %v3145_v40 = vsel %vm1018_vm7, %v5301_v57, 0.0 }
0x13f9   : > { %2655 = vadd.xlane.f32.xlu1 %v2654_v23 }
0x13fd   : > { %2890 = vadd.xlane.f32.xlu1 %v2889_v55 }
0x1401   : > { %3146 = vadd.xlane.f32.xlu1 %v3145_v40 }
0x1406   : > { %3167 = vrot.lane.b32.xlu0 %v5150_v26, %s5440_s22 }
0x1408   : > { %v3389_v48 = vpop.xlane.xlu1 %3388 }
0x1409   : > { %v3394_v58 = vsub.f32 %v5254_v59, %v3389_v48  ;;  %v4307_v59 = vunpack.i.h.bf16 %v4305_v42 }
0x140b   : > { %v3398_v60 = vmul.f32 1.442695, %v3394_v58  ;;  %v4208_v9 = vpack.c.bf16 %v4307_v59, %v4306_v6 }
0x140d   : > { %4467 = vpow2.f32 %v3398_v60 }
0x1417   : > { %v5308_v62 = vpop.eup %4467 }
0x1418   : > { %v3405_v0 = vsel %vm1018_vm7, %v5308_v62, 0.0 }
0x1419   : > { %3406 = vadd.xlane.f32.xlu1 %v3405_v0 }
0x142a   : > { %4314 = vrot.lane.b32.xlu1 %v5146_v45, %s5442_s23 }
0x142e   : > { %3424 = vrot.lane.b32.xlu1 %v5150_v26, %s5442_s23 }
0x1451   : > { %v2650_v4 = vpop.xlane.xlu1 %2649 }
0x1452   : > { %4469 = vrcp.f32 %v2650_v4 }
0x1455   : > { %v2653_v5 = vpop.xlane.xlu0 %2652  ;;  %v4310_v14 = vpop.permute.xlu1 %4309 }
0x1456   : > { %4471 = vrcp.f32 %v2653_v5  ;;  %v4312_v1 = vunpack.i.h.bf16 %v4310_v14  ;;  %v4311_v37 = vunpack.i.l.bf16 %v4310_v14 }
0x1458   : > { %v4215_v29 = vpack.c.bf16 %v4312_v1, %v4311_v37 }
0x145c   : > { %v4470_v7 = vpop.eup %4469 }
0x145d   : > { %v2658_v8 = vmul.f32 %v4470_v7, %v5259_v53  ;;  %v2888_v26 = vpop.xlane.xlu0 %2887 }
0x145f   : > { %4070 = vmatmul.mubr.msk.f32.vlgmr.msra.gmra.mrb[22].mxu0 %vm1018_vm7, %v2658_v8 }
0x1460   : > { %v4472_v10 = vpop.eup %4471  ;;  %4209 = vmatpush3.bf16.msra.mxu0 %v4208_v9  ;;  %4072 = vmatprep.mubr.msk.f32.mxu0 %vm4507_vm3, %v4508_v44 }
0x1461   : > { %4097 = vmatprep.subr.mxu0 %v4508_v44  ;;  %v5322_v45 = vmul.f32 %v4472_v10, %v5263_v12 }
0x1463   : > { %4073 = vmatmul.mubr.msk.f32.gmra.mrb[32].mxu0 %vm1018_vm7, %v5322_v45 }
0x1464   : > { %4098 = vmatpush3.msk.msra.mxu0 %vm1065_vm6, %v2911_v3  ;;  %4075 = vmatprep.mubr.msk.f32.mxu0 %vm4507_vm3, %v4508_v44 }
0x1465   : > { %4214 = vmatprep.subr.bf16.mxu0 %v4505_v30  ;;  %v2894_v53 = vpop.xlane.xlu0 %2893 }
0x1466   : > { %4473 = vrcp.f32 %v2894_v53 }
0x146d   : > { %v3150_v11 = vpop.xlane.xlu0 %3149 }
0x1470   : > { %v4474_v20 = vpop.eup %4473 }
0x1471   : > { %v3153_v13 = vpop.xlane.xlu0 %3152  ;;  %v2900_v2 = vmul.f32 %v4474_v20, %v5273_v22 }
0x1472   : > { %4475 = vrcp.f32 %v3153_v13 }
0x1475   : > { %v3404_v15 = vpop.xlane.xlu0 %3403 }
0x147c   : > { %v4476_v21 = vpop.eup %4475 }
0x147d   : > { %v3410_v12 = vpop.xlane.xlu0 %3409  ;;  %v3159_v25 = vmul.f32 %v4476_v21, %v5281_v27 }
0x1481   : > { %v3168_v34 = vpop.permute.xlu0 %3167 }
0x1486   : > { %v2656_v16 = vpop.xlane.xlu1 %2655 }
0x1487   : > { %4477 = vrcp.f32 %v2656_v16 }
0x1488   : > { %4479 = vrcp.f32 %v2888_v26 }
0x1489   : > { %4481 = vrcp.f32 %v3410_v12 }
0x148a   : > { %v2891_v17 = vpop.xlane.xlu1 %2890 }
0x148b   : > { %4483 = vrcp.f32 %v2891_v17 }
0x148c   : > { %4485 = vrcp.f32 %v3404_v15 }
0x148e   : > { %v3147_v19 = vpop.xlane.xlu1 %3146 }
0x148f   : > { %4487 = vrcp.f32 %v3147_v19 }
0x1490   : > { %4489 = vrcp.f32 %v3150_v11 }
0x1491   : > { %v4478_v43 = vpop.eup %4477 }
0x1492   : > { %v4480_v61 = vpop.eup %4479  ;;  %v2662_v63 = vmul.f32 %v4478_v43, %v4462_v52 }
0x1493   : > { %v4482_v41 = vpop.eup %4481  ;;  %v2896_v33 = vmul.f32 %v4480_v61, %v5267_v18 }
0x1494   : > { %4076 = vmatmul.mubr.msk.f32.gmra.mrb[34].mxu0 %vm1018_vm7, %v2662_v63  ;;  %v2903_v24 = vadd.f32 %v2900_v2, %v2662_v63  ;;  %v3416_v36 = vmul.f32 %v4482_v41, %v5292_v39 }
0x1495   : > { %4099 = vmatprep.mubr.msk.f32.mxu0 %vm4507_vm3, %v4508_v44  ;;  %v4484_v38 = vpop.eup %4483  ;;  %v2901_v27 = vadd.f32 %v2896_v33, %v2658_v8 }
0x1496   : > { %v3162_v32 = vadd.f32 %v3159_v25, %v2903_v24  ;;  %v4486_v28 = vpop.eup %4485  ;;  %v2898_v18 = vmul.f32 %v4484_v38, %v5297_v54 }
0x1497   : > { %v3412_v35 = vmul.f32 %v4486_v28, %v5286_v47 }
0x1498   : > { %4100 = vmatmul.mubr.msk.f32.vlgmr.msra.gmra.mrb[36].mxu0 %vm1018_vm7, %v2896_v33  ;;  %v3419_v22 = vadd.f32 %v3416_v36, %v3162_v32  ;;  %v2902_v40 = vadd.f32 %v2898_v18, %v5322_v45 }
0x1499   : > { %v4488_v49 = vpop.eup %4487  ;;  %4216 = vmatpush3.bf16.msra.mxu0 %v4215_v29  ;;  %4102 = vmatprep.mubr.msk.f32.mxu0 %vm4507_vm3, %v4508_v44 }
0x149a   : > { %v3155_v50 = vmul.f32 %v4488_v49, %v5301_v57  ;;  %4127 = vmatprep.subr.mxu0 %v4508_v44  ;;  %v3536_v46 = vmul.f32 0.25, %v3419_v22  ;;  %v4490_v47 = vpop.eup %4489 }
0x149b   : > { %v3157_v23 = vmul.f32 %v4490_v47, %v5277_v31 }
0x149c   : > { %v3160_v39 = vadd.f32 %v3155_v50, %v2901_v27  ;;  %4103 = vmatmul.mubr.msk.f32.gmra.mrb[38].mxu0 %vm1018_vm7, %v2898_v18  ;;  %3762 = vst.msk [vmem:[%s4971_s27 + $0x28] sm:$0x1] %vm1025_vm8, %v3536_v46 }
0x149d   : > { %4128 = vmatpush3.msk.msra.mxu0 %vm1065_vm6, %v3168_v34  ;;  %4105 = vmatprep.mubr.msk.f32.mxu0 %vm4507_vm3, %v4508_v44  ;;  %v3161_v42 = vadd.f32 %v3157_v23, %v2902_v40 }
0x149e   : > { %v3417_v56 = vadd.f32 %v3412_v35, %v3160_v39  ;;  %4221 = vmatprep.subr.bf16.mxu0 %v4505_v30 }
0x14a0   : > { %v3534_v51 = vmul.f32 0.25, %v3417_v56  ;;  %4106 = vmatmul.mubr.msk.f32.gmra.mrb[40].mxu0 %vm1018_vm7, %v2900_v2 }
0x14a1   : > { %4129 = vmatprep.mubr.msk.f32.mxu0 %vm4507_vm3, %v4508_v44 }
0x14a2   : > { %3760 = vst.msk [vmem:[%s4971_s27 + $0x18] sm:$0xff] %vm1018_vm7, %v3534_v51 }
0x14a4   : > { %4130 = vmatmul.mubr.msk.f32.vlgmr.msra.gmra.mrb[42].mxu0 %vm1018_vm7, %v3155_v50 }
0x14a5   : > { %4132 = vmatprep.mubr.msk.f32.mxu0 %vm4507_vm3, %v4508_v44 }
0x14a6   : > { %v3407_v52 = vpop.xlane.xlu1 %3406 }
0x14a7   : > { %4491 = vrcp.f32 %v3407_v52 }
0x14a8   : > { %4133 = vmatmul.mubr.msk.f32.gmra.mrb[44].mxu0 %vm1018_vm7, %v3157_v23 }
0x14a9   : > { %4135 = vmatprep.mubr.msk.f32.mxu0 %vm4507_vm3, %v4508_v44 }
0x14aa   : > { %v4315_v30 = vpop.permute.xlu1 %4314 }
0x14ab   : > { %v4317_v54 = vunpack.i.h.bf16 %v4315_v30  ;;  %v4316_v55 = vunpack.i.l.bf16 %v4315_v30 }
0x14ac   : > { %4136 = vmatmul.mubr.msk.f32.gmra.mrb[46].mxu0 %vm1018_vm7, %v3159_v25 }
0x14ad   : > { %v4222_v57 = vpack.c.bf16 %v4317_v54, %v4316_v55  ;;  %4159 = vmatprep.mubr.msk.f32.mxu0 %vm4507_vm3, %v4508_v44 }
0x14ae   : > { %v3425_v48 = vpop.permute.xlu1 %3424 }
0x14af   : > { %4223 = vmatpush3.bf16.msra.mxu0 %v4222_v57  ;;  %4226 = vmatpush3.bf16.msra.mxu1 %v4222_v57 }
0x14b0   : > { %4157 = vmatprep.subr.mxu0 %v4508_v44  ;;  %4225 = vmatprep.subr.mxu1 %v4508_v44 }
0x14b1   : > { %v4492_v31 = vpop.eup %4491 }
0x14b2   : > { %v3414_v58 = vmul.f32 %v4492_v31, %v5308_v62 }
0x14b3   : > { %4158 = vmatpush3.msk.msra.mxu0 %vm1065_vm6, %v3425_v48  ;;  %4227 = vmatpush3.msk.msra.mxu1 %vm1065_vm6, %v3425_v48 }
0x14b4   : > { %4160 = vmatmul.mubr.msk.f32.vlgmr.msra.gmra.mrb[48].mxu0 %vm1018_vm7, %v3412_v35  ;;  %4166 = vmatmul.mubr.msk.f32.vlgmr.msra.gmra.mrb[74].mxu1 %vm1018_vm7, %v3416_v36  ;;  %v3418_v60 = vadd.f32 %v3414_v58, %v3161_v42 }
0x14b5   : > { %4162 = vmatprep.mubr.msk.f32.mxu0 %vm4507_vm3, %v4508_v44 }
0x14b6   : > { %v3535_v0 = vmul.f32 0.25, %v3418_v60 }
0x14b8   : > { %4163 = vmatmul.mubr.msk.f32.gmra.mrb[50].mxu0 %vm1018_vm7, %v3414_v58  ;;  %3761 = vst.msk [vmem:[%s4971_s27 + $0x20] sm:$0xff] %vm1018_vm7, %v3535_v0 }
0x1532   : > { %v2744_v3 = vpop.f32.mrb[22].mxu0 }
0x1533   : > { %2758 = vst.msk [vmem:[#allocation3] sm:$0xff] %vm922_vm4, %v2744_v3  ;;  %v4071_v62 = vpop.f32.mrb[23].mxu0 }
0x1536   : > { %v2749_v4 = vpop.f32.mrb[32].mxu0 }
0x1537   : > { %2759 = vst.msk [vmem:[#allocation3 + $0x8] sm:$0xff] %vm922_vm4, %v2749_v4  ;;  %v4074_v5 = vpop.f32.mrb[33].mxu0 }
0x1567   : > { %v2754_v59 = vpop.f32.mrb[34].mxu0 }
0x1568   : > { %2760 = vst.msk [vmem:[#allocation3 + $0x10] sm:$0x1] %vm1151_vm9, %v2754_v59  ;;  %v4077_v6 = vpop.f32.mrb[35].mxu0 }
0x156b   : > { %v2991_v7 = vpop.f32.mrb[36].mxu0 }
0x156c   : > { %3008 = vrot.lane.b32.xlu1 %v2991_v7, %s5441_s29  ;;  %v4101_v44 = vpop.f32.mrb[37].mxu0 }
0x156f   : > { %v2996_v8 = vpop.f32.mrb[38].mxu0 }
0x1570   : > { %3010 = vrot.lane.b32.xlu1 %v2996_v8, %s5441_s29  ;;  %v4104_v9 = vpop.f32.mrb[39].mxu0 }
0x1573   : > { %v3001_v10 = vpop.f32.mrb[40].mxu0 }
0x1574   : > { %3012 = vrot.lane.b32.xlu1 %v3001_v10, %s5441_s29  ;;  %v4107_v45 = vpop.f32.mrb[41].mxu0 }
0x1577   : > { %v3248_v26 = vpop.f32.mrb[42].mxu0 }
0x1578   : > { %3265 = vrot.lane.b32.xlu0 %v3248_v26, %s4511_s18  ;;  %v4131_v53 = vpop.f32.mrb[43].mxu0 }
0x157b   : > { %v3253_v11 = vpop.f32.mrb[44].mxu0 }
0x157c   : > { %3267 = vrot.lane.b32.xlu1 %v3253_v11, %s4511_s18  ;;  %v4134_v13 = vpop.f32.mrb[45].mxu0 }
0x157f   : > { %v3258_v14 = vpop.f32.mrb[46].mxu0 }
0x1580   : > { %3269 = vrot.lane.b32.xlu0 %v3258_v14, %s4511_s18  ;;  %v4137_v15 = vpop.f32.mrb[47].mxu0 }
0x1587   : > { %v3505_v12 = vpop.f32.mrb[48].mxu0  ;;  %v3515_v16 = vpop.f32.mrb[74].mxu1 }
0x1588   : > { %3522 = vrot.lane.b32.xlu1 %v3505_v12, %s5438_s26  ;;  %v4161_v17 = vpop.f32.mrb[49].mxu0  ;;  %v4167_v19 = vpop.f32.mrb[75].mxu1 }
0x158b   : > { %v3510_v20 = vpop.f32.mrb[50].mxu0 }
0x158c   : > { %3524 = vrot.lane.b32.xlu0 %v3510_v20, %s5438_s26  ;;  %v4164_v21 = vpop.f32.mrb[51].mxu0  ;;  %3526 = vrot.lane.b32.xlu1 %v3515_v16, %s5438_s26 }
0x15de   : > { %v3009_v43 = vpop.permute.xlu1 %3008 }
0x15df   : > { %3017 = vst.msk [vmem:[#allocation3] sm:$0xff] %vm1409_vm10, %v3009_v43 }
0x15e2   : > { %v3011_v61 = vpop.permute.xlu1 %3010 }
0x15e3   : > { %3018 = vst.msk [vmem:[#allocation3 + $0x8] sm:$0xff] %vm1409_vm10, %v3011_v61 }
0x15e6   : > { %v3013_v63 = vpop.permute.xlu1 %3012 }
0x15e7   : > { %3019 = vst.msk [vmem:[#allocation3 + $0x10] sm:$0x1] %vm1412_vm11, %v3013_v63 }
0x15ea   : > { %v3266_v2 = vpop.permute.xlu0 %3265 }
0x15eb   : > { %3274 = vst.msk [vmem:[#allocation3] sm:$0xff] %vm1668_vm12, %v3266_v2 }
0x15ee   : > { %v3268_v41 = vpop.permute.xlu1 %3267 }
0x15ef   : > { %3275 = vst.msk [vmem:[#allocation3 + $0x8] sm:$0xff] %vm1668_vm12, %v3268_v41 }
0x15f2   : > { %v3270_v1 = vpop.permute.xlu0 %3269 }
0x15f3   : > { %3276 = vst.msk [vmem:[#allocation3 + $0x10] sm:$0x1] %vm1671_vm13, %v3270_v1 }
0x15fa   : > { %v3523_v37 = vpop.permute.xlu1 %3522 }
0x15fb   : > { %3531 = vst.msk [vmem:[#allocation3] sm:$0xff] %vm1927_vm14, %v3523_v37 }
0x15fe   : > { %v3525_v24 = vpop.permute.xlu0 %3524  ;;  %v3527_v25 = vpop.permute.xlu1 %3526 }
0x15ff   : > { %3532 = vst.msk [vmem:[#allocation3 + $0x8] sm:$0xff] %vm1927_vm14, %v3525_v24 }
0x1600   : > { %3533 = vst.msk [vmem:[#allocation3 + $0x10] sm:$0x1] %vm1930_vm15, %v3527_v25 }
0x1601 PF: > { %s27_s24 = sadd.s32 1, %s4502_s24  }
0x1602   : > { %p24_p4 = scmp.ge.s32.totalorder %s27_s24, 4  }
0x1604   :  { %26 = sbr.rel (!%p24_p4) target bundleno = 3 (0x3), region = 123 }

</bundles_post_ra>
